<compile_context>
chip_gen: v5e
topology: v5e:2x2
jax: 0.10.0
libtpu: 0.0.40
codegen_flags: <defaults>
</compile_context>

<pallas_src>
import functools

import jax
import jax.numpy as jnp
from jax.experimental import pallas as pl
from jax.experimental.pallas import tpu as pltpu


# ---------------------------------------------------------------------------
# small dot_general helpers (f32 accumulation on the MXU)
# ---------------------------------------------------------------------------
def _mm(x, w):
    """[..., K] @ [K, N] -> [..., N]."""
    return jax.lax.dot_general(x, w, (((x.ndim - 1,), (0,)), ((), ())),
                               preferred_element_type=jnp.float32)


def _bmm_nt(x, y):
    """[B, M, D] x [B, N, D] -> [B, M, N]  (x @ y^T, batched over axis 0)."""
    return jax.lax.dot_general(x, y, (((2,), (2,)), ((0,), (0,))),
                               preferred_element_type=jnp.float32)


def _bmm(x, y):
    """[B, M, K] x [B, K, N] -> [B, M, N]  (batched over axis 0)."""
    return jax.lax.dot_general(x, y, (((2,), (1,)), ((0,), (0,))),
                               preferred_element_type=jnp.float32)


# ---------------------------------------------------------------------------
# fused kernel: mask + 6-head attention + residual + bidirectional GRU + readout
# ---------------------------------------------------------------------------
def _node_gru_kernel(a_ref, p_ref, wts_ref,
                     wa_ref, ba_ref,
                     wih_ref, bih_ref, whh_ref, bhh_ref,
                     bones_ref, out_ref,
                     *, n_heads, d_model):
    f32, bf16 = jnp.float32, jnp.bfloat16

    a = a_ref[...]                                   # [Bb, Ta, Dp] f32
    p = p_ref[...]                                   # [Bb, Tp, Dp] f32
    Bb, Ta, Dp = a.shape
    Tp = p.shape[1]
    H = n_heads
    dk = d_model // n_heads
    scale = 1.0 / float(dk) ** 0.5

    # ---------------- padding mask (exact, kept in f32) ---------------------
    a_nz = (a != 0.0).astype(f32)
    p_nz = (p != 0.0).astype(f32)
    p_nz_packed = jnp.tile(p_nz, (1, H, 1))          # [Bb, H*Tp, Dp]
    mask = _bmm_nt(a_nz, p_nz_packed) == 0.0         # [Bb, Ta, H*Tp]

    # ---------------- multi-head attention, all heads packed ----------------
    a16 = a.astype(bf16)
    p16 = p.astype(bf16)
    q = (_mm(a16, wa_ref[0]) + ba_ref[0]).astype(bf16)        # [Bb, Ta, Dp]
    k = (_mm(p16, wa_ref[1]) + ba_ref[1]).astype(bf16)        # [Bb, Tp, Dp]
    v = (_mm(p16, wa_ref[2]) + ba_ref[2]).astype(bf16)        # [Bb, Tp, Dp]

    # head h realised as a lane mask over the first d_model lanes (hoisted).
    lane = jax.lax.broadcasted_iota(jnp.int32, (1, 1, Dp), 2)
    head_masks = [((lane >= h * dk) & (lane < (h + 1) * dk)).astype(bf16)
                  for h in range(H)]
    k_packed = jnp.concatenate([k * head_masks[h] for h in range(H)], axis=1)
    v_packed = jnp.concatenate([v * head_masks[h] for h in range(H)], axis=1)

    # one packed score matmul: block h of columns = head-h scores.
    scores = _bmm_nt(q, k_packed) * scale                     # [Bb, Ta, H*Tp]
    scores = jnp.where(mask, -1e9, scores)
    row_max = jnp.max(scores, axis=-1, keepdims=True)         # shared max (exact)
    e = jnp.exp(scores - row_max)
    # per-head sums broadcast to every column of the head block (block-diag ones)
    denom = _mm(e, bones_ref[...])                             # [Bb, Ta, H*Tp]
    p_attn = e * pl.reciprocal(denom, approx=True)
    xcat = _bmm(p_attn.astype(bf16), v_packed)                 # [Bb, Ta, Dp]
    hseq = _mm(xcat.astype(bf16), wa_ref[3]) + ba_ref[3] + a   # residual, f32

    # ---------------- bidirectional GRU (gates + directions fused) ----------
    h0 = jnp.max(hseq, axis=1)                                 # [Bb, Dp]
    # hoisted input projections: all 3 gates x 2 directions in one matmul.
    gx = _mm(hseq.astype(bf16), wih_ref[...]) + bih_ref[...]   # [Bb, Ta, 6*Dp]
    whh = whh_ref[...]                                         # bf16 [2*Dp, 6*Dp]
    bhh = bhh_ref[...]                                         # f32  [1, 6*Dp]
    wts = wts_ref[...]                                         # [Bb, Ta, 1]

    hcat = jnp.concatenate([h0, h0], axis=-1)                  # [Bb, 2*Dp]
    acc_f = jnp.zeros((Bb, Dp), f32)
    acc_b = jnp.zeros((Bb, Dp), f32)

    # TODO(synk): switch to lax.fori_loop(..., unroll=True) if Ta grows large.
    for i in range(Ta):
        tf, tb = i, Ta - 1 - i
        # single recurrent matmul per step: both directions, all 3 gates.
        rec = _mm(hcat.astype(bf16), whh) + bhh                # [Bb, 6*Dp]
        gxf = gx[:, tf]                                        # fwd cols 0:3Dp
        gxb = gx[:, tb]                                        # bwd cols 3Dp:6Dp
        hf = hcat[:, 0:Dp]
        hb = hcat[:, Dp:2 * Dp]

        r_f = jax.nn.sigmoid(gxf[:, 0:Dp] + rec[:, 0:Dp])
        z_f = jax.nn.sigmoid(gxf[:, Dp:2 * Dp] + rec[:, Dp:2 * Dp])
        n_f = jnp.tanh(gxf[:, 2 * Dp:3 * Dp] + r_f * rec[:, 2 * Dp:3 * Dp])
        h_f = (1.0 - z_f) * n_f + z_f * hf

        r_b = jax.nn.sigmoid(gxb[:, 3 * Dp:4 * Dp] + rec[:, 3 * Dp:4 * Dp])
        z_b = jax.nn.sigmoid(gxb[:, 4 * Dp:5 * Dp] + rec[:, 4 * Dp:5 * Dp])
        n_b = jnp.tanh(gxb[:, 5 * Dp:6 * Dp] + r_b * rec[:, 5 * Dp:6 * Dp])
        h_b = (1.0 - z_b) * n_b + z_b * hb

        # length-masked mean readout, pre-scaled weights (0 beyond p_size)
        acc_f = acc_f + wts[:, tf] * h_f
        acc_b = acc_b + wts[:, tb] * h_b
        hcat = jnp.concatenate([h_f, h_b], axis=-1)

    # single dense store: [Bblk, 2, Dp] (row0 = fwd mean, row1 = bwd mean)
    out_ref[...] = jnp.stack([acc_f, acc_b], axis=1)


# ---------------------------------------------------------------------------
# wrapper
# ---------------------------------------------------------------------------
def node_gru_forward(a_pad, p_pad, p_sizes, params, *, n_heads=6, n_blocks=None):
    """a_pad: (B,Ta,D), p_pad: (B,Tp,D), p_sizes: (B,) int32 -> (B, 2*D)."""
    B, Ta, D = a_pad.shape
    Tp = p_pad.shape[1]
    assert D % n_heads == 0
    f32, bf16 = jnp.float32, jnp.bfloat16

    Dp = ((D + 127) // 128) * 128          # lane-pad feature dim to 128
    pad_d = Dp - D

    # graphs per grid step: keep grid >= 2 when possible (v7x megacore) while
    # amortizing per-step overhead by batching graphs within a step.
    if n_blocks is None:
        n_blocks = 2 if B >= 2 else 1
    Bblk = -(-B // n_blocks)
    Bt = Bblk * n_blocks

    def pad_batch(x):
        return jnp.pad(x, ((0, Bt - B),) + ((0, 0),) * (x.ndim - 1))

    a_in = pad_batch(jnp.pad(a_pad.astype(f32), ((0, 0), (0, 0), (0, pad_d))))
    p_in = pad_batch(jnp.pad(p_pad.astype(f32), ((0, 0), (0, 0), (0, pad_d))))

    # readout weights: wts[b,t] = 1/min(max(p_size,1),Ta) if t < p_size else 0
    sizes = p_sizes.astype(jnp.int32)
    denom = jnp.maximum(jnp.minimum(sizes, Ta), 1).astype(f32)   # p_size==0 guard
    wts = (jnp.arange(Ta)[None, :] < sizes[:, None]).astype(f32) / denom[:, None]
    wts = pad_batch(wts)[:, :, None]                             # [Bt, Ta, 1]

    # attention weights (q,k,v,o), lane-padded, bf16 operands for the MXU.
    w_attn = jnp.pad(params["w_attn"], ((0, 0), (0, pad_d), (0, pad_d))).astype(bf16)
    b_attn = jnp.pad(params["b_attn"], ((0, 0), (0, 0), (0, pad_d))).astype(f32)

    # GRU weights: fuse gates (r,z,n) x directions (fwd,bwd) into big operands.
    def padw(w):
        return jnp.pad(w, ((0, pad_d), (0, pad_d)))

    def padb(b):
        return jnp.pad(b, ((0, 0), (0, pad_d)))

    wih = [padw(params["w_ih"][i]) for i in range(6)]   # index = dir*3 + gate
    whh = [padw(params["w_hh"][i]) for i in range(6)]
    bih = [padb(params["b_ih"][i]) for i in range(6)]
    bhh = [padb(params["b_hh"][i]) for i in range(6)]

    w_ih_big = jnp.concatenate(wih, axis=1).astype(bf16)          # [Dp, 6*Dp]
    b_ih_big = jnp.concatenate(bih, axis=1).astype(f32)           # [1, 6*Dp]
    zeros3 = jnp.zeros((Dp, 3 * Dp), f32)
    w_hh_big = jnp.concatenate(                                   # block-diag
        [jnp.concatenate(whh[0:3] + [zeros3], axis=1),            # fwd rows
         jnp.concatenate([zeros3] + whh[3:6], axis=1)],           # bwd rows
        axis=0).astype(bf16)                                      # [2*Dp, 6*Dp]
    b_hh_big = jnp.concatenate(bhh, axis=1).astype(f32)           # [1, 6*Dp]

    # block-diagonal ones for per-head softmax denominators
    HTp = n_heads * Tp
    bid = jnp.repeat(jnp.arange(n_heads), Tp)
    bones = (bid[:, None] == bid[None, :]).astype(f32)            # [HTp, HTp]

    kernel = functools.partial(_node_gru_kernel, n_heads=n_heads, d_model=D)
    out = pl.pallas_call(
        kernel,
        out_shape=jax.ShapeDtypeStruct((Bt, 2, Dp), f32),
        grid_spec=pltpu.PrefetchScalarGridSpec(
            num_scalar_prefetch=0,
            grid=(n_blocks,),
            in_specs=[
                pl.BlockSpec((Bblk, Ta, Dp), lambda b: (b, 0, 0)),   # a block
                pl.BlockSpec((Bblk, Tp, Dp), lambda b: (b, 0, 0)),   # p block
                pl.BlockSpec((Bblk, Ta, 1), lambda b: (b, 0, 0)),    # readout wts
                pl.BlockSpec((4, Dp, Dp), lambda b: (0, 0, 0)),      # W_{q,k,v,o}
                pl.BlockSpec((4, 1, Dp), lambda b: (0, 0, 0)),       # b_{q,k,v,o}
                pl.BlockSpec((Dp, 6 * Dp), lambda b: (0, 0)),        # W_ih fused
                pl.BlockSpec((1, 6 * Dp), lambda b: (0, 0)),         # b_ih fused
                pl.BlockSpec((2 * Dp, 6 * Dp), lambda b: (0, 0)),    # W_hh block-diag
                pl.BlockSpec((1, 6 * Dp), lambda b: (0, 0)),         # b_hh fused
                pl.BlockSpec((HTp, HTp), lambda b: (0, 0)),          # head block-ones
            ],
            out_specs=pl.BlockSpec((Bblk, 2, Dp), lambda b: (b, 0, 0)),
        ),
        compiler_params=pltpu.CompilerParams(
            dimension_semantics=("parallel",)),
    )(a_in, p_in, wts, w_attn, b_attn,
      w_ih_big, b_ih_big, w_hh_big, b_hh_big, bones)

    out = out[:B, :, :D]                          # drop batch / lane padding
    return jnp.concatenate([out[:, 0, :], out[:, 1, :]], axis=-1)   # [B, 2*D]


# ----------------------------- pure-JAX reference ---------------------------
def reference_forward(a_pad, p_pad, p_sizes, params, *, n_heads=6):
    B, T, D = a_pad.shape
    dk = D // n_heads
    wa = params["w_attn"]
    ba = params["b_attn"][:, 0, :]
    a_nz = (a_pad != 0).astype(jnp.float32)
    p_nz = (p_pad != 0).astype(jnp.float32)
    mask = jnp.einsum("bid,bjd->bij", a_nz, p_nz) == 0

    q = a_pad @ wa[0] + ba[0]
    k = p_pad @ wa[1] + ba[1]
    v = p_pad @ wa[2] + ba[2]

    def heads(x):
        return x.reshape(B, -1, n_heads, dk).transpose(0, 2, 1, 3)

    qh, kh, vh = heads(q), heads(k), heads(v)
    scores = jnp.einsum("bhid,bhjd->bhij", qh, kh) / (dk ** 0.5)
    scores = jnp.where(mask[:, None, :, :], -1e9, scores)
    p_attn = jax.nn.softmax(scores, axis=-1)
    xh = jnp.einsum("bhij,bhjd->bhid", p_attn, vh)
    xcat = xh.transpose(0, 2, 1, 3).reshape(B, -1, D)
    h = xcat @ wa[3] + ba[3] + a_pad

    h0 = h.max(axis=1)
    wih, whh = params["w_ih"], params["w_hh"]
    bih = params["b_ih"][:, 0, :]
    bhh = params["b_hh"][:, 0, :]

    def gru_dir(d, reverse):
        hprev = h0
        outs = [None] * T
        order = range(T - 1, -1, -1) if reverse else range(T)
        for t in order:
            xt = h[:, t]
            r = jax.nn.sigmoid(xt @ wih[3 * d] + bih[3 * d] + hprev @ whh[3 * d] + bhh[3 * d])
            z = jax.nn.sigmoid(xt @ wih[3 * d + 1] + bih[3 * d + 1] + hprev @ whh[3 * d + 1] + bhh[3 * d + 1])
            n = jnp.tanh(xt @ wih[3 * d + 2] + bih[3 * d + 2] + r * (hprev @ whh[3 * d + 2] + bhh[3 * d + 2]))
            hprev = (1.0 - z) * n + z * hprev
            outs[t] = hprev
        return jnp.stack(outs, axis=1)

    gru_out = jnp.concatenate([gru_dir(0, False), gru_dir(1, True)], axis=-1)
    embeds = []
    for i in range(B):
        cnt = min(int(p_sizes[i]), T)
        embeds.append(gru_out[i, :cnt].mean(0))
    return jnp.stack(embeds, 0)


if __name__ == "__main__":
    # Small shapes: 2 graphs, up to 8 'a'-nodes / 8 'p'-nodes, hid_dim=48, 6 heads.
    B, T_A, T_P, HID, HEADS = 2, 8, 8, 48, 6

    key = jax.random.PRNGKey(0)
    ks = jax.random.split(key, 8)

    a_sizes = jnp.array([8, 5], jnp.int32)   # 'a'-node counts per graph
    p_sizes = jnp.array([6, 4], jnp.int32)   # 'p'-node counts (readout lengths)

    a_full = jax.random.normal(ks[0], (B, T_A, HID), jnp.float32)
    p_full = jax.random.normal(ks[1], (B, T_P, HID), jnp.float32)
    a_pad = jnp.where(jnp.arange(T_A)[None, :, None] < a_sizes[:, None, None], a_full, 0.0)
    p_pad = jnp.where(jnp.arange(T_P)[None, :, None] < p_sizes[:, None, None], p_full, 0.0)

    s = 1.0 / (HID ** 0.5)

    def u(kk, shape):
        return jax.random.uniform(kk, shape, jnp.float32, -s, s)

    params = {
        # 4 attention linears (q,k,v,o), stored for x @ W (transposed vs nn.Linear).
        "w_attn": u(ks[2], (4, HID, HID)),
        "b_attn": u(ks[3], (4, 1, HID)),
        # GRU weights: index = direction*3 + gate, gates ordered (r, z, n) as in PyTorch.
        "w_ih": u(ks[4], (6, HID, HID)),
        "w_hh": u(ks[5], (6, HID, HID)),
        "b_ih": u(ks[6], (6, 1, HID)),
        "b_hh": u(ks[7], (6, 1, HID)),
    }

    out = node_gru_forward(a_pad, p_pad, p_sizes, params, n_heads=HEADS)
    out = jax.block_until_ready(out)

    ref = reference_forward(a_pad, p_pad, p_sizes, params, n_heads=HEADS)
    assert out.shape == (B, 2 * HID)
    # kernel uses bf16 MXU operands (f32 accumulation) vs f32 reference,
    # compounded over an 8-step recurrence -> loosened tolerance.
    assert jnp.allclose(out, ref, atol=3e-2, rtol=3e-2), "mismatch vs reference"

    print("KERNEL_OK")
</pallas_src>

<mosaic_0001>
module attributes {stable_mosaic.version = 11 : i64} {
  func.func @_node_gru_kernel(%arg0: i32, %arg1: memref<1x8x128xf32, #tpu.memory_space<vmem>>, %arg2: memref<1x8x128xf32, #tpu.memory_space<vmem>>, %arg3: memref<1x8x1xf32, #tpu.memory_space<vmem>>, %arg4: memref<4x128x128xbf16, #tpu.memory_space<vmem>>, %arg5: memref<4x1x128xf32, #tpu.memory_space<vmem>>, %arg6: memref<128x768xbf16, #tpu.memory_space<vmem>>, %arg7: memref<1x768xf32, #tpu.memory_space<vmem>>, %arg8: memref<256x768xbf16, #tpu.memory_space<vmem>>, %arg9: memref<1x768xf32, #tpu.memory_space<vmem>>, %arg10: memref<48x48xf32, #tpu.memory_space<vmem>>, %arg11: memref<1x2x128xf32, #tpu.memory_space<vmem>>) attributes {dimension_semantics = [#tpu.dimension_semantics<parallel>], iteration_bounds = array<i64: 2>, scalar_prefetch = 0 : i64, scratch_operands = 0 : i64, tpu.core_type = #tpu.core_type<tc>, window_params = [{transform_indices = @transform_0, window_bounds = array<i64: 1, 8, 128>}, {transform_indices = @transform_1, window_bounds = array<i64: 1, 8, 128>}, {transform_indices = @transform_2, window_bounds = array<i64: 1, 8, 1>}, {pipeline_mode = #tpu.pipeline_mode<synchronous>, transform_indices = @transform_3, window_bounds = array<i64: 4, 128, 128>}, {pipeline_mode = #tpu.pipeline_mode<synchronous>, transform_indices = @transform_4, window_bounds = array<i64: 4, 1, 128>}, {pipeline_mode = #tpu.pipeline_mode<synchronous>, transform_indices = @transform_5, window_bounds = array<i64: 128, 768>}, {pipeline_mode = #tpu.pipeline_mode<synchronous>, transform_indices = @transform_6, window_bounds = array<i64: 1, 768>}, {pipeline_mode = #tpu.pipeline_mode<synchronous>, transform_indices = @transform_7, window_bounds = array<i64: 256, 768>}, {pipeline_mode = #tpu.pipeline_mode<synchronous>, transform_indices = @transform_8, window_bounds = array<i64: 1, 768>}, {pipeline_mode = #tpu.pipeline_mode<synchronous>, transform_indices = @transform_9, window_bounds = array<i64: 48, 48>}, {transform_indices = @transform_10, window_bounds = array<i64: 1, 2, 128>}]} {
    %c0 = arith.constant 0 : index
    %c0_0 = arith.constant 0 : index
    %c0_1 = arith.constant 0 : index
    %0 = vector.load %arg1[%c0, %c0_0, %c0_1] : memref<1x8x128xf32, #tpu.memory_space<vmem>>, vector<1x8x128xf32>
    %c0_2 = arith.constant 0 : index
    %c0_3 = arith.constant 0 : index
    %c0_4 = arith.constant 0 : index
    %1 = vector.load %arg2[%c0_2, %c0_3, %c0_4] : memref<1x8x128xf32, #tpu.memory_space<vmem>>, vector<1x8x128xf32>
    %cst = arith.constant 0.000000e+00 : f32
    %2 = vector.broadcast %cst : f32 to vector<1x8x128xf32>
    %3 = arith.cmpf one, %0, %2 : vector<1x8x128xf32>
    %4 = arith.extui %3 : vector<1x8x128xi1> to vector<1x8x128xi32>
    %5 = arith.sitofp %4 : vector<1x8x128xi32> to vector<1x8x128xf32>
    %cst_5 = arith.constant 0.000000e+00 : f32
    %6 = vector.broadcast %cst_5 : f32 to vector<1x8x128xf32>
    %7 = arith.cmpf one, %1, %6 : vector<1x8x128xf32>
    %8 = arith.extui %7 : vector<1x8x128xi1> to vector<1x8x128xi32>
    %9 = arith.sitofp %8 : vector<1x8x128xi32> to vector<1x8x128xf32>
    %10 = tpu.concatenate %9, %9, %9, %9, %9, %9 in 1 : vector<1x8x128xf32>, vector<1x8x128xf32>, vector<1x8x128xf32>, vector<1x8x128xf32>, vector<1x8x128xf32>, vector<1x8x128xf32> -> vector<1x48x128xf32>
    %cst_6 = arith.constant dense<0.000000e+00> : vector<1x8x48xf32>
    %11 = tpu.matmul %5, %10, %cst_6 {dimension_numbers = #tpu.dot_dimension_numbers<[2], [2], [1], [1], [0, 0, 0, 1, 1, 1], [0], [0]>} : vector<1x8x128xf32>, vector<1x48x128xf32>, vector<1x8x48xf32> -> vector<1x8x48xf32>
    %cst_7 = arith.constant 0.000000e+00 : f32
    %12 = vector.broadcast %cst_7 : f32 to vector<1x8x48xf32>
    %13 = arith.cmpf oeq, %11, %12 : vector<1x8x48xf32>
    %14 = arith.truncf %0 : vector<1x8x128xf32> to vector<1x8x128xbf16>
    %15 = arith.truncf %1 : vector<1x8x128xf32> to vector<1x8x128xbf16>
    %c0_8 = arith.constant 0 : index
    %c0_9 = arith.constant 0 : index
    %c0_10 = arith.constant 0 : index
    %16 = vector.load %arg4[%c0_8, %c0_9, %c0_10] : memref<4x128x128xbf16, #tpu.memory_space<vmem>>, vector<1x128x128xbf16>
    %17 = vector.shape_cast %16 : vector<1x128x128xbf16> to vector<128x128xbf16>
    %cst_11 = arith.constant dense<0.000000e+00> : vector<1x8x128xf32>
    %18 = tpu.matmul %14, %17, %cst_11 {dimension_numbers = #tpu.dot_dimension_numbers<[2], [0], [0, 1], [1], [0, 0, 0, 1, 1, 1], [], []>} : vector<1x8x128xbf16>, vector<128x128xbf16>, vector<1x8x128xf32> -> vector<1x8x128xf32>
    %c0_12 = arith.constant 0 : index
    %c0_13 = arith.constant 0 : index
    %c0_14 = arith.constant 0 : index
    %19 = vector.load %arg5[%c0_12, %c0_13, %c0_14] : memref<4x1x128xf32, #tpu.memory_space<vmem>>, vector<1x1x128xf32>
    %20 = vector.shape_cast %19 : vector<1x1x128xf32> to vector<1x128xf32>
    %21 = vector.shape_cast %20 : vector<1x128xf32> to vector<1x1x128xf32>
    %22 = vector.broadcast %21 : vector<1x1x128xf32> to vector<1x8x128xf32>
    %23 = arith.addf %18, %22 : vector<1x8x128xf32>
    %24 = arith.truncf %23 : vector<1x8x128xf32> to vector<1x8x128xbf16>
    %c1 = arith.constant 1 : index
    %c0_15 = arith.constant 0 : index
    %c0_16 = arith.constant 0 : index
    %25 = vector.load %arg4[%c1, %c0_15, %c0_16] : memref<4x128x128xbf16, #tpu.memory_space<vmem>>, vector<1x128x128xbf16>
    %26 = vector.shape_cast %25 : vector<1x128x128xbf16> to vector<128x128xbf16>
    %cst_17 = arith.constant dense<0.000000e+00> : vector<1x8x128xf32>
    %27 = tpu.matmul %15, %26, %cst_17 {dimension_numbers = #tpu.dot_dimension_numbers<[2], [0], [0, 1], [1], [0, 0, 0, 1, 1, 1], [], []>} : vector<1x8x128xbf16>, vector<128x128xbf16>, vector<1x8x128xf32> -> vector<1x8x128xf32>
    %c1_18 = arith.constant 1 : index
    %c0_19 = arith.constant 0 : index
    %c0_20 = arith.constant 0 : index
    %28 = vector.load %arg5[%c1_18, %c0_19, %c0_20] : memref<4x1x128xf32, #tpu.memory_space<vmem>>, vector<1x1x128xf32>
    %29 = vector.shape_cast %28 : vector<1x1x128xf32> to vector<1x128xf32>
    %30 = vector.shape_cast %29 : vector<1x128xf32> to vector<1x1x128xf32>
    %31 = vector.broadcast %30 : vector<1x1x128xf32> to vector<1x8x128xf32>
    %32 = arith.addf %27, %31 : vector<1x8x128xf32>
    %33 = arith.truncf %32 : vector<1x8x128xf32> to vector<1x8x128xbf16>
    %c2 = arith.constant 2 : index
    %c0_21 = arith.constant 0 : index
    %c0_22 = arith.constant 0 : index
    %34 = vector.load %arg4[%c2, %c0_21, %c0_22] : memref<4x128x128xbf16, #tpu.memory_space<vmem>>, vector<1x128x128xbf16>
    %35 = vector.shape_cast %34 : vector<1x128x128xbf16> to vector<128x128xbf16>
    %cst_23 = arith.constant dense<0.000000e+00> : vector<1x8x128xf32>
    %36 = tpu.matmul %15, %35, %cst_23 {dimension_numbers = #tpu.dot_dimension_numbers<[2], [0], [0, 1], [1], [0, 0, 0, 1, 1, 1], [], []>} : vector<1x8x128xbf16>, vector<128x128xbf16>, vector<1x8x128xf32> -> vector<1x8x128xf32>
    %c2_24 = arith.constant 2 : index
    %c0_25 = arith.constant 0 : index
    %c0_26 = arith.constant 0 : index
    %37 = vector.load %arg5[%c2_24, %c0_25, %c0_26] : memref<4x1x128xf32, #tpu.memory_space<vmem>>, vector<1x1x128xf32>
    %38 = vector.shape_cast %37 : vector<1x1x128xf32> to vector<1x128xf32>
    %39 = vector.shape_cast %38 : vector<1x128xf32> to vector<1x1x128xf32>
    %40 = vector.broadcast %39 : vector<1x1x128xf32> to vector<1x8x128xf32>
    %41 = arith.addf %36, %40 : vector<1x8x128xf32>
    %42 = arith.truncf %41 : vector<1x8x128xf32> to vector<1x8x128xbf16>
    %43 = tpu.iota {dimensions = array<i32: 2>} : vector<1x1x128xi32>
    %c0_i32 = arith.constant 0 : i32
    %44 = vector.broadcast %c0_i32 : i32 to vector<1x1x128xi32>
    %45 = arith.cmpi sge, %43, %44 : vector<1x1x128xi32>
    %c8_i32 = arith.constant 8 : i32
    %46 = vector.broadcast %c8_i32 : i32 to vector<1x1x128xi32>
    %47 = arith.cmpi slt, %43, %46 : vector<1x1x128xi32>
    %48 = arith.andi %45, %47 : vector<1x1x128xi1>
    %49 = arith.extui %48 : vector<1x1x128xi1> to vector<1x1x128xi32>
    %50 = arith.sitofp %49 : vector<1x1x128xi32> to vector<1x1x128xf32>
    %51 = arith.truncf %50 : vector<1x1x128xf32> to vector<1x1x128xbf16>
    %c8_i32_27 = arith.constant 8 : i32
    %52 = vector.broadcast %c8_i32_27 : i32 to vector<1x1x128xi32>
    %53 = arith.cmpi sge, %43, %52 : vector<1x1x128xi32>
    %c16_i32 = arith.constant 16 : i32
    %54 = vector.broadcast %c16_i32 : i32 to vector<1x1x128xi32>
    %55 = arith.cmpi slt, %43, %54 : vector<1x1x128xi32>
    %56 = arith.andi %53, %55 : vector<1x1x128xi1>
    %57 = arith.extui %56 : vector<1x1x128xi1> to vector<1x1x128xi32>
    %58 = arith.sitofp %57 : vector<1x1x128xi32> to vector<1x1x128xf32>
    %59 = arith.truncf %58 : vector<1x1x128xf32> to vector<1x1x128xbf16>
    %c16_i32_28 = arith.constant 16 : i32
    %60 = vector.broadcast %c16_i32_28 : i32 to vector<1x1x128xi32>
    %61 = arith.cmpi sge, %43, %60 : vector<1x1x128xi32>
    %c24_i32 = arith.constant 24 : i32
    %62 = vector.broadcast %c24_i32 : i32 to vector<1x1x128xi32>
    %63 = arith.cmpi slt, %43, %62 : vector<1x1x128xi32>
    %64 = arith.andi %61, %63 : vector<1x1x128xi1>
    %65 = arith.extui %64 : vector<1x1x128xi1> to vector<1x1x128xi32>
    %66 = arith.sitofp %65 : vector<1x1x128xi32> to vector<1x1x128xf32>
    %67 = arith.truncf %66 : vector<1x1x128xf32> to vector<1x1x128xbf16>
    %c24_i32_29 = arith.constant 24 : i32
    %68 = vector.broadcast %c24_i32_29 : i32 to vector<1x1x128xi32>
    %69 = arith.cmpi sge, %43, %68 : vector<1x1x128xi32>
    %c32_i32 = arith.constant 32 : i32
    %70 = vector.broadcast %c32_i32 : i32 to vector<1x1x128xi32>
    %71 = arith.cmpi slt, %43, %70 : vector<1x1x128xi32>
    %72 = arith.andi %69, %71 : vector<1x1x128xi1>
    %73 = arith.extui %72 : vector<1x1x128xi1> to vector<1x1x128xi32>
    %74 = arith.sitofp %73 : vector<1x1x128xi32> to vector<1x1x128xf32>
    %75 = arith.truncf %74 : vector<1x1x128xf32> to vector<1x1x128xbf16>
    %c32_i32_30 = arith.constant 32 : i32
    %76 = vector.broadcast %c32_i32_30 : i32 to vector<1x1x128xi32>
    %77 = arith.cmpi sge, %43, %76 : vector<1x1x128xi32>
    %c40_i32 = arith.constant 40 : i32
    %78 = vector.broadcast %c40_i32 : i32 to vector<1x1x128xi32>
    %79 = arith.cmpi slt, %43, %78 : vector<1x1x128xi32>
    %80 = arith.andi %77, %79 : vector<1x1x128xi1>
    %81 = arith.extui %80 : vector<1x1x128xi1> to vector<1x1x128xi32>
    %82 = arith.sitofp %81 : vector<1x1x128xi32> to vector<1x1x128xf32>
    %83 = arith.truncf %82 : vector<1x1x128xf32> to vector<1x1x128xbf16>
    %c40_i32_31 = arith.constant 40 : i32
    %84 = vector.broadcast %c40_i32_31 : i32 to vector<1x1x128xi32>
    %85 = arith.cmpi sge, %43, %84 : vector<1x1x128xi32>
    %c48_i32 = arith.constant 48 : i32
    %86 = vector.broadcast %c48_i32 : i32 to vector<1x1x128xi32>
    %87 = arith.cmpi slt, %43, %86 : vector<1x1x128xi32>
    %88 = arith.andi %85, %87 : vector<1x1x128xi1>
    %89 = arith.extui %88 : vector<1x1x128xi1> to vector<1x1x128xi32>
    %90 = arith.sitofp %89 : vector<1x1x128xi32> to vector<1x1x128xf32>
    %91 = arith.truncf %90 : vector<1x1x128xf32> to vector<1x1x128xbf16>
    %92 = vector.broadcast %51 : vector<1x1x128xbf16> to vector<1x8x128xbf16>
    %93 = arith.mulf %33, %92 : vector<1x8x128xbf16>
    %94 = vector.broadcast %59 : vector<1x1x128xbf16> to vector<1x8x128xbf16>
    %95 = arith.mulf %33, %94 : vector<1x8x128xbf16>
    %96 = vector.broadcast %67 : vector<1x1x128xbf16> to vector<1x8x128xbf16>
    %97 = arith.mulf %33, %96 : vector<1x8x128xbf16>
    %98 = vector.broadcast %75 : vector<1x1x128xbf16> to vector<1x8x128xbf16>
    %99 = arith.mulf %33, %98 : vector<1x8x128xbf16>
    %100 = vector.broadcast %83 : vector<1x1x128xbf16> to vector<1x8x128xbf16>
    %101 = arith.mulf %33, %100 : vector<1x8x128xbf16>
    %102 = vector.broadcast %91 : vector<1x1x128xbf16> to vector<1x8x128xbf16>
    %103 = arith.mulf %33, %102 : vector<1x8x128xbf16>
    %104 = tpu.concatenate %93, %95, %97, %99, %101, %103 in 1 : vector<1x8x128xbf16>, vector<1x8x128xbf16>, vector<1x8x128xbf16>, vector<1x8x128xbf16>, vector<1x8x128xbf16>, vector<1x8x128xbf16> -> vector<1x48x128xbf16>
    %105 = vector.broadcast %51 : vector<1x1x128xbf16> to vector<1x8x128xbf16>
    %106 = arith.mulf %42, %105 : vector<1x8x128xbf16>
    %107 = vector.broadcast %59 : vector<1x1x128xbf16> to vector<1x8x128xbf16>
    %108 = arith.mulf %42, %107 : vector<1x8x128xbf16>
    %109 = vector.broadcast %67 : vector<1x1x128xbf16> to vector<1x8x128xbf16>
    %110 = arith.mulf %42, %109 : vector<1x8x128xbf16>
    %111 = vector.broadcast %75 : vector<1x1x128xbf16> to vector<1x8x128xbf16>
    %112 = arith.mulf %42, %111 : vector<1x8x128xbf16>
    %113 = vector.broadcast %83 : vector<1x1x128xbf16> to vector<1x8x128xbf16>
    %114 = arith.mulf %42, %113 : vector<1x8x128xbf16>
    %115 = vector.broadcast %91 : vector<1x1x128xbf16> to vector<1x8x128xbf16>
    %116 = arith.mulf %42, %115 : vector<1x8x128xbf16>
    %117 = tpu.concatenate %106, %108, %110, %112, %114, %116 in 1 : vector<1x8x128xbf16>, vector<1x8x128xbf16>, vector<1x8x128xbf16>, vector<1x8x128xbf16>, vector<1x8x128xbf16>, vector<1x8x128xbf16> -> vector<1x48x128xbf16>
    %cst_32 = arith.constant dense<0.000000e+00> : vector<1x8x48xf32>
    %118 = tpu.matmul %24, %104, %cst_32 {dimension_numbers = #tpu.dot_dimension_numbers<[2], [2], [1], [1], [0, 0, 0, 1, 1, 1], [0], [0]>} : vector<1x8x128xbf16>, vector<1x48x128xbf16>, vector<1x8x48xf32> -> vector<1x8x48xf32>
    %cst_33 = arith.constant 0.353553385 : f32
    %119 = vector.broadcast %cst_33 : f32 to vector<1x8x48xf32>
    %120 = arith.mulf %118, %119 : vector<1x8x48xf32>
    %cst_34 = arith.constant -1.000000e+09 : f32
    %121 = vector.broadcast %cst_34 : f32 to vector<1x8x48xf32>
    %122 = arith.select %13, %121, %120 : vector<1x8x48xi1>, vector<1x8x48xf32>
    %cst_35 = arith.constant dense<0xFF800000> : vector<1x8xf32>
    %123 = vector.multi_reduction <maximumf>, %122, %cst_35 [2] : vector<1x8x48xf32> to vector<1x8xf32>
    %124 = vector.shape_cast %123 : vector<1x8xf32> to vector<1x8x1xf32>
    %125 = vector.broadcast %124 : vector<1x8x1xf32> to vector<1x8x48xf32>
    %126 = arith.subf %122, %125 : vector<1x8x48xf32>
    %127 = math.exp %126 : vector<1x8x48xf32>
    %c0_36 = arith.constant 0 : index
    %c0_37 = arith.constant 0 : index
    %128 = vector.load %arg10[%c0_36, %c0_37] : memref<48x48xf32, #tpu.memory_space<vmem>>, vector<48x48xf32>
    %cst_38 = arith.constant dense<0.000000e+00> : vector<1x8x48xf32>
    %129 = tpu.matmul %127, %128, %cst_38 {dimension_numbers = #tpu.dot_dimension_numbers<[2], [0], [0, 1], [1], [0, 0, 0, 1, 1, 1], [], []>} : vector<1x8x48xf32>, vector<48x48xf32>, vector<1x8x48xf32> -> vector<1x8x48xf32>
    %130 = tpu.reciprocal %129 {approx = true} : vector<1x8x48xf32> -> vector<1x8x48xf32>
    %131 = arith.mulf %127, %130 : vector<1x8x48xf32>
    %132 = arith.truncf %131 : vector<1x8x48xf32> to vector<1x8x48xbf16>
    %cst_39 = arith.constant dense<0.000000e+00> : vector<1x8x128xf32>
    %133 = tpu.matmul %132, %117, %cst_39 {dimension_numbers = #tpu.dot_dimension_numbers<[2], [1], [1], [2], [0, 0, 0, 1, 1, 2], [0], [0]>} : vector<1x8x48xbf16>, vector<1x48x128xbf16>, vector<1x8x128xf32> -> vector<1x8x128xf32>
    %134 = arith.truncf %133 : vector<1x8x128xf32> to vector<1x8x128xbf16>
    %c3 = arith.constant 3 : index
    %c0_40 = arith.constant 0 : index
    %c0_41 = arith.constant 0 : index
    %135 = vector.load %arg4[%c3, %c0_40, %c0_41] : memref<4x128x128xbf16, #tpu.memory_space<vmem>>, vector<1x128x128xbf16>
    %136 = vector.shape_cast %135 : vector<1x128x128xbf16> to vector<128x128xbf16>
    %cst_42 = arith.constant dense<0.000000e+00> : vector<1x8x128xf32>
    %137 = tpu.matmul %134, %136, %cst_42 {dimension_numbers = #tpu.dot_dimension_numbers<[2], [0], [0, 1], [1], [0, 0, 0, 1, 1, 1], [], []>} : vector<1x8x128xbf16>, vector<128x128xbf16>, vector<1x8x128xf32> -> vector<1x8x128xf32>
    %c3_43 = arith.constant 3 : index
    %c0_44 = arith.constant 0 : index
    %c0_45 = arith.constant 0 : index
    %138 = vector.load %arg5[%c3_43, %c0_44, %c0_45] : memref<4x1x128xf32, #tpu.memory_space<vmem>>, vector<1x1x128xf32>
    %139 = vector.shape_cast %138 : vector<1x1x128xf32> to vector<1x128xf32>
    %140 = vector.shape_cast %139 : vector<1x128xf32> to vector<1x1x128xf32>
    %141 = vector.broadcast %140 : vector<1x1x128xf32> to vector<1x8x128xf32>
    %142 = arith.addf %137, %141 : vector<1x8x128xf32>
    %143 = arith.addf %142, %0 : vector<1x8x128xf32>
    %cst_46 = arith.constant dense<0xFF800000> : vector<1x128xf32>
    %144 = vector.multi_reduction <maximumf>, %143, %cst_46 [1] : vector<1x8x128xf32> to vector<1x128xf32>
    %145 = arith.truncf %143 : vector<1x8x128xf32> to vector<1x8x128xbf16>
    %c0_47 = arith.constant 0 : index
    %c0_48 = arith.constant 0 : index
    %146 = vector.load %arg6[%c0_47, %c0_48] : memref<128x768xbf16, #tpu.memory_space<vmem>>, vector<128x768xbf16>
    %cst_49 = arith.constant dense<0.000000e+00> : vector<1x8x768xf32>
    %147 = tpu.matmul %145, %146, %cst_49 {dimension_numbers = #tpu.dot_dimension_numbers<[2], [0], [0, 1], [1], [0, 0, 0, 1, 1, 1], [], []>} : vector<1x8x128xbf16>, vector<128x768xbf16>, vector<1x8x768xf32> -> vector<1x8x768xf32>
    %c0_50 = arith.constant 0 : index
    %c0_51 = arith.constant 0 : index
    %148 = vector.load %arg7[%c0_50, %c0_51] : memref<1x768xf32, #tpu.memory_space<vmem>>, vector<1x768xf32>
    %149 = vector.shape_cast %148 : vector<1x768xf32> to vector<1x1x768xf32>
    %150 = vector.broadcast %149 : vector<1x1x768xf32> to vector<1x8x768xf32>
    %151 = arith.addf %147, %150 : vector<1x8x768xf32>
    %c0_52 = arith.constant 0 : index
    %c0_53 = arith.constant 0 : index
    %152 = vector.load %arg8[%c0_52, %c0_53] : memref<256x768xbf16, #tpu.memory_space<vmem>>, vector<256x768xbf16>
    %c0_54 = arith.constant 0 : index
    %c0_55 = arith.constant 0 : index
    %153 = vector.load %arg9[%c0_54, %c0_55] : memref<1x768xf32, #tpu.memory_space<vmem>>, vector<1x768xf32>
    %c0_56 = arith.constant 0 : index
    %c0_57 = arith.constant 0 : index
    %c0_58 = arith.constant 0 : index
    %154 = vector.load %arg3[%c0_56, %c0_57, %c0_58] : memref<1x8x1xf32, #tpu.memory_space<vmem>>, vector<1x8x1xf32>
    %155 = tpu.concatenate %144, %144 in 1 : vector<1x128xf32>, vector<1x128xf32> -> vector<1x256xf32>
    %cst_59 = arith.constant 0.000000e+00 : f32
    %156 = vector.broadcast %cst_59 : f32 to vector<1x128xf32>
    %cst_60 = arith.constant 0.000000e+00 : f32
    %157 = vector.broadcast %cst_60 : f32 to vector<1x128xf32>
    %158 = arith.truncf %155 : vector<1x256xf32> to vector<1x256xbf16>
    %cst_61 = arith.constant dense<0.000000e+00> : vector<1x768xf32>
    %159 = tpu.matmul %158, %152, %cst_61 {dimension_numbers = #tpu.dot_dimension_numbers<[1], [0], [0], [1], [0, 0, 1, 1], [], []>} : vector<1x256xbf16>, vector<256x768xbf16>, vector<1x768xf32> -> vector<1x768xf32>
    %160 = arith.addf %159, %153 : vector<1x768xf32>
    %161 = vector.extract_strided_slice %151 {offsets = [0, 0, 0], sizes = [1, 1, 768], strides = [1, 1, 1]} : vector<1x8x768xf32> to vector<1x1x768xf32>
    %162 = vector.shape_cast %161 : vector<1x1x768xf32> to vector<1x768xf32>
    %163 = vector.extract_strided_slice %151 {offsets = [0, 7, 0], sizes = [1, 1, 768], strides = [1, 1, 1]} : vector<1x8x768xf32> to vector<1x1x768xf32>
    %164 = vector.shape_cast %163 : vector<1x1x768xf32> to vector<1x768xf32>
    %165 = vector.extract_strided_slice %155 {offsets = [0, 0], sizes = [1, 128], strides = [1, 1]} : vector<1x256xf32> to vector<1x128xf32>
    %166 = vector.extract_strided_slice %155 {offsets = [0, 128], sizes = [1, 128], strides = [1, 1]} : vector<1x256xf32> to vector<1x128xf32>
    %167 = vector.extract_strided_slice %162 {offsets = [0, 0], sizes = [1, 128], strides = [1, 1]} : vector<1x768xf32> to vector<1x128xf32>
    %168 = vector.extract_strided_slice %160 {offsets = [0, 0], sizes = [1, 128], strides = [1, 1]} : vector<1x768xf32> to vector<1x128xf32>
    %169 = arith.addf %167, %168 : vector<1x128xf32>
    %170 = arith.negf %169 : vector<1x128xf32>
    %171 = math.exp %170 : vector<1x128xf32>
    %cst_62 = arith.constant 1.000000e+00 : f32
    %172 = vector.broadcast %cst_62 : f32 to vector<1x128xf32>
    %173 = arith.addf %172, %171 : vector<1x128xf32>
    %174 = arith.divf %172, %173 : vector<1x128xf32>
    %175 = vector.extract_strided_slice %162 {offsets = [0, 128], sizes = [1, 128], strides = [1, 1]} : vector<1x768xf32> to vector<1x128xf32>
    %176 = vector.extract_strided_slice %160 {offsets = [0, 128], sizes = [1, 128], strides = [1, 1]} : vector<1x768xf32> to vector<1x128xf32>
    %177 = arith.addf %175, %176 : vector<1x128xf32>
    %178 = arith.negf %177 : vector<1x128xf32>
    %179 = math.exp %178 : vector<1x128xf32>
    %cst_63 = arith.constant 1.000000e+00 : f32
    %180 = vector.broadcast %cst_63 : f32 to vector<1x128xf32>
    %181 = arith.addf %180, %179 : vector<1x128xf32>
    %182 = arith.divf %180, %181 : vector<1x128xf32>
    %183 = vector.extract_strided_slice %162 {offsets = [0, 256], sizes = [1, 128], strides = [1, 1]} : vector<1x768xf32> to vector<1x128xf32>
    %184 = vector.extract_strided_slice %160 {offsets = [0, 256], sizes = [1, 128], strides = [1, 1]} : vector<1x768xf32> to vector<1x128xf32>
    %185 = arith.mulf %174, %184 : vector<1x128xf32>
    %186 = arith.addf %183, %185 : vector<1x128xf32>
    %187 = math.tanh %186 : vector<1x128xf32>
    %cst_64 = arith.constant 1.000000e+00 : f32
    %188 = vector.broadcast %cst_64 : f32 to vector<1x128xf32>
    %189 = arith.subf %188, %182 : vector<1x128xf32>
    %190 = arith.mulf %189, %187 : vector<1x128xf32>
    %191 = arith.mulf %182, %165 : vector<1x128xf32>
    %192 = arith.addf %190, %191 : vector<1x128xf32>
    %193 = vector.extract_strided_slice %164 {offsets = [0, 384], sizes = [1, 128], strides = [1, 1]} : vector<1x768xf32> to vector<1x128xf32>
    %194 = vector.extract_strided_slice %160 {offsets = [0, 384], sizes = [1, 128], strides = [1, 1]} : vector<1x768xf32> to vector<1x128xf32>
    %195 = arith.addf %193, %194 : vector<1x128xf32>
    %196 = arith.negf %195 : vector<1x128xf32>
    %197 = math.exp %196 : vector<1x128xf32>
    %cst_65 = arith.constant 1.000000e+00 : f32
    %198 = vector.broadcast %cst_65 : f32 to vector<1x128xf32>
    %199 = arith.addf %198, %197 : vector<1x128xf32>
    %200 = arith.divf %198, %199 : vector<1x128xf32>
    %201 = vector.extract_strided_slice %164 {offsets = [0, 512], sizes = [1, 128], strides = [1, 1]} : vector<1x768xf32> to vector<1x128xf32>
    %202 = vector.extract_strided_slice %160 {offsets = [0, 512], sizes = [1, 128], strides = [1, 1]} : vector<1x768xf32> to vector<1x128xf32>
    %203 = arith.addf %201, %202 : vector<1x128xf32>
    %204 = arith.negf %203 : vector<1x128xf32>
    %205 = math.exp %204 : vector<1x128xf32>
    %cst_66 = arith.constant 1.000000e+00 : f32
    %206 = vector.broadcast %cst_66 : f32 to vector<1x128xf32>
    %207 = arith.addf %206, %205 : vector<1x128xf32>
    %208 = arith.divf %206, %207 : vector<1x128xf32>
    %209 = vector.extract_strided_slice %164 {offsets = [0, 640], sizes = [1, 128], strides = [1, 1]} : vector<1x768xf32> to vector<1x128xf32>
    %210 = vector.extract_strided_slice %160 {offsets = [0, 640], sizes = [1, 128], strides = [1, 1]} : vector<1x768xf32> to vector<1x128xf32>
    %211 = arith.mulf %200, %210 : vector<1x128xf32>
    %212 = arith.addf %209, %211 : vector<1x128xf32>
    %213 = math.tanh %212 : vector<1x128xf32>
    %cst_67 = arith.constant 1.000000e+00 : f32
    %214 = vector.broadcast %cst_67 : f32 to vector<1x128xf32>
    %215 = arith.subf %214, %208 : vector<1x128xf32>
    %216 = arith.mulf %215, %213 : vector<1x128xf32>
    %217 = arith.mulf %208, %166 : vector<1x128xf32>
    %218 = arith.addf %216, %217 : vector<1x128xf32>
    %219 = vector.extract_strided_slice %154 {offsets = [0, 0, 0], sizes = [1, 1, 1], strides = [1, 1, 1]} : vector<1x8x1xf32> to vector<1x1x1xf32>
    %220 = vector.shape_cast %219 : vector<1x1x1xf32> to vector<1x1xf32>
    %221 = vector.broadcast %220 : vector<1x1xf32> to vector<1x128xf32>
    %222 = arith.mulf %221, %192 : vector<1x128xf32>
    %223 = arith.addf %156, %222 : vector<1x128xf32>
    %224 = vector.extract_strided_slice %154 {offsets = [0, 7, 0], sizes = [1, 1, 1], strides = [1, 1, 1]} : vector<1x8x1xf32> to vector<1x1x1xf32>
    %225 = vector.shape_cast %224 : vector<1x1x1xf32> to vector<1x1xf32>
    %226 = vector.broadcast %225 : vector<1x1xf32> to vector<1x128xf32>
    %227 = arith.mulf %226, %218 : vector<1x128xf32>
    %228 = arith.addf %157, %227 : vector<1x128xf32>
    %229 = tpu.concatenate %192, %218 in 1 : vector<1x128xf32>, vector<1x128xf32> -> vector<1x256xf32>
    %230 = arith.truncf %229 : vector<1x256xf32> to vector<1x256xbf16>
    %cst_68 = arith.constant dense<0.000000e+00> : vector<1x768xf32>
    %231 = tpu.matmul %230, %152, %cst_68 {dimension_numbers = #tpu.dot_dimension_numbers<[1], [0], [0], [1], [0, 0, 1, 1], [], []>} : vector<1x256xbf16>, vector<256x768xbf16>, vector<1x768xf32> -> vector<1x768xf32>
    %232 = arith.addf %231, %153 : vector<1x768xf32>
    %233 = vector.extract_strided_slice %151 {offsets = [0, 1, 0], sizes = [1, 1, 768], strides = [1, 1, 1]} : vector<1x8x768xf32> to vector<1x1x768xf32>
    %234 = vector.shape_cast %233 : vector<1x1x768xf32> to vector<1x768xf32>
    %235 = vector.extract_strided_slice %151 {offsets = [0, 6, 0], sizes = [1, 1, 768], strides = [1, 1, 1]} : vector<1x8x768xf32> to vector<1x1x768xf32>
    %236 = vector.shape_cast %235 : vector<1x1x768xf32> to vector<1x768xf32>
    %237 = vector.extract_strided_slice %229 {offsets = [0, 0], sizes = [1, 128], strides = [1, 1]} : vector<1x256xf32> to vector<1x128xf32>
    %238 = vector.extract_strided_slice %229 {offsets = [0, 128], sizes = [1, 128], strides = [1, 1]} : vector<1x256xf32> to vector<1x128xf32>
    %239 = vector.extract_strided_slice %234 {offsets = [0, 0], sizes = [1, 128], strides = [1, 1]} : vector<1x768xf32> to vector<1x128xf32>
    %240 = vector.extract_strided_slice %232 {offsets = [0, 0], sizes = [1, 128], strides = [1, 1]} : vector<1x768xf32> to vector<1x128xf32>
    %241 = arith.addf %239, %240 : vector<1x128xf32>
    %242 = arith.negf %241 : vector<1x128xf32>
    %243 = math.exp %242 : vector<1x128xf32>
    %cst_69 = arith.constant 1.000000e+00 : f32
    %244 = vector.broadcast %cst_69 : f32 to vector<1x128xf32>
    %245 = arith.addf %244, %243 : vector<1x128xf32>
    %246 = arith.divf %244, %245 : vector<1x128xf32>
    %247 = vector.extract_strided_slice %234 {offsets = [0, 128], sizes = [1, 128], strides = [1, 1]} : vector<1x768xf32> to vector<1x128xf32>
    %248 = vector.extract_strided_slice %232 {offsets = [0, 128], sizes = [1, 128], strides = [1, 1]} : vector<1x768xf32> to vector<1x128xf32>
    %249 = arith.addf %247, %248 : vector<1x128xf32>
    %250 = arith.negf %249 : vector<1x128xf32>
    %251 = math.exp %250 : vector<1x128xf32>
    %cst_70 = arith.constant 1.000000e+00 : f32
    %252 = vector.broadcast %cst_70 : f32 to vector<1x128xf32>
    %253 = arith.addf %252, %251 : vector<1x128xf32>
    %254 = arith.divf %252, %253 : vector<1x128xf32>
    %255 = vector.extract_strided_slice %234 {offsets = [0, 256], sizes = [1, 128], strides = [1, 1]} : vector<1x768xf32> to vector<1x128xf32>
    %256 = vector.extract_strided_slice %232 {offsets = [0, 256], sizes = [1, 128], strides = [1, 1]} : vector<1x768xf32> to vector<1x128xf32>
    %257 = arith.mulf %246, %256 : vector<1x128xf32>
    %258 = arith.addf %255, %257 : vector<1x128xf32>
    %259 = math.tanh %258 : vector<1x128xf32>
    %cst_71 = arith.constant 1.000000e+00 : f32
    %260 = vector.broadcast %cst_71 : f32 to vector<1x128xf32>
    %261 = arith.subf %260, %254 : vector<1x128xf32>
    %262 = arith.mulf %261, %259 : vector<1x128xf32>
    %263 = arith.mulf %254, %237 : vector<1x128xf32>
    %264 = arith.addf %262, %263 : vector<1x128xf32>
    %265 = vector.extract_strided_slice %236 {offsets = [0, 384], sizes = [1, 128], strides = [1, 1]} : vector<1x768xf32> to vector<1x128xf32>
    %266 = vector.extract_strided_slice %232 {offsets = [0, 384], sizes = [1, 128], strides = [1, 1]} : vector<1x768xf32> to vector<1x128xf32>
    %267 = arith.addf %265, %266 : vector<1x128xf32>
    %268 = arith.negf %267 : vector<1x128xf32>
    %269 = math.exp %268 : vector<1x128xf32>
    %cst_72 = arith.constant 1.000000e+00 : f32
    %270 = vector.broadcast %cst_72 : f32 to vector<1x128xf32>
    %271 = arith.addf %270, %269 : vector<1x128xf32>
    %272 = arith.divf %270, %271 : vector<1x128xf32>
    %273 = vector.extract_strided_slice %236 {offsets = [0, 512], sizes = [1, 128], strides = [1, 1]} : vector<1x768xf32> to vector<1x128xf32>
    %274 = vector.extract_strided_slice %232 {offsets = [0, 512], sizes = [1, 128], strides = [1, 1]} : vector<1x768xf32> to vector<1x128xf32>
    %275 = arith.addf %273, %274 : vector<1x128xf32>
    %276 = arith.negf %275 : vector<1x128xf32>
    %277 = math.exp %276 : vector<1x128xf32>
    %cst_73 = arith.constant 1.000000e+00 : f32
    %278 = vector.broadcast %cst_73 : f32 to vector<1x128xf32>
    %279 = arith.addf %278, %277 : vector<1x128xf32>
    %280 = arith.divf %278, %279 : vector<1x128xf32>
    %281 = vector.extract_strided_slice %236 {offsets = [0, 640], sizes = [1, 128], strides = [1, 1]} : vector<1x768xf32> to vector<1x128xf32>
    %282 = vector.extract_strided_slice %232 {offsets = [0, 640], sizes = [1, 128], strides = [1, 1]} : vector<1x768xf32> to vector<1x128xf32>
    %283 = arith.mulf %272, %282 : vector<1x128xf32>
    %284 = arith.addf %281, %283 : vector<1x128xf32>
    %285 = math.tanh %284 : vector<1x128xf32>
    %cst_74 = arith.constant 1.000000e+00 : f32
    %286 = vector.broadcast %cst_74 : f32 to vector<1x128xf32>
    %287 = arith.subf %286, %280 : vector<1x128xf32>
    %288 = arith.mulf %287, %285 : vector<1x128xf32>
    %289 = arith.mulf %280, %238 : vector<1x128xf32>
    %290 = arith.addf %288, %289 : vector<1x128xf32>
    %291 = vector.extract_strided_slice %154 {offsets = [0, 1, 0], sizes = [1, 1, 1], strides = [1, 1, 1]} : vector<1x8x1xf32> to vector<1x1x1xf32>
    %292 = vector.shape_cast %291 : vector<1x1x1xf32> to vector<1x1xf32>
    %293 = vector.broadcast %292 : vector<1x1xf32> to vector<1x128xf32>
    %294 = arith.mulf %293, %264 : vector<1x128xf32>
    %295 = arith.addf %223, %294 : vector<1x128xf32>
    %296 = vector.extract_strided_slice %154 {offsets = [0, 6, 0], sizes = [1, 1, 1], strides = [1, 1, 1]} : vector<1x8x1xf32> to vector<1x1x1xf32>
    %297 = vector.shape_cast %296 : vector<1x1x1xf32> to vector<1x1xf32>
    %298 = vector.broadcast %297 : vector<1x1xf32> to vector<1x128xf32>
    %299 = arith.mulf %298, %290 : vector<1x128xf32>
    %300 = arith.addf %228, %299 : vector<1x128xf32>
    %301 = tpu.concatenate %264, %290 in 1 : vector<1x128xf32>, vector<1x128xf32> -> vector<1x256xf32>
    %302 = arith.truncf %301 : vector<1x256xf32> to vector<1x256xbf16>
    %cst_75 = arith.constant dense<0.000000e+00> : vector<1x768xf32>
    %303 = tpu.matmul %302, %152, %cst_75 {dimension_numbers = #tpu.dot_dimension_numbers<[1], [0], [0], [1], [0, 0, 1, 1], [], []>} : vector<1x256xbf16>, vector<256x768xbf16>, vector<1x768xf32> -> vector<1x768xf32>
    %304 = arith.addf %303, %153 : vector<1x768xf32>
    %305 = vector.extract_strided_slice %151 {offsets = [0, 2, 0], sizes = [1, 1, 768], strides = [1, 1, 1]} : vector<1x8x768xf32> to vector<1x1x768xf32>
    %306 = vector.shape_cast %305 : vector<1x1x768xf32> to vector<1x768xf32>
    %307 = vector.extract_strided_slice %151 {offsets = [0, 5, 0], sizes = [1, 1, 768], strides = [1, 1, 1]} : vector<1x8x768xf32> to vector<1x1x768xf32>
    %308 = vector.shape_cast %307 : vector<1x1x768xf32> to vector<1x768xf32>
    %309 = vector.extract_strided_slice %301 {offsets = [0, 0], sizes = [1, 128], strides = [1, 1]} : vector<1x256xf32> to vector<1x128xf32>
    %310 = vector.extract_strided_slice %301 {offsets = [0, 128], sizes = [1, 128], strides = [1, 1]} : vector<1x256xf32> to vector<1x128xf32>
    %311 = vector.extract_strided_slice %306 {offsets = [0, 0], sizes = [1, 128], strides = [1, 1]} : vector<1x768xf32> to vector<1x128xf32>
    %312 = vector.extract_strided_slice %304 {offsets = [0, 0], sizes = [1, 128], strides = [1, 1]} : vector<1x768xf32> to vector<1x128xf32>
    %313 = arith.addf %311, %312 : vector<1x128xf32>
    %314 = arith.negf %313 : vector<1x128xf32>
    %315 = math.exp %314 : vector<1x128xf32>
    %cst_76 = arith.constant 1.000000e+00 : f32
    %316 = vector.broadcast %cst_76 : f32 to vector<1x128xf32>
    %317 = arith.addf %316, %315 : vector<1x128xf32>
    %318 = arith.divf %316, %317 : vector<1x128xf32>
    %319 = vector.extract_strided_slice %306 {offsets = [0, 128], sizes = [1, 128], strides = [1, 1]} : vector<1x768xf32> to vector<1x128xf32>
    %320 = vector.extract_strided_slice %304 {offsets = [0, 128], sizes = [1, 128], strides = [1, 1]} : vector<1x768xf32> to vector<1x128xf32>
    %321 = arith.addf %319, %320 : vector<1x128xf32>
    %322 = arith.negf %321 : vector<1x128xf32>
    %323 = math.exp %322 : vector<1x128xf32>
    %cst_77 = arith.constant 1.000000e+00 : f32
    %324 = vector.broadcast %cst_77 : f32 to vector<1x128xf32>
    %325 = arith.addf %324, %323 : vector<1x128xf32>
    %326 = arith.divf %324, %325 : vector<1x128xf32>
    %327 = vector.extract_strided_slice %306 {offsets = [0, 256], sizes = [1, 128], strides = [1, 1]} : vector<1x768xf32> to vector<1x128xf32>
    %328 = vector.extract_strided_slice %304 {offsets = [0, 256], sizes = [1, 128], strides = [1, 1]} : vector<1x768xf32> to vector<1x128xf32>
    %329 = arith.mulf %318, %328 : vector<1x128xf32>
    %330 = arith.addf %327, %329 : vector<1x128xf32>
    %331 = math.tanh %330 : vector<1x128xf32>
    %cst_78 = arith.constant 1.000000e+00 : f32
    %332 = vector.broadcast %cst_78 : f32 to vector<1x128xf32>
    %333 = arith.subf %332, %326 : vector<1x128xf32>
    %334 = arith.mulf %333, %331 : vector<1x128xf32>
    %335 = arith.mulf %326, %309 : vector<1x128xf32>
    %336 = arith.addf %334, %335 : vector<1x128xf32>
    %337 = vector.extract_strided_slice %308 {offsets = [0, 384], sizes = [1, 128], strides = [1, 1]} : vector<1x768xf32> to vector<1x128xf32>
    %338 = vector.extract_strided_slice %304 {offsets = [0, 384], sizes = [1, 128], strides = [1, 1]} : vector<1x768xf32> to vector<1x128xf32>
    %339 = arith.addf %337, %338 : vector<1x128xf32>
    %340 = arith.negf %339 : vector<1x128xf32>
    %341 = math.exp %340 : vector<1x128xf32>
    %cst_79 = arith.constant 1.000000e+00 : f32
    %342 = vector.broadcast %cst_79 : f32 to vector<1x128xf32>
    %343 = arith.addf %342, %341 : vector<1x128xf32>
    %344 = arith.divf %342, %343 : vector<1x128xf32>
    %345 = vector.extract_strided_slice %308 {offsets = [0, 512], sizes = [1, 128], strides = [1, 1]} : vector<1x768xf32> to vector<1x128xf32>
    %346 = vector.extract_strided_slice %304 {offsets = [0, 512], sizes = [1, 128], strides = [1, 1]} : vector<1x768xf32> to vector<1x128xf32>
    %347 = arith.addf %345, %346 : vector<1x128xf32>
    %348 = arith.negf %347 : vector<1x128xf32>
    %349 = math.exp %348 : vector<1x128xf32>
    %cst_80 = arith.constant 1.000000e+00 : f32
    %350 = vector.broadcast %cst_80 : f32 to vector<1x128xf32>
    %351 = arith.addf %350, %349 : vector<1x128xf32>
    %352 = arith.divf %350, %351 : vector<1x128xf32>
    %353 = vector.extract_strided_slice %308 {offsets = [0, 640], sizes = [1, 128], strides = [1, 1]} : vector<1x768xf32> to vector<1x128xf32>
    %354 = vector.extract_strided_slice %304 {offsets = [0, 640], sizes = [1, 128], strides = [1, 1]} : vector<1x768xf32> to vector<1x128xf32>
    %355 = arith.mulf %344, %354 : vector<1x128xf32>
    %356 = arith.addf %353, %355 : vector<1x128xf32>
    %357 = math.tanh %356 : vector<1x128xf32>
    %cst_81 = arith.constant 1.000000e+00 : f32
    %358 = vector.broadcast %cst_81 : f32 to vector<1x128xf32>
    %359 = arith.subf %358, %352 : vector<1x128xf32>
    %360 = arith.mulf %359, %357 : vector<1x128xf32>
    %361 = arith.mulf %352, %310 : vector<1x128xf32>
    %362 = arith.addf %360, %361 : vector<1x128xf32>
    %363 = vector.extract_strided_slice %154 {offsets = [0, 2, 0], sizes = [1, 1, 1], strides = [1, 1, 1]} : vector<1x8x1xf32> to vector<1x1x1xf32>
    %364 = vector.shape_cast %363 : vector<1x1x1xf32> to vector<1x1xf32>
    %365 = vector.broadcast %364 : vector<1x1xf32> to vector<1x128xf32>
    %366 = arith.mulf %365, %336 : vector<1x128xf32>
    %367 = arith.addf %295, %366 : vector<1x128xf32>
    %368 = vector.extract_strided_slice %154 {offsets = [0, 5, 0], sizes = [1, 1, 1], strides = [1, 1, 1]} : vector<1x8x1xf32> to vector<1x1x1xf32>
    %369 = vector.shape_cast %368 : vector<1x1x1xf32> to vector<1x1xf32>
    %370 = vector.broadcast %369 : vector<1x1xf32> to vector<1x128xf32>
    %371 = arith.mulf %370, %362 : vector<1x128xf32>
    %372 = arith.addf %300, %371 : vector<1x128xf32>
    %373 = tpu.concatenate %336, %362 in 1 : vector<1x128xf32>, vector<1x128xf32> -> vector<1x256xf32>
    %374 = arith.truncf %373 : vector<1x256xf32> to vector<1x256xbf16>
    %cst_82 = arith.constant dense<0.000000e+00> : vector<1x768xf32>
    %375 = tpu.matmul %374, %152, %cst_82 {dimension_numbers = #tpu.dot_dimension_numbers<[1], [0], [0], [1], [0, 0, 1, 1], [], []>} : vector<1x256xbf16>, vector<256x768xbf16>, vector<1x768xf32> -> vector<1x768xf32>
    %376 = arith.addf %375, %153 : vector<1x768xf32>
    %377 = vector.extract_strided_slice %151 {offsets = [0, 3, 0], sizes = [1, 1, 768], strides = [1, 1, 1]} : vector<1x8x768xf32> to vector<1x1x768xf32>
    %378 = vector.shape_cast %377 : vector<1x1x768xf32> to vector<1x768xf32>
    %379 = vector.extract_strided_slice %151 {offsets = [0, 4, 0], sizes = [1, 1, 768], strides = [1, 1, 1]} : vector<1x8x768xf32> to vector<1x1x768xf32>
    %380 = vector.shape_cast %379 : vector<1x1x768xf32> to vector<1x768xf32>
    %381 = vector.extract_strided_slice %373 {offsets = [0, 0], sizes = [1, 128], strides = [1, 1]} : vector<1x256xf32> to vector<1x128xf32>
    %382 = vector.extract_strided_slice %373 {offsets = [0, 128], sizes = [1, 128], strides = [1, 1]} : vector<1x256xf32> to vector<1x128xf32>
    %383 = vector.extract_strided_slice %378 {offsets = [0, 0], sizes = [1, 128], strides = [1, 1]} : vector<1x768xf32> to vector<1x128xf32>
    %384 = vector.extract_strided_slice %376 {offsets = [0, 0], sizes = [1, 128], strides = [1, 1]} : vector<1x768xf32> to vector<1x128xf32>
    %385 = arith.addf %383, %384 : vector<1x128xf32>
    %386 = arith.negf %385 : vector<1x128xf32>
    %387 = math.exp %386 : vector<1x128xf32>
    %cst_83 = arith.constant 1.000000e+00 : f32
    %388 = vector.broadcast %cst_83 : f32 to vector<1x128xf32>
    %389 = arith.addf %388, %387 : vector<1x128xf32>
    %390 = arith.divf %388, %389 : vector<1x128xf32>
    %391 = vector.extract_strided_slice %378 {offsets = [0, 128], sizes = [1, 128], strides = [1, 1]} : vector<1x768xf32> to vector<1x128xf32>
    %392 = vector.extract_strided_slice %376 {offsets = [0, 128], sizes = [1, 128], strides = [1, 1]} : vector<1x768xf32> to vector<1x128xf32>
    %393 = arith.addf %391, %392 : vector<1x128xf32>
    %394 = arith.negf %393 : vector<1x128xf32>
    %395 = math.exp %394 : vector<1x128xf32>
    %cst_84 = arith.constant 1.000000e+00 : f32
    %396 = vector.broadcast %cst_84 : f32 to vector<1x128xf32>
    %397 = arith.addf %396, %395 : vector<1x128xf32>
    %398 = arith.divf %396, %397 : vector<1x128xf32>
    %399 = vector.extract_strided_slice %378 {offsets = [0, 256], sizes = [1, 128], strides = [1, 1]} : vector<1x768xf32> to vector<1x128xf32>
    %400 = vector.extract_strided_slice %376 {offsets = [0, 256], sizes = [1, 128], strides = [1, 1]} : vector<1x768xf32> to vector<1x128xf32>
    %401 = arith.mulf %390, %400 : vector<1x128xf32>
    %402 = arith.addf %399, %401 : vector<1x128xf32>
    %403 = math.tanh %402 : vector<1x128xf32>
    %cst_85 = arith.constant 1.000000e+00 : f32
    %404 = vector.broadcast %cst_85 : f32 to vector<1x128xf32>
    %405 = arith.subf %404, %398 : vector<1x128xf32>
    %406 = arith.mulf %405, %403 : vector<1x128xf32>
    %407 = arith.mulf %398, %381 : vector<1x128xf32>
    %408 = arith.addf %406, %407 : vector<1x128xf32>
    %409 = vector.extract_strided_slice %380 {offsets = [0, 384], sizes = [1, 128], strides = [1, 1]} : vector<1x768xf32> to vector<1x128xf32>
    %410 = vector.extract_strided_slice %376 {offsets = [0, 384], sizes = [1, 128], strides = [1, 1]} : vector<1x768xf32> to vector<1x128xf32>
    %411 = arith.addf %409, %410 : vector<1x128xf32>
    %412 = arith.negf %411 : vector<1x128xf32>
    %413 = math.exp %412 : vector<1x128xf32>
    %cst_86 = arith.constant 1.000000e+00 : f32
    %414 = vector.broadcast %cst_86 : f32 to vector<1x128xf32>
    %415 = arith.addf %414, %413 : vector<1x128xf32>
    %416 = arith.divf %414, %415 : vector<1x128xf32>
    %417 = vector.extract_strided_slice %380 {offsets = [0, 512], sizes = [1, 128], strides = [1, 1]} : vector<1x768xf32> to vector<1x128xf32>
    %418 = vector.extract_strided_slice %376 {offsets = [0, 512], sizes = [1, 128], strides = [1, 1]} : vector<1x768xf32> to vector<1x128xf32>
    %419 = arith.addf %417, %418 : vector<1x128xf32>
    %420 = arith.negf %419 : vector<1x128xf32>
    %421 = math.exp %420 : vector<1x128xf32>
    %cst_87 = arith.constant 1.000000e+00 : f32
    %422 = vector.broadcast %cst_87 : f32 to vector<1x128xf32>
    %423 = arith.addf %422, %421 : vector<1x128xf32>
    %424 = arith.divf %422, %423 : vector<1x128xf32>
    %425 = vector.extract_strided_slice %380 {offsets = [0, 640], sizes = [1, 128], strides = [1, 1]} : vector<1x768xf32> to vector<1x128xf32>
    %426 = vector.extract_strided_slice %376 {offsets = [0, 640], sizes = [1, 128], strides = [1, 1]} : vector<1x768xf32> to vector<1x128xf32>
    %427 = arith.mulf %416, %426 : vector<1x128xf32>
    %428 = arith.addf %425, %427 : vector<1x128xf32>
    %429 = math.tanh %428 : vector<1x128xf32>
    %cst_88 = arith.constant 1.000000e+00 : f32
    %430 = vector.broadcast %cst_88 : f32 to vector<1x128xf32>
    %431 = arith.subf %430, %424 : vector<1x128xf32>
    %432 = arith.mulf %431, %429 : vector<1x128xf32>
    %433 = arith.mulf %424, %382 : vector<1x128xf32>
    %434 = arith.addf %432, %433 : vector<1x128xf32>
    %435 = vector.extract_strided_slice %154 {offsets = [0, 3, 0], sizes = [1, 1, 1], strides = [1, 1, 1]} : vector<1x8x1xf32> to vector<1x1x1xf32>
    %436 = vector.shape_cast %435 : vector<1x1x1xf32> to vector<1x1xf32>
    %437 = vector.broadcast %436 : vector<1x1xf32> to vector<1x128xf32>
    %438 = arith.mulf %437, %408 : vector<1x128xf32>
    %439 = arith.addf %367, %438 : vector<1x128xf32>
    %440 = vector.extract_strided_slice %154 {offsets = [0, 4, 0], sizes = [1, 1, 1], strides = [1, 1, 1]} : vector<1x8x1xf32> to vector<1x1x1xf32>
    %441 = vector.shape_cast %440 : vector<1x1x1xf32> to vector<1x1xf32>
    %442 = vector.broadcast %441 : vector<1x1xf32> to vector<1x128xf32>
    %443 = arith.mulf %442, %434 : vector<1x128xf32>
    %444 = arith.addf %372, %443 : vector<1x128xf32>
    %445 = tpu.concatenate %408, %434 in 1 : vector<1x128xf32>, vector<1x128xf32> -> vector<1x256xf32>
    %446 = arith.truncf %445 : vector<1x256xf32> to vector<1x256xbf16>
    %cst_89 = arith.constant dense<0.000000e+00> : vector<1x768xf32>
    %447 = tpu.matmul %446, %152, %cst_89 {dimension_numbers = #tpu.dot_dimension_numbers<[1], [0], [0], [1], [0, 0, 1, 1], [], []>} : vector<1x256xbf16>, vector<256x768xbf16>, vector<1x768xf32> -> vector<1x768xf32>
    %448 = arith.addf %447, %153 : vector<1x768xf32>
    %449 = vector.extract_strided_slice %151 {offsets = [0, 4, 0], sizes = [1, 1, 768], strides = [1, 1, 1]} : vector<1x8x768xf32> to vector<1x1x768xf32>
    %450 = vector.shape_cast %449 : vector<1x1x768xf32> to vector<1x768xf32>
    %451 = vector.extract_strided_slice %151 {offsets = [0, 3, 0], sizes = [1, 1, 768], strides = [1, 1, 1]} : vector<1x8x768xf32> to vector<1x1x768xf32>
    %452 = vector.shape_cast %451 : vector<1x1x768xf32> to vector<1x768xf32>
    %453 = vector.extract_strided_slice %445 {offsets = [0, 0], sizes = [1, 128], strides = [1, 1]} : vector<1x256xf32> to vector<1x128xf32>
    %454 = vector.extract_strided_slice %445 {offsets = [0, 128], sizes = [1, 128], strides = [1, 1]} : vector<1x256xf32> to vector<1x128xf32>
    %455 = vector.extract_strided_slice %450 {offsets = [0, 0], sizes = [1, 128], strides = [1, 1]} : vector<1x768xf32> to vector<1x128xf32>
    %456 = vector.extract_strided_slice %448 {offsets = [0, 0], sizes = [1, 128], strides = [1, 1]} : vector<1x768xf32> to vector<1x128xf32>
    %457 = arith.addf %455, %456 : vector<1x128xf32>
    %458 = arith.negf %457 : vector<1x128xf32>
    %459 = math.exp %458 : vector<1x128xf32>
    %cst_90 = arith.constant 1.000000e+00 : f32
    %460 = vector.broadcast %cst_90 : f32 to vector<1x128xf32>
    %461 = arith.addf %460, %459 : vector<1x128xf32>
    %462 = arith.divf %460, %461 : vector<1x128xf32>
    %463 = vector.extract_strided_slice %450 {offsets = [0, 128], sizes = [1, 128], strides = [1, 1]} : vector<1x768xf32> to vector<1x128xf32>
    %464 = vector.extract_strided_slice %448 {offsets = [0, 128], sizes = [1, 128], strides = [1, 1]} : vector<1x768xf32> to vector<1x128xf32>
    %465 = arith.addf %463, %464 : vector<1x128xf32>
    %466 = arith.negf %465 : vector<1x128xf32>
    %467 = math.exp %466 : vector<1x128xf32>
    %cst_91 = arith.constant 1.000000e+00 : f32
    %468 = vector.broadcast %cst_91 : f32 to vector<1x128xf32>
    %469 = arith.addf %468, %467 : vector<1x128xf32>
    %470 = arith.divf %468, %469 : vector<1x128xf32>
    %471 = vector.extract_strided_slice %450 {offsets = [0, 256], sizes = [1, 128], strides = [1, 1]} : vector<1x768xf32> to vector<1x128xf32>
    %472 = vector.extract_strided_slice %448 {offsets = [0, 256], sizes = [1, 128], strides = [1, 1]} : vector<1x768xf32> to vector<1x128xf32>
    %473 = arith.mulf %462, %472 : vector<1x128xf32>
    %474 = arith.addf %471, %473 : vector<1x128xf32>
    %475 = math.tanh %474 : vector<1x128xf32>
    %cst_92 = arith.constant 1.000000e+00 : f32
    %476 = vector.broadcast %cst_92 : f32 to vector<1x128xf32>
    %477 = arith.subf %476, %470 : vector<1x128xf32>
    %478 = arith.mulf %477, %475 : vector<1x128xf32>
    %479 = arith.mulf %470, %453 : vector<1x128xf32>
    %480 = arith.addf %478, %479 : vector<1x128xf32>
    %481 = vector.extract_strided_slice %452 {offsets = [0, 384], sizes = [1, 128], strides = [1, 1]} : vector<1x768xf32> to vector<1x128xf32>
    %482 = vector.extract_strided_slice %448 {offsets = [0, 384], sizes = [1, 128], strides = [1, 1]} : vector<1x768xf32> to vector<1x128xf32>
    %483 = arith.addf %481, %482 : vector<1x128xf32>
    %484 = arith.negf %483 : vector<1x128xf32>
    %485 = math.exp %484 : vector<1x128xf32>
    %cst_93 = arith.constant 1.000000e+00 : f32
    %486 = vector.broadcast %cst_93 : f32 to vector<1x128xf32>
    %487 = arith.addf %486, %485 : vector<1x128xf32>
    %488 = arith.divf %486, %487 : vector<1x128xf32>
    %489 = vector.extract_strided_slice %452 {offsets = [0, 512], sizes = [1, 128], strides = [1, 1]} : vector<1x768xf32> to vector<1x128xf32>
    %490 = vector.extract_strided_slice %448 {offsets = [0, 512], sizes = [1, 128], strides = [1, 1]} : vector<1x768xf32> to vector<1x128xf32>
    %491 = arith.addf %489, %490 : vector<1x128xf32>
    %492 = arith.negf %491 : vector<1x128xf32>
    %493 = math.exp %492 : vector<1x128xf32>
    %cst_94 = arith.constant 1.000000e+00 : f32
    %494 = vector.broadcast %cst_94 : f32 to vector<1x128xf32>
    %495 = arith.addf %494, %493 : vector<1x128xf32>
    %496 = arith.divf %494, %495 : vector<1x128xf32>
    %497 = vector.extract_strided_slice %452 {offsets = [0, 640], sizes = [1, 128], strides = [1, 1]} : vector<1x768xf32> to vector<1x128xf32>
    %498 = vector.extract_strided_slice %448 {offsets = [0, 640], sizes = [1, 128], strides = [1, 1]} : vector<1x768xf32> to vector<1x128xf32>
    %499 = arith.mulf %488, %498 : vector<1x128xf32>
    %500 = arith.addf %497, %499 : vector<1x128xf32>
    %501 = math.tanh %500 : vector<1x128xf32>
    %cst_95 = arith.constant 1.000000e+00 : f32
    %502 = vector.broadcast %cst_95 : f32 to vector<1x128xf32>
    %503 = arith.subf %502, %496 : vector<1x128xf32>
    %504 = arith.mulf %503, %501 : vector<1x128xf32>
    %505 = arith.mulf %496, %454 : vector<1x128xf32>
    %506 = arith.addf %504, %505 : vector<1x128xf32>
    %507 = vector.extract_strided_slice %154 {offsets = [0, 4, 0], sizes = [1, 1, 1], strides = [1, 1, 1]} : vector<1x8x1xf32> to vector<1x1x1xf32>
    %508 = vector.shape_cast %507 : vector<1x1x1xf32> to vector<1x1xf32>
    %509 = vector.broadcast %508 : vector<1x1xf32> to vector<1x128xf32>
    %510 = arith.mulf %509, %480 : vector<1x128xf32>
    %511 = arith.addf %439, %510 : vector<1x128xf32>
    %512 = vector.extract_strided_slice %154 {offsets = [0, 3, 0], sizes = [1, 1, 1], strides = [1, 1, 1]} : vector<1x8x1xf32> to vector<1x1x1xf32>
    %513 = vector.shape_cast %512 : vector<1x1x1xf32> to vector<1x1xf32>
    %514 = vector.broadcast %513 : vector<1x1xf32> to vector<1x128xf32>
    %515 = arith.mulf %514, %506 : vector<1x128xf32>
    %516 = arith.addf %444, %515 : vector<1x128xf32>
    %517 = tpu.concatenate %480, %506 in 1 : vector<1x128xf32>, vector<1x128xf32> -> vector<1x256xf32>
    %518 = arith.truncf %517 : vector<1x256xf32> to vector<1x256xbf16>
    %cst_96 = arith.constant dense<0.000000e+00> : vector<1x768xf32>
    %519 = tpu.matmul %518, %152, %cst_96 {dimension_numbers = #tpu.dot_dimension_numbers<[1], [0], [0], [1], [0, 0, 1, 1], [], []>} : vector<1x256xbf16>, vector<256x768xbf16>, vector<1x768xf32> -> vector<1x768xf32>
    %520 = arith.addf %519, %153 : vector<1x768xf32>
    %521 = vector.extract_strided_slice %151 {offsets = [0, 5, 0], sizes = [1, 1, 768], strides = [1, 1, 1]} : vector<1x8x768xf32> to vector<1x1x768xf32>
    %522 = vector.shape_cast %521 : vector<1x1x768xf32> to vector<1x768xf32>
    %523 = vector.extract_strided_slice %151 {offsets = [0, 2, 0], sizes = [1, 1, 768], strides = [1, 1, 1]} : vector<1x8x768xf32> to vector<1x1x768xf32>
    %524 = vector.shape_cast %523 : vector<1x1x768xf32> to vector<1x768xf32>
    %525 = vector.extract_strided_slice %517 {offsets = [0, 0], sizes = [1, 128], strides = [1, 1]} : vector<1x256xf32> to vector<1x128xf32>
    %526 = vector.extract_strided_slice %517 {offsets = [0, 128], sizes = [1, 128], strides = [1, 1]} : vector<1x256xf32> to vector<1x128xf32>
    %527 = vector.extract_strided_slice %522 {offsets = [0, 0], sizes = [1, 128], strides = [1, 1]} : vector<1x768xf32> to vector<1x128xf32>
    %528 = vector.extract_strided_slice %520 {offsets = [0, 0], sizes = [1, 128], strides = [1, 1]} : vector<1x768xf32> to vector<1x128xf32>
    %529 = arith.addf %527, %528 : vector<1x128xf32>
    %530 = arith.negf %529 : vector<1x128xf32>
    %531 = math.exp %530 : vector<1x128xf32>
    %cst_97 = arith.constant 1.000000e+00 : f32
    %532 = vector.broadcast %cst_97 : f32 to vector<1x128xf32>
    %533 = arith.addf %532, %531 : vector<1x128xf32>
    %534 = arith.divf %532, %533 : vector<1x128xf32>
    %535 = vector.extract_strided_slice %522 {offsets = [0, 128], sizes = [1, 128], strides = [1, 1]} : vector<1x768xf32> to vector<1x128xf32>
    %536 = vector.extract_strided_slice %520 {offsets = [0, 128], sizes = [1, 128], strides = [1, 1]} : vector<1x768xf32> to vector<1x128xf32>
    %537 = arith.addf %535, %536 : vector<1x128xf32>
    %538 = arith.negf %537 : vector<1x128xf32>
    %539 = math.exp %538 : vector<1x128xf32>
    %cst_98 = arith.constant 1.000000e+00 : f32
    %540 = vector.broadcast %cst_98 : f32 to vector<1x128xf32>
    %541 = arith.addf %540, %539 : vector<1x128xf32>
    %542 = arith.divf %540, %541 : vector<1x128xf32>
    %543 = vector.extract_strided_slice %522 {offsets = [0, 256], sizes = [1, 128], strides = [1, 1]} : vector<1x768xf32> to vector<1x128xf32>
    %544 = vector.extract_strided_slice %520 {offsets = [0, 256], sizes = [1, 128], strides = [1, 1]} : vector<1x768xf32> to vector<1x128xf32>
    %545 = arith.mulf %534, %544 : vector<1x128xf32>
    %546 = arith.addf %543, %545 : vector<1x128xf32>
    %547 = math.tanh %546 : vector<1x128xf32>
    %cst_99 = arith.constant 1.000000e+00 : f32
    %548 = vector.broadcast %cst_99 : f32 to vector<1x128xf32>
    %549 = arith.subf %548, %542 : vector<1x128xf32>
    %550 = arith.mulf %549, %547 : vector<1x128xf32>
    %551 = arith.mulf %542, %525 : vector<1x128xf32>
    %552 = arith.addf %550, %551 : vector<1x128xf32>
    %553 = vector.extract_strided_slice %524 {offsets = [0, 384], sizes = [1, 128], strides = [1, 1]} : vector<1x768xf32> to vector<1x128xf32>
    %554 = vector.extract_strided_slice %520 {offsets = [0, 384], sizes = [1, 128], strides = [1, 1]} : vector<1x768xf32> to vector<1x128xf32>
    %555 = arith.addf %553, %554 : vector<1x128xf32>
    %556 = arith.negf %555 : vector<1x128xf32>
    %557 = math.exp %556 : vector<1x128xf32>
    %cst_100 = arith.constant 1.000000e+00 : f32
    %558 = vector.broadcast %cst_100 : f32 to vector<1x128xf32>
    %559 = arith.addf %558, %557 : vector<1x128xf32>
    %560 = arith.divf %558, %559 : vector<1x128xf32>
    %561 = vector.extract_strided_slice %524 {offsets = [0, 512], sizes = [1, 128], strides = [1, 1]} : vector<1x768xf32> to vector<1x128xf32>
    %562 = vector.extract_strided_slice %520 {offsets = [0, 512], sizes = [1, 128], strides = [1, 1]} : vector<1x768xf32> to vector<1x128xf32>
    %563 = arith.addf %561, %562 : vector<1x128xf32>
    %564 = arith.negf %563 : vector<1x128xf32>
    %565 = math.exp %564 : vector<1x128xf32>
    %cst_101 = arith.constant 1.000000e+00 : f32
    %566 = vector.broadcast %cst_101 : f32 to vector<1x128xf32>
    %567 = arith.addf %566, %565 : vector<1x128xf32>
    %568 = arith.divf %566, %567 : vector<1x128xf32>
    %569 = vector.extract_strided_slice %524 {offsets = [0, 640], sizes = [1, 128], strides = [1, 1]} : vector<1x768xf32> to vector<1x128xf32>
    %570 = vector.extract_strided_slice %520 {offsets = [0, 640], sizes = [1, 128], strides = [1, 1]} : vector<1x768xf32> to vector<1x128xf32>
    %571 = arith.mulf %560, %570 : vector<1x128xf32>
    %572 = arith.addf %569, %571 : vector<1x128xf32>
    %573 = math.tanh %572 : vector<1x128xf32>
    %cst_102 = arith.constant 1.000000e+00 : f32
    %574 = vector.broadcast %cst_102 : f32 to vector<1x128xf32>
    %575 = arith.subf %574, %568 : vector<1x128xf32>
    %576 = arith.mulf %575, %573 : vector<1x128xf32>
    %577 = arith.mulf %568, %526 : vector<1x128xf32>
    %578 = arith.addf %576, %577 : vector<1x128xf32>
    %579 = vector.extract_strided_slice %154 {offsets = [0, 5, 0], sizes = [1, 1, 1], strides = [1, 1, 1]} : vector<1x8x1xf32> to vector<1x1x1xf32>
    %580 = vector.shape_cast %579 : vector<1x1x1xf32> to vector<1x1xf32>
    %581 = vector.broadcast %580 : vector<1x1xf32> to vector<1x128xf32>
    %582 = arith.mulf %581, %552 : vector<1x128xf32>
    %583 = arith.addf %511, %582 : vector<1x128xf32>
    %584 = vector.extract_strided_slice %154 {offsets = [0, 2, 0], sizes = [1, 1, 1], strides = [1, 1, 1]} : vector<1x8x1xf32> to vector<1x1x1xf32>
    %585 = vector.shape_cast %584 : vector<1x1x1xf32> to vector<1x1xf32>
    %586 = vector.broadcast %585 : vector<1x1xf32> to vector<1x128xf32>
    %587 = arith.mulf %586, %578 : vector<1x128xf32>
    %588 = arith.addf %516, %587 : vector<1x128xf32>
    %589 = tpu.concatenate %552, %578 in 1 : vector<1x128xf32>, vector<1x128xf32> -> vector<1x256xf32>
    %590 = arith.truncf %589 : vector<1x256xf32> to vector<1x256xbf16>
    %cst_103 = arith.constant dense<0.000000e+00> : vector<1x768xf32>
    %591 = tpu.matmul %590, %152, %cst_103 {dimension_numbers = #tpu.dot_dimension_numbers<[1], [0], [0], [1], [0, 0, 1, 1], [], []>} : vector<1x256xbf16>, vector<256x768xbf16>, vector<1x768xf32> -> vector<1x768xf32>
    %592 = arith.addf %591, %153 : vector<1x768xf32>
    %593 = vector.extract_strided_slice %151 {offsets = [0, 6, 0], sizes = [1, 1, 768], strides = [1, 1, 1]} : vector<1x8x768xf32> to vector<1x1x768xf32>
    %594 = vector.shape_cast %593 : vector<1x1x768xf32> to vector<1x768xf32>
    %595 = vector.extract_strided_slice %151 {offsets = [0, 1, 0], sizes = [1, 1, 768], strides = [1, 1, 1]} : vector<1x8x768xf32> to vector<1x1x768xf32>
    %596 = vector.shape_cast %595 : vector<1x1x768xf32> to vector<1x768xf32>
    %597 = vector.extract_strided_slice %589 {offsets = [0, 0], sizes = [1, 128], strides = [1, 1]} : vector<1x256xf32> to vector<1x128xf32>
    %598 = vector.extract_strided_slice %589 {offsets = [0, 128], sizes = [1, 128], strides = [1, 1]} : vector<1x256xf32> to vector<1x128xf32>
    %599 = vector.extract_strided_slice %594 {offsets = [0, 0], sizes = [1, 128], strides = [1, 1]} : vector<1x768xf32> to vector<1x128xf32>
    %600 = vector.extract_strided_slice %592 {offsets = [0, 0], sizes = [1, 128], strides = [1, 1]} : vector<1x768xf32> to vector<1x128xf32>
    %601 = arith.addf %599, %600 : vector<1x128xf32>
    %602 = arith.negf %601 : vector<1x128xf32>
    %603 = math.exp %602 : vector<1x128xf32>
    %cst_104 = arith.constant 1.000000e+00 : f32
    %604 = vector.broadcast %cst_104 : f32 to vector<1x128xf32>
    %605 = arith.addf %604, %603 : vector<1x128xf32>
    %606 = arith.divf %604, %605 : vector<1x128xf32>
    %607 = vector.extract_strided_slice %594 {offsets = [0, 128], sizes = [1, 128], strides = [1, 1]} : vector<1x768xf32> to vector<1x128xf32>
    %608 = vector.extract_strided_slice %592 {offsets = [0, 128], sizes = [1, 128], strides = [1, 1]} : vector<1x768xf32> to vector<1x128xf32>
    %609 = arith.addf %607, %608 : vector<1x128xf32>
    %610 = arith.negf %609 : vector<1x128xf32>
    %611 = math.exp %610 : vector<1x128xf32>
    %cst_105 = arith.constant 1.000000e+00 : f32
    %612 = vector.broadcast %cst_105 : f32 to vector<1x128xf32>
    %613 = arith.addf %612, %611 : vector<1x128xf32>
    %614 = arith.divf %612, %613 : vector<1x128xf32>
    %615 = vector.extract_strided_slice %594 {offsets = [0, 256], sizes = [1, 128], strides = [1, 1]} : vector<1x768xf32> to vector<1x128xf32>
    %616 = vector.extract_strided_slice %592 {offsets = [0, 256], sizes = [1, 128], strides = [1, 1]} : vector<1x768xf32> to vector<1x128xf32>
    %617 = arith.mulf %606, %616 : vector<1x128xf32>
    %618 = arith.addf %615, %617 : vector<1x128xf32>
    %619 = math.tanh %618 : vector<1x128xf32>
    %cst_106 = arith.constant 1.000000e+00 : f32
    %620 = vector.broadcast %cst_106 : f32 to vector<1x128xf32>
    %621 = arith.subf %620, %614 : vector<1x128xf32>
    %622 = arith.mulf %621, %619 : vector<1x128xf32>
    %623 = arith.mulf %614, %597 : vector<1x128xf32>
    %624 = arith.addf %622, %623 : vector<1x128xf32>
    %625 = vector.extract_strided_slice %596 {offsets = [0, 384], sizes = [1, 128], strides = [1, 1]} : vector<1x768xf32> to vector<1x128xf32>
    %626 = vector.extract_strided_slice %592 {offsets = [0, 384], sizes = [1, 128], strides = [1, 1]} : vector<1x768xf32> to vector<1x128xf32>
    %627 = arith.addf %625, %626 : vector<1x128xf32>
    %628 = arith.negf %627 : vector<1x128xf32>
    %629 = math.exp %628 : vector<1x128xf32>
    %cst_107 = arith.constant 1.000000e+00 : f32
    %630 = vector.broadcast %cst_107 : f32 to vector<1x128xf32>
    %631 = arith.addf %630, %629 : vector<1x128xf32>
    %632 = arith.divf %630, %631 : vector<1x128xf32>
    %633 = vector.extract_strided_slice %596 {offsets = [0, 512], sizes = [1, 128], strides = [1, 1]} : vector<1x768xf32> to vector<1x128xf32>
    %634 = vector.extract_strided_slice %592 {offsets = [0, 512], sizes = [1, 128], strides = [1, 1]} : vector<1x768xf32> to vector<1x128xf32>
    %635 = arith.addf %633, %634 : vector<1x128xf32>
    %636 = arith.negf %635 : vector<1x128xf32>
    %637 = math.exp %636 : vector<1x128xf32>
    %cst_108 = arith.constant 1.000000e+00 : f32
    %638 = vector.broadcast %cst_108 : f32 to vector<1x128xf32>
    %639 = arith.addf %638, %637 : vector<1x128xf32>
    %640 = arith.divf %638, %639 : vector<1x128xf32>
    %641 = vector.extract_strided_slice %596 {offsets = [0, 640], sizes = [1, 128], strides = [1, 1]} : vector<1x768xf32> to vector<1x128xf32>
    %642 = vector.extract_strided_slice %592 {offsets = [0, 640], sizes = [1, 128], strides = [1, 1]} : vector<1x768xf32> to vector<1x128xf32>
    %643 = arith.mulf %632, %642 : vector<1x128xf32>
    %644 = arith.addf %641, %643 : vector<1x128xf32>
    %645 = math.tanh %644 : vector<1x128xf32>
    %cst_109 = arith.constant 1.000000e+00 : f32
    %646 = vector.broadcast %cst_109 : f32 to vector<1x128xf32>
    %647 = arith.subf %646, %640 : vector<1x128xf32>
    %648 = arith.mulf %647, %645 : vector<1x128xf32>
    %649 = arith.mulf %640, %598 : vector<1x128xf32>
    %650 = arith.addf %648, %649 : vector<1x128xf32>
    %651 = vector.extract_strided_slice %154 {offsets = [0, 6, 0], sizes = [1, 1, 1], strides = [1, 1, 1]} : vector<1x8x1xf32> to vector<1x1x1xf32>
    %652 = vector.shape_cast %651 : vector<1x1x1xf32> to vector<1x1xf32>
    %653 = vector.broadcast %652 : vector<1x1xf32> to vector<1x128xf32>
    %654 = arith.mulf %653, %624 : vector<1x128xf32>
    %655 = arith.addf %583, %654 : vector<1x128xf32>
    %656 = vector.extract_strided_slice %154 {offsets = [0, 1, 0], sizes = [1, 1, 1], strides = [1, 1, 1]} : vector<1x8x1xf32> to vector<1x1x1xf32>
    %657 = vector.shape_cast %656 : vector<1x1x1xf32> to vector<1x1xf32>
    %658 = vector.broadcast %657 : vector<1x1xf32> to vector<1x128xf32>
    %659 = arith.mulf %658, %650 : vector<1x128xf32>
    %660 = arith.addf %588, %659 : vector<1x128xf32>
    %661 = tpu.concatenate %624, %650 in 1 : vector<1x128xf32>, vector<1x128xf32> -> vector<1x256xf32>
    %662 = arith.truncf %661 : vector<1x256xf32> to vector<1x256xbf16>
    %cst_110 = arith.constant dense<0.000000e+00> : vector<1x768xf32>
    %663 = tpu.matmul %662, %152, %cst_110 {dimension_numbers = #tpu.dot_dimension_numbers<[1], [0], [0], [1], [0, 0, 1, 1], [], []>} : vector<1x256xbf16>, vector<256x768xbf16>, vector<1x768xf32> -> vector<1x768xf32>
    %664 = arith.addf %663, %153 : vector<1x768xf32>
    %665 = vector.extract_strided_slice %151 {offsets = [0, 7, 0], sizes = [1, 1, 768], strides = [1, 1, 1]} : vector<1x8x768xf32> to vector<1x1x768xf32>
    %666 = vector.shape_cast %665 : vector<1x1x768xf32> to vector<1x768xf32>
    %667 = vector.extract_strided_slice %151 {offsets = [0, 0, 0], sizes = [1, 1, 768], strides = [1, 1, 1]} : vector<1x8x768xf32> to vector<1x1x768xf32>
    %668 = vector.shape_cast %667 : vector<1x1x768xf32> to vector<1x768xf32>
    %669 = vector.extract_strided_slice %661 {offsets = [0, 0], sizes = [1, 128], strides = [1, 1]} : vector<1x256xf32> to vector<1x128xf32>
    %670 = vector.extract_strided_slice %661 {offsets = [0, 128], sizes = [1, 128], strides = [1, 1]} : vector<1x256xf32> to vector<1x128xf32>
    %671 = vector.extract_strided_slice %666 {offsets = [0, 0], sizes = [1, 128], strides = [1, 1]} : vector<1x768xf32> to vector<1x128xf32>
    %672 = vector.extract_strided_slice %664 {offsets = [0, 0], sizes = [1, 128], strides = [1, 1]} : vector<1x768xf32> to vector<1x128xf32>
    %673 = arith.addf %671, %672 : vector<1x128xf32>
    %674 = arith.negf %673 : vector<1x128xf32>
    %675 = math.exp %674 : vector<1x128xf32>
    %cst_111 = arith.constant 1.000000e+00 : f32
    %676 = vector.broadcast %cst_111 : f32 to vector<1x128xf32>
    %677 = arith.addf %676, %675 : vector<1x128xf32>
    %678 = arith.divf %676, %677 : vector<1x128xf32>
    %679 = vector.extract_strided_slice %666 {offsets = [0, 128], sizes = [1, 128], strides = [1, 1]} : vector<1x768xf32> to vector<1x128xf32>
    %680 = vector.extract_strided_slice %664 {offsets = [0, 128], sizes = [1, 128], strides = [1, 1]} : vector<1x768xf32> to vector<1x128xf32>
    %681 = arith.addf %679, %680 : vector<1x128xf32>
    %682 = arith.negf %681 : vector<1x128xf32>
    %683 = math.exp %682 : vector<1x128xf32>
    %cst_112 = arith.constant 1.000000e+00 : f32
    %684 = vector.broadcast %cst_112 : f32 to vector<1x128xf32>
    %685 = arith.addf %684, %683 : vector<1x128xf32>
    %686 = arith.divf %684, %685 : vector<1x128xf32>
    %687 = vector.extract_strided_slice %666 {offsets = [0, 256], sizes = [1, 128], strides = [1, 1]} : vector<1x768xf32> to vector<1x128xf32>
    %688 = vector.extract_strided_slice %664 {offsets = [0, 256], sizes = [1, 128], strides = [1, 1]} : vector<1x768xf32> to vector<1x128xf32>
    %689 = arith.mulf %678, %688 : vector<1x128xf32>
    %690 = arith.addf %687, %689 : vector<1x128xf32>
    %691 = math.tanh %690 : vector<1x128xf32>
    %cst_113 = arith.constant 1.000000e+00 : f32
    %692 = vector.broadcast %cst_113 : f32 to vector<1x128xf32>
    %693 = arith.subf %692, %686 : vector<1x128xf32>
    %694 = arith.mulf %693, %691 : vector<1x128xf32>
    %695 = arith.mulf %686, %669 : vector<1x128xf32>
    %696 = arith.addf %694, %695 : vector<1x128xf32>
    %697 = vector.extract_strided_slice %668 {offsets = [0, 384], sizes = [1, 128], strides = [1, 1]} : vector<1x768xf32> to vector<1x128xf32>
    %698 = vector.extract_strided_slice %664 {offsets = [0, 384], sizes = [1, 128], strides = [1, 1]} : vector<1x768xf32> to vector<1x128xf32>
    %699 = arith.addf %697, %698 : vector<1x128xf32>
    %700 = arith.negf %699 : vector<1x128xf32>
    %701 = math.exp %700 : vector<1x128xf32>
    %cst_114 = arith.constant 1.000000e+00 : f32
    %702 = vector.broadcast %cst_114 : f32 to vector<1x128xf32>
    %703 = arith.addf %702, %701 : vector<1x128xf32>
    %704 = arith.divf %702, %703 : vector<1x128xf32>
    %705 = vector.extract_strided_slice %668 {offsets = [0, 512], sizes = [1, 128], strides = [1, 1]} : vector<1x768xf32> to vector<1x128xf32>
    %706 = vector.extract_strided_slice %664 {offsets = [0, 512], sizes = [1, 128], strides = [1, 1]} : vector<1x768xf32> to vector<1x128xf32>
    %707 = arith.addf %705, %706 : vector<1x128xf32>
    %708 = arith.negf %707 : vector<1x128xf32>
    %709 = math.exp %708 : vector<1x128xf32>
    %cst_115 = arith.constant 1.000000e+00 : f32
    %710 = vector.broadcast %cst_115 : f32 to vector<1x128xf32>
    %711 = arith.addf %710, %709 : vector<1x128xf32>
    %712 = arith.divf %710, %711 : vector<1x128xf32>
    %713 = vector.extract_strided_slice %668 {offsets = [0, 640], sizes = [1, 128], strides = [1, 1]} : vector<1x768xf32> to vector<1x128xf32>
    %714 = vector.extract_strided_slice %664 {offsets = [0, 640], sizes = [1, 128], strides = [1, 1]} : vector<1x768xf32> to vector<1x128xf32>
    %715 = arith.mulf %704, %714 : vector<1x128xf32>
    %716 = arith.addf %713, %715 : vector<1x128xf32>
    %717 = math.tanh %716 : vector<1x128xf32>
    %cst_116 = arith.constant 1.000000e+00 : f32
    %718 = vector.broadcast %cst_116 : f32 to vector<1x128xf32>
    %719 = arith.subf %718, %712 : vector<1x128xf32>
    %720 = arith.mulf %719, %717 : vector<1x128xf32>
    %721 = arith.mulf %712, %670 : vector<1x128xf32>
    %722 = arith.addf %720, %721 : vector<1x128xf32>
    %723 = vector.extract_strided_slice %154 {offsets = [0, 7, 0], sizes = [1, 1, 1], strides = [1, 1, 1]} : vector<1x8x1xf32> to vector<1x1x1xf32>
    %724 = vector.shape_cast %723 : vector<1x1x1xf32> to vector<1x1xf32>
    %725 = vector.broadcast %724 : vector<1x1xf32> to vector<1x128xf32>
    %726 = arith.mulf %725, %696 : vector<1x128xf32>
    %727 = arith.addf %655, %726 : vector<1x128xf32>
    %728 = vector.extract_strided_slice %154 {offsets = [0, 0, 0], sizes = [1, 1, 1], strides = [1, 1, 1]} : vector<1x8x1xf32> to vector<1x1x1xf32>
    %729 = vector.shape_cast %728 : vector<1x1x1xf32> to vector<1x1xf32>
    %730 = vector.broadcast %729 : vector<1x1xf32> to vector<1x128xf32>
    %731 = arith.mulf %730, %722 : vector<1x128xf32>
    %732 = arith.addf %660, %731 : vector<1x128xf32>
    %733 = vector.shape_cast %727 : vector<1x128xf32> to vector<1x1x128xf32>
    %734 = vector.shape_cast %732 : vector<1x128xf32> to vector<1x1x128xf32>
    %735 = tpu.concatenate %733, %734 in 1 : vector<1x1x128xf32>, vector<1x1x128xf32> -> vector<1x2x128xf32>
    %c0_117 = arith.constant 0 : index
    %c0_118 = arith.constant 0 : index
    %c0_119 = arith.constant 0 : index
    %736 = vector.load %arg11[%c0_117, %c0_118, %c0_119] : memref<1x2x128xf32, #tpu.memory_space<vmem>>, vector<1x2x128xf32>
    tpu.vector_store %arg11[%c0_117, %c0_118, %c0_119], %735 {strides = array<i32>} : memref<1x2x128xf32, #tpu.memory_space<vmem>>, vector<1x2x128xf32>,
    return
  }
  func.func @transform_0(%arg0: i32) -> (i32, i32, i32) {
    %c0_i32 = arith.constant 0 : i32
    %c0_i32_0 = arith.constant 0 : i32
    %c0_i32_1 = arith.constant 0 : i32
    return %arg0, %c0_i32, %c0_i32_0 : i32, i32, i32
  }
  func.func @transform_1(%arg0: i32) -> (i32, i32, i32) {
    %c0_i32 = arith.constant 0 : i32
    %c0_i32_0 = arith.constant 0 : i32
    %c0_i32_1 = arith.constant 0 : i32
    return %arg0, %c0_i32, %c0_i32_0 : i32, i32, i32
  }
  func.func @transform_2(%arg0: i32) -> (i32, i32, i32) {
    %c0_i32 = arith.constant 0 : i32
    %c0_i32_0 = arith.constant 0 : i32
    %c0_i32_1 = arith.constant 0 : i32
    return %arg0, %c0_i32, %c0_i32_0 : i32, i32, i32
  }
  func.func @transform_3(%arg0: i32) -> (i32, i32, i32) {
    %c0_i32 = arith.constant 0 : i32
    %c0_i32_0 = arith.constant 0 : i32
    %c0_i32_1 = arith.constant 0 : i32
    %c0_i32_2 = arith.constant 0 : i32
    return %c0_i32, %c0_i32_0, %c0_i32_1 : i32, i32, i32
  }
  func.func @transform_4(%arg0: i32) -> (i32, i32, i32) {
    %c0_i32 = arith.constant 0 : i32
    %c0_i32_0 = arith.constant 0 : i32
    %c0_i32_1 = arith.constant 0 : i32
    %c0_i32_2 = arith.constant 0 : i32
    return %c0_i32, %c0_i32_0, %c0_i32_1 : i32, i32, i32
  }
  func.func @transform_5(%arg0: i32) -> (i32, i32) {
    %c0_i32 = arith.constant 0 : i32
    %c0_i32_0 = arith.constant 0 : i32
    %c0_i32_1 = arith.constant 0 : i32
    return %c0_i32, %c0_i32_0 : i32, i32
  }
  func.func @transform_6(%arg0: i32) -> (i32, i32) {
    %c0_i32 = arith.constant 0 : i32
    %c0_i32_0 = arith.constant 0 : i32
    %c0_i32_1 = arith.constant 0 : i32
    return %c0_i32, %c0_i32_0 : i32, i32
  }
  func.func @transform_7(%arg0: i32) -> (i32, i32) {
    %c0_i32 = arith.constant 0 : i32
    %c0_i32_0 = arith.constant 0 : i32
    %c0_i32_1 = arith.constant 0 : i32
    return %c0_i32, %c0_i32_0 : i32, i32
  }
  func.func @transform_8(%arg0: i32) -> (i32, i32) {
    %c0_i32 = arith.constant 0 : i32
    %c0_i32_0 = arith.constant 0 : i32
    %c0_i32_1 = arith.constant 0 : i32
    return %c0_i32, %c0_i32_0 : i32, i32
  }
  func.func @transform_9(%arg0: i32) -> (i32, i32) {
    %c0_i32 = arith.constant 0 : i32
    %c0_i32_0 = arith.constant 0 : i32
    %c0_i32_1 = arith.constant 0 : i32
    return %c0_i32, %c0_i32_0 : i32, i32
  }
  func.func @transform_10(%arg0: i32) -> (i32, i32, i32) {
    %c0_i32 = arith.constant 0 : i32
    %c0_i32_0 = arith.constant 0 : i32
    %c0_i32_1 = arith.constant 0 : i32
    return %arg0, %c0_i32, %c0_i32_0 : i32, i32, i32
  }
}

</mosaic_0001>

<bundles_post_ra>
// kernel: tpu_custom_call.1
= control target key start
LH: loop header
LB: loop body
LE: loop exit
PB: predicated region body
PF: predicated region fallthrough
CT: control target
= control target key end

     0   :  { %s7728_s0 = inlined_call_operand.vmem [shape: f32[2,8,128], index: 0, kind: input, shape index: {}]   ;;  %s7729_s1 = inlined_call_operand.hbm [shape: f32[2,8,128], index: 1, kind: input, shape index: {}]   ;;  %s7730_s2 = inlined_call_operand.vmem [shape: f32[2,8,1], index: 2, kind: input, shape index: {}]   ;;  %s7731_s3 = inlined_call_operand.hbm [shape: bf16[4,128,128], index: 3, kind: input, shape index: {}]   ;;  %s7732_s4 = inlined_call_operand.hbm [shape: f32[4,1,128], index: 4, kind: input, shape index: {}]   ;;  %s7733_s5 = inlined_call_operand.hbm [shape: bf16[128,768], index: 5, kind: input, shape index: {}]   ;;  %s7734_s6 = inlined_call_operand.vmem [shape: f32[1,768], index: 6, kind: input, shape index: {}]   ;;  %s7735_s7 = inlined_call_operand.hbm [shape: bf16[256,768], index: 7, kind: input, shape index: {}]   ;;  %s7736_s8 = inlined_call_operand.hbm [shape: f32[1,768], index: 8, kind: input, shape index: {}]   ;;  %s7737_s9 = inlined_call_operand.hbm [shape: f32[48,48], index: 9, kind: input, shape index: {}]   ;;  %s7738_s10 = inlined_call_operand.hbm [shape: f32[2,2,128], index: 10, kind: output, shape index: {}]  }
   0x1   :  { %7930 = sst [smem:[#allocation112_spill]] %s7731_s3 }
   0x2   :  { %7931 = sst [smem:[#allocation113_spill]] %s7732_s4 }
   0x3   :  { %7932 = sst [smem:[#allocation114_spill]] %s7733_s5 }
   0x4   :  { %7933 = sst [smem:[#allocation115_spill]] %s7735_s7 }
   0x5   :  { %7934 = sst [smem:[#allocation116_spill]] %s7738_s10 }
   0x6   :  { %15 = vsyncpa [#allocation3], 0 }
   0x7   :  { %17 = vsyncpa [#allocation3 + $0x1], 0 }
   0x8   :  { %18 = vsyncpa [#allocation6], 0 }
   0x9   :  { %19 = vsyncpa [#allocation9], 0 }
   0xa   :  { %20 = vsyncpa [#allocation12], 0 }
   0xb   :  { %21 = vsyncpa [#allocation4], 0 }
   0xc   :  { %23 = vsyncpa [#allocation4 + $0x1], 0  ;;  %s6136_s13 = smov 0   ;;  %s6138_s14 = smov 0  }
   0xd   :  { %s6140_s15 = smov 0   ;;  %s6142_s16 = smov 0  }
   0xe LB: > { %s7935_s3 = sld [smem:[#allocation112_spill]]  ;;  %s6160_s20 = sadd.s32 4294967295, %s6062_s16   ;;  %s6062_s16 = sphi %s6142_s16, %s8525_s16   ;;  %s6058_s15 = sphi %s6140_s15, %s8524_s15   ;;  %s6054_s14 = sphi %s6138_s14, %s8523_s14   ;;  %s6050_s13 = sphi %s6136_s13, %s8522_s13  }
   0xf   : > { %p4533_p0 = scmp.ge.s32.totalorder %s6062_s16, 1  ;;  %p76_p1 = scmp.eq.s32.totalorder %s6160_s20, 0 }
  0x10   : > { %p285_p2 = scmp.lt.s32.totalorder %s6062_s16, 3  ;;  %s6064_s22 = smov [#allocation5]  }
  0x11   : > { %s298_s23 = sshll.u32 %s6064_s22, 4  ;;  %s7937_s5 = sld [smem:[#allocation114_spill]]  ;;  %s299_s23 = int_to_ptr.vmem [resolvable:$true] %s298_s23 }
  0x12   : > { %p6165_p3 = pnand %p4533_p0, %p285_p2  ;;  %s6065_s28 = smov [#allocation8]  }
  0x13   : > { %s326_s29 = sshll.u32 %s6065_s28, 4  ;;  %s6066_s30 = smov 64   ;;  %s327_s29 = int_to_ptr.vmem [resolvable:$true] %s326_s29 }
  0x14   : > { %s296_s19 = sshll.u32 %s7935_s3, 4  ;;  %p5515_p4 = pneg %p6165_p3  ;;  %s297_s19 = int_to_ptr.hbm [resolvable:$true] %s296_s19 }
  0x15   : > { %s6067_s11 = smov 4   ;;  %s6068_s12 = smov 384  }
  0x16   : > { %p6177_p6 = pnand %p5515_p4, %p76_p1  ;;  %s6069_s17 = smov 24  }
  0x17   : > { %s324_s26 = sshll.u32 %s7937_s5, 4  ;;  %s356_s24 = sshll.u32 %s7736_s8, 4  ;;  %s325_s26 = int_to_ptr.hbm [resolvable:$true] %s324_s26  ;;  %s357_s24 = int_to_ptr.hbm [resolvable:$true] %s356_s24 }
  0x18   : > { %5518 = dma.hbm_to_vmem [thread:$0]  (!%p6177_p6), %s297_s19, 4096, %s299_s23, [#allocation6], %s6066_s30, %s6066_s30, %s6067_s11  }
  0x19   : > { %5524 = dma.hbm_to_vmem [thread:$0]  (!%p6177_p6), %s325_s26, 6144, %s327_s29, [#allocation9], %s6068_s12, %s6068_s12, %s6069_s17  }
  0x1a   : > { %s6070_s25 = smov [#allocation11]   ;;  %s7939_s4 = sld [smem:[#allocation113_spill]] }
  0x1b   : > { %s358_s3 = sshll.u32 %s6070_s25, 4  ;;  %s6071_s19 = smov [#allocation7]   ;;  %s359_s3 = int_to_ptr.vmem [resolvable:$true] %s358_s3 }
  0x1c   : > { %5530 = dma.hbm_to_vmem [thread:$0]  (!%p6177_p6), %s357_s24, 96, %s359_s3, [#allocation12]  }
  0x1d   : > { %s312_s23 = sshll.u32 %s6071_s19, 4  ;;  %s6072_s26 = smov 16   ;;  %s313_s23 = int_to_ptr.vmem [resolvable:$true] %s312_s23 }
  0x1e   : > { %s6073_s29 = smov 1   ;;  %s7940_s7 = sld [smem:[#allocation115_spill]] }
  0x1f   : > { %s6074_s5 = smov [#allocation10]   ;;  %s367_s25 = sshll.u32 %s7737_s9, 4  ;;  %s368_s25 = int_to_ptr.hbm [resolvable:$true] %s367_s25 }
  0x20   : > { %s310_s10 = sshll.u32 %s7939_s4, 4  ;;  %s343_s3 = sshll.u32 %s6074_s5, 4  ;;  %s311_s10 = int_to_ptr.hbm [resolvable:$true] %s310_s10  ;;  %s344_s3 = int_to_ptr.vmem [resolvable:$true] %s343_s3 }
  0x21   : > { %5521 = dma.hbm_to_vmem [thread:$0]  (!%p6177_p6), %s311_s10, 64, %s313_s23, [#allocation6], %s6072_s26, %s6072_s26, %s6073_s29  }
  0x22   : > { %s6075_s10 = smov [#allocation13]   ;;  %s6076_s19 = smov 128  }
  0x23   : > { %s369_s28 = sshll.u32 %s6075_s10, 4  ;;  %s6077_s23 = smov 8   ;;  %s370_s28 = int_to_ptr.vmem [resolvable:$true] %s369_s28 }
  0x24   : > { %s341_s18 = sshll.u32 %s7940_s7, 4  ;;  %s4532_s26 = sadd.s32 4294967294, %s6062_s16   ;;  %s342_s18 = int_to_ptr.hbm [resolvable:$true] %s341_s18 }
  0x25   : > { %5527 = dma.hbm_to_vmem [thread:$0]  (!%p6177_p6), %s342_s18, 12288, %s344_s3, [#allocation9], %s6068_s12, %s6068_s12, %s6069_s17  }
  0x26   : > { %5533 = dma.hbm_to_vmem [thread:$0]  (!%p6177_p6), %s368_s25, 768, %s370_s28, [#allocation12], %s6076_s19, %s6076_s19, %s6077_s23  }
  0x27   : > { %s6207_s29 = sadd.s32 1, %s6062_s16   ;;  %s62_s12 = sadd.s32 1, %s6058_s15 }
  0x28   : > { %s59_s30 = ssub.s32 %s6062_s16, %s6207_s29  ;;  %p69_p8 = scmp.ne.s32.totalorder %s6058_s15, %s6054_s14 }
  0x29   : > { %p60_p7 = scmp.eq.s32.totalorder %s59_s30, 0  ;;  %p70_p9 = scmp.eq.s32.totalorder %s6062_s16, 0 }
  0x2a   : > { %p75_p10 = scmp.ne.s32.totalorder %s6054_s14, %s6050_s13  ;;  %p272_p13 = scmp.eq.s32.totalorder %s6160_s20, 1 }
  0x2b   : > { %s6218_s17 = scalar_select %p60_p7, %s6058_s15, %s62_s12  }
  0x2c   : > { %p6220_p11 = por %p70_p9, %p69_p8  ;;  %p6226_p12 = por %p76_p1, %p75_p10 }
  0x2d   : > { %p278_p0 = scmp.eq.s32.totalorder %s4532_s26, 1  ;;  %p5548_p2 = scmp.lt.s32.totalorder %s6062_s16, 2 }
  0x2e   : > { %s390_s18 = sand.u32 1, %s6058_s15   ;;  %p6233_p4 = por %p272_p13, %p69_p8 }
  0x2f   : > { %p6237_p6 = por %p278_p0, %p75_p10  ;;  %s4541_s22 = sshll.u32 %s390_s18, 3 }
  0x30   : > { %s4542_s24 = sshll.u32 %s6062_s16, 3  ;;  %s394_s19 = scalar_lea.vmem [#allocation2], %s4541_s22 }
  0x31   : > { %s398_s28 = scalar_lea.hbm %s7729_s1, %s4542_s24  ;;  %s402_s23 = sshll.u32 %s394_s19, 4  ;;  %s403_s23 = int_to_ptr.vmem [resolvable:$true] %s402_s23 }
  0x32   : > { %s400_s30 = sshll.u32 %s398_s28, 4  ;;  %p6247_p7 = pnand %p5548_p2, %p6220_p11  ;;  %s401_s30 = int_to_ptr.hbm [resolvable:$true] %s400_s30 }
  0x33   : > { %s391_s12 = scalar_lea.sflag [#allocation3], %s390_s18  ;;  %s5954_s4 = sshra.s32 %s401_s30, 4  ;;  %s5955_s4 = int_to_ptr.hbm [resolvable:$true] %s5954_s4 }
  0x34   : > { %s5956_s7 = scalar_lea.hbm %s5955_s4, 8  ;;  %p5958_p9 = pneg %p6247_p7 }
  0x35   : > { %p5957_p8 = scmp.ne.s32.totalorder %s5955_s4, %s5956_s7  ;;  %s5961_s25 = scalar_lea.hbm %s7729_s1, 16 }
  0x36   : > { %p5962_p11 = scmp.lt.s32.totalorder %s5955_s4, %s7729_s1  ;;  %p5963_p0 = scmp.lt.s32.totalorder %s5961_s25, %s5956_s7 }
  0x37   : > { %p5959_p10 = pnand %p5958_p9, %p5957_p8 }
  0x38   : > { %p5964_p2 = por %p5963_p0, %p5962_p11 }
  0x39   : > { %p5960_p13 = pneg %p5959_p10 }
  0x3b   : > { %p5965_p5 = pnand %p5964_p2, %p5960_p13 }
  0x3d   : > { %5968 = shalt.err (!%p5965_p5)
}
  0x3e   : > { %5537 = dma.hbm_to_vmem [thread:$0]  (!%p6247_p7), %s401_s30, 128, %s403_s23, %s391_s12  }
  0x3f   : > { %418 = sbr.rel (%p6165_p3) target bundleno = 2707 (0xa93), region = 60 }
  0x44   : > { %s6264_s18 = sand.u32 1, %s6054_s14  }
  0x45   : > { %s4544_s28 = sshll.u32 %s6264_s18, 3  ;;  %s421_s19 = scalar_lea.sflag [#allocation3], %s6264_s18 }
  0x46   : > { %s424_s22 = scalar_lea.vmem [#allocation2], %s4544_s28 }
  0x47   : > { %6029 = dma.done.wait (%p6226_p12), %s421_s19, 128  }
  0x48   : > { %6031 = vsyncadd (%p6226_p12), %s421_s19, 4294967168 }
  0x49   : > { %6033 = dma.done.wait (%p76_p1), [#allocation6], 4160  }
  0x4a   : > { %6035 = vsyncadd (%p76_p1), [#allocation6], 4294963136 }
  0x4b   : > { %6037 = dma.done.wait (%p76_p1), [#allocation9], 18432  }
  0x4c   : > { %6039 = vsyncadd (%p76_p1), [#allocation9], 4294948864 }
  0x4d   : > { %6041 = dma.done.wait (%p76_p1), [#allocation12], 864  }
  0x4e   : > { %6043 = vsyncadd (%p76_p1), [#allocation12], 4294966432  ;;  %v510_v0 = vld [vmem:[%s424_s22] sm:$0xff]  ;;  %v6078_v1 = vmov 1.0   ;;  %p500_p3 = scmp.lt.s32.totalorder %s6160_s20, 1  ;;  %v5324_v7 = vld [vmem:[#allocation5 + $0x68] sm:$0xff]  ;;  %v790_v21 = vlaneseq }
  0x4f   : > { %vm514_vm0 = vcmp.ne.f32.partialorder %v510_v0, 0.0  ;;  %v5326_v2 = vld [vmem:[#allocation5 + $0x78] sm:$0xff]  ;;  %v5325_v5 = vld [vmem:[#allocation5 + $0x70] sm:$0xff]  ;;  %v5316_v8 = vld [vmem:[#allocation5 + $0x28] sm:$0xff]  ;;  %v6297_v19 = vpack.c.bf16 %v510_v0, %v510_v0  ;;  %v6079_v30 = vmov 0.0   ;;  %s4551_s10 = sshll.u32 %s6264_s18, 1 }
  0x50   : > { %4556 = vmatpush.xpose.msk.msra.mxu2 %vm514_vm0, %v6078_v1  ;;  %s6286_s4 = scalar_select %p500_p3, %s6160_s20, 1  ;;  %v5318_v4 = vld [vmem:[#allocation5 + $0x38] sm:$0xff]  ;;  %v5317_v6 = vld [vmem:[#allocation5 + $0x30] sm:$0xff]  ;;  %v5323_v9 = vld [vmem:[#allocation5 + $0x60] sm:$0xff]  ;;  %v791_v23 = vand.u32 127, %v790_v21 }
  0x51   : > { %608 = vmatpush.bf16.msra.mxu1 %v5318_v4  ;;  %v5315_v10 = vld [vmem:[#allocation5 + $0x20] sm:$0xff]  ;;  %v5322_v11 = vld [vmem:[#allocation5 + $0x58] sm:$0xff]  ;;  %v5321_v13 = vld [vmem:[#allocation5 + $0x50] sm:$0xff]  ;;  %s5308_s11 = sshll.u32 %s6160_s20, 1  ;;  %s8520_s22 = sld [smem:[#allocation116_spill]] }
  0x52   : > { %s4552_s7 = sshll.u32 %s6286_s4, 3  ;;  %v5314_v12 = vld [vmem:[#allocation5 + $0x18] sm:$0xff]  ;;  %v5313_v14 = vld [vmem:[#allocation5 + $0x10] sm:$0xff]  ;;  %v5320_v15 = vld [vmem:[#allocation5 + $0x48] sm:$0xff]  ;;  %vm822_vm2 = vcmp.ge.s32.totalorder %v791_v23, 40  ;;  %vm823_vm3 = vcmp.lt.s32.totalorder %v791_v23, 48 }
  0x53   : > { %s503_s23 = scalar_lea.vmem %s7728_s0, %s4552_s7  ;;  %v5312_v16 = vld [vmem:[#allocation5 + $0x8] sm:$0xff]  ;;  %v5319_v17 = vld [vmem:[#allocation5 + $0x40] sm:$0xff]  ;;  %vm810_vm4 = vcmp.ge.s32.totalorder %v791_v23, 24  ;;  %vm811_vm5 = vcmp.lt.s32.totalorder %v791_v23, 32  ;;  %vm816_vm6 = vcmp.ge.s32.totalorder %v791_v23, 32  ;;  %vm817_vm7 = vcmp.lt.s32.totalorder %v791_v23, 40  ;;  %vm824_vm8 = vmand %vm822_vm2, %vm823_vm3  ;;  %s507_s12 = scalar_lea.vmem %s7730_s2, %s4552_s7 }
  0x54   : > { %4557 = vmatpush.xpose.msk.msra.mxu2 %vm514_vm0, %v6078_v1  ;;  %v6294_v3 = vld [vmem:[%s503_s23] sm:$0xff]  ;;  %v5311_v18 = vld [vmem:[#allocation5] sm:$0xff]  ;;  %vm812_vm9 = vmand %vm810_vm4, %vm811_vm5  ;;  %v6304_v31 = vsel %vm824_vm8, 1.0, %v6079_v30  ;;  %vm798_vm11 = vcmp.ge.s32.totalorder %v791_v23, 8  ;;  %vm799_vm12 = vcmp.lt.s32.totalorder %v791_v23, 16  ;;  %vm804_vm13 = vcmp.ge.s32.totalorder %v791_v23, 16 }
  0x55   : > { %vm511_vm1 = vcmp.ne.f32.partialorder %v6294_v3, 0.0  ;;  %609 = vmatpush.bf16.msra.mxu1 %v5317_v6  ;;  %v538_v20 = vpack.c.bf16 %v6294_v3, %v6294_v3  ;;  %v5606_v25 = vld [vmem:[#allocation7 + $0x1] ss:$0 sm:$0xff]  ;;  %vm818_vm10 = vmand %vm816_vm6, %vm817_vm7  ;;  %v6306_v32 = vsel %vm812_vm9, 1.0, %v6079_v30  ;;  %vm805_vm14 = vcmp.lt.s32.totalorder %v791_v23, 24  ;;  %v5334_v63 = vld [vmem:[#allocation5 + $0xb8] sm:$0xff] }
  0x56   : > { %v6308_v34 = vsel %vm818_vm10, 1.0, %v6079_v30  ;;  %vm800_vm15 = vmand %vm798_vm11, %vm799_vm12  ;;  %vm793_vm2 = vcmp.lt.s32.totalorder %v791_v23, 8  ;;  %v5607_v57 = vld [vmem:[#allocation7] ss:$0 sm:$0xff]  ;;  %776 = vmatpush.bf16.msra.mxu3 %v5334_v63  ;;  %v5333_v0 = vld [vmem:[#allocation5 + $0xb0] sm:$0xff]  ;;  %vm918_vm3 = vcmask 392192  }
  0x57   : > { %v6313_v42 = vsel %vm800_vm15, 1.0, %v6079_v30  ;;  %v6320_v53 = vsel %vm793_vm2, 1.0, %v6079_v30  ;;  %v5330_v4 = vld [vmem:[#allocation5 + $0x98] sm:$0xff]  ;;  %v5328_v6 = vld [vmem:[#allocation5 + $0x88] sm:$0xff]  ;;  %s4376_s4 = scalar_lea.hbm %s8520_s22, %s5308_s11  ;;  %s499_s7 = scalar_lea.vmem [#allocation14], %s4551_s10 }
  0x58   : > { %4558 = vmatpush.xpose.msk.msra.mxu2 %vm514_vm0, %v6078_v1  ;;  %v5388_v63 = vld [vmem:[#allocation8 + $0x164] sm:$0xf0]  ;;  %s4378_s21 = sshll.u32 %s499_s7, 4  ;;  %s4380_s27 = sshll.u32 %s4376_s4, 4  ;;  %s4379_s21 = int_to_ptr.vmem [resolvable:$true] %s4378_s21  ;;  %s4381_s27 = int_to_ptr.hbm [resolvable:$true] %s4380_s27 }
  0x59   : > { %610 = vmatpush.bf16.msra.mxu1 %v5316_v8  ;;  %s4366_s20 = scalar_lea.sflag [#allocation4], %s6264_s18  ;;  %s5998_s23 = sshra.s32 %s4381_s27, 4  ;;  %s5999_s23 = int_to_ptr.hbm [resolvable:$true] %s5998_s23 }
  0x5a   : > { %777 = vmatpush.bf16.msra.mxu3 %v5333_v0  ;;  %v5385_v0 = vld [vmem:[#allocation8 + $0x154] sm:$0xf]  ;;  %s6000_s30 = scalar_lea.hbm %s5999_s23, 2  ;;  %s6004_s24 = scalar_lea.hbm %s8520_s22, 4 }
  0x5b   : > { %p6001_p1 = scmp.ne.s32.totalorder %s5999_s23, %s6000_s30  ;;  %p6005_p7 = scmp.lt.s32.totalorder %s5999_s23, %s8520_s22 }
  0x5c   : > { %4559 = vmatpush.xpose.msk.msra.mxu2 %vm514_vm0, %v6078_v1  ;;  %p6006_p8 = scmp.lt.s32.totalorder %s6004_s24, %s6000_s30 }
  0x5d   : > { %611 = vmatpush.bf16.msra.mxu1 %v5315_v10  ;;  %p6002_p5 = pnand %p6001_p1, %p6233_p4 }
  0x5e   : > { %p6007_p9 = por %p6006_p8, %p6005_p7 }
  0x5f   : > { %p6003_p12 = pneg %p6002_p5 }
  0x60   : > { %4560 = vmatpush.xpose.msk.msra.mxu2 %vm514_vm0, %v6078_v1 }
  0x61   : > { %612 = vmatpush.bf16.msra.mxu1 %v5314_v12  ;;  %p6008_p10 = pnand %p6007_p9, %p6003_p12 }
  0x64   : > { %4561 = vmatpush.xpose.msk.msra.mxu2 %vm514_vm0, %v6078_v1  ;;  %vm806_vm0 = vmand %vm804_vm13, %vm805_vm14 }
  0x65   : > { %613 = vmatpush.bf16.msra.mxu1 %v5313_v14  ;;  %v6315_v45 = vsel %vm806_vm0, 1.0, %v6079_v30  ;;  %v929_v14 = vld [vmem:[#allocation13 + $0x20] sm:$0xff] }
  0x67   : > { %4562 = vmatmul.msk.f32.vlgmr.msra.gmra.mxu2 %vm511_vm1, %v6078_v1  ;;  %vm856_vm1 = vcmask 1043456   ;;  %v5332_v1 = vld [vmem:[#allocation5 + $0xa8] sm:$0xff] }
  0x68   : > { %692 = vmatpush.bf16.msrb.mxu2 %v5326_v2  ;;  %778 = vmatpush.bf16.msra.mxu3 %v5332_v1  ;;  %v5331_v2 = vld [vmem:[#allocation5 + $0xa0] sm:$0xff] }
  0x69   : > { %614 = vmatpush.bf16.msra.mxu1 %v5312_v16  ;;  %v927_v16 = vld [vmem:[#allocation13 + $0x10] sm:$0xff] }
  0x6c   : > { %693 = vmatpush.bf16.msrb.mxu2 %v5325_v5  ;;  %779 = vmatpush.bf16.msra.mxu3 %v5331_v2  ;;  %v5329_v5 = vld [vmem:[#allocation5 + $0x90] sm:$0xff] }
  0x6d   : > { %615 = vmatpush.bf16.msra.mxu1 %v5311_v18  ;;  %v925_v18 = vld [vmem:[#allocation13] sm:$0xff] }
  0x6e   : > { %v4871_v2 = vld [vmem:[#allocation8 + $0x168] sm:$0xf0] }
  0x70   : > { %694 = vmatpush.bf16.msrb.mxu2 %v5324_v7  ;;  %616 = vmatmul.bf16.vlgmr.msra.gmra.mxu1 %v538_v20 }
  0x71   : > { %780 = vmatpush.bf16.msra.mxu3 %v5330_v4  ;;  %v4877_v4 = vld [vmem:[#allocation8 + $0x158] sm:$0xf] }
  0x74   : > { %695 = vmatpush.bf16.msrb.mxu2 %v5323_v9  ;;  %v5327_v9 = vld [vmem:[#allocation5 + $0x80] sm:$0xff] }
  0x75   : > { %781 = vmatpush.bf16.msra.mxu3 %v5329_v5  ;;  %v5389_v5 = vld [vmem:[#allocation8 + $0x16c] sm:$0xf0] }
  0x78   : > { %696 = vmatpush.bf16.msrb.mxu2 %v5322_v11 }
  0x79   : > { %782 = vmatpush.bf16.msra.mxu3 %v5328_v6  ;;  %v4874_v6 = vor.u32 %v5385_v0, %v4871_v2  ;;  %v5359_v0 = vld [vmem:[#allocation8 + $0x7c] sm:$0xf0]  ;;  %v4759_v2 = vld [vmem:[#allocation8 + $0x80] sm:$0xf0] }
  0x7b   : > { %1380 = vmatpush.bf16.msrb.mxu1 %v4874_v6 }
  0x7c   : > { %697 = vmatpush.bf16.msrb.mxu2 %v5321_v13  ;;  %v930_v13 = vld [vmem:[#allocation13 + $0x28] sm:$0xff] }
  0x7d   : > { %783 = vmatpush.bf16.msra.mxu3 %v5327_v9  ;;  %v4879_v9 = vld [vmem:[#allocation8 + $0x170] sm:$0xf0] }
  0x80   : > { %698 = vmatpush.bf16.msrb.mxu2 %v5320_v15  ;;  %784 = vmatmul.bf16.vlgmr.msra.gmra.mxu3 %v6297_v19  ;;  %v928_v15 = vld [vmem:[#allocation13 + $0x18] sm:$0xff] }
  0x84   : > { %699 = vmatpush.bf16.msrb.mxu2 %v5319_v17  ;;  %v926_v17 = vld [vmem:[#allocation13 + $0x8] sm:$0xff] }
  0x87   : > { %700 = vmatmul.bf16.vlgmr.msrb.gmra.mxu2 %v6297_v19  ;;  %v5608_v19 = vld [vmem:[#allocation7 + $0x2] ss:$0 sm:$0xff] }
  0xea   : > { %v6302_v22 = vpop.f32.mrf.mxu2 }
  0xeb   : > { %vm537_vm4 = vcmp.eq.f32.partialorder %v6302_v22, 0.0 }
  0xed   : > { %v617_v24 = vpop.f32.mrf.mxu1 }
  0xee   : > { %v618_v60 = vadd.f32 %v5607_v57, %v617_v24  ;;  %v5336_v57 = vld [vmem:[#allocation5 + $0xc8] sm:$0xff] }
  0xf0   : > { %v621_v62 = vpack.c.bf16 %v618_v60, %v618_v60 }
  0xf5   : > { %v619_v28 = vpop.f32.mrf.mxu1 }
 0x103   : > { %v785_v24 = vpop.f32.mrf.mxu3 }
 0x10a   : > { %v701_v26 = vpop.f32.mrf.mxu2 }
 0x10b   : > { %v702_v27 = vadd.f32 %v5606_v25, %v701_v26  ;;  %v786_v25 = vadd.f32 %v5608_v19, %v785_v24  ;;  %v5376_v19 = vld [vmem:[#allocation8 + $0x104] sm:$0xf0] }
 0x10d   : > { %v705_v29 = vpack.c.bf16 %v702_v27, %v702_v27  ;;  %v789_v26 = vpack.c.bf16 %v786_v25, %v786_v25  ;;  %v5373_v25 = vld [vmem:[#allocation8 + $0xf4] sm:$0xf] }
 0x10f   : > { %v828_v33 = vunpack.c.l.bf16 %v705_v29  ;;  %v869_v27 = vunpack.c.l.bf16 %v789_v26  ;;  %v4823_v26 = vld [vmem:[#allocation8 + $0x108] sm:$0xf0] }
 0x111   : > { %v845_v35 = vmul.f32 %v6304_v31, %v828_v33  ;;  %v839_v36 = vmul.f32 %v6306_v32, %v828_v33  ;;  %v842_v38 = vmul.f32 %v6308_v34, %v828_v33  ;;  %v833_v48 = vmul.f32 %v6313_v42, %v828_v33 }
 0x112   : > { %v703_v37 = vpop.f32.mrf.mxu2  ;;  %v836_v49 = vmul.f32 %v6315_v45, %v828_v33  ;;  %v830_v56 = vmul.f32 %v6320_v53, %v828_v33  ;;  %v878_v28 = vmul.f32 %v6308_v34, %v869_v27  ;;  %v880_v29 = vmul.f32 %v6304_v31, %v869_v27  ;;  %v787_v33 = vpop.f32.mrf.mxu3 }
 0x113   : > { %v846_v39 = vpack.c.bf16 %v845_v35, %v845_v35  ;;  %v840_v41 = vpack.c.bf16 %v839_v36, %v839_v36  ;;  %v843_v43 = vpack.c.bf16 %v842_v38, %v842_v38  ;;  %v834_v51 = vpack.c.bf16 %v833_v48, %v833_v48  ;;  %v4831_v33 = vld [vmem:[#allocation8 + $0x110] sm:$0xf0] }
 0x114   : > { %v837_v52 = vpack.c.bf16 %v836_v49, %v836_v49  ;;  %v831_v59 = vpack.c.bf16 %v830_v56, %v830_v56  ;;  %v876_v30 = vmul.f32 %v6306_v32, %v869_v27  ;;  %v872_v35 = vmul.f32 %v6313_v42, %v869_v27 }
 0x115   : > { %v854_v40 = vunpack.c.l.b16 %v846_v39  ;;  %v851_v47 = vunpack.c.l.b16 %v840_v41  ;;  %v848_v55 = vunpack.c.l.b16 %v834_v51  ;;  %v881_v36 = vpack.c.bf16 %v880_v29, %v880_v29  ;;  %v5341_v51 = vld [vmem:[#allocation5 + $0xf0] sm:$0xff] }
 0x116   : > { %v874_v37 = vmul.f32 %v6315_v45, %v869_v27  ;;  %v877_v38 = vpack.c.bf16 %v876_v30, %v876_v30  ;;  %v873_v39 = vpack.c.bf16 %v872_v35, %v872_v35  ;;  %v5377_v29 = vld [vmem:[#allocation8 + $0x10c] sm:$0xf0]  ;;  %v5374_v30 = vld [vmem:[#allocation8 + $0xfc] sm:$0xf]  ;;  %v4826_v35 = vor.u32 %v5373_v25, %v4823_v26 }
 0x117   : > { %v855_v44 = vpack.c.b16 %v854_v40, %v854_v40  ;;  %v852_v50 = vpack.c.b16 %v851_v47, %v851_v47  ;;  %v849_v58 = vpack.c.b16 %v848_v55, %v848_v55  ;;  %v879_v40 = vpack.c.bf16 %v878_v28, %v878_v28  ;;  %v5337_v55 = vld [vmem:[#allocation5 + $0xd0] sm:$0xff] }
 0x118   : > { %v889_v41 = vunpack.c.l.b16 %v881_v36  ;;  %v875_v47 = vpack.c.bf16 %v874_v37, %v874_v37  ;;  %v883_v48 = vunpack.c.l.b16 %v873_v39  ;;  %v4797_v37 = vld [vmem:[#allocation8 + $0xc0] sm:$0xf]  ;;  %v5367_v39 = vld [vmem:[#allocation8 + $0xc4] sm:$0xf] }
 0x119   : > { %v867_v46 = vsel %vm856_vm1, %v843_v43, %v855_v44  ;;  %v863_v54 = vsel %vm856_vm1, %v837_v52, %v852_v50  ;;  %v859_v61 = vsel %vm856_vm1, %v831_v59, %v849_v58  ;;  %v886_v43 = vunpack.c.l.b16 %v877_v38  ;;  %v5342_v50 = vld [vmem:[#allocation5 + $0xf8] sm:$0xff]  ;;  %v5340_v52 = vld [vmem:[#allocation5 + $0xe8] sm:$0xff] }
 0x11a   : > { %908 = vmatpush.bf16.xpose.msra.mxu0 %v867_v46  ;;  %v870_v44 = vmul.f32 %v6320_v53, %v869_v27  ;;  %v890_v46 = vpack.c.b16 %v889_v41, %v889_v41  ;;  %v884_v49 = vpack.c.b16 %v883_v48, %v883_v48  ;;  %1044 = vmatpush.bf16.msrb.mxu3 %v5342_v50  ;;  %v5339_v53 = vld [vmem:[#allocation5 + $0xe0] sm:$0xff]  ;;  %v4829_v27 = vld [vmem:[#allocation8 + $0xf8] sm:$0xf]  ;;  %v4775_v50 = vld [vmem:[#allocation8 + $0xa8] sm:$0xf0] }
 0x11b   : > { %v887_v34 = vpack.c.b16 %v886_v43, %v886_v43  ;;  %v4830_v36 = vor.u32 %v5377_v29, %v4829_v27  ;;  %v5370_v38 = vld [vmem:[#allocation8 + $0xd4] sm:$0xf0]  ;;  %v4799_v41 = vld [vmem:[#allocation8 + $0xd8] sm:$0xf0]  ;;  %v4805_v43 = vld [vmem:[#allocation8 + $0xc8] sm:$0xf] }
 0x11c   : > { %v901_v31 = vsel %vm856_vm1, %v879_v40, %v890_v46  ;;  %v871_v42 = vpack.c.bf16 %v870_v44, %v870_v44  ;;  %v4834_v40 = vor.u32 %v5374_v30, %v4831_v33  ;;  %v5371_v44 = vld [vmem:[#allocation8 + $0xdc] sm:$0xf0]  ;;  %v5368_v46 = vld [vmem:[#allocation8 + $0xcc] sm:$0xf]  ;;  %v4802_v48 = vor.u32 %v5367_v39, %v4799_v41  ;;  %v4711_v29 = vld [vmem:[#allocation8 + $0x20] sm:$0xf0] }
 0x11d   : > { %965 = vmatpush.bf16.msra.mxu2 %v901_v31  ;;  %v897_v32 = vsel %vm856_vm1, %v875_v47, %v887_v34  ;;  %v4807_v47 = vld [vmem:[#allocation8 + $0xe0] sm:$0xf0]  ;;  %v4798_v34 = vor.u32 %v5370_v38, %v4797_v37  ;;  %v4806_v31 = vor.u32 %v5371_v44, %v4805_v43  ;;  %v5347_v27 = vld [vmem:[#allocation8 + $0x1c] sm:$0xf0]  ;;  %v5390_v33 = vld [vmem:[#allocation8 + $0x174] sm:$0xf0] }
 0x11e   : > { %v893_v45 = vsel %vm856_vm1, %v871_v42, %v884_v49  ;;  %1045 = vmatpush.bf16.msrb.mxu3 %v5341_v51  ;;  %v5364_v42 = vld [vmem:[#allocation8 + $0xa4] sm:$0xf0]  ;;  %v5361_v49 = vld [vmem:[#allocation8 + $0x94] sm:$0xf]  ;;  %v4781_v51 = vld [vmem:[#allocation8 + $0x98] sm:$0xf] }
 0x11f   : > { %v4885_v30 = vld [vmem:[#allocation8 + $0x160] sm:$0xf]  ;;  %v4887_v37 = vld [vmem:[#allocation8 + $0x178] sm:$0xf0]  ;;  %v5061_v38 = vld [vmem:[#allocation10 + $0x150] sm:$0xf] }
 0x120   : > { %v5436_v39 = vld [vmem:[#allocation10 + $0x164] sm:$0xf0]  ;;  %v5253_v43 = vld [vmem:[#allocation10 + $0x2d0] sm:$0xf] }
 0x121   : > { %966 = vmatpush.bf16.msra.mxu2 %v897_v32  ;;  %v4773_v32 = vld [vmem:[#allocation8 + $0x90] sm:$0xf]  ;;  %v5484_v44 = vld [vmem:[#allocation10 + $0x2e4] sm:$0xf0] }
 0x122   : > { %909 = vmatpush.bf16.xpose.msra.mxu0 %v863_v54  ;;  %1046 = vmatpush.bf16.msrb.mxu3 %v5340_v52  ;;  %v5338_v54 = vld [vmem:[#allocation5 + $0xd8] sm:$0xff]  ;;  %v5365_v52 = vld [vmem:[#allocation8 + $0xac] sm:$0xf0] }
 0x125   : > { %967 = vmatpush.bf16.msra.mxu2 %v893_v45  ;;  %v4810_v45 = vor.u32 %v5368_v46, %v4807_v47  ;;  %v4886_v47 = vor.u32 %v5390_v33, %v4885_v30  ;;  %v4765_v33 = vld [vmem:[#allocation8 + $0x70] sm:$0xf] }
 0x126   : > { %1047 = vmatpush.bf16.msrb.mxu3 %v5339_v53  ;;  %v5362_v53 = vld [vmem:[#allocation8 + $0x9c] sm:$0xf] }
 0x12a   : > { %910 = vmatpush.bf16.xpose.msra.mxu0 %v859_v61  ;;  %1048 = vmatpush.bf16.msrb.mxu3 %v5338_v54  ;;  %v5335_v61 = vld [vmem:[#allocation5 + $0xc0] sm:$0xff]  ;;  %v4783_v54 = vld [vmem:[#allocation8 + $0xb0] sm:$0xf0] }
 0x12e   : > { %1049 = vmatpush.bf16.msrb.mxu3 %v5337_v55  ;;  %v4774_v55 = vor.u32 %v5364_v42, %v4773_v32  ;;  %v5384_v32 = vld [vmem:[#allocation8 + $0x144] sm:$0xf0]  ;;  %v5381_v42 = vld [vmem:[#allocation8 + $0x134] sm:$0xf] }
 0x131   : > { %911 = vmatmul.bf16.vlgmr.msra.gmra.mxu0 %v621_v62  ;;  %v4869_v62 = vld [vmem:[#allocation8 + $0x150] sm:$0xf] }
 0x132   : > { %944 = vmatpush.msrb.mxu0 %v930_v13  ;;  %1050 = vmatpush.bf16.msrb.mxu3 %v5336_v57  ;;  %v4870_v1 = vor.u32 %v5388_v63, %v4869_v62  ;;  %v5379_v13 = vld [vmem:[#allocation8 + $0x124] sm:$0xf]  ;;  %v4782_v57 = vor.u32 %v5365_v52, %v4781_v51  ;;  %v4751_v62 = vld [vmem:[#allocation8 + $0x78] sm:$0xf0]  ;;  %v4757_v63 = vld [vmem:[#allocation8 + $0x68] sm:$0xf] }
 0x133   : > { %v4758_v6 = vor.u32 %v5359_v0, %v4757_v63  ;;  %v5430_v51 = vld [vmem:[#allocation10 + $0x134] sm:$0xf0]  ;;  %v5013_v63 = vld [vmem:[#allocation10 + $0xf0] sm:$0xf]  ;;  %v5424_v0 = vld [vmem:[#allocation10 + $0x104] sm:$0xf0] }
 0x134   : > { %945 = vmatpush.msrb.mxu0 %v929_v14  ;;  %v4847_v14 = vld [vmem:[#allocation8 + $0x138] sm:$0xf0] }
 0x136   : > { %946 = vmatpush.msrb.mxu0 %v928_v15  ;;  %1051 = vmatpush.bf16.msrb.mxu3 %v5335_v61  ;;  %v4786_v61 = vor.u32 %v5362_v53, %v4783_v54  ;;  %v5229_v53 = vld [vmem:[#allocation10 + $0x2a0] sm:$0xf]  ;;  %v5478_v54 = vld [vmem:[#allocation10 + $0x2b4] sm:$0xf0] }
 0x138   : > { %947 = vmatpush.msrb.mxu0 %v927_v16  ;;  %v4850_v16 = vor.u32 %v5379_v13, %v4847_v14  ;;  %v5353_v13 = vld [vmem:[#allocation8 + $0x4c] sm:$0xf0]  ;;  %v5350_v14 = vld [vmem:[#allocation8 + $0x3c] sm:$0xf] }
 0x13a   : > { %948 = vmatpush.msrb.mxu0 %v926_v17  ;;  %v4853_v17 = vld [vmem:[#allocation8 + $0x128] sm:$0xf]  ;;  %1381 = vmatpush.bf16.msrb.mxu1 %v4850_v16 }
 0x13c   : > { %949 = vmatpush.msrb.mxu0 %v925_v18  ;;  %v5383_v18 = vld [vmem:[#allocation8 + $0x13c] sm:$0xf0] }
 0x13e   : > { %1367 = vmatpush.bf16.msra.mxu0 %v4870_v1  ;;  %1382 = vmatpush.bf16.msrb.mxu1 %v4826_v35  ;;  %v5356_v1 = vld [vmem:[#allocation8 + $0x6c] sm:$0xf]  ;;  %v5387_v35 = vld [vmem:[#allocation8 + $0x164] sm:$0xf] }
 0x142   : > { %1383 = vmatpush.bf16.msrb.mxu1 %v4802_v48  ;;  %v6339_v48 = vor.u32 %v5436_v39, %v5061_v38  ;;  %v4767_v38 = vld [vmem:[#allocation8 + $0x88] sm:$0xf0]  ;;  %v4941_v39 = vld [vmem:[#allocation10 + $0x60] sm:$0xf] }
 0x1ae   : > { %v912_v7 = vpop.f32.mrf.mxu0 }
 0x1af   : > { %v916_v8 = vmul.f32 0.35355338, %v912_v7  ;;  %v4878_v7 = vor.u32 %v5389_v5, %v4877_v4 }
 0x1b1   : > { %v917_v10 = vsel %vm537_vm4, -1e+09, %v916_v8  ;;  %v5386_v8 = vld [vmem:[#allocation8 + $0x15c] sm:$0xf]  ;;  %1393 = vmatpush.bf16.msrb.mxu2 %v4878_v7  ;;  %v4725_v7 = vld [vmem:[#allocation8 + $0x30] sm:$0xf] }
 0x1b2   : > { %v919_v11 = vsel %vm918_vm3, %v917_v10, -inf }
 0x1b3   : > { %920 = vmax.xlane.f32.xlu0 %v919_v11  ;;  %v4882_v11 = vor.u32 %v5386_v8, %v4879_v9  ;;  %v5352_v8 = vld [vmem:[#allocation8 + $0x44] sm:$0xf0]  ;;  %v5349_v9 = vld [vmem:[#allocation8 + $0x34] sm:$0xf] }
 0x1b4   : > { %v4726_v16 = vor.u32 %v5352_v8, %v4725_v7  ;;  %v4813_v7 = vld [vmem:[#allocation8 + $0xd0] sm:$0xf]  ;;  %v5372_v8 = vld [vmem:[#allocation8 + $0xe4] sm:$0xf0] }
 0x1b5   : > { %1406 = vmatpush.bf16.msra.mxu3 %v4882_v11  ;;  %v4727_v11 = vld [vmem:[#allocation8 + $0x48] sm:$0xf0] }
 0x1b6   : > { %v914_v12 = vpop.f32.mrf.mxu0 }
 0x1b7   : > { %v5382_v12 = vld [vmem:[#allocation8 + $0x134] sm:$0xf0] }
 0x226   : > { %v921_v20 = vpop.xlane.xlu0 %920 }
 0x227   : > { %v922_v21 = vsub.f32 %v917_v10, %v921_v20  ;;  %v4845_v10 = vld [vmem:[#allocation8 + $0x120] sm:$0xf]  ;;  %v5380_v20 = vld [vmem:[#allocation8 + $0x12c] sm:$0xf] }
 0x228   : > { %v4846_v15 = vor.u32 %v5382_v12, %v4845_v10  ;;  %v4762_v10 = vor.u32 %v5356_v1, %v4759_v2  ;;  %v4733_v12 = vld [vmem:[#allocation8 + $0x38] sm:$0xf]  ;;  %v5205_v1 = vld [vmem:[#allocation10 + $0x270] sm:$0xf]  ;;  %v5472_v2 = vld [vmem:[#allocation10 + $0x284] sm:$0xf0] }
 0x229   : > { %v923_v22 = vmul.f32 1.442695, %v922_v21  ;;  %v4854_v21 = vor.u32 %v5383_v18, %v4853_v17  ;;  %v4701_v17 = vld [vmem:[#allocation8] sm:$0xf]  ;;  %v5346_v18 = vld [vmem:[#allocation8 + $0x14] sm:$0xf0] }
 0x22a   : > { %1368 = vmatpush.bf16.msra.mxu0 %v4846_v15  ;;  %v4735_v15 = vld [vmem:[#allocation8 + $0x50] sm:$0xf0] }
 0x22b   : > { %5610 = vpow2.f32 %v923_v22  ;;  %v4855_v22 = vld [vmem:[#allocation8 + $0x140] sm:$0xf0]  ;;  %1394 = vmatpush.bf16.msrb.mxu2 %v4854_v21  ;;  %v4730_v21 = vor.u32 %v5349_v9, %v4727_v11  ;;  %v4738_v26 = vor.u32 %v5350_v14, %v4735_v15  ;;  %v5369_v9 = vld [vmem:[#allocation8 + $0xd4] sm:$0xf]  ;;  %v4815_v11 = vld [vmem:[#allocation8 + $0xe8] sm:$0xf0] }
 0x22c   : > { %v4858_v24 = vor.u32 %v5380_v20, %v4855_v22  ;;  %v4734_v22 = vor.u32 %v5353_v13, %v4733_v12  ;;  %v4989_v12 = vld [vmem:[#allocation10 + $0xc0] sm:$0xf]  ;;  %v5418_v13 = vld [vmem:[#allocation10 + $0xd4] sm:$0xf0] }
 0x22d   : > { %v5181_v14 = vld [vmem:[#allocation10 + $0x240] sm:$0xf]  ;;  %v5466_v15 = vld [vmem:[#allocation10 + $0x254] sm:$0xf0] }
 0x22e   : > { %1407 = vmatpush.bf16.msra.mxu3 %v4858_v24  ;;  %v4709_v24 = vld [vmem:[#allocation8 + $0x8] sm:$0xf] }
 0x22f   : > { %1395 = vmatpush.bf16.msrb.mxu2 %v4830_v36  ;;  %v4702_v36 = vor.u32 %v5346_v18, %v4701_v17  ;;  %v4710_v41 = vor.u32 %v5347_v27, %v4709_v24  ;;  %v4818_v17 = vor.u32 %v5369_v9, %v4815_v11  ;;  %v6356_v18 = vor.u32 %v5418_v13, %v4989_v12  ;;  %v4965_v24 = vld [vmem:[#allocation10 + $0x90] sm:$0xf]  ;;  %v5460_v27 = vld [vmem:[#allocation10 + $0x224] sm:$0xf0]  ;;  %v5609_v11 = vld [vmem:[#allocation7 + $0x3] ss:$0 sm:$0xff] }
 0x231   : > { %v5611_v23 = vpop.eup %5610  ;;  %7950 = vst [vmem:[#allocation24_spill] sm:$0xff] %v6356_v18 }
 0x232   : > { %4665 = vmatmul.msk.f32.vlgmr.msrb.gmra.mxu0 %vm918_vm3, %v5611_v23  ;;  %1408 = vmatpush.bf16.msra.mxu3 %v4834_v40 }
 0x233   : > { %1396 = vmatpush.bf16.msrb.mxu2 %v4806_v31  ;;  %v4861_v31 = vld [vmem:[#allocation8 + $0x130] sm:$0xf] }
 0x236   : > { %1409 = vmatpush.bf16.msra.mxu3 %v4810_v45  ;;  %v4863_v45 = vld [vmem:[#allocation8 + $0x148] sm:$0xf0] }
 0x237   : > { %1397 = vmatpush.bf16.msrb.mxu2 %v4782_v57 }
 0x23a   : > { %1410 = vmatpush.bf16.msra.mxu3 %v4786_v61  ;;  %v6347_v61 = vor.u32 %v5478_v54, %v5229_v53 }
 0x23b   : > { %1398 = vmatpush.bf16.msrb.mxu2 %v4758_v6  ;;  %v6350_v6 = vor.u32 %v5424_v0, %v5013_v63  ;;  %v4719_v0 = vld [vmem:[#allocation8 + $0x28] sm:$0xf0] }
 0x23c   : > { %7947 = vst [vmem:[#allocation21_spill] sm:$0xff] %v6347_v61 }
 0x23d   : > { %7948 = vst [vmem:[#allocation22_spill] sm:$0xff] %v6350_v6 }
 0x23e   : > { %1411 = vmatpush.bf16.msra.mxu3 %v4762_v10  ;;  %v6353_v10 = vor.u32 %v5472_v2, %v5205_v1  ;;  %v4893_v1 = vld [vmem:[#allocation10] sm:$0xf]  ;;  %v5394_v2 = vld [vmem:[#allocation10 + $0x14] sm:$0xf0] }
 0x23f   : > { %1399 = vmatpush.bf16.msrb.mxu2 %v4734_v22  ;;  %v5363_v22 = vld [vmem:[#allocation8 + $0xa4] sm:$0xf] }
 0x240   : > { %7949 = vst [vmem:[#allocation23_spill] sm:$0xff] %v6353_v10 }
 0x242   : > { %1412 = vmatpush.bf16.msra.mxu3 %v4738_v26  ;;  %v5157_v26 = vld [vmem:[#allocation10 + $0x210] sm:$0xf] }
 0x243   : > { %1400 = vmatpush.bf16.msrb.mxu2 %v4710_v41  ;;  %v5133_v41 = vld [vmem:[#allocation10 + $0x1e0] sm:$0xf] }
 0x2af   : > { %v951_v56 = vpop.f32.mrf.mxu0 }
 0x2b0   : > { %5612 = vrcp.f32 %v951_v56  ;;  %v4778_v56 = vor.u32 %v5361_v49, %v4775_v50  ;;  %v6341_v49 = vor.u32 %v5484_v44, %v5253_v43  ;;  %v5037_v50 = vld [vmem:[#allocation10 + $0x120] sm:$0xf]  ;;  %v5454_v43 = vld [vmem:[#allocation10 + $0x1f4] sm:$0xf0] }
 0x2b1   : > { %v6344_v57 = vor.u32 %v5430_v51, %v5037_v50  ;;  %v4743_v50 = vld [vmem:[#allocation8 + $0x58] sm:$0xf0]  ;;  %v4917_v51 = vld [vmem:[#allocation10 + $0x30] sm:$0xf] }
 0x2b2   : > { %1384 = vmatpush.bf16.msrb.mxu1 %v4778_v56  ;;  %7946 = vst [vmem:[#allocation20_spill] sm:$0xff] %v6341_v49  ;;  %v4866_v56 = vor.u32 %v5381_v42, %v4863_v45  ;;  %v5351_v42 = vld [vmem:[#allocation8 + $0x44] sm:$0xf] }
 0x2b3   : > { %v4746_v53 = vor.u32 %v5351_v42, %v4743_v50  ;;  %v5015_v50 = vld [vmem:[#allocation10 + $0x108] sm:$0xf0] }
 0x2b6   : > { %v5613_v58 = vpop.eup %5612 }
 0x2b7   : > { %v955_v59 = vmul.f32 %v5613_v58, %v5611_v23  ;;  %v4821_v23 = vld [vmem:[#allocation8 + $0xf0] sm:$0xf]  ;;  %v4749_v58 = vld [vmem:[#allocation8 + $0x60] sm:$0xf] }
 0x2b8   : > { %v4822_v28 = vor.u32 %v5376_v19, %v4821_v23  ;;  %v5343_v23 = vld [vmem:[#allocation8 + $0x4] sm:$0xf]  ;;  %v4703_v19 = vld [vmem:[#allocation8 + $0x18] sm:$0xf0] }
 0x2b9   : > { %v956_v60 = vpack.c.bf16 %v955_v59, %v955_v59  ;;  %v5358_v59 = vld [vmem:[#allocation8 + $0x74] sm:$0xf0]  ;;  %v4706_v40 = vor.u32 %v5343_v23, %v4703_v19  ;;  %v6359_v23 = vor.u32 %v5466_v15, %v5181_v14  ;;  %v4791_v19 = vld [vmem:[#allocation8 + $0xb8] sm:$0xf0]  ;;  %v5433_v14 = vld [vmem:[#allocation10 + $0x154] sm:$0xf] }
 0x2ba   : > { %1369 = vmatpush.bf16.msra.mxu0 %v4822_v28  ;;  %v4750_v4 = vor.u32 %v5358_v59, %v4749_v58  ;;  %v5344_v28 = vld [vmem:[#allocation8 + $0xc] sm:$0xf]  ;;  %v4837_v58 = vld [vmem:[#allocation8 + $0x100] sm:$0xf]  ;;  %v5378_v59 = vld [vmem:[#allocation8 + $0x114] sm:$0xf0] }
 0x2bb   : > { %4666 = vmatmul.msk.bf16.vlgmr.msra.gmra.mxu2 %vm918_vm3, %v956_v60  ;;  %v5355_v60 = vld [vmem:[#allocation8 + $0x64] sm:$0xf]  ;;  %v4714_v46 = vor.u32 %v5344_v28, %v4711_v29  ;;  %7951 = vst [vmem:[#allocation25_spill] sm:$0xff] %v6359_v23  ;;  %v4794_v29 = vor.u32 %v5363_v22, %v4791_v19  ;;  %v5063_v15 = vld [vmem:[#allocation10 + $0x168] sm:$0xf0] }
 0x2bc   : > { %v4754_v5 = vor.u32 %v5355_v60, %v4751_v62  ;;  %2037 = vmatpush.bf16.msra.mxu2 %v6339_v48  ;;  %v5375_v60 = vld [vmem:[#allocation8 + $0x104] sm:$0xf]  ;;  %v4839_v62 = vld [vmem:[#allocation8 + $0x118] sm:$0xf0]  ;;  %v5437_v22 = vld [vmem:[#allocation10 + $0x16c] sm:$0xf0] }
 0x2bd   : > { %1413 = vmatpush.bf16.msra.mxu3 %v4714_v46  ;;  %v5261_v19 = vld [vmem:[#allocation10 + $0x2d8] sm:$0xf] }
 0x2be   : > { %1370 = vmatpush.bf16.msra.mxu0 %v4798_v34  ;;  %1385 = vmatpush.bf16.msrb.mxu1 %v4754_v5  ;;  %v4890_v34 = vor.u32 %v5387_v35, %v4887_v37  ;;  %v4842_v5 = vor.u32 %v5375_v60, %v4839_v62  ;;  %v5360_v35 = vld [vmem:[#allocation8 + $0x84] sm:$0xf0]  ;;  %v6365_v37 = vor.u32 %v5460_v27, %v5157_v26  ;;  %v5345_v62 = vld [vmem:[#allocation8 + $0x14] sm:$0xf] }
 0x2bf   : > { %v4766_v44 = vor.u32 %v5360_v35, %v4765_v33  ;;  %v5348_v60 = vld [vmem:[#allocation8 + $0x24] sm:$0xf0]  ;;  %v6390_v27 = vor.u32 %v5433_v14, %v5063_v15  ;;  %v5039_v33 = vld [vmem:[#allocation10 + $0x138] sm:$0xf0]  ;;  %v5419_v15 = vld [vmem:[#allocation10 + $0xdc] sm:$0xf0] }
 0x2c0   : > { %2038 = vmatpush.bf16.msra.mxu2 %v6344_v57  ;;  %7953 = vst [vmem:[#allocation27_spill] sm:$0xff] %v6365_v37  ;;  %v4997_v14 = vld [vmem:[#allocation10 + $0xc8] sm:$0xf] }
 0x2c2   : > { %1371 = vmatpush.bf16.msra.mxu0 %v4774_v55  ;;  %1386 = vmatpush.bf16.msrb.mxu1 %v4730_v21  ;;  %v4862_v55 = vor.u32 %v5384_v32, %v4861_v31  ;;  %v5366_v21 = vld [vmem:[#allocation8 + $0xb4] sm:$0xf0]  ;;  %v4741_v31 = vld [vmem:[#allocation8 + $0x40] sm:$0xf] }
 0x2c3   : > { %v5354_v32 = vld [vmem:[#allocation8 + $0x54] sm:$0xf0] }
 0x2c4   : > { %2039 = vmatpush.bf16.msra.mxu2 %v6350_v6  ;;  %v4742_v45 = vor.u32 %v5354_v32, %v4741_v31 }
 0x2c6   : > { %1372 = vmatpush.bf16.msra.mxu0 %v4750_v4  ;;  %1387 = vmatpush.bf16.msrb.mxu1 %v4706_v40  ;;  %v4838_v4 = vor.u32 %v5378_v59, %v4837_v58  ;;  %v5406_v40 = vld [vmem:[#allocation10 + $0x74] sm:$0xf0]  ;;  %v4717_v59 = vld [vmem:[#allocation8 + $0x10] sm:$0xf] }
 0x2c7   : > { %v4718_v63 = vor.u32 %v5348_v60, %v4717_v59  ;;  %v5425_v60 = vld [vmem:[#allocation10 + $0x10c] sm:$0xf0] }
 0x2c8   : > { %2040 = vmatpush.bf16.msra.mxu2 %v6356_v18 }
 0x2ca   : > { %1373 = vmatpush.bf16.msra.mxu0 %v4726_v16  ;;  %1432 = vmatpush.bf16.msra.mxu1 %v4890_v34  ;;  %v4814_v16 = vor.u32 %v5372_v8, %v4813_v7  ;;  %v6371_v34 = vor.u32 %v5454_v43, %v5133_v41  ;;  %v5085_v7 = vld [vmem:[#allocation10 + $0x180] sm:$0xf]  ;;  %v5442_v8 = vld [vmem:[#allocation10 + $0x194] sm:$0xf0]  ;;  %v5237_v43 = vld [vmem:[#allocation10 + $0x2a8] sm:$0xf] }
 0x2cb   : > { %v6383_v9 = vor.u32 %v5442_v8, %v5085_v7  ;;  %v5431_v41 = vld [vmem:[#allocation10 + $0x13c] sm:$0xf0]  ;;  %v5463_v7 = vld [vmem:[#allocation10 + $0x244] sm:$0xf] }
 0x2cc   : > { %7955 = vst [vmem:[#allocation29_spill] sm:$0xff] %v6371_v34 }
 0x2cd   : > { %7959 = vst [vmem:[#allocation33_spill] sm:$0xff] %v6383_v9 }
 0x2ce   : > { %1374 = vmatpush.bf16.msra.mxu0 %v4702_v36  ;;  %1433 = vmatpush.bf16.msra.mxu1 %v4866_v56  ;;  %v5357_v36 = vld [vmem:[#allocation8 + $0x74] sm:$0xf]  ;;  %v5448_v56 = vld [vmem:[#allocation10 + $0x1c4] sm:$0xf0] }
 0x2cf   : > { %v4770_v46 = vor.u32 %v5357_v36, %v4767_v38  ;;  %v5475_v38 = vld [vmem:[#allocation10 + $0x2a4] sm:$0xf] }
 0x2d2   : > { %1419 = vmatpush.bf16.msrb.mxu0 %v4886_v47  ;;  %1434 = vmatpush.bf16.msra.mxu1 %v4842_v5  ;;  %v6368_v47 = vor.u32 %v5406_v40, %v4941_v39  ;;  %v6381_v5 = vor.u32 %v5394_v2, %v4893_v1  ;;  %v5231_v39 = vld [vmem:[#allocation10 + $0x2b8] sm:$0xf0]  ;;  %v5045_v40 = vld [vmem:[#allocation10 + $0x128] sm:$0xf]  ;;  %v5415_v2 = vld [vmem:[#allocation10 + $0xc4] sm:$0xf] }
 0x2d3   : > { %v6406_v42 = vor.u32 %v5475_v38, %v5231_v39  ;;  %v5159_v38 = vld [vmem:[#allocation10 + $0x228] sm:$0xf0]  ;;  %v4973_v39 = vld [vmem:[#allocation10 + $0x98] sm:$0xf] }
 0x2d4   : > { %7954 = vst [vmem:[#allocation28_spill] sm:$0xff] %v6368_v47 }
 0x2d5   : > { %7958 = vst [vmem:[#allocation32_spill] sm:$0xff] %v6381_v5 }
 0x2d6   : > { %1420 = vmatpush.bf16.msrb.mxu0 %v4862_v55  ;;  %1435 = vmatpush.bf16.msra.mxu1 %v4818_v17  ;;  %v5109_v55 = vld [vmem:[#allocation10 + $0x1b0] sm:$0xf]  ;;  %v5255_v17 = vld [vmem:[#allocation10 + $0x2e8] sm:$0xf0]  ;;  %7963 = vst [vmem:[#allocation37_spill] sm:$0xff] %v6406_v42 }
 0x2d7   : > { %v6377_v58 = vor.u32 %v5448_v56, %v5109_v55  ;;  %v5207_v55 = vld [vmem:[#allocation10 + $0x288] sm:$0xf0]  ;;  %v5021_v56 = vld [vmem:[#allocation10 + $0xf8] sm:$0xf] }
 0x2d9   : > { %7957 = vst [vmem:[#allocation31_spill] sm:$0xff] %v6377_v58 }
 0x2da   : > { %1421 = vmatpush.bf16.msrb.mxu0 %v4838_v4  ;;  %1436 = vmatpush.bf16.msra.mxu1 %v4794_v29  ;;  %v4722_v4 = vor.u32 %v5345_v62, %v4719_v0  ;;  %v5427_v29 = vld [vmem:[#allocation10 + $0x124] sm:$0xf]  ;;  %v5213_v62 = vld [vmem:[#allocation10 + $0x278] sm:$0xf] }
 0x2db   : > { %v6404_v32 = vor.u32 %v5427_v29, %v5039_v33  ;;  %v5457_v33 = vld [vmem:[#allocation10 + $0x214] sm:$0xf] }
 0x2de   : > { %1422 = vmatpush.bf16.msrb.mxu0 %v4814_v16  ;;  %1437 = vmatpush.bf16.msra.mxu1 %v4770_v46  ;;  %v5481_v16 = vld [vmem:[#allocation10 + $0x2d4] sm:$0xf] }
 0x2e2   : > { %1438 = vmatpush.bf16.msra.mxu1 %v4746_v53  ;;  %v5469_v53 = vld [vmem:[#allocation10 + $0x274] sm:$0xf] }
 0x2e3   : > { %v6418_v1 = vor.u32 %v5469_v53, %v5207_v55  ;;  %v5451_v55 = vld [vmem:[#allocation10 + $0x1e4] sm:$0xf] }
 0x2e5   : > { %7967 = vst [vmem:[#allocation41_spill] sm:$0xff] %v6418_v1 }
 0x2e6   : > { %1439 = vmatpush.bf16.msra.mxu1 %v4722_v4  ;;  %v4991_v4 = vld [vmem:[#allocation10 + $0xd8] sm:$0xf0] }
 0x33e   : > { %v969_v20 = vpop.f32.mrf.mxu2 }
 0x33f   : > { %v973_v25 = vpack.c.bf16 %v969_v20, %v969_v20  ;;  %v4789_v20 = vld [vmem:[#allocation8 + $0xa0] sm:$0xf] }
 0x340   : > { %v4790_v28 = vor.u32 %v5366_v21, %v4789_v20  ;;  %v5069_v20 = vld [vmem:[#allocation10 + $0x158] sm:$0xf] }
 0x341   : > { %1052 = vmatmul.bf16.vlgmr.msrb.gmra.mxu3 %v973_v25  ;;  %v5412_v25 = vld [vmem:[#allocation10 + $0xa4] sm:$0xf0]  ;;  %v6394_v35 = vor.u32 %v5437_v22, %v5069_v20  ;;  %v6428_v20 = vor.u32 %v5415_v2, %v4991_v4  ;;  %v5409_v22 = vld [vmem:[#allocation10 + $0x94] sm:$0xf] }
 0x342   : > { %2050 = vmatpush.bf16.msrb.mxu3 %v6341_v49  ;;  %v6362_v30 = vor.u32 %v5412_v25, %v4965_v24  ;;  %1423 = vmatpush.bf16.msrb.mxu0 %v4790_v28  ;;  %v5485_v24 = vld [vmem:[#allocation10 + $0x2ec] sm:$0xf0]  ;;  %v6392_v28 = vor.u32 %v5481_v16, %v5255_v17  ;;  %v5189_v16 = vld [vmem:[#allocation10 + $0x248] sm:$0xf]  ;;  %v5467_v17 = vld [vmem:[#allocation10 + $0x25c] sm:$0xf0] }
 0x343   : > { %7961 = vst [vmem:[#allocation35_spill] sm:$0xff] %v6394_v35  ;;  %v6396_v36 = vor.u32 %v5485_v24, %v5261_v19  ;;  %v4967_v19 = vld [vmem:[#allocation10 + $0xa8] sm:$0xf0]  ;;  %v6438_v29 = vor.u32 %v5467_v17, %v5189_v16  ;;  %v4925_v16 = vld [vmem:[#allocation10 + $0x38] sm:$0xf] }
 0x344   : > { %7952 = vst [vmem:[#allocation26_spill] sm:$0xff] %v6362_v30  ;;  %2041 = vmatpush.bf16.msra.mxu2 %v6362_v30  ;;  %v5401_v17 = vld [vmem:[#allocation10 + $0x4c] sm:$0xf0] }
 0x345   : > { %7960 = vst [vmem:[#allocation34_spill] sm:$0xff] %v6392_v28 }
 0x346   : > { %v971_v52 = vpop.f32.mrf.mxu2  ;;  %2051 = vmatpush.bf16.msrb.mxu3 %v6347_v61  ;;  %1424 = vmatpush.bf16.msrb.mxu0 %v4766_v44  ;;  %7962 = vst [vmem:[#allocation36_spill] sm:$0xff] %v6396_v36  ;;  %v5479_v44 = vld [vmem:[#allocation10 + $0x2bc] sm:$0xf0] }
 0x347   : > { %v5400_v52 = vld [vmem:[#allocation10 + $0x44] sm:$0xf0]  ;;  %7970 = vst [vmem:[#allocation44_spill] sm:$0xff] %v6428_v20 }
 0x348   : > { %2042 = vmatpush.bf16.msra.mxu2 %v6368_v47  ;;  %v6375_v54 = vor.u32 %v5400_v52, %v4917_v51  ;;  %v6410_v51 = vor.u32 %v5431_v41, %v5045_v40  ;;  %v6412_v52 = vor.u32 %v5479_v44, %v5237_v43  ;;  %7974 = vst [vmem:[#allocation48_spill] sm:$0xff] %v6438_v29  ;;  %v5413_v40 = vld [vmem:[#allocation10 + $0xac] sm:$0xf0] }
 0x349   : > { %v5461_v41 = vld [vmem:[#allocation10 + $0x22c] sm:$0xf0]  ;;  %v6442_v43 = vor.u32 %v5409_v22, %v4967_v19  ;;  %v6444_v44 = vor.u32 %v5457_v33, %v5159_v38  ;;  %v5117_v22 = vld [vmem:[#allocation10 + $0x1b8] sm:$0xf]  ;;  %v5391_v33 = vld [vmem:[#allocation10 + $0x4] sm:$0xf] }
 0x34a   : > { %2052 = vmatpush.bf16.msrb.mxu3 %v6353_v10  ;;  %7956 = vst [vmem:[#allocation30_spill] sm:$0xff] %v6375_v54  ;;  %1425 = vmatpush.bf16.msrb.mxu0 %v4742_v45  ;;  %v5421_v45 = vld [vmem:[#allocation10 + $0xf4] sm:$0xf]  ;;  %v5449_v19 = vld [vmem:[#allocation10 + $0x1cc] sm:$0xf0] }
 0x34b   : > { %7964 = vst [vmem:[#allocation38_spill] sm:$0xff] %v6410_v51  ;;  %v6416_v0 = vor.u32 %v5421_v45, %v5015_v50  ;;  %v6452_v50 = vor.u32 %v5413_v40, %v4973_v39  ;;  %v4895_v40 = vld [vmem:[#allocation10 + $0x18] sm:$0xf0] }
 0x34c   : > { %2043 = vmatpush.bf16.msra.mxu2 %v6375_v54  ;;  %7965 = vst [vmem:[#allocation39_spill] sm:$0xff] %v6412_v52 }
 0x34d   : > { %7966 = vst [vmem:[#allocation40_spill] sm:$0xff] %v6416_v0 }
 0x34e   : > { %2053 = vmatpush.bf16.msrb.mxu3 %v6359_v23  ;;  %1426 = vmatpush.bf16.msrb.mxu0 %v4718_v63  ;;  %v5473_v63 = vld [vmem:[#allocation10 + $0x28c] sm:$0xf0]  ;;  %7975 = vst [vmem:[#allocation49_spill] sm:$0xff] %v6442_v43 }
 0x34f   : > { %7976 = vst [vmem:[#allocation50_spill] sm:$0xff] %v6444_v44 }
 0x350   : > { %2044 = vmatpush.bf16.msra.mxu2 %v6381_v5  ;;  %7977 = vst [vmem:[#allocation51_spill] sm:$0xff] %v6452_v50 }
 0x352   : > { %2054 = vmatpush.bf16.msrb.mxu3 %v6365_v37 }
 0x356   : > { %2055 = vmatpush.bf16.msrb.mxu3 %v6371_v34 }
 0x35a   : > { %2056 = vmatpush.bf16.msrb.mxu3 %v6377_v58 }
 0x35e   : > { %2057 = vmatpush.bf16.msrb.mxu3 %v6383_v9 }
 0x3c4   : > { %v1053_v12 = vpop.f32.mrf.mxu3 }
 0x3c5   : > { %v1054_v13 = vadd.f32 %v5609_v11, %v1053_v12  ;;  %v6422_v11 = vor.u32 %v5425_v60, %v5021_v56  ;;  %v6424_v12 = vor.u32 %v5473_v63, %v5213_v62  ;;  %v5135_v56 = vld [vmem:[#allocation10 + $0x1f8] sm:$0xf0]  ;;  %v5407_v60 = vld [vmem:[#allocation10 + $0x7c] sm:$0xf0]  ;;  %v5141_v62 = vld [vmem:[#allocation10 + $0x1e8] sm:$0xf] }
 0x3c6   : > { %v5455_v63 = vld [vmem:[#allocation10 + $0x1fc] sm:$0xf0]  ;;  %v6464_v4 = vor.u32 %v5451_v55, %v5135_v56  ;;  %v4901_v55 = vld [vmem:[#allocation10 + $0x8] sm:$0xf] }
 0x3c7   : > { %v1057_v21 = vadd.f32 %v1054_v13, %v6294_v3  ;;  %7968 = vst [vmem:[#allocation42_spill] sm:$0xff] %v6422_v11  ;;  %v5183_v13 = vld [vmem:[#allocation10 + $0x258] sm:$0xf0]  ;;  %v5395_v56 = vld [vmem:[#allocation10 + $0x1c] sm:$0xf0] }
 0x3c8   : > { %7969 = vst [vmem:[#allocation43_spill] sm:$0xff] %v6424_v12 }
 0x3c9   : > { %v1058_v25 = vrot.slane %v1057_v21, 4  ;;  %v6388_v26 = vpack.c.bf16 %v1057_v21, %v1057_v21  ;;  %7980 = vst [vmem:[#allocation54_spill] sm:$0xff] %v6464_v4 }
 0x3cb   : > { %v1059_v3 = vmax.f32 %v1057_v21, %v1058_v25  ;;  %1375 = vmatmul.bf16.vlgmr.msra.gmra.mxu0 %v6388_v26  ;;  %1388 = vmatmul.bf16.vlgmr.msrb.gmra.mxu1 %v6388_v26  ;;  %v6430_v21 = vor.u32 %v5463_v7, %v5183_v13  ;;  %v6436_v25 = vor.u32 %v5419_v15, %v4997_v14  ;;  %v5397_v7 = vld [vmem:[#allocation10 + $0x34] sm:$0xf]  ;;  %v5111_v15 = vld [vmem:[#allocation10 + $0x1c8] sm:$0xf0] }
 0x3cc   : > { %1401 = vmatmul.bf16.vlgmr.msrb.gmra.mxu2 %v6388_v26  ;;  %1414 = vmatmul.bf16.vlgmr.msra.gmra.mxu3 %v6388_v26  ;;  %v1055_v46 = vpop.f32.mrf.mxu3  ;;  %v6470_v13 = vor.u32 %v5455_v63, %v5141_v62  ;;  %v5445_v14 = vld [vmem:[#allocation10 + $0x1b4] sm:$0xf]  ;;  %v5434_v62 = vld [vmem:[#allocation10 + $0x15c] sm:$0xf] }
 0x3cd   : > { %v1060_v31 = vrot.slane %v1059_v3, 2  ;;  %2063 = vmatpush.bf16.msra.mxu0 %v6390_v27  ;;  %2076 = vmatpush.bf16.msrb.mxu1 %v6392_v28  ;;  %7971 = vst [vmem:[#allocation45_spill] sm:$0xff] %v6430_v21  ;;  %v5403_v46 = vld [vmem:[#allocation10 + $0x64] sm:$0xf]  ;;  %v6476_v39 = vor.u32 %v5445_v14, %v5111_v15  ;;  %v5071_v63 = vld [vmem:[#allocation10 + $0x170] sm:$0xf0]  ;;  %v6486_v15 = vor.u32 %v5391_v33, %v4895_v40 }
 0x3ce   : > { %2089 = vmatpush.bf16.msrb.mxu2 %v6394_v35  ;;  %2102 = vmatpush.bf16.msra.mxu3 %v6396_v36  ;;  %7973 = vst [vmem:[#allocation47_spill] sm:$0xff] %v6436_v25  ;;  %v5077_v14 = vld [vmem:[#allocation10 + $0x160] sm:$0xf]  ;;  %v5047_v33 = vld [vmem:[#allocation10 + $0x140] sm:$0xf0] }
 0x3cf   : > { %v1061_v59 = vmax.f32 %v1059_v3, %v1060_v31  ;;  %v5165_v3 = vld [vmem:[#allocation10 + $0x218] sm:$0xf]  ;;  %v4943_v31 = vld [vmem:[#allocation10 + $0x78] sm:$0xf0]  ;;  %7982 = vst [vmem:[#allocation56_spill] sm:$0xff] %v6470_v13 }
 0x3d0   : > { %v6454_v53 = vor.u32 %v5461_v41, %v5165_v3  ;;  %v6462_v2 = vor.u32 %v5403_v46, %v4943_v31  ;;  %7984 = vst [vmem:[#allocation58_spill] sm:$0xff] %v6476_v39  ;;  %v5439_v3 = vld [vmem:[#allocation10 + $0x184] sm:$0xf]  ;;  %v5087_v41 = vld [vmem:[#allocation10 + $0x198] sm:$0xf0]  ;;  %v6480_v46 = vor.u32 %v5401_v17, %v4925_v16  ;;  %v6482_v31 = vor.u32 %v5449_v19, %v5117_v22 }
 0x3d1   : > { %2064 = vmatpush.bf16.msra.mxu0 %v6404_v32  ;;  %2077 = vmatpush.bf16.msrb.mxu1 %v6406_v42  ;;  %v1062_v8 = vrot.slane %v1061_v59, 1  ;;  %7987 = vst [vmem:[#allocation61_spill] sm:$0xff] %v6486_v15  ;;  %v5438_v16 = vld [vmem:[#allocation10 + $0x174] sm:$0xf0]  ;;  %v5269_v17 = vld [vmem:[#allocation10 + $0x2e0] sm:$0xf]  ;;  %v6492_v19 = vor.u32 %v5395_v56, %v4901_v55 }
 0x3d2   : > { %2090 = vmatpush.bf16.msrb.mxu2 %v6410_v51  ;;  %2103 = vmatpush.bf16.msra.mxu3 %v6412_v52  ;;  %7978 = vst [vmem:[#allocation52_spill] sm:$0xff] %v6454_v53  ;;  %v5486_v22 = vld [vmem:[#allocation10 + $0x2f4] sm:$0xf0]  ;;  %v6500_v40 = vor.u32 %v5438_v16, %v5077_v14  ;;  %v5432_v55 = vld [vmem:[#allocation10 + $0x144] sm:$0xf0] }
 0x3d3   : > { %v6432_v24 = vmax.f32 %v1061_v59, %v1062_v8  ;;  %v4949_v59 = vld [vmem:[#allocation10 + $0x68] sm:$0xf]  ;;  %7979 = vst [vmem:[#allocation53_spill] sm:$0xff] %v6462_v2  ;;  %v4919_v8 = vld [vmem:[#allocation10 + $0x48] sm:$0xf0] }
 0x3d4   : > { %v6474_v38 = vor.u32 %v5397_v7, %v4919_v8  ;;  %7985 = vst [vmem:[#allocation59_spill] sm:$0xff] %v6480_v46  ;;  %v5482_v7 = vld [vmem:[#allocation10 + $0x2dc] sm:$0xf]  ;;  %v5263_v8 = vld [vmem:[#allocation10 + $0x2f0] sm:$0xf0] }
 0x3d5   : > { %2065 = vmatpush.bf16.msra.mxu0 %v6416_v0  ;;  %2078 = vmatpush.bf16.msrb.mxu1 %v6418_v1  ;;  %7972 = vst [vmem:[#allocation46_spill] sm:$0xff] %v6432_v24  ;;  %v6448_v45 = vpack.c.bf16 %v6432_v24, %v6432_v24  ;;  %v6488_v24 = vor.u32 %v5439_v3, %v5087_v41  ;;  %v5476_v41 = vld [vmem:[#allocation10 + $0x2ac] sm:$0xf]  ;;  %v5245_v56 = vld [vmem:[#allocation10 + $0x2b0] sm:$0xf] }
 0x3d6   : > { %2091 = vmatpush.bf16.msrb.mxu2 %v6422_v11  ;;  %2104 = vmatpush.bf16.msra.mxu3 %v6424_v12  ;;  %7983 = vst [vmem:[#allocation57_spill] sm:$0xff] %v6474_v38  ;;  %v6502_v3 = vor.u32 %v5486_v22, %v5269_v17  ;;  %v5470_v16 = vld [vmem:[#allocation10 + $0x27c] sm:$0xf]  ;;  %v5215_v17 = vld [vmem:[#allocation10 + $0x290] sm:$0xf0] }
 0x3d7   : > { %7986 = vst [vmem:[#allocation60_spill] sm:$0xff] %v6482_v31  ;;  %v5029_v22 = vld [vmem:[#allocation10 + $0x100] sm:$0xf] }
 0x3d8   : > { %7988 = vst [vmem:[#allocation62_spill] sm:$0xff] %v6488_v24 }
 0x3d9   : > { %2066 = vmatpush.bf16.msra.mxu0 %v6428_v20  ;;  %2079 = vmatpush.bf16.msrb.mxu1 %v6430_v21  ;;  %7989 = vst [vmem:[#allocation63_spill] sm:$0xff] %v6492_v19 }
 0x3da   : > { %2092 = vmatpush.bf16.msrb.mxu2 %v6436_v25  ;;  %2105 = vmatpush.bf16.msra.mxu3 %v6438_v29  ;;  %7993 = vst [vmem:[#allocation67_spill] sm:$0xff] %v6500_v40 }
 0x3db   : > { %1427 = vmatmul.bf16.vlgmr.msrb.gmra.mxu0 %v6388_v26  ;;  %1440 = vmatmul.bf16.vlgmr.msra.gmra.mxu1 %v6388_v26  ;;  %v6468_v26 = vor.u32 %v5407_v60, %v4949_v59  ;;  %v5093_v59 = vld [vmem:[#allocation10 + $0x188] sm:$0xf]  ;;  %v5443_v60 = vld [vmem:[#allocation10 + $0x19c] sm:$0xf0]  ;;  %7994 = vst [vmem:[#allocation68_spill] sm:$0xff] %v6502_v3 }
 0x3dc   : > { %2045 = vmatmul.bf16.vlgmr.msra.gmra.mxu2 %v6448_v45  ;;  %2058 = vmatmul.bf16.vlgmr.msrb.gmra.mxu3 %v6448_v45 }
 0x3dd   : > { %2067 = vmatpush.bf16.msra.mxu0 %v6442_v43  ;;  %2080 = vmatpush.bf16.msrb.mxu1 %v6444_v44  ;;  %7981 = vst [vmem:[#allocation55_spill] sm:$0xff] %v6468_v26 }
 0x3de   : > { %2093 = vmatpush.bf16.msrb.mxu2 %v6452_v50  ;;  %2106 = vmatpush.bf16.msra.mxu3 %v6454_v53  ;;  %v5239_v53 = vld [vmem:[#allocation10 + $0x2c0] sm:$0xf0] }
 0x3e1   : > { %2068 = vmatpush.bf16.msra.mxu0 %v6462_v2  ;;  %2081 = vmatpush.bf16.msrb.mxu1 %v6464_v4  ;;  %v5053_v4 = vld [vmem:[#allocation10 + $0x130] sm:$0xf] }
 0x3e2   : > { %2094 = vmatpush.bf16.msrb.mxu2 %v6468_v26  ;;  %2107 = vmatpush.bf16.msra.mxu3 %v6470_v13  ;;  %v6494_v13 = vor.u32 %v5443_v60, %v5093_v59  ;;  %v6496_v26 = vor.u32 %v5434_v62, %v5071_v63  ;;  %v5480_v59 = vld [vmem:[#allocation10 + $0x2c4] sm:$0xf0]  ;;  %v6512_v62 = vor.u32 %v5476_v41, %v5239_v53  ;;  %v5422_v63 = vld [vmem:[#allocation10 + $0xfc] sm:$0xf]  ;;  %v5221_v53 = vld [vmem:[#allocation10 + $0x280] sm:$0xf] }
 0x3e3   : > { %v6518_v14 = vor.u32 %v5480_v59, %v5245_v56  ;;  %v6528_v41 = vor.u32 %v5470_v16, %v5215_v17  ;;  %v4999_v56 = vld [vmem:[#allocation10 + $0xe0] sm:$0xf0]  ;;  %v5410_v16 = vld [vmem:[#allocation10 + $0x9c] sm:$0xf]  ;;  %v4975_v17 = vld [vmem:[#allocation10 + $0xb0] sm:$0xf0] }
 0x3e4   : > { %7990 = vst [vmem:[#allocation64_spill] sm:$0xff] %v6494_v13 }
 0x3e5   : > { %2069 = vmatpush.bf16.msra.mxu0 %v6474_v38  ;;  %2082 = vmatpush.bf16.msrb.mxu1 %v6476_v39  ;;  %7991 = vst [vmem:[#allocation65_spill] sm:$0xff] %v6496_v26  ;;  %v6498_v38 = vor.u32 %v5482_v7, %v5263_v8  ;;  %v5428_v39 = vld [vmem:[#allocation10 + $0x12c] sm:$0xf]  ;;  %v5023_v7 = vld [vmem:[#allocation10 + $0x110] sm:$0xf0]  ;;  %v6516_v8 = vor.u32 %v5432_v55, %v5053_v4 }
 0x3e6   : > { %2095 = vmatpush.bf16.msrb.mxu2 %v6480_v46  ;;  %2108 = vmatpush.bf16.msra.mxu3 %v6482_v31  ;;  %v6510_v60 = vor.u32 %v5428_v39, %v5047_v33  ;;  %7996 = vst [vmem:[#allocation70_spill] sm:$0xff] %v6512_v62  ;;  %v5426_v39 = vld [vmem:[#allocation10 + $0x114] sm:$0xf0]  ;;  %v6526_v4 = vor.u32 %v5422_v63, %v5023_v7  ;;  %v5416_v55 = vld [vmem:[#allocation10 + $0xcc] sm:$0xf] }
 0x3e7   : > { %7992 = vst [vmem:[#allocation66_spill] sm:$0xff] %v6498_v38  ;;  %v5474_v33 = vld [vmem:[#allocation10 + $0x294] sm:$0xf0]  ;;  %v6532_v59 = vor.u32 %v5426_v39, %v5029_v22  ;;  %v5197_v31 = vld [vmem:[#allocation10 + $0x250] sm:$0xf]  ;;  %v6538_v63 = vor.u32 %v5416_v55, %v4999_v56 }
 0x3e8   : > { %7995 = vst [vmem:[#allocation69_spill] sm:$0xff] %v6510_v60  ;;  %v5404_v55 = vld [vmem:[#allocation10 + $0x6c] sm:$0xf]  ;;  %v4951_v56 = vld [vmem:[#allocation10 + $0x80] sm:$0xf0] }
 0x3e9   : > { %2070 = vmatpush.bf16.msra.mxu0 %v6486_v15  ;;  %2083 = vmatpush.bf16.msrb.mxu1 %v6488_v24  ;;  %7997 = vst [vmem:[#allocation71_spill] sm:$0xff] %v6516_v8  ;;  %v5477_v24 = vld [vmem:[#allocation10 + $0x2b4] sm:$0xf] }
 0x3ea   : > { %2096 = vmatpush.bf16.msrb.mxu2 %v6492_v19  ;;  %2109 = vmatpush.bf16.msra.mxu3 %v6494_v13  ;;  %7998 = vst [vmem:[#allocation72_spill] sm:$0xff] %v6518_v14  ;;  %v5191_v13 = vld [vmem:[#allocation10 + $0x260] sm:$0xf0]  ;;  %v5005_v19 = vld [vmem:[#allocation10 + $0xd0] sm:$0xf] }
 0x3eb   : > { %7999 = vst [vmem:[#allocation73_spill] sm:$0xff] %v6526_v4 }
 0x3ec   : > { %2071 = vmatmul.bf16.vlgmr.msra.gmra.mxu0 %v6448_v45  ;;  %2084 = vmatmul.bf16.vlgmr.msrb.gmra.mxu1 %v6448_v45  ;;  %8000 = vst [vmem:[#allocation74_spill] sm:$0xff] %v6528_v41 }
 0x3ed   : > { %2115 = vmatpush.bf16.msrb.mxu0 %v6496_v26  ;;  %2128 = vmatpush.bf16.msra.mxu1 %v6498_v38  ;;  %8001 = vst [vmem:[#allocation75_spill] sm:$0xff] %v6532_v59  ;;  %v5444_v38 = vld [vmem:[#allocation10 + $0x1a4] sm:$0xf0] }
 0x3ee   : > { %2141 = vmatpush.bf16.msra.mxu2 %v6500_v40  ;;  %2154 = vmatpush.bf16.msrb.mxu3 %v6502_v3  ;;  %v6534_v3 = vor.u32 %v5474_v33, %v5221_v53  ;;  %v5464_v40 = vld [vmem:[#allocation10 + $0x24c] sm:$0xf]  ;;  %8003 = vst [vmem:[#allocation77_spill] sm:$0xff] %v6538_v63  ;;  %v5458_v53 = vld [vmem:[#allocation10 + $0x21c] sm:$0xf] }
 0x3ef   : > { %2097 = vmatmul.bf16.vlgmr.msrb.gmra.mxu2 %v6448_v45  ;;  %2110 = vmatmul.bf16.vlgmr.msra.gmra.mxu3 %v6448_v45  ;;  %v6540_v7 = vor.u32 %v5464_v40, %v5191_v13  ;;  %v5167_v33 = vld [vmem:[#allocation10 + $0x230] sm:$0xf0]  ;;  %v6550_v13 = vor.u32 %v5410_v16, %v4975_v17  ;;  %v6562_v16 = vor.u32 %v5404_v55, %v4951_v56  ;;  %v5450_v55 = vld [vmem:[#allocation10 + $0x1d4] sm:$0xf0]  ;;  %v5392_v56 = vld [vmem:[#allocation10 + $0xc] sm:$0xf] }
 0x3f0   : > { %8002 = vst [vmem:[#allocation76_spill] sm:$0xff] %v6534_v3  ;;  %v6552_v40 = vor.u32 %v5458_v53, %v5167_v33  ;;  %v5398_v53 = vld [vmem:[#allocation10 + $0x3c] sm:$0xf]  ;;  %v5119_v33 = vld [vmem:[#allocation10 + $0x1d0] sm:$0xf0] }
 0x3f1   : > { %2116 = vmatpush.bf16.msrb.mxu0 %v6510_v60  ;;  %2129 = vmatpush.bf16.msra.mxu1 %v6512_v62  ;;  %v5420_v60 = vld [vmem:[#allocation10 + $0xe4] sm:$0xf0]  ;;  %8004 = vst [vmem:[#allocation78_spill] sm:$0xff] %v6540_v7 }
 0x3f2   : > { %2142 = vmatpush.bf16.msra.mxu2 %v6516_v8  ;;  %2155 = vmatpush.bf16.msrb.mxu3 %v6518_v14  ;;  %v5468_v62 = vld [vmem:[#allocation10 + $0x264] sm:$0xf0]  ;;  %v6544_v22 = vor.u32 %v5420_v60, %v5005_v19  ;;  %v4981_v14 = vld [vmem:[#allocation10 + $0xa0] sm:$0xf]  ;;  %v5414_v8 = vld [vmem:[#allocation10 + $0xb4] sm:$0xf0] }
 0x3f3   : > { %v6546_v39 = vor.u32 %v5468_v62, %v5197_v31  ;;  %8007 = vst [vmem:[#allocation81_spill] sm:$0xff] %v6550_v13  ;;  %v6556_v31 = vor.u32 %v5414_v8, %v4981_v14  ;;  %v5452_v60 = vld [vmem:[#allocation10 + $0x1ec] sm:$0xf]  ;;  %v5143_v62 = vld [vmem:[#allocation10 + $0x200] sm:$0xf0] }
 0x3f4   : > { %8005 = vst [vmem:[#allocation79_spill] sm:$0xff] %v6544_v22  ;;  %v6564_v17 = vor.u32 %v5452_v60, %v5143_v62  ;;  %v4927_v8 = vld [vmem:[#allocation10 + $0x50] sm:$0xf0]  ;;  %v5446_v14 = vld [vmem:[#allocation10 + $0x1bc] sm:$0xf]  ;;  %v6080_v60 = vmov 0  }
 0x3f5   : > { %2117 = vmatpush.bf16.msrb.mxu0 %v6526_v4  ;;  %2130 = vmatpush.bf16.msra.mxu1 %v6528_v41  ;;  %8006 = vst [vmem:[#allocation80_spill] sm:$0xff] %v6546_v39  ;;  %v5173_v4 = vld [vmem:[#allocation10 + $0x220] sm:$0xf]  ;;  %v5462_v41 = vld [vmem:[#allocation10 + $0x234] sm:$0xf0] }
 0x3f6   : > { %2143 = vmatpush.bf16.msra.mxu2 %v6532_v59  ;;  %2156 = vmatpush.bf16.msrb.mxu3 %v6534_v3  ;;  %8008 = vst [vmem:[#allocation82_spill] sm:$0xff] %v6552_v40  ;;  %v6558_v19 = vor.u32 %v5462_v41, %v5173_v4  ;;  %v4957_v3 = vld [vmem:[#allocation10 + $0x70] sm:$0xf]  ;;  %v5408_v59 = vld [vmem:[#allocation10 + $0x84] sm:$0xf0] }
 0x3f7   : > { %8009 = vst [vmem:[#allocation83_spill] sm:$0xff] %v6556_v31  ;;  %v6568_v4 = vor.u32 %v5408_v59, %v4957_v3  ;;  %5605 = vset.pattern.permute.xlu0 %v6080_v60  ;;  %v6579_v3 = vor.u32 %v5398_v53, %v4927_v8  ;;  %v6581_v59 = vor.u32 %v5446_v14, %v5119_v33  ;;  %v5095_v62 = vld [vmem:[#allocation10 + $0x1a0] sm:$0xf0]  ;;  %v1542_v53 = vld [vmem:[%s507_s12] sm:$0xff]  ;;  %v5079_v8 = vld [vmem:[#allocation10 + $0x178] sm:$0xf0] }
 0x3f8   : > { %8010 = vst [vmem:[#allocation84_spill] sm:$0xff] %v6558_v19  ;;  %v5483_v14 = vld [vmem:[#allocation10 + $0x2e4] sm:$0xf]  ;;  %v5271_v33 = vld [vmem:[#allocation10 + $0x2f8] sm:$0xf0]  ;;  %2301 = vperm.xlu0 %5605, %v1542_v53  }
 0x3f9   : > { %2118 = vmatpush.bf16.msrb.mxu0 %v6538_v63  ;;  %2131 = vmatpush.bf16.msra.mxu1 %v6540_v7  ;;  %v5149_v63 = vld [vmem:[#allocation10 + $0x1f0] sm:$0xf]  ;;  %v5456_v7 = vld [vmem:[#allocation10 + $0x204] sm:$0xf0]  ;;  %8011 = vst [vmem:[#allocation85_spill] sm:$0xff] %v6562_v16 }
 0x3fa   : > { %2144 = vmatpush.bf16.msra.mxu2 %v6544_v22  ;;  %2157 = vmatpush.bf16.msrb.mxu3 %v6546_v39  ;;  %8012 = vst [vmem:[#allocation86_spill] sm:$0xff] %v6564_v17  ;;  %v6570_v41 = vor.u32 %v5456_v7, %v5149_v63  ;;  %v4933_v39 = vld [vmem:[#allocation10 + $0x40] sm:$0xf]  ;;  %v5402_v22 = vld [vmem:[#allocation10 + $0x54] sm:$0xf0] }
 0x3fb   : > { %8013 = vst [vmem:[#allocation87_spill] sm:$0xff] %v6568_v4  ;;  %v4903_v63 = vld [vmem:[#allocation10 + $0x20] sm:$0xf0]  ;;  %v5440_v7 = vld [vmem:[#allocation10 + $0x18c] sm:$0xf]  ;;  %v6585_v60 = vor.u32 %v5402_v22, %v4933_v39 }
 0x3fc   : > { %8014 = vst [vmem:[#allocation88_spill] sm:$0xff] %v6570_v41  ;;  %v6593_v22 = vor.u32 %v5440_v7, %v5095_v62  ;;  %v5429_v53 = vld [vmem:[#allocation10 + $0x134] sm:$0xf]  ;;  %v5199_v62 = vld [vmem:[#allocation10 + $0x268] sm:$0xf0] }
 0x3fd   : > { %2119 = vmatpush.bf16.msrb.mxu0 %v6550_v13  ;;  %2132 = vmatpush.bf16.msra.mxu1 %v6552_v40  ;;  %v5125_v40 = vld [vmem:[#allocation10 + $0x1c0] sm:$0xf]  ;;  %8015 = vst [vmem:[#allocation89_spill] sm:$0xff] %v6579_v3  ;;  %v5396_v13 = vld [vmem:[#allocation10 + $0x24] sm:$0xf0] }
 0x3fe   : > { %2145 = vmatpush.bf16.msra.mxu2 %v6556_v31  ;;  %2158 = vmatpush.bf16.msrb.mxu3 %v6558_v19  ;;  %8016 = vst [vmem:[#allocation90_spill] sm:$0xff] %v6581_v59  ;;  %v6587_v19 = vor.u32 %v5450_v55, %v5125_v40  ;;  %v4909_v31 = vld [vmem:[#allocation10 + $0x10] sm:$0xf]  ;;  %v5465_v7 = vld [vmem:[#allocation10 + $0x254] sm:$0xf] }
 0x3ff   : > { %8019 = vst [vmem:[#allocation93_spill] sm:$0xff] %v6593_v22  ;;  %v6597_v39 = vor.u32 %v5396_v13, %v4909_v31  ;;  %v5423_v31 = vld [vmem:[#allocation10 + $0x104] sm:$0xf] }
 0x400   : > { %8017 = vst [vmem:[#allocation91_spill] sm:$0xff] %v6587_v19 }
 0x401   : > { %2120 = vmatpush.bf16.msrb.mxu0 %v6562_v16  ;;  %2133 = vmatpush.bf16.msra.mxu1 %v6564_v17  ;;  %v5101_v16 = vld [vmem:[#allocation10 + $0x190] sm:$0xf]  ;;  %v5435_v17 = vld [vmem:[#allocation10 + $0x164] sm:$0xf] }
 0x402   : > { %2146 = vmatpush.bf16.msra.mxu2 %v6568_v4  ;;  %2159 = vmatpush.bf16.msrb.mxu3 %v6570_v41  ;;  %v6591_v4 = vor.u32 %v5392_v56, %v4903_v63  ;;  %v6599_v40 = vor.u32 %v5444_v38, %v5101_v16  ;;  %v6601_v55 = vor.u32 %v5435_v17, %v5079_v8  ;;  %v5031_v16 = vld [vmem:[#allocation10 + $0x118] sm:$0xf0]  ;;  %v5471_v17 = vld [vmem:[#allocation10 + $0x284] sm:$0xf]  ;;  %v5007_v63 = vld [vmem:[#allocation10 + $0xe8] sm:$0xf0] }
 0x403   : > { %v6603_v41 = vor.u32 %v5483_v14, %v5271_v33  ;;  %v5223_v56 = vld [vmem:[#allocation10 + $0x298] sm:$0xf0]  ;;  %v6633_v14 = vor.u32 %v5465_v7, %v5199_v62  ;;  %v5411_v33 = vld [vmem:[#allocation10 + $0xa4] sm:$0xf]  ;;  %v5453_v7 = vld [vmem:[#allocation10 + $0x1f4] sm:$0xf] }
 0x404   : > { %8018 = vst [vmem:[#allocation92_spill] sm:$0xff] %v6591_v4  ;;  %v5151_v62 = vld [vmem:[#allocation10 + $0x208] sm:$0xf0] }
 0x405   : > { %2121 = vmatpush.bf16.msrb.mxu0 %v6579_v3  ;;  %2134 = vmatpush.bf16.msra.mxu1 %v6581_v59  ;;  %8020 = vst [vmem:[#allocation94_spill] sm:$0xff] %v6599_v40  ;;  %v5055_v3 = vld [vmem:[#allocation10 + $0x148] sm:$0xf0] }
 0x406   : > { %2147 = vmatpush.bf16.msra.mxu2 %v6585_v60  ;;  %2160 = vmatpush.bf16.msrb.mxu3 %v6587_v19  ;;  %v5247_v59 = vld [vmem:[#allocation10 + $0x2c8] sm:$0xf0]  ;;  %v6611_v38 = vor.u32 %v5429_v53, %v5055_v3  ;;  %v6625_v3 = vor.u32 %v5471_v17, %v5223_v56  ;;  %8024 = vst [vmem:[#allocation98_spill] sm:$0xff] %v6633_v14  ;;  %v4983_v53 = vld [vmem:[#allocation10 + $0xb8] sm:$0xf0] }
 0x407   : > { %v6613_v13 = vor.u32 %v5477_v24, %v5247_v59  ;;  %v6623_v24 = vor.u32 %v5423_v31, %v5031_v16  ;;  %v5417_v59 = vld [vmem:[#allocation10 + $0xd4] sm:$0xf]  ;;  %v5459_v31 = vld [vmem:[#allocation10 + $0x224] sm:$0xf]  ;;  %v5175_v16 = vld [vmem:[#allocation10 + $0x238] sm:$0xf0]  ;;  %v6639_v17 = vor.u32 %v5411_v33, %v4983_v53 }
 0x408   : > { %8021 = vst [vmem:[#allocation95_spill] sm:$0xff] %v6611_v38  ;;  %v6631_v8 = vor.u32 %v5417_v59, %v5007_v63  ;;  %v6641_v56 = vor.u32 %v5459_v31, %v5175_v16  ;;  %v5405_v59 = vld [vmem:[#allocation10 + $0x74] sm:$0xf]  ;;  %v4959_v63 = vld [vmem:[#allocation10 + $0x88] sm:$0xf0] }
 0x409   : > { %2122 = vmatpush.bf16.msrb.mxu0 %v6591_v4  ;;  %2135 = vmatpush.bf16.msra.mxu1 %v6593_v22  ;;  %8022 = vst [vmem:[#allocation96_spill] sm:$0xff] %v6623_v24  ;;  %v5399_v33 = vld [vmem:[#allocation10 + $0x44] sm:$0xf]  ;;  %v4935_v53 = vld [vmem:[#allocation10 + $0x58] sm:$0xf0] }
 0x40a   : > { %2148 = vmatpush.bf16.msra.mxu2 %v6597_v39  ;;  %2161 = vmatpush.bf16.msrb.mxu3 %v6599_v40  ;;  %8023 = vst [vmem:[#allocation97_spill] sm:$0xff] %v6631_v8  ;;  %v5447_v31 = vld [vmem:[#allocation10 + $0x1c4] sm:$0xf]  ;;  %v5127_v16 = vld [vmem:[#allocation10 + $0x1d8] sm:$0xf0] }
 0x40b   : > { %8025 = vst [vmem:[#allocation99_spill] sm:$0xff] %v6639_v17 }
 0x40c   : > { %2123 = vmatmul.bf16.vlgmr.msrb.gmra.mxu0 %v6448_v45  ;;  %2136 = vmatmul.bf16.vlgmr.msra.gmra.mxu1 %v6448_v45  ;;  %8026 = vst [vmem:[#allocation100_spill] sm:$0xff] %v6641_v56 }
 0x40d   : > { %2167 = vmatpush.bf16.msra.mxu0 %v6601_v55  ;;  %2180 = vmatpush.bf16.msrb.mxu1 %v6603_v41 }
 0x40e   : > { %2149 = vmatmul.bf16.vlgmr.msra.gmra.mxu2 %v6448_v45  ;;  %2162 = vmatmul.bf16.vlgmr.msrb.gmra.mxu3 %v6448_v45 }
 0x40f   : > { %2313 = vmatpush.bf16.msrb.mxu2 %v6339_v48  ;;  %2326 = vmatpush.bf16.msra.mxu3 %v6341_v49  ;;  %v6657_v49 = vor.u32 %v5447_v31, %v5127_v16  ;;  %v8033_v31 = vld [vmem:[#allocation55_spill] sm:$0xff]  ;;  %v8034_v16 = vld [vmem:[#allocation58_spill] sm:$0xff] }
 0x411   : > { %2168 = vmatpush.bf16.msra.mxu0 %v6611_v38  ;;  %2181 = vmatpush.bf16.msrb.mxu1 %v6613_v13  ;;  %8028 = vst [vmem:[#allocation102_spill] sm:$0xff] %v6657_v49 }
 0x413   : > { %2314 = vmatpush.bf16.msrb.mxu2 %v6344_v57  ;;  %2327 = vmatpush.bf16.msra.mxu3 %v6347_v61  ;;  %v6649_v61 = vor.u32 %v5453_v7, %v5151_v62  ;;  %v5441_v7 = vld [vmem:[#allocation10 + $0x194] sm:$0xf]  ;;  %v5103_v62 = vld [vmem:[#allocation10 + $0x1a8] sm:$0xf0] }
 0x414   : > { %v6665_v40 = vor.u32 %v5441_v7, %v5103_v62  ;;  %v8037_v7 = vld [vmem:[#allocation66_spill] sm:$0xff]  ;;  %v8038_v62 = vld [vmem:[#allocation60_spill] sm:$0xff] }
 0x415   : > { %2169 = vmatpush.bf16.msra.mxu0 %v6623_v24  ;;  %2182 = vmatpush.bf16.msrb.mxu1 %v6625_v3  ;;  %8027 = vst [vmem:[#allocation101_spill] sm:$0xff] %v6649_v61 }
 0x416   : > { %8029 = vst [vmem:[#allocation103_spill] sm:$0xff] %v6665_v40 }
 0x417   : > { %2315 = vmatpush.bf16.msrb.mxu2 %v6350_v6  ;;  %2328 = vmatpush.bf16.msra.mxu3 %v6353_v10  ;;  %v6647_v10 = vor.u32 %v5405_v59, %v4959_v63  ;;  %v5393_v59 = vld [vmem:[#allocation10 + $0x14] sm:$0xf]  ;;  %v4911_v63 = vld [vmem:[#allocation10 + $0x28] sm:$0xf0] }
 0x419   : > { %2170 = vmatpush.bf16.msra.mxu0 %v6631_v8  ;;  %2183 = vmatpush.bf16.msrb.mxu1 %v6633_v14 }
 0x41b   : > { %2316 = vmatpush.bf16.msrb.mxu2 %v6356_v18  ;;  %2329 = vmatpush.bf16.msra.mxu3 %v6359_v23  ;;  %v6655_v23 = vor.u32 %v5399_v33, %v4935_v53  ;;  %v8031_v33 = vld [vmem:[#allocation52_spill] sm:$0xff]  ;;  %v8032_v53 = vld [vmem:[#allocation57_spill] sm:$0xff] }
 0x41d   : > { %2171 = vmatpush.bf16.msra.mxu0 %v6639_v17  ;;  %2184 = vmatpush.bf16.msrb.mxu1 %v6641_v56 }
 0x41f   : > { %2317 = vmatpush.bf16.msrb.mxu2 %v6362_v30  ;;  %2330 = vmatpush.bf16.msra.mxu3 %v6365_v37  ;;  %v6663_v37 = vor.u32 %v5393_v59, %v4911_v63  ;;  %v8035_v59 = vld [vmem:[#allocation56_spill] sm:$0xff]  ;;  %v8036_v63 = vld [vmem:[#allocation62_spill] sm:$0xff] }
 0x421   : > { %2172 = vmatpush.bf16.msra.mxu0 %v6647_v10  ;;  %2185 = vmatpush.bf16.msrb.mxu1 %v6649_v61 }
 0x423   : > { %2318 = vmatpush.bf16.msrb.mxu2 %v6368_v47  ;;  %2331 = vmatpush.bf16.msra.mxu3 %v6371_v34  ;;  %v8046_v34 = vld [vmem:[#allocation78_spill] sm:$0xff] }
 0x425   : > { %2173 = vmatpush.bf16.msra.mxu0 %v6655_v23  ;;  %2186 = vmatpush.bf16.msrb.mxu1 %v6657_v49 }
 0x427   : > { %2319 = vmatpush.bf16.msrb.mxu2 %v6375_v54  ;;  %2332 = vmatpush.bf16.msra.mxu3 %v6377_v58 }
 0x429   : > { %2174 = vmatpush.bf16.msra.mxu0 %v6663_v37  ;;  %2187 = vmatpush.bf16.msrb.mxu1 %v6665_v40 }
 0x42b   : > { %2320 = vmatpush.bf16.msrb.mxu2 %v6381_v5  ;;  %2333 = vmatpush.bf16.msra.mxu3 %v6383_v9  ;;  %v8043_v9 = vld [vmem:[#allocation73_spill] sm:$0xff] }
 0x42c   : > { %2175 = vmatmul.bf16.vlgmr.msra.gmra.mxu0 %v6448_v45  ;;  %2188 = vmatmul.bf16.vlgmr.msrb.gmra.mxu1 %v6448_v45  ;;  %v8030_v45 = vld [vmem:[#allocation54_spill] sm:$0xff] }
 0x42d   : > { %2339 = vmatpush.bf16.msrb.mxu0 %v6390_v27  ;;  %2352 = vmatpush.bf16.msra.mxu1 %v6392_v28 }
 0x42f   : > { %2365 = vmatpush.bf16.msra.mxu2 %v6394_v35  ;;  %2378 = vmatpush.bf16.msrb.mxu3 %v6396_v36  ;;  %v8041_v36 = vld [vmem:[#allocation70_spill] sm:$0xff] }
 0x431   : > { %2340 = vmatpush.bf16.msrb.mxu0 %v6404_v32  ;;  %2353 = vmatpush.bf16.msra.mxu1 %v6406_v42 }
 0x433   : > { %2366 = vmatpush.bf16.msra.mxu2 %v6410_v51  ;;  %2379 = vmatpush.bf16.msrb.mxu3 %v6412_v52 }
 0x435   : > { %2341 = vmatpush.bf16.msrb.mxu0 %v6416_v0  ;;  %2354 = vmatpush.bf16.msra.mxu1 %v6418_v1  ;;  %v6733_v1 = vld [vmem:[#allocation11] sm:$0x3f] }
 0x436   : > { %v6748_v40 = vperm.slane %v6733_v1, 1 }
 0x437   : > { %2367 = vmatpush.bf16.msra.mxu2 %v6422_v11  ;;  %2380 = vmatpush.bf16.msrb.mxu3 %v6424_v12 }
 0x438   : > { %8055 = vst [vmem:[#allocation106_spill] sm:$0xff] %v6748_v40 }
 0x439   : > { %2342 = vmatpush.bf16.msrb.mxu0 %v6428_v20  ;;  %2355 = vmatpush.bf16.msra.mxu1 %v6430_v21  ;;  %v8049_v21 = vld [vmem:[#allocation85_spill] sm:$0xff] }
 0x43b   : > { %2368 = vmatpush.bf16.msra.mxu2 %v6436_v25  ;;  %2381 = vmatpush.bf16.msrb.mxu3 %v6438_v29  ;;  %v8040_v29 = vld [vmem:[#allocation69_spill] sm:$0xff] }
 0x43d   : > { %2343 = vmatpush.bf16.msrb.mxu0 %v6442_v43  ;;  %2356 = vmatpush.bf16.msra.mxu1 %v6444_v44 }
 0x43f   : > { %2369 = vmatpush.bf16.msra.mxu2 %v6452_v50  ;;  %2382 = vmatpush.bf16.msrb.mxu3 %v8031_v33  ;;  %v8039_v33 = vld [vmem:[#allocation63_spill] sm:$0xff]  ;;  %v6737_v50 = vperm.slane %v6733_v1, 0 }
 0x441   : > { %2344 = vmatpush.bf16.msrb.mxu0 %v6462_v2  ;;  %2357 = vmatpush.bf16.msra.mxu1 %v8030_v45  ;;  %8052 = vst [vmem:[#allocation104_spill] sm:$0xff] %v6737_v50 }
 0x443   : > { %2370 = vmatpush.bf16.msra.mxu2 %v8033_v31  ;;  %2383 = vmatpush.bf16.msrb.mxu3 %v8035_v59  ;;  %v8042_v59 = vld [vmem:[#allocation64_spill] sm:$0xff] }
 0x445   : > { %2345 = vmatpush.bf16.msrb.mxu0 %v8032_v53  ;;  %2358 = vmatpush.bf16.msra.mxu1 %v8034_v16  ;;  %v8044_v16 = vld [vmem:[#allocation74_spill] sm:$0xff] }
 0x447   : > { %2371 = vmatpush.bf16.msra.mxu2 %v6480_v46  ;;  %2384 = vmatpush.bf16.msrb.mxu3 %v8038_v62 }
 0x448   : > { %v1376_v12 = vpop.f32.mrf.mxu0  ;;  %v1389_v52 = vpop.f32.mrf.mxu1 }
 0x449   : > { %2346 = vmatpush.bf16.msrb.mxu0 %v6486_v15  ;;  %2359 = vmatpush.bf16.msra.mxu1 %v8036_v63 }
 0x44b   : > { %2372 = vmatpush.bf16.msra.mxu2 %v8039_v33  ;;  %2385 = vmatpush.bf16.msrb.mxu3 %v8042_v59  ;;  %v8047_v33 = vld [vmem:[#allocation81_spill] sm:$0xff]  ;;  %v6723_v59 = vld [vmem:[%s7734_s6] sm:$0x3f] }
 0x44d   : > { %2391 = vmatpush.bf16.msra.mxu0 %v6496_v26  ;;  %2404 = vmatpush.bf16.msrb.mxu1 %v8037_v7  ;;  %v8045_v7 = vld [vmem:[#allocation77_spill] sm:$0xff] }
 0x44f   : > { %v6713_v58 = vpop.f32.mrf.mxu2  ;;  %v6715_v63 = vpop.f32.mrf.mxu3 }
 0x450   : > { %v1378_v62 = vpop.f32.mrf.mxu0  ;;  %v1391_v45 = vpop.f32.mrf.mxu1 }
 0x451   : > { %2392 = vmatpush.bf16.msra.mxu0 %v8040_v29  ;;  %2405 = vmatpush.bf16.msrb.mxu1 %v8041_v36  ;;  %v8048_v36 = vld [vmem:[#allocation82_spill] sm:$0xff] }
 0x452   : > { %v8050_v62 = vld [vmem:[#allocation86_spill] sm:$0xff] }
 0x455   : > { %2393 = vmatpush.bf16.msra.mxu0 %v8043_v9  ;;  %2406 = vmatpush.bf16.msrb.mxu1 %v8044_v16  ;;  %v1120_v16 = vperm.slane %v6723_v59, 5 }
 0x457   : > { %v1404_v44 = vpop.f32.mrf.mxu2  ;;  %v1417_v46 = vpop.f32.mrf.mxu3 }
 0x458   : > { %v6728_v31 = vpop.f32.mrf.mxu0  ;;  %v1441_v45 = vpop.f32.mrf.mxu1  ;;  %v1115_v44 = vperm.slane %v6723_v59, 0 }
 0x459   : > { %2394 = vmatpush.bf16.msra.mxu0 %v8045_v7  ;;  %2407 = vmatpush.bf16.msrb.mxu1 %v8046_v34  ;;  %v6731_v34 = vadd.f32 %v1441_v45, %v1120_v16 }
 0x45a   : > { %v6744_v45 = vadd.f32 %v1376_v12, %v1115_v44 }
 0x45c   : > { %8054 = vst [vmem:[#allocation105_spill] sm:$0xff] %v6744_v45 }
 0x45d   : > { %2395 = vmatpush.bf16.msra.mxu0 %v8047_v33  ;;  %2408 = vmatpush.bf16.msrb.mxu1 %v8048_v36  ;;  %v8051_v33 = vld [vmem:[#allocation89_spill] sm:$0xff]  ;;  %v8053_v36 = vld [vmem:[#allocation90_spill] sm:$0xff] }
 0x45f   : > { %v2046_v46 = vpop.f32.mrf.mxu2 }
 0x460   : > { %v2047_v42 = vadd.f32 %v2046_v46, %v6737_v50  ;;  %v1443_v16 = vpop.f32.mrf.mxu1  ;;  %v6756_v50 = vperm.slane %v6733_v1, 2 }
 0x461   : > { %2396 = vmatpush.bf16.msra.mxu0 %v8049_v21  ;;  %2409 = vmatpush.bf16.msrb.mxu1 %v8050_v62  ;;  %v2059_v21 = vpop.f32.mrf.mxu3  ;;  %v1430_v62 = vpop.f32.mrf.mxu0 }
 0x462   : > { %8057 = vst [vmem:[#allocation108_spill] sm:$0xff] %v6756_v50 }
 0x465   : > { %2397 = vmatpush.bf16.msra.mxu0 %v8051_v33  ;;  %2410 = vmatpush.bf16.msrb.mxu1 %v8053_v36  ;;  %v2060_v33 = vadd.f32 %v2059_v21, %v2047_v42 }
 0x467   : > { %v2193_v7 = vadd.f32 %v2060_v33, %v6744_v45  ;;  %v2048_v28 = vpop.f32.mrf.mxu2 }
 0x469   : > { %2398 = vmatpush.bf16.msra.mxu0 %v6591_v4  ;;  %2411 = vmatpush.bf16.msrb.mxu1 %v6593_v22  ;;  %v5275_v25 = vmul.f32 -1.442695, %v2193_v7  ;;  %v2061_v36 = vpop.f32.mrf.mxu3  ;;  %v1116_v4 = vperm.slane %v6723_v59, 1  ;;  %v2072_v9 = vpop.f32.mrf.mxu0 }
 0x46a   : > { %v2085_v46 = vpop.f32.mrf.mxu1  ;;  %v2073_v62 = vadd.f32 %v2072_v9, %v6748_v40 }
 0x46b   : > { %5614 = vpow2.f32 %v5275_v25  ;;  %v6752_v16 = vadd.f32 %v1389_v52, %v1116_v4 }
 0x46c   : > { %v2086_v12 = vadd.f32 %v2085_v46, %v2073_v62 }
 0x46d   : > { %8056 = vst [vmem:[#allocation107_spill] sm:$0xff] %v6752_v16 }
 0x46e   : > { %v2213_v21 = vadd.f32 %v2086_v12, %v6752_v16 }
 0x470   : > { %v5276_v28 = vmul.f32 -1.442695, %v2213_v21 }
 0x471   : > { %v5615_v44 = vpop.eup %5614  ;;  %v2074_v7 = vpop.f32.mrf.mxu0 }
 0x472   : > { %v2197_v42 = vadd.f32 1.0, %v5615_v44  ;;  %v2098_v36 = vpop.f32.mrf.mxu2  ;;  %v2111_v33 = vpop.f32.mrf.mxu3 }
 0x473   : > { %v2087_v45 = vpop.f32.mrf.mxu1  ;;  %v2099_v12 = vadd.f32 %v2098_v36, %v6756_v50 }
 0x474   : > { %5616 = vrcp.f32 %v2197_v42  ;;  %v2207_v44 = vand.u32 2147483647, %v2197_v42  ;;  %v2209_v40 = vand.u32 2147483648, %v2197_v42  ;;  %v1117_v45 = vperm.slane %v6723_v59, 2 }
 0x475   : > { %5618 = vpow2.f32 %v5276_v28  ;;  %vm2203_vm6 = vweird.f32 %v2197_v42  ;;  %v2112_v16 = vadd.f32 %v2111_v33, %v2099_v12 }
 0x476   : > { %v2210_v7 = vor.u32 1.1754944e-38, %v2209_v40  ;;  %vm2208_vm8 = vcmp.eq.f32.partialorder %v2207_v44, 8.507059e+37 }
 0x47a   : > { %v5617_v25 = vpop.eup %5616  ;;  %v2100_v52 = vpop.f32.mrf.mxu2 }
 0x47b   : > { %v2199_v22 = vmul.f32 %v5617_v25, %v2197_v42  ;;  %v5619_v9 = vpop.eup %5618  ;;  %v2113_v4 = vpop.f32.mrf.mxu3  ;;  %vm2204_vm5 = vweird.f32 %v5617_v25 }
 0x47c   : > { %v2217_v46 = vadd.f32 1.0, %v5619_v9  ;;  %vm2205_vm7 = vmor %vm2203_vm6, %vm2204_vm5 }
 0x47d   : > { %v2200_v62 = vsub.f32 1.0, %v2199_v22  ;;  %v6761_v22 = vadd.f32 %v6713_v58, %v1117_v45 }
 0x47e   : > { %5620 = vrcp.f32 %v2217_v46  ;;  %v2227_v40 = vand.u32 2147483647, %v2217_v46  ;;  %vm2223_vm10 = vweird.f32 %v2217_v46 }
 0x47f   : > { %v2201_v21 = vmul.f32 %v5617_v25, %v2200_v62  ;;  %8058 = vst [vmem:[#allocation109_spill] sm:$0xff] %v6761_v22  ;;  %v6765_v62 = vperm.slane %v6733_v1, 3 }
 0x480   : > { %vm2228_vm12 = vcmp.eq.f32.partialorder %v2227_v40, 8.507059e+37 }
 0x481   : > { %v2202_v28 = vadd.f32 %v5617_v25, %v2201_v21  ;;  %8059 = vst [vmem:[#allocation110_spill] sm:$0xff] %v6765_v62  ;;  %v2229_v21 = vand.u32 2147483648, %v2217_v46 }
 0x483   : > { %v2206_v11 = vsel %vm2205_vm7, %v5617_v25, %v2202_v28  ;;  %v2230_v44 = vor.u32 1.1754944e-38, %v2229_v21 }
 0x484   : > { %v2211_v52 = vsel %vm2208_vm8, %v2210_v7, %v2206_v11  ;;  %v5621_v4 = vpop.eup %5620  ;;  %v1118_v11 = vperm.slane %v6723_v59, 3 }
 0x485   : > { %v2233_v9 = vmul.f32 %v2211_v52, %v2112_v16  ;;  %v2219_v49 = vmul.f32 %v5621_v4, %v2217_v46  ;;  %vm2224_vm9 = vweird.f32 %v5621_v4 }
 0x486   : > { %vm2225_vm11 = vmor %vm2223_vm10, %vm2224_vm9 }
 0x487   : > { %v2234_v36 = vadd.f32 %v2233_v9, %v6761_v22  ;;  %v2220_v50 = vsub.f32 1.0, %v2219_v49  ;;  %v6770_v49 = vperm.slane %v6733_v1, 4 }
 0x489   : > { %5622 = vtanh.f32 %v2234_v36  ;;  %v2221_v42 = vmul.f32 %v5621_v4, %v2220_v50  ;;  %v2124_v33 = vpop.f32.mrf.mxu0  ;;  %v2137_v25 = vpop.f32.mrf.mxu1  ;;  %v6773_v50 = vadd.f32 %v6715_v63, %v1118_v11 }
 0x48a   : > { %v2125_v58 = vadd.f32 %v2124_v33, %v6765_v62 }
 0x48b   : > { %v2222_v16 = vadd.f32 %v5621_v4, %v2221_v42  ;;  %8060 = vst [vmem:[#allocation111_spill] sm:$0xff] %v6773_v50  ;;  %v1119_v42 = vperm.slane %v6723_v59, 4 }
 0x48c   : > { %v2138_v12 = vadd.f32 %v2137_v25, %v2125_v58  ;;  %v8061_v25 = vld [vmem:[#allocation46_spill] sm:$0xff] }
 0x48d   : > { %v2226_v45 = vsel %vm2225_vm11, %v5621_v4, %v2222_v16  ;;  %v6782_v11 = vadd.f32 %v6728_v31, %v1119_v42 }
 0x48e   : > { %v2231_v7 = vsel %vm2228_vm12, %v2230_v44, %v2226_v45  ;;  %v2241_v52 = vrot.slane %v2138_v12, 1 }
 0x48f   : > { %v5623_v28 = vpop.eup %5622  ;;  %v2236_v9 = vsub.f32 1.0, %v2231_v7  ;;  %v2238_v4 = vmul.f32 %v2231_v7, %v8061_v25  ;;  %v8062_v7 = vld [vmem:[#allocation67_spill] sm:$0xff] }
 0x490   : > { %v2243_v36 = vadd.f32 %v2241_v52, %v6773_v50 }
 0x491   : > { %v2150_v33 = vpop.f32.mrf.mxu2  ;;  %v2163_v46 = vpop.f32.mrf.mxu3  ;;  %v2237_v21 = vmul.f32 %v5623_v28, %v2236_v9  ;;  %v8063_v9 = vld [vmem:[#allocation71_spill] sm:$0xff] }
 0x492   : > { %v2151_v40 = vadd.f32 %v2150_v33, %v6770_v49  ;;  %v2126_v58 = vpop.f32.mrf.mxu0  ;;  %v2139_v16 = vpop.f32.mrf.mxu1  ;;  %v5277_v22 = vmul.f32 -1.442695, %v2243_v36  ;;  %v8064_v36 = vld [vmem:[#allocation75_spill] sm:$0xff] }
 0x493   : > { %v6779_v62 = vadd.f32 %v2238_v4, %v2237_v21  ;;  %v8065_v21 = vld [vmem:[#allocation79_spill] sm:$0xff]  ;;  %v6800_v4 = vperm.slane %v6733_v1, 5 }
 0x494   : > { %v2164_v63 = vadd.f32 %v2163_v46, %v2151_v40  ;;  %5624 = vpow2.f32 %v5277_v22 }
 0x495   : > { %v6786_v12 = vpack.c.bf16 %v6779_v62, %v6779_v62 }
 0x496   : > { %v2264_v44 = vrot.slane %v2164_v63, 1 }
 0x497   : > { %2321 = vmatmul.bf16.vlgmr.msrb.gmra.mxu2 %v6786_v12  ;;  %2347 = vmatmul.bf16.vlgmr.msrb.gmra.mxu0 %v6786_v12 }
 0x498   : > { %v2266_v59 = vadd.f32 %v2264_v44, %v6782_v11  ;;  %2417 = vmatpush.bf16.msrb.mxu2 %v8062_v7  ;;  %2443 = vmatpush.bf16.msrb.mxu0 %v6601_v55 }
 0x499   : > { %v2152_v45 = vpop.f32.mrf.mxu2  ;;  %v2165_v28 = vpop.f32.mrf.mxu3 }
 0x49a   : > { %v5278_v22 = vmul.f32 -1.442695, %v2266_v59  ;;  %v5625_v31 = vpop.eup %5624 }
 0x49b   : > { %v2247_v52 = vadd.f32 1.0, %v5625_v31 }
 0x49c   : > { %5626 = vpow2.f32 %v5278_v22  ;;  %2418 = vmatpush.bf16.msrb.mxu2 %v8063_v9  ;;  %2444 = vmatpush.bf16.msrb.mxu0 %v6611_v38  ;;  %v8066_v22 = vld [vmem:[#allocation83_spill] sm:$0xff] }
 0x49d   : > { %5628 = vrcp.f32 %v2247_v52  ;;  %v2259_v44 = vand.u32 2147483648, %v2247_v52  ;;  %v2257_v28 = vand.u32 2147483647, %v2247_v52  ;;  %vm2253_vm14 = vweird.f32 %v2247_v52 }
 0x49f   : > { %vm2258_vm0 = vcmp.eq.f32.partialorder %v2257_v28, 8.507059e+37 }
 0x4a0   : > { %2419 = vmatpush.bf16.msrb.mxu2 %v8064_v36  ;;  %2445 = vmatpush.bf16.msrb.mxu0 %v6623_v24  ;;  %v8067_v36 = vld [vmem:[#allocation87_spill] sm:$0xff] }
 0x4a2   : > { %v5627_v33 = vpop.eup %5626 }
 0x4a3   : > { %v2270_v46 = vadd.f32 1.0, %v5627_v33  ;;  %v5629_v42 = vpop.eup %5628 }
 0x4a4   : > { %2420 = vmatpush.bf16.msrb.mxu2 %v8065_v21  ;;  %2446 = vmatpush.bf16.msrb.mxu0 %v6631_v8  ;;  %v2249_v40 = vmul.f32 %v5629_v42, %v2247_v52  ;;  %vm2254_vm13 = vweird.f32 %v5629_v42  ;;  %v2260_v8 = vor.u32 1.1754944e-38, %v2259_v44 }
 0x4a5   : > { %5630 = vrcp.f32 %v2270_v46  ;;  %vm2255_vm15 = vmor %vm2253_vm14, %vm2254_vm13  ;;  %v2282_v38 = vand.u32 2147483648, %v2270_v46  ;;  %vm2276_vm2 = vweird.f32 %v2270_v46 }
 0x4a6   : > { %v2250_v58 = vsub.f32 1.0, %v2249_v40 }
 0x4a7   : > { %2373 = vmatmul.bf16.vlgmr.msra.gmra.mxu2 %v6786_v12  ;;  %2399 = vmatmul.bf16.vlgmr.msra.gmra.mxu0 %v6786_v12  ;;  %v2283_v44 = vor.u32 1.1754944e-38, %v2282_v38 }
 0x4a8   : > { %v2251_v45 = vmul.f32 %v5629_v42, %v2250_v58  ;;  %2421 = vmatpush.bf16.msrb.mxu2 %v8066_v22  ;;  %2447 = vmatpush.bf16.msrb.mxu0 %v6639_v17  ;;  %v2280_v17 = vand.u32 2147483647, %v2270_v46 }
 0x4a9   : > { %v2176_v16 = vpop.f32.mrf.mxu0  ;;  %v2189_v63 = vpop.f32.mrf.mxu1 }
 0x4aa   : > { %v2177_v59 = vadd.f32 %v2176_v16, %v6800_v4  ;;  %v2252_v33 = vadd.f32 %v5629_v42, %v2251_v45  ;;  %vm2281_vm4 = vcmp.eq.f32.partialorder %v2280_v17, 8.507059e+37 }
 0x4ab   : > { %v5631_v1 = vpop.eup %5630 }
 0x4ac   : > { %v2190_v31 = vadd.f32 %v2189_v63, %v2177_v59  ;;  %v2272_v40 = vmul.f32 %v5631_v1, %v2270_v46  ;;  %v2256_v21 = vsel %vm2255_vm15, %v5629_v42, %v2252_v33  ;;  %2422 = vmatpush.bf16.msrb.mxu2 %v8067_v36  ;;  %2448 = vmatpush.bf16.msrb.mxu0 %v6647_v10  ;;  %vm2277_vm1 = vweird.f32 %v5631_v1  ;;  %v8072_v33 = vld [vmem:[#allocation84_spill] sm:$0xff] }
 0x4ad   : > { %v2261_v16 = vsel %vm2258_vm0, %v2260_v8, %v2256_v21  ;;  %vm2278_vm3 = vmor %vm2276_vm2, %vm2277_vm1 }
 0x4ae   : > { %v2287_v24 = vrot.slane %v2190_v31, 1  ;;  %v2273_v58 = vsub.f32 1.0, %v2272_v40  ;;  %v8071_v31 = vld [vmem:[#allocation80_spill] sm:$0xff] }
 0x4af   : > { %v8073_v40 = vld [vmem:[#allocation88_spill] sm:$0xff] }
 0x4b0   : > { %v2289_v22 = vmul.f32 %v2287_v24, %v2261_v16  ;;  %v2274_v9 = vmul.f32 %v5631_v1, %v2273_v58  ;;  %2423 = vmatpush.bf16.msrb.mxu2 %v6585_v60  ;;  %2449 = vmatpush.bf16.msrb.mxu0 %v6655_v23  ;;  %v2295_v24 = vrot.slane %v8061_v25, 1  ;;  %v8074_v58 = vld [vmem:[#allocation102_spill] sm:$0xff] }
 0x4b1   : > { %v2178_v63 = vpop.f32.mrf.mxu0  ;;  %v2191_v59 = vpop.f32.mrf.mxu1  ;;  %v8075_v16 = vld [vmem:[#allocation42_spill] sm:$0xff] }
 0x4b2   : > { %v2290_v52 = vadd.f32 %v2289_v22, %v6731_v34  ;;  %v2275_v42 = vadd.f32 %v5631_v1, %v2274_v9  ;;  %v8069_v22 = vld [vmem:[#allocation72_spill] sm:$0xff]  ;;  %v8076_v63 = vld [vmem:[#allocation73_spill] sm:$0xff]  ;;  %v8077_v59 = vld [vmem:[#allocation94_spill] sm:$0xff] }
 0x4b4   : > { %5632 = vtanh.f32 %v2290_v52  ;;  %v2279_v45 = vsel %vm2278_vm3, %v5631_v1, %v2275_v42  ;;  %2424 = vmatpush.bf16.msrb.mxu2 %v6597_v39  ;;  %2450 = vmatpush.bf16.msrb.mxu0 %v6663_v37  ;;  %v8070_v1 = vld [vmem:[#allocation76_spill] sm:$0xff]  ;;  %v8078_v52 = vld [vmem:[#allocation103_spill] sm:$0xff] }
 0x4b5   : > { %v2284_v8 = vsel %vm2281_vm4, %v2283_v44, %v2279_v45  ;;  %v8079_v42 = vld [vmem:[#allocation20_spill] sm:$0xff]  ;;  %v8080_v44 = vld [vmem:[#allocation34_spill] sm:$0xff]  ;;  %v8081_v45 = vld [vmem:[#allocation47_spill] sm:$0xff] }
 0x4b6   : > { %v2292_v21 = vsub.f32 1.0, %v2284_v8  ;;  %v2297_v46 = vmul.f32 %v2295_v24, %v2284_v8  ;;  %v8082_v8 = vld [vmem:[#allocation77_spill] sm:$0xff] }
 0x4b7   : > { %2425 = vmatmul.bf16.vlgmr.msrb.gmra.mxu2 %v6786_v12  ;;  %2451 = vmatmul.bf16.vlgmr.msrb.gmra.mxu0 %v6786_v12  ;;  %v8068_v12 = vld [vmem:[#allocation68_spill] sm:$0xff]  ;;  %v8083_v24 = vld [vmem:[#allocation21_spill] sm:$0xff] }
 0x4b8   : > { %2609 = vmatpush.bf16.msra.mxu2 %v6339_v48  ;;  %2635 = vmatpush.bf16.msra.mxu0 %v6390_v27 }
 0x4ba   : > { %v5633_v38 = vpop.eup %5632 }
 0x4bb   : > { %v2293_v9 = vmul.f32 %v5633_v38, %v2292_v21  ;;  %v8084_v21 = vld [vmem:[#allocation37_spill] sm:$0xff]  ;;  %v8085_v38 = vld [vmem:[#allocation51_spill] sm:$0xff] }
 0x4bc   : > { %2610 = vmatpush.bf16.msra.mxu2 %v6344_v57  ;;  %2636 = vmatpush.bf16.msra.mxu0 %v6404_v32 }
 0x4bd   : > { %v6821_v17 = vadd.f32 %v2297_v46, %v2293_v9  ;;  %v8086_v9 = vld [vmem:[#allocation81_spill] sm:$0xff]  ;;  %v8087_v46 = vld [vmem:[#allocation23_spill] sm:$0xff] }
 0x4bf   : > { %v6824_v28 = vrot.slane %v6821_v17, 7 }
 0x4c0   : > { %2611 = vmatpush.bf16.msra.mxu2 %v6350_v6  ;;  %2637 = vmatpush.bf16.msra.mxu0 %v6416_v0 }
 0x4c1   : > { %v2312_v25 = vpack.c.bf16 %v6824_v28, %v6824_v28 }
 0x4c3   : > { %2334 = vmatmul.bf16.vlgmr.msra.gmra.mxu3 %v2312_v25  ;;  %2360 = vmatmul.bf16.vlgmr.msra.gmra.mxu1 %v2312_v25 }
 0x4c4   : > { %2430 = vmatpush.bf16.msra.mxu3 %v8068_v12  ;;  %2456 = vmatpush.bf16.msra.mxu1 %v6603_v41 }
 0x4c5   : > { %2612 = vmatpush.bf16.msra.mxu2 %v6356_v18  ;;  %2638 = vmatpush.bf16.msra.mxu0 %v6428_v20 }
 0x4c8   : > { %2431 = vmatpush.bf16.msra.mxu3 %v8069_v22  ;;  %2457 = vmatpush.bf16.msra.mxu1 %v6613_v13 }
 0x4c9   : > { %2613 = vmatpush.bf16.msra.mxu2 %v6362_v30  ;;  %2639 = vmatpush.bf16.msra.mxu0 %v6442_v43 }
 0x4cc   : > { %2432 = vmatpush.bf16.msra.mxu3 %v8070_v1  ;;  %2458 = vmatpush.bf16.msra.mxu1 %v6625_v3 }
 0x4cd   : > { %2614 = vmatpush.bf16.msra.mxu2 %v6368_v47  ;;  %2640 = vmatpush.bf16.msra.mxu0 %v6462_v2 }
 0x4d0   : > { %2433 = vmatpush.bf16.msra.mxu3 %v8071_v31  ;;  %2459 = vmatpush.bf16.msra.mxu1 %v6633_v14 }
 0x4d1   : > { %2615 = vmatpush.bf16.msra.mxu2 %v6375_v54  ;;  %2641 = vmatpush.bf16.msra.mxu0 %v8032_v53 }
 0x4d3   : > { %2386 = vmatmul.bf16.vlgmr.msrb.gmra.mxu3 %v2312_v25  ;;  %2412 = vmatmul.bf16.vlgmr.msrb.gmra.mxu1 %v2312_v25 }
 0x4d4   : > { %2434 = vmatpush.bf16.msra.mxu3 %v8072_v33  ;;  %2460 = vmatpush.bf16.msra.mxu1 %v6641_v56 }
 0x4d5   : > { %2616 = vmatpush.bf16.msra.mxu2 %v6381_v5  ;;  %2642 = vmatpush.bf16.msra.mxu0 %v6486_v15  ;;  %v8121_v5 = vld [vmem:[#allocation106_spill] sm:$0xff] }
 0x4d8   : > { %2435 = vmatpush.bf16.msra.mxu3 %v8073_v40  ;;  %2461 = vmatpush.bf16.msra.mxu1 %v6649_v61 }
 0x4d9   : > { %2661 = vmatpush.bf16.msrb.mxu2 %v6394_v35  ;;  %2687 = vmatpush.bf16.msrb.mxu0 %v6496_v26  ;;  %v8095_v26 = vld [vmem:[#allocation27_spill] sm:$0xff] }
 0x4dc   : > { %2436 = vmatpush.bf16.msra.mxu3 %v6587_v19  ;;  %2462 = vmatpush.bf16.msra.mxu1 %v8074_v58 }
 0x4dd   : > { %2662 = vmatpush.bf16.msrb.mxu2 %v6410_v51  ;;  %2688 = vmatpush.bf16.msrb.mxu0 %v8040_v29  ;;  %v8090_v29 = vld [vmem:[#allocation85_spill] sm:$0xff] }
 0x4de   : > { %v8094_v51 = vld [vmem:[#allocation89_spill] sm:$0xff] }
 0x4e0   : > { %2437 = vmatpush.bf16.msra.mxu3 %v8077_v59  ;;  %2463 = vmatpush.bf16.msra.mxu1 %v8078_v52 }
 0x4e1   : > { %2663 = vmatpush.bf16.msrb.mxu2 %v8075_v16  ;;  %2689 = vmatpush.bf16.msrb.mxu0 %v8076_v63  ;;  %v8088_v63 = vld [vmem:[#allocation41_spill] sm:$0xff]  ;;  %v8089_v16 = vld [vmem:[#allocation55_spill] sm:$0xff] }
 0x4e3   : > { %2438 = vmatmul.bf16.vlgmr.msra.gmra.mxu3 %v2312_v25  ;;  %2464 = vmatmul.bf16.vlgmr.msra.gmra.mxu1 %v2312_v25  ;;  %v8093_v25 = vld [vmem:[#allocation59_spill] sm:$0xff] }
 0x4e4   : > { %2622 = vmatpush.bf16.msrb.mxu3 %v8079_v42  ;;  %2648 = vmatpush.bf16.msrb.mxu1 %v8080_v44 }
 0x4e5   : > { %2664 = vmatpush.bf16.msrb.mxu2 %v8081_v45  ;;  %2690 = vmatpush.bf16.msrb.mxu0 %v8082_v8  ;;  %v8091_v45 = vld [vmem:[#allocation25_spill] sm:$0xff] }
 0x4e6   : > { %v8092_v8 = vld [vmem:[#allocation45_spill] sm:$0xff] }
 0x4e8   : > { %2623 = vmatpush.bf16.msrb.mxu3 %v8083_v24  ;;  %2649 = vmatpush.bf16.msrb.mxu1 %v8084_v21 }
 0x4e9   : > { %2665 = vmatpush.bf16.msrb.mxu2 %v8085_v38  ;;  %2691 = vmatpush.bf16.msrb.mxu0 %v8086_v9  ;;  %v8096_v38 = vld [vmem:[#allocation50_spill] sm:$0xff]  ;;  %v8097_v9 = vld [vmem:[#allocation63_spill] sm:$0xff] }
 0x4ec   : > { %2624 = vmatpush.bf16.msrb.mxu3 %v8087_v46  ;;  %2650 = vmatpush.bf16.msrb.mxu1 %v8088_v63  ;;  %v8098_v46 = vld [vmem:[#allocation92_spill] sm:$0xff]  ;;  %v8099_v63 = vld [vmem:[#allocation29_spill] sm:$0xff] }
 0x4ed   : > { %2666 = vmatpush.bf16.msrb.mxu2 %v8089_v16  ;;  %2692 = vmatpush.bf16.msrb.mxu0 %v8090_v29  ;;  %v8100_v16 = vld [vmem:[#allocation54_spill] sm:$0xff]  ;;  %v8101_v29 = vld [vmem:[#allocation31_spill] sm:$0xff] }
 0x4f0   : > { %2625 = vmatpush.bf16.msrb.mxu3 %v8091_v45  ;;  %2651 = vmatpush.bf16.msrb.mxu1 %v8092_v8  ;;  %v8102_v45 = vld [vmem:[#allocation58_spill] sm:$0xff]  ;;  %v8103_v8 = vld [vmem:[#allocation33_spill] sm:$0xff] }
 0x4f1   : > { %2667 = vmatpush.bf16.msrb.mxu2 %v8093_v25  ;;  %2693 = vmatpush.bf16.msrb.mxu0 %v8094_v51  ;;  %v8104_v25 = vld [vmem:[#allocation62_spill] sm:$0xff]  ;;  %v8105_v51 = vld [vmem:[#allocation36_spill] sm:$0xff] }
 0x4f4   : > { %2626 = vmatpush.bf16.msrb.mxu3 %v8095_v26  ;;  %2652 = vmatpush.bf16.msrb.mxu1 %v8096_v38  ;;  %v8106_v26 = vld [vmem:[#allocation66_spill] sm:$0xff]  ;;  %v8107_v38 = vld [vmem:[#allocation39_spill] sm:$0xff] }
 0x4f5   : > { %2668 = vmatpush.bf16.msrb.mxu2 %v8097_v9  ;;  %2694 = vmatpush.bf16.msrb.mxu0 %v8098_v46  ;;  %v8108_v9 = vld [vmem:[#allocation70_spill] sm:$0xff]  ;;  %v8109_v46 = vld [vmem:[#allocation43_spill] sm:$0xff] }
 0x4f8   : > { %2627 = vmatpush.bf16.msrb.mxu3 %v8099_v63  ;;  %2653 = vmatpush.bf16.msrb.mxu1 %v8100_v16  ;;  %v8110_v63 = vld [vmem:[#allocation74_spill] sm:$0xff]  ;;  %v8111_v16 = vld [vmem:[#allocation48_spill] sm:$0xff] }
 0x4fc   : > { %2628 = vmatpush.bf16.msrb.mxu3 %v8101_v29  ;;  %2654 = vmatpush.bf16.msrb.mxu1 %v8102_v45  ;;  %v8112_v29 = vld [vmem:[#allocation78_spill] sm:$0xff]  ;;  %v8113_v45 = vld [vmem:[#allocation52_spill] sm:$0xff] }
 0x500   : > { %2629 = vmatpush.bf16.msrb.mxu3 %v8103_v8  ;;  %2655 = vmatpush.bf16.msrb.mxu1 %v8104_v25  ;;  %v8114_v8 = vld [vmem:[#allocation82_spill] sm:$0xff]  ;;  %v8115_v25 = vld [vmem:[#allocation56_spill] sm:$0xff] }
 0x504   : > { %2674 = vmatpush.bf16.msra.mxu3 %v8105_v51  ;;  %2700 = vmatpush.bf16.msra.mxu1 %v8106_v26  ;;  %v8116_v51 = vld [vmem:[#allocation86_spill] sm:$0xff] }
 0x508   : > { %2675 = vmatpush.bf16.msra.mxu3 %v8107_v38  ;;  %2701 = vmatpush.bf16.msra.mxu1 %v8108_v9  ;;  %v8117_v38 = vld [vmem:[#allocation60_spill] sm:$0xff]  ;;  %v8118_v9 = vld [vmem:[#allocation90_spill] sm:$0xff] }
 0x50c   : > { %2676 = vmatpush.bf16.msra.mxu3 %v8109_v46  ;;  %2702 = vmatpush.bf16.msra.mxu1 %v8110_v63  ;;  %v8119_v46 = vld [vmem:[#allocation64_spill] sm:$0xff]  ;;  %v8120_v63 = vld [vmem:[#allocation93_spill] sm:$0xff] }
 0x510   : > { %2677 = vmatpush.bf16.msra.mxu3 %v8111_v16  ;;  %2703 = vmatpush.bf16.msra.mxu1 %v8112_v29 }
 0x514   : > { %2678 = vmatpush.bf16.msra.mxu3 %v8113_v45  ;;  %2704 = vmatpush.bf16.msra.mxu1 %v8114_v8  ;;  %v2348_v26 = vpop.f32.mrf.mxu0 }
 0x515   : > { %v2349_v44 = vadd.f32 %v2348_v26, %v8121_v5  ;;  %v8125_v26 = vld [vmem:[#allocation110_spill] sm:$0xff] }
 0x518   : > { %2679 = vmatpush.bf16.msra.mxu3 %v8115_v25  ;;  %2705 = vmatpush.bf16.msra.mxu1 %v8116_v51 }
 0x51a   : > { %v2322_v16 = vpop.f32.mrf.mxu2 }
 0x51c   : > { %2680 = vmatpush.bf16.msra.mxu3 %v8117_v38  ;;  %2706 = vmatpush.bf16.msra.mxu1 %v8118_v9  ;;  %v2350_v35 = vpop.f32.mrf.mxu0 }
 0x520   : > { %2681 = vmatpush.bf16.msra.mxu3 %v8119_v46  ;;  %2707 = vmatpush.bf16.msra.mxu1 %v8120_v63  ;;  %v8122_v46 = vld [vmem:[#allocation104_spill] sm:$0xff]  ;;  %v8123_v63 = vld [vmem:[#allocation107_spill] sm:$0xff] }
 0x521   : > { %v2323_v54 = vadd.f32 %v2322_v16, %v8122_v46 }
 0x522   : > { %v2324_v29 = vpop.f32.mrf.mxu2 }
 0x524   : > { %v2400_v21 = vpop.f32.mrf.mxu0 }
 0x525   : > { %v2401_v5 = vadd.f32 %v2400_v21, %v8125_v26 }
 0x52a   : > { %v2374_v45 = vpop.f32.mrf.mxu2 }
 0x52c   : > { %v2402_v24 = vpop.f32.mrf.mxu0 }
 0x52d   : > { %v8124_v24 = vld [vmem:[#allocation105_spill] sm:$0xff] }
 0x532   : > { %v2376_v8 = vpop.f32.mrf.mxu2 }
 0x534   : > { %v6904_v15 = vpop.f32.mrf.mxu0 }
 0x53a   : > { %v2426_v25 = vpop.f32.mrf.mxu2 }
 0x53c   : > { %v2454_v51 = vpop.f32.mrf.mxu0 }
 0x540   : > { %v2361_v38 = vpop.f32.mrf.mxu1 }
 0x541   : > { %v2362_v42 = vadd.f32 %v2361_v38, %v2349_v44 }
 0x542   : > { %v2428_v53 = vpop.f32.mrf.mxu2 }
 0x543   : > { %v2493_v9 = vrot.slane %v2362_v42, 7 }
 0x545   : > { %v2495_v52 = vadd.f32 %v2493_v9, %v8123_v63 }
 0x546   : > { %v2335_v35 = vpop.f32.mrf.mxu3 }
 0x547   : > { %v5280_v29 = vmul.f32 -1.442695, %v2495_v52  ;;  %v2336_v59 = vadd.f32 %v2335_v35, %v2323_v54 }
 0x548   : > { %v2363_v2 = vpop.f32.mrf.mxu1 }
 0x549   : > { %5634 = vpow2.f32 %v5280_v29  ;;  %v2470_v8 = vrot.slane %v2336_v59, 7 }
 0x54b   : > { %v2472_v47 = vadd.f32 %v2470_v8, %v8124_v24 }
 0x54d   : > { %v5279_v58 = vmul.f32 -1.442695, %v2472_v47 }
 0x54e   : > { %v2337_v51 = vpop.f32.mrf.mxu3 }
 0x54f   : > { %v5635_v19 = vpop.eup %5634  ;;  %5636 = vpow2.f32 %v5279_v58 }
 0x550   : > { %v2499_v42 = vadd.f32 1.0, %v5635_v19  ;;  %v2413_v53 = vpop.f32.mrf.mxu1 }
 0x551   : > { %v2414_v44 = vadd.f32 %v2413_v53, %v2401_v5  ;;  %v8126_v53 = vld [vmem:[#allocation108_spill] sm:$0xff] }
 0x552   : > { %5638 = vrcp.f32 %v2499_v42  ;;  %vm2505_vm10 = vweird.f32 %v2499_v42 }
 0x553   : > { %v2529_v16 = vrot.slane %v2414_v44, 2  ;;  %v2375_v44 = vadd.f32 %v2374_v45, %v8126_v53 }
 0x555   : > { %v5637_v38 = vpop.eup %5636  ;;  %v2531_v52 = vadd.f32 %v2529_v16, %v6773_v50  ;;  %v2427_v50 = vadd.f32 %v2426_v25, %v6770_v49  ;;  %v2509_v25 = vand.u32 2147483647, %v2499_v42 }
 0x556   : > { %v2476_v54 = vadd.f32 1.0, %v5637_v38  ;;  %v2387_v2 = vpop.f32.mrf.mxu3 }
 0x557   : > { %v5281_v9 = vmul.f32 -1.442695, %v2531_v52  ;;  %v2388_v38 = vadd.f32 %v2387_v2, %v2375_v44  ;;  %vm2510_vm12 = vcmp.eq.f32.partialorder %v2509_v25, 8.507059e+37 }
 0x558   : > { %5640 = vrcp.f32 %v2476_v54  ;;  %v2415_v59 = vpop.f32.mrf.mxu1  ;;  %v5639_v35 = vpop.eup %5638  ;;  %v2488_v16 = vand.u32 2147483648, %v2476_v54  ;;  %vm2482_vm6 = vweird.f32 %v2476_v54 }
 0x559   : > { %5642 = vpow2.f32 %v5281_v9  ;;  %v2501_v47 = vmul.f32 %v5639_v35, %v2499_v42  ;;  %v2486_v59 = vand.u32 2147483647, %v2476_v54  ;;  %v2516_v63 = vrot.slane %v2388_v38, 7 }
 0x55a   : > { %vm2506_vm9 = vweird.f32 %v5639_v35 }
 0x55b   : > { %v2502_v19 = vsub.f32 1.0, %v2501_v47  ;;  %v2489_v47 = vor.u32 1.1754944e-38, %v2488_v16  ;;  %vm2487_vm8 = vcmp.eq.f32.partialorder %v2486_v59, 8.507059e+37  ;;  %vm2507_vm11 = vmor %vm2505_vm10, %vm2506_vm9 }
 0x55d   : > { %v2503_v9 = vmul.f32 %v5639_v35, %v2502_v19 }
 0x55e   : > { %v5641_v29 = vpop.eup %5640  ;;  %v2389_v8 = vpop.f32.mrf.mxu3 }
 0x55f   : > { %v5643_v21 = vpop.eup %5642  ;;  %v2478_v58 = vmul.f32 %v5641_v29, %v2476_v54  ;;  %vm2483_vm5 = vweird.f32 %v5641_v29  ;;  %v2504_v46 = vadd.f32 %v5639_v35, %v2503_v9  ;;  %v8127_v54 = vld [vmem:[#allocation109_spill] sm:$0xff] }
 0x560   : > { %v6912_v51 = vadd.f32 1.0, %v5643_v21  ;;  %v2465_v5 = vpop.f32.mrf.mxu1  ;;  %vm2484_vm7 = vmor %vm2482_vm6, %vm2483_vm5 }
 0x561   : > { %v2479_v26 = vsub.f32 1.0, %v2478_v58  ;;  %v2508_v38 = vsel %vm2507_vm11, %v5639_v35, %v2504_v46 }
 0x562   : > { %5644 = vrcp.f32 %v6912_v51  ;;  %vm2541_vm14 = vweird.f32 %v6912_v51 }
 0x563   : > { %v2480_v52 = vmul.f32 %v5641_v29, %v2479_v26  ;;  %v2511_v26 = vand.u32 2147483648, %v2499_v42 }
 0x565   : > { %v2481_v8 = vadd.f32 %v5641_v29, %v2480_v52 }
 0x566   : > { %v2439_v21 = vpop.f32.mrf.mxu3 }
 0x567   : > { %v2485_v24 = vsel %vm2484_vm7, %v5641_v29, %v2481_v8  ;;  %v2440_v45 = vadd.f32 %v2439_v21, %v2427_v50  ;;  %v2512_v50 = vor.u32 1.1754944e-38, %v2511_v26  ;;  %v2453_v21 = vadd.f32 %v6904_v15, %v6800_v4 }
 0x568   : > { %v5645_v58 = vpop.eup %5644  ;;  %v2490_v53 = vsel %vm2487_vm8, %v2489_v47, %v2485_v24  ;;  %v2467_v2 = vpop.f32.mrf.mxu1 }
 0x569   : > { %v2518_v44 = vmul.f32 %v2516_v63, %v2490_v53  ;;  %v2537_v19 = vmul.f32 %v5645_v58, %v6912_v51  ;;  %v2552_v43 = vrot.slane %v2440_v45, 2  ;;  %v2513_v8 = vsel %vm2510_vm12, %v2512_v50, %v2508_v38 }
 0x56a   : > { %v2521_v63 = vsub.f32 1.0, %v2513_v8  ;;  %v2524_v53 = vrot.slane %v6779_v62, 7  ;;  %vm2542_vm13 = vweird.f32 %v5645_v58  ;;  %v2545_v45 = vand.u32 2147483647, %v6912_v51 }
 0x56b   : > { %v2519_v16 = vadd.f32 %v2518_v44, %v8127_v54  ;;  %v2538_v52 = vsub.f32 1.0, %v2537_v19  ;;  %v2554_v29 = vadd.f32 %v2552_v43, %v6782_v11  ;;  %v2547_v43 = vand.u32 2147483648, %v6912_v51  ;;  %vm2543_vm15 = vmor %vm2541_vm14, %vm2542_vm13 }
 0x56c   : > { %v2526_v35 = vmul.f32 %v2524_v53, %v2513_v8  ;;  %v2466_v44 = vadd.f32 %v2465_v5, %v2453_v21  ;;  %vm2546_vm0 = vcmp.eq.f32.partialorder %v2545_v45, 8.507059e+37  ;;  %v8130_v45 = vld [vmem:[#allocation75_spill] sm:$0xff] }
 0x56d   : > { %5646 = vtanh.f32 %v2519_v16  ;;  %v5282_v59 = vmul.f32 -1.442695, %v2554_v29  ;;  %v2539_v24 = vmul.f32 %v5645_v58, %v2538_v52  ;;  %v6928_v16 = vpop.permute.xlu0 %2301  ;;  %v2548_v52 = vor.u32 1.1754944e-38, %v2547_v43 }
 0x56e   : > { %v2441_v9 = vpop.f32.mrf.mxu3  ;;  %v2304_v51 = vmul.f32 %v6928_v16, %v6779_v62  ;;  %v8129_v62 = vld [vmem:[#allocation95_spill] sm:$0xff] }
 0x56f   : > { %5648 = vpow2.f32 %v5282_v59  ;;  %v2540_v47 = vadd.f32 %v5645_v58, %v2539_v24  ;;  %v2575_v59 = vrot.slane %v2466_v44, 2 }
 0x571   : > { %v2544_v19 = vsel %vm2543_vm15, %v5645_v58, %v2540_v47 }
 0x572   : > { %v2549_v29 = vsel %vm2546_vm0, %v2548_v52, %v2544_v19  ;;  %v2582_v52 = vrot.slane %v6824_v28, 2  ;;  %v2306_v28 = vmul.f32 %v6928_v16, %v6821_v17  ;;  %v8136_v17 = vld [vmem:[#allocation49_spill] sm:$0xff] }
 0x573   : > { %v5647_v42 = vpop.eup %5646  ;;  %v2577_v24 = vmul.f32 %v2575_v59, %v2549_v29 }
 0x574   : > { %v2522_v46 = vmul.f32 %v5647_v42, %v2521_v63  ;;  %v8128_v42 = vld [vmem:[#allocation71_spill] sm:$0xff] }
 0x575   : > { %v5649_v2 = vpop.eup %5648  ;;  %v2578_v63 = vadd.f32 %v2577_v24, %v6731_v34  ;;  %v8134_v24 = vld [vmem:[#allocation83_spill] sm:$0xff] }
 0x576   : > { %v6926_v26 = vadd.f32 %v2526_v35, %v2522_v46  ;;  %v2558_v25 = vadd.f32 1.0, %v5649_v2  ;;  %v8131_v2 = vld [vmem:[#allocation96_spill] sm:$0xff] }
 0x578   : > { %v2586_v15 = vmul.f32 %v6926_v26, %v6928_v16  ;;  %5650 = vrcp.f32 %v2558_v25  ;;  %v2599_v38 = vpack.c.bf16 %v6926_v26, %v6926_v26  ;;  %v2570_v47 = vand.u32 2147483648, %v2558_v25 }
 0x579   : > { %v2568_v43 = vand.u32 2147483647, %v2558_v25  ;;  %5652 = vtanh.f32 %v2578_v63  ;;  %vm2564_vm2 = vweird.f32 %v2558_v25 }
 0x57a   : > { %v2588_v50 = vrot.slane %v2586_v15, 1  ;;  %v2602_v5 = vshrl.u32 %v2599_v38, 16  ;;  %v2571_v35 = vor.u32 1.1754944e-38, %v2570_v47  ;;  %v8132_v38 = vld [vmem:[#allocation79_spill] sm:$0xff] }
 0x57b   : > { %vm2569_vm4 = vcmp.eq.f32.partialorder %v2568_v43, 8.507059e+37 }
 0x57c   : > { %v6936_v58 = vadd.f32 %v2588_v50, %v2304_v51  ;;  %2617 = vmatmul.bf16.vlgmr.msra.gmra.mxu2 %v2602_v5  ;;  %2643 = vmatmul.bf16.vlgmr.msra.gmra.mxu0 %v2602_v5  ;;  %v8133_v51 = vld [vmem:[#allocation97_spill] sm:$0xff] }
 0x57d   : > { %2713 = vmatpush.bf16.msra.mxu2 %v8062_v7  ;;  %2739 = vmatpush.bf16.msra.mxu0 %v6601_v55 }
 0x57e   : > { %v5651_v9 = vpop.eup %5650 }
 0x57f   : > { %v2560_v8 = vmul.f32 %v5651_v9, %v2558_v25  ;;  %vm2565_vm1 = vweird.f32 %v5651_v9  ;;  %v5653_v29 = vpop.eup %5652 }
 0x580   : > { %vm2566_vm3 = vmor %vm2564_vm2, %vm2565_vm1 }
 0x581   : > { %v2561_v53 = vsub.f32 1.0, %v2560_v8  ;;  %2714 = vmatpush.bf16.msra.mxu2 %v8128_v42  ;;  %2740 = vmatpush.bf16.msra.mxu0 %v8129_v62  ;;  %v8135_v8 = vld [vmem:[#allocation99_spill] sm:$0xff] }
 0x583   : > { %v2562_v21 = vmul.f32 %v5651_v9, %v2561_v53 }
 0x585   : > { %v2563_v46 = vadd.f32 %v5651_v9, %v2562_v21  ;;  %2715 = vmatpush.bf16.msra.mxu2 %v8130_v45  ;;  %2741 = vmatpush.bf16.msra.mxu0 %v8131_v2 }
 0x587   : > { %v2567_v44 = vsel %vm2566_vm3, %v5651_v9, %v2563_v46  ;;  %v8138_v46 = vld [vmem:[#allocation102_spill] sm:$0xff] }
 0x588   : > { %v2572_v19 = vsel %vm2569_vm4, %v2571_v35, %v2567_v44  ;;  %v8139_v35 = vld [vmem:[#allocation28_spill] sm:$0xff]  ;;  %v8140_v44 = vld [vmem:[#allocation53_spill] sm:$0xff] }
 0x589   : > { %v2580_v15 = vsub.f32 1.0, %v2572_v19  ;;  %2716 = vmatpush.bf16.msra.mxu2 %v8132_v38  ;;  %2742 = vmatpush.bf16.msra.mxu0 %v8133_v51  ;;  %v2584_v50 = vmul.f32 %v2582_v52, %v2572_v19  ;;  %v8141_v19 = vld [vmem:[#allocation94_spill] sm:$0xff]  ;;  %v8142_v52 = vld [vmem:[#allocation103_spill] sm:$0xff] }
 0x58b   : > { %v2581_v59 = vmul.f32 %v5653_v29, %v2580_v15  ;;  %v8143_v15 = vld [vmem:[#allocation30_spill] sm:$0xff]  ;;  %v8144_v29 = vld [vmem:[#allocation57_spill] sm:$0xff] }
 0x58c   : > { %2669 = vmatmul.bf16.vlgmr.msrb.gmra.mxu2 %v2602_v5  ;;  %2695 = vmatmul.bf16.vlgmr.msrb.gmra.mxu0 %v2602_v5 }
 0x58d   : > { %v2585_v25 = vadd.f32 %v2584_v50, %v2581_v59  ;;  %2717 = vmatpush.bf16.msra.mxu2 %v8134_v24  ;;  %2743 = vmatpush.bf16.msra.mxu0 %v8135_v8  ;;  %v8145_v50 = vld [vmem:[#allocation20_spill] sm:$0xff]  ;;  %v8146_v59 = vld [vmem:[#allocation34_spill] sm:$0xff] }
 0x58f   : > { %v2591_v9 = vmul.f32 %v2585_v25, %v6928_v16  ;;  %v6951_v63 = vrot.slane %v2585_v25, 5  ;;  %v8147_v25 = vld [vmem:[#allocation32_spill] sm:$0xff] }
 0x591   : > { %v2593_v53 = vrot.slane %v2591_v9, 7  ;;  %v2600_v47 = vpack.c.bf16 %v6951_v63, %v6951_v63  ;;  %2718 = vmatpush.bf16.msra.mxu2 %v8067_v36  ;;  %2744 = vmatpush.bf16.msra.mxu0 %v6647_v10  ;;  %v8148_v9 = vld [vmem:[#allocation61_spill] sm:$0xff] }
 0x593   : > { %v2605_v21 = vshrl.u32 %v2600_v47, 16  ;;  %v6959_v43 = vadd.f32 %v2593_v53, %v2306_v28  ;;  %v8149_v28 = vld [vmem:[#allocation21_spill] sm:$0xff]  ;;  %v8151_v47 = vld [vmem:[#allocation35_spill] sm:$0xff] }
 0x594   : > { %v8150_v53 = vld [vmem:[#allocation37_spill] sm:$0xff] }
 0x595   : > { %2630 = vmatmul.bf16.vlgmr.msrb.gmra.mxu3 %v2605_v21  ;;  %2656 = vmatmul.bf16.vlgmr.msrb.gmra.mxu1 %v2605_v21 }
 0x596   : > { %2719 = vmatpush.bf16.msra.mxu2 %v6585_v60  ;;  %2745 = vmatpush.bf16.msra.mxu0 %v6655_v23 }
 0x597   : > { %2726 = vmatpush.bf16.msrb.mxu3 %v8068_v12  ;;  %2752 = vmatpush.bf16.msrb.mxu1 %v6603_v41 }
 0x59a   : > { %2720 = vmatpush.bf16.msra.mxu2 %v6597_v39  ;;  %2746 = vmatpush.bf16.msra.mxu0 %v6663_v37 }
 0x59b   : > { %2727 = vmatpush.bf16.msrb.mxu3 %v8069_v22  ;;  %2753 = vmatpush.bf16.msrb.mxu1 %v6613_v13 }
 0x59d   : > { %2721 = vmatmul.bf16.vlgmr.msra.gmra.mxu2 %v2602_v5  ;;  %2747 = vmatmul.bf16.vlgmr.msra.gmra.mxu0 %v2602_v5  ;;  %v8137_v5 = vld [vmem:[#allocation91_spill] sm:$0xff] }
 0x59e   : > { %2903 = vmatpush.bf16.msrb.mxu2 %v6339_v48  ;;  %2929 = vmatpush.bf16.msrb.mxu0 %v6390_v27 }
 0x59f   : > { %2728 = vmatpush.bf16.msrb.mxu3 %v8070_v1  ;;  %2754 = vmatpush.bf16.msrb.mxu1 %v6625_v3 }
 0x5a2   : > { %2904 = vmatpush.bf16.msrb.mxu2 %v6344_v57  ;;  %2930 = vmatpush.bf16.msrb.mxu0 %v6404_v32 }
 0x5a3   : > { %2729 = vmatpush.bf16.msrb.mxu3 %v8071_v31  ;;  %2755 = vmatpush.bf16.msrb.mxu1 %v6633_v14 }
 0x5a5   : > { %2682 = vmatmul.bf16.vlgmr.msra.gmra.mxu3 %v2605_v21  ;;  %2708 = vmatmul.bf16.vlgmr.msra.gmra.mxu1 %v2605_v21 }
 0x5a6   : > { %2905 = vmatpush.bf16.msrb.mxu2 %v6350_v6  ;;  %2931 = vmatpush.bf16.msrb.mxu0 %v6416_v0 }
 0x5a7   : > { %2730 = vmatpush.bf16.msrb.mxu3 %v8072_v33  ;;  %2756 = vmatpush.bf16.msrb.mxu1 %v6641_v56 }
 0x5aa   : > { %2906 = vmatpush.bf16.msrb.mxu2 %v6356_v18  ;;  %2932 = vmatpush.bf16.msrb.mxu0 %v6428_v20  ;;  %v8198_v18 = vld [vmem:[#allocation105_spill] sm:$0xff] }
 0x5ab   : > { %2731 = vmatpush.bf16.msrb.mxu3 %v8073_v40  ;;  %2757 = vmatpush.bf16.msrb.mxu1 %v6649_v61 }
 0x5ae   : > { %2907 = vmatpush.bf16.msrb.mxu2 %v6362_v30  ;;  %2933 = vmatpush.bf16.msrb.mxu0 %v8136_v17  ;;  %v8196_v17 = vld [vmem:[#allocation104_spill] sm:$0xff]  ;;  %v8197_v30 = vld [vmem:[#allocation107_spill] sm:$0xff] }
 0x5af   : > { %2732 = vmatpush.bf16.msrb.mxu3 %v8137_v5  ;;  %2758 = vmatpush.bf16.msrb.mxu1 %v8138_v46 }
 0x5b2   : > { %2908 = vmatpush.bf16.msrb.mxu2 %v8139_v35  ;;  %2934 = vmatpush.bf16.msrb.mxu0 %v8140_v44  ;;  %v8195_v35 = vld [vmem:[#allocation106_spill] sm:$0xff] }
 0x5b3   : > { %2733 = vmatpush.bf16.msrb.mxu3 %v8141_v19  ;;  %2759 = vmatpush.bf16.msrb.mxu1 %v8142_v52  ;;  %v8152_v52 = vld [vmem:[#allocation65_spill] sm:$0xff] }
 0x5b6   : > { %2909 = vmatpush.bf16.msrb.mxu2 %v8143_v15  ;;  %2935 = vmatpush.bf16.msrb.mxu0 %v8144_v29  ;;  %v8153_v15 = vld [vmem:[#allocation23_spill] sm:$0xff]  ;;  %v8154_v29 = vld [vmem:[#allocation41_spill] sm:$0xff] }
 0x5b7   : > { %2916 = vmatpush.bf16.msra.mxu3 %v8145_v50  ;;  %2942 = vmatpush.bf16.msra.mxu1 %v8146_v59  ;;  %v8155_v50 = vld [vmem:[#allocation38_spill] sm:$0xff]  ;;  %v8156_v59 = vld [vmem:[#allocation69_spill] sm:$0xff] }
 0x5b8   : > { %2734 = vmatmul.bf16.vlgmr.msrb.gmra.mxu3 %v2605_v21  ;;  %2760 = vmatmul.bf16.vlgmr.msrb.gmra.mxu1 %v2605_v21  ;;  %v8157_v21 = vld [vmem:[#allocation25_spill] sm:$0xff] }
 0x5ba   : > { %2910 = vmatpush.bf16.msrb.mxu2 %v8147_v25  ;;  %2936 = vmatpush.bf16.msrb.mxu0 %v8148_v9  ;;  %v8158_v25 = vld [vmem:[#allocation45_spill] sm:$0xff]  ;;  %v8159_v9 = vld [vmem:[#allocation42_spill] sm:$0xff] }
 0x5bb   : > { %2917 = vmatpush.bf16.msra.mxu3 %v8149_v28  ;;  %2943 = vmatpush.bf16.msra.mxu1 %v8150_v53  ;;  %v8160_v28 = vld [vmem:[#allocation73_spill] sm:$0xff]  ;;  %v8161_v53 = vld [vmem:[#allocation27_spill] sm:$0xff] }
 0x5be   : > { %2955 = vmatpush.bf16.msra.mxu2 %v8151_v47  ;;  %2981 = vmatpush.bf16.msra.mxu0 %v8152_v52  ;;  %v8162_v47 = vld [vmem:[#allocation50_spill] sm:$0xff]  ;;  %v8163_v52 = vld [vmem:[#allocation47_spill] sm:$0xff] }
 0x5bf   : > { %2918 = vmatpush.bf16.msra.mxu3 %v8153_v15  ;;  %2944 = vmatpush.bf16.msra.mxu1 %v8154_v29  ;;  %v8164_v15 = vld [vmem:[#allocation77_spill] sm:$0xff] }
 0x5c0   : > { %v8165_v29 = vld [vmem:[#allocation29_spill] sm:$0xff] }
 0x5c2   : > { %2956 = vmatpush.bf16.msra.mxu2 %v8155_v50  ;;  %2982 = vmatpush.bf16.msra.mxu0 %v8156_v59  ;;  %v8166_v50 = vld [vmem:[#allocation54_spill] sm:$0xff]  ;;  %v8167_v59 = vld [vmem:[#allocation51_spill] sm:$0xff] }
 0x5c3   : > { %2919 = vmatpush.bf16.msra.mxu3 %v8157_v21  ;;  %2945 = vmatpush.bf16.msra.mxu1 %v8158_v25  ;;  %v8168_v21 = vld [vmem:[#allocation81_spill] sm:$0xff]  ;;  %v8169_v25 = vld [vmem:[#allocation31_spill] sm:$0xff] }
 0x5c6   : > { %2957 = vmatpush.bf16.msra.mxu2 %v8159_v9  ;;  %2983 = vmatpush.bf16.msra.mxu0 %v8160_v28  ;;  %v8170_v9 = vld [vmem:[#allocation58_spill] sm:$0xff]  ;;  %v8171_v28 = vld [vmem:[#allocation55_spill] sm:$0xff] }
 0x5c7   : > { %2920 = vmatpush.bf16.msra.mxu3 %v8161_v53  ;;  %2946 = vmatpush.bf16.msra.mxu1 %v8162_v47  ;;  %v8172_v53 = vld [vmem:[#allocation85_spill] sm:$0xff] }
 0x5c8   : > { %v8173_v47 = vld [vmem:[#allocation33_spill] sm:$0xff] }
 0x5ca   : > { %2958 = vmatpush.bf16.msra.mxu2 %v8163_v52  ;;  %2984 = vmatpush.bf16.msra.mxu0 %v8164_v15  ;;  %v8174_v52 = vld [vmem:[#allocation62_spill] sm:$0xff]  ;;  %v8175_v15 = vld [vmem:[#allocation59_spill] sm:$0xff] }
 0x5cb   : > { %2921 = vmatpush.bf16.msra.mxu3 %v8165_v29  ;;  %2947 = vmatpush.bf16.msra.mxu1 %v8166_v50  ;;  %v8176_v29 = vld [vmem:[#allocation89_spill] sm:$0xff]  ;;  %v8177_v50 = vld [vmem:[#allocation36_spill] sm:$0xff] }
 0x5ce   : > { %2959 = vmatpush.bf16.msra.mxu2 %v8167_v59  ;;  %2985 = vmatpush.bf16.msra.mxu0 %v8168_v21  ;;  %v8178_v59 = vld [vmem:[#allocation66_spill] sm:$0xff]  ;;  %v8179_v21 = vld [vmem:[#allocation63_spill] sm:$0xff] }
 0x5cf   : > { %2922 = vmatpush.bf16.msra.mxu3 %v8169_v25  ;;  %2948 = vmatpush.bf16.msra.mxu1 %v8170_v9  ;;  %v8180_v25 = vld [vmem:[#allocation92_spill] sm:$0xff]  ;;  %v8181_v9 = vld [vmem:[#allocation39_spill] sm:$0xff] }
 0x5d2   : > { %2960 = vmatpush.bf16.msra.mxu2 %v8171_v28  ;;  %2986 = vmatpush.bf16.msra.mxu0 %v8172_v53  ;;  %v8182_v28 = vld [vmem:[#allocation70_spill] sm:$0xff]  ;;  %v8183_v53 = vld [vmem:[#allocation43_spill] sm:$0xff] }
 0x5d3   : > { %2923 = vmatpush.bf16.msra.mxu3 %v8173_v47  ;;  %2949 = vmatpush.bf16.msra.mxu1 %v8174_v52  ;;  %v8184_v47 = vld [vmem:[#allocation74_spill] sm:$0xff]  ;;  %v8185_v52 = vld [vmem:[#allocation48_spill] sm:$0xff] }
 0x5d6   : > { %2961 = vmatpush.bf16.msra.mxu2 %v8175_v15  ;;  %2987 = vmatpush.bf16.msra.mxu0 %v8176_v29  ;;  %v8186_v15 = vld [vmem:[#allocation78_spill] sm:$0xff]  ;;  %v8187_v29 = vld [vmem:[#allocation52_spill] sm:$0xff] }
 0x5d7   : > { %2968 = vmatpush.bf16.msrb.mxu3 %v8177_v50  ;;  %2994 = vmatpush.bf16.msrb.mxu1 %v8178_v59  ;;  %v8188_v50 = vld [vmem:[#allocation82_spill] sm:$0xff]  ;;  %v8189_v59 = vld [vmem:[#allocation56_spill] sm:$0xff] }
 0x5da   : > { %2962 = vmatpush.bf16.msra.mxu2 %v8179_v21  ;;  %2988 = vmatpush.bf16.msra.mxu0 %v8180_v25  ;;  %v8190_v21 = vld [vmem:[#allocation86_spill] sm:$0xff]  ;;  %v8191_v25 = vld [vmem:[#allocation60_spill] sm:$0xff] }
 0x5db   : > { %2969 = vmatpush.bf16.msrb.mxu3 %v8181_v9  ;;  %2995 = vmatpush.bf16.msrb.mxu1 %v8182_v28  ;;  %v8192_v9 = vld [vmem:[#allocation90_spill] sm:$0xff]  ;;  %v8193_v28 = vld [vmem:[#allocation64_spill] sm:$0xff] }
 0x5df   : > { %2970 = vmatpush.bf16.msrb.mxu3 %v8183_v53  ;;  %2996 = vmatpush.bf16.msrb.mxu1 %v8184_v47  ;;  %v8194_v53 = vld [vmem:[#allocation93_spill] sm:$0xff] }
 0x5e3   : > { %2971 = vmatpush.bf16.msrb.mxu3 %v8185_v52  ;;  %2997 = vmatpush.bf16.msrb.mxu1 %v8186_v15 }
 0x5e7   : > { %2972 = vmatpush.bf16.msrb.mxu3 %v8187_v29  ;;  %2998 = vmatpush.bf16.msrb.mxu1 %v8188_v50 }
 0x5eb   : > { %2973 = vmatpush.bf16.msrb.mxu3 %v8189_v59  ;;  %2999 = vmatpush.bf16.msrb.mxu1 %v8190_v21 }
 0x5ef   : > { %2974 = vmatpush.bf16.msrb.mxu3 %v8191_v25  ;;  %3000 = vmatpush.bf16.msrb.mxu1 %v8192_v9 }
 0x5f3   : > { %2975 = vmatpush.bf16.msrb.mxu3 %v8193_v28  ;;  %3001 = vmatpush.bf16.msrb.mxu1 %v8194_v53 }
 0x5f9   : > { %v2644_v47 = vpop.f32.mrf.mxu0 }
 0x5fa   : > { %v2645_v50 = vadd.f32 %v2644_v47, %v8195_v35 }
 0x5ff   : > { %v2618_v52 = vpop.f32.mrf.mxu2 }
 0x600   : > { %v2619_v25 = vadd.f32 %v2618_v52, %v8196_v17 }
 0x601   : > { %v2646_v19 = vpop.f32.mrf.mxu0 }
 0x607   : > { %v2620_v15 = vpop.f32.mrf.mxu2 }
 0x609   : > { %v2696_v44 = vpop.f32.mrf.mxu0 }
 0x60f   : > { %v2670_v29 = vpop.f32.mrf.mxu2 }
 0x611   : > { %v2698_v46 = vpop.f32.mrf.mxu0 }
 0x612   : > { %v2657_v59 = vpop.f32.mrf.mxu1 }
 0x613   : > { %v2658_v5 = vadd.f32 %v2657_v59, %v2645_v50 }
 0x615   : > { %v2789_v21 = vrot.slane %v2658_v5, 6  ;;  %v8199_v5 = vld [vmem:[#allocation110_spill] sm:$0xff] }
 0x616   : > { %v2697_v59 = vadd.f32 %v2696_v44, %v8199_v5 }
 0x617   : > { %v2791_v9 = vadd.f32 %v2789_v21, %v8197_v30  ;;  %v2672_v61 = vpop.f32.mrf.mxu2 }
 0x618   : > { %v2631_v28 = vpop.f32.mrf.mxu3 }
 0x619   : > { %v5284_v40 = vmul.f32 -1.442695, %v2791_v9  ;;  %v2632_v53 = vadd.f32 %v2631_v28, %v2619_v25  ;;  %v8200_v28 = vld [vmem:[#allocation111_spill] sm:$0xff] }
 0x61a   : > { %v7048_v20 = vpop.f32.mrf.mxu0  ;;  %v2659_v19 = vpop.f32.mrf.mxu1 }
 0x61b   : > { %5654 = vpow2.f32 %v5284_v40  ;;  %v2766_v15 = vrot.slane %v2632_v53, 6 }
 0x61d   : > { %v2768_v56 = vadd.f32 %v2766_v15, %v8198_v18 }
 0x61f   : > { %v5283_v47 = vmul.f32 -1.442695, %v2768_v56 }
 0x620   : > { %v2722_v46 = vpop.f32.mrf.mxu2  ;;  %v2633_v35 = vpop.f32.mrf.mxu3 }
 0x621   : > { %v5655_v50 = vpop.eup %5654  ;;  %5656 = vpow2.f32 %v5283_v47 }
 0x622   : > { %v2795_v52 = vadd.f32 1.0, %v5655_v50  ;;  %v2750_v21 = vpop.f32.mrf.mxu0  ;;  %v2709_v61 = vpop.f32.mrf.mxu1 }
 0x623   : > { %v2710_v30 = vadd.f32 %v2709_v61, %v2697_v59 }
 0x624   : > { %5658 = vrcp.f32 %v2795_v52  ;;  %vm2801_vm10 = vweird.f32 %v2795_v52 }
 0x625   : > { %v2825_v25 = vrot.slane %v2710_v30, 3  ;;  %v8201_v30 = vld [vmem:[#allocation108_spill] sm:$0xff] }
 0x626   : > { %v2671_v61 = vadd.f32 %v2670_v29, %v8201_v30 }
 0x627   : > { %v5657_v9 = vpop.eup %5656  ;;  %v2827_v19 = vadd.f32 %v2825_v25, %v8200_v28 }
 0x628   : > { %v2772_v40 = vadd.f32 1.0, %v5657_v9  ;;  %v2724_v53 = vpop.f32.mrf.mxu2  ;;  %v2683_v17 = vpop.f32.mrf.mxu3 }
 0x629   : > { %v5285_v15 = vmul.f32 -1.442695, %v2827_v19  ;;  %v2684_v19 = vadd.f32 %v2683_v17, %v2671_v61  ;;  %v2807_v17 = vand.u32 2147483648, %v2795_v52 }
 0x62a   : > { %5660 = vrcp.f32 %v2772_v40  ;;  %v2711_v56 = vpop.f32.mrf.mxu1  ;;  %v5659_v35 = vpop.eup %5658  ;;  %v2784_v9 = vand.u32 2147483648, %v2772_v40  ;;  %vm2778_vm6 = vweird.f32 %v2772_v40 }
 0x62b   : > { %5662 = vpow2.f32 %v5285_v15  ;;  %v2797_v18 = vmul.f32 %v5659_v35, %v2795_v52  ;;  %v2782_v56 = vand.u32 2147483647, %v2772_v40  ;;  %v2812_v14 = vrot.slane %v2684_v19, 6 }
 0x62c   : > { %vm2802_vm9 = vweird.f32 %v5659_v35  ;;  %v2808_v19 = vor.u32 1.1754944e-38, %v2807_v17 }
 0x62d   : > { %v2798_v5 = vsub.f32 1.0, %v2797_v18  ;;  %v2785_v18 = vor.u32 1.1754944e-38, %v2784_v9  ;;  %vm2783_vm8 = vcmp.eq.f32.partialorder %v2782_v56, 8.507059e+37  ;;  %vm2803_vm11 = vmor %vm2801_vm10, %vm2802_vm9 }
 0x62f   : > { %v2799_v15 = vmul.f32 %v5659_v35, %v2798_v5 }
 0x630   : > { %v5661_v44 = vpop.eup %5660  ;;  %v2685_v47 = vpop.f32.mrf.mxu3 }
 0x631   : > { %v5663_v50 = vpop.eup %5662  ;;  %v2774_v21 = vmul.f32 %v5661_v44, %v2772_v40  ;;  %vm2779_vm5 = vweird.f32 %v5661_v44  ;;  %v2723_v47 = vadd.f32 %v2722_v46, %v6770_v49  ;;  %v2800_v31 = vadd.f32 %v5659_v35, %v2799_v15 }
 0x632   : > { %v7053_v59 = vadd.f32 1.0, %v5663_v50  ;;  %vm2780_vm7 = vmor %vm2778_vm6, %vm2779_vm5  ;;  %v2805_v40 = vand.u32 2147483647, %v2795_v52 }
 0x633   : > { %v2775_v33 = vsub.f32 1.0, %v2774_v21 }
 0x634   : > { %5664 = vrcp.f32 %v7053_v59  ;;  %vm2806_vm12 = vcmp.eq.f32.partialorder %v2805_v40, 8.507059e+37  ;;  %vm2837_vm14 = vweird.f32 %v7053_v59  ;;  %v2841_v17 = vand.u32 2147483647, %v7053_v59 }
 0x635   : > { %v2761_v25 = vpop.f32.mrf.mxu1  ;;  %v2776_v53 = vmul.f32 %v5661_v44, %v2775_v33 }
 0x636   : > { %vm2842_vm0 = vcmp.eq.f32.partialorder %v2841_v17, 8.507059e+37 }
 0x637   : > { %v2777_v28 = vadd.f32 %v5661_v44, %v2776_v53 }
 0x639   : > { %v2781_v50 = vsel %vm2780_vm7, %v5661_v44, %v2777_v28  ;;  %v2804_v44 = vsel %vm2803_vm11, %v5659_v35, %v2800_v31  ;;  %v2843_v31 = vand.u32 2147483648, %v7053_v59  ;;  %v2749_v35 = vadd.f32 %v7048_v20, %v6800_v4 }
 0x63a   : > { %v5665_v21 = vpop.eup %5664  ;;  %v2786_v30 = vsel %vm2783_vm8, %v2785_v18, %v2781_v50  ;;  %v2809_v15 = vsel %vm2806_vm12, %v2808_v19, %v2804_v44  ;;  %v2820_v18 = vrot.slane %v6926_v26, 7 }
 0x63b   : > { %v2735_v29 = vpop.f32.mrf.mxu3  ;;  %v2814_v33 = vmul.f32 %v2812_v14, %v2786_v30  ;;  %v2833_v61 = vmul.f32 %v5665_v21, %v7053_v59  ;;  %v2817_v30 = vsub.f32 1.0, %v2809_v15  ;;  %vm2838_vm13 = vweird.f32 %v5665_v21 }
 0x63c   : > { %v2736_v0 = vadd.f32 %v2735_v29, %v2723_v47  ;;  %v2822_v29 = vmul.f32 %v2820_v18, %v2809_v15  ;;  %vm2839_vm15 = vmor %vm2837_vm14, %vm2838_vm13 }
 0x63d   : > { %v2763_v5 = vpop.f32.mrf.mxu1  ;;  %v2815_v46 = vadd.f32 %v2814_v33, %v8127_v54  ;;  %v2834_v28 = vsub.f32 1.0, %v2833_v61 }
 0x63e   : > { %v2848_v53 = vrot.slane %v2736_v0, 3  ;;  %v2762_v5 = vadd.f32 %v2761_v25, %v2749_v35 }
 0x63f   : > { %5666 = vtanh.f32 %v2815_v46  ;;  %v2835_v47 = vmul.f32 %v5665_v21, %v2834_v28  ;;  %v2844_v46 = vor.u32 1.1754944e-38, %v2843_v31 }
 0x640   : > { %v2850_v9 = vadd.f32 %v2848_v53, %v6782_v11  ;;  %v2871_v59 = vrot.slane %v2762_v5, 3 }
 0x641   : > { %v2836_v0 = vadd.f32 %v5665_v21, %v2835_v47 }
 0x642   : > { %v5286_v56 = vmul.f32 -1.442695, %v2850_v9 }
 0x643   : > { %v2737_v14 = vpop.f32.mrf.mxu3  ;;  %v2840_v26 = vsel %vm2839_vm15, %v5665_v21, %v2836_v0 }
 0x644   : > { %5668 = vpow2.f32 %v5286_v56  ;;  %v2845_v44 = vsel %vm2842_vm0, %v2844_v46, %v2840_v26 }
 0x645   : > { %v5667_v52 = vpop.eup %5666  ;;  %v2873_v25 = vmul.f32 %v2871_v59, %v2845_v44  ;;  %v8204_v44 = vld [vmem:[#allocation98_spill] sm:$0xff]  ;;  %v8205_v59 = vld [vmem:[#allocation84_spill] sm:$0xff] }
 0x646   : > { %v2818_v50 = vmul.f32 %v5667_v52, %v2817_v30 }
 0x647   : > { %v2874_v15 = vadd.f32 %v2873_v25, %v6731_v34  ;;  %v8207_v25 = vld [vmem:[#allocation24_spill] sm:$0xff] }
 0x648   : > { %v7067_v61 = vadd.f32 %v2822_v29, %v2818_v50  ;;  %v2878_v29 = vrot.slane %v6951_v63, 4 }
 0x64a   : > { %v5669_v33 = vpop.eup %5668  ;;  %v2882_v53 = vmul.f32 %v7067_v61, %v6928_v16  ;;  %v2895_v28 = vpack.c.bf16 %v7067_v61, %v7067_v61 }
 0x64b   : > { %v2854_v40 = vadd.f32 1.0, %v5669_v33 }
 0x64c   : > { %v2884_v20 = vrot.slane %v2882_v53, 2  ;;  %v2899_v9 = vrot.slane %v2895_v28, 1 }
 0x64d   : > { %5670 = vrcp.f32 %v2854_v40  ;;  %v2866_v14 = vand.u32 2147483648, %v2854_v40  ;;  %vm2860_vm2 = vweird.f32 %v2854_v40 }
 0x64e   : > { %v7074_v19 = vadd.f32 %v2884_v20, %v6936_v58  ;;  %2911 = vmatmul.bf16.vlgmr.msrb.gmra.mxu2 %v2899_v9  ;;  %2937 = vmatmul.bf16.vlgmr.msrb.gmra.mxu0 %v2899_v9  ;;  %v2864_v58 = vand.u32 2147483647, %v2854_v40  ;;  %5672 = vtanh.f32 %v2874_v15  ;;  %v8203_v20 = vld [vmem:[#allocation80_spill] sm:$0xff]  ;;  %v8210_v15 = vld [vmem:[#allocation101_spill] sm:$0xff] }
 0x64f   : > { %3007 = vmatpush.bf16.msrb.mxu2 %v8062_v7  ;;  %3033 = vmatpush.bf16.msrb.mxu0 %v6601_v55  ;;  %v2867_v52 = vor.u32 1.1754944e-38, %v2866_v14  ;;  %v8212_v14 = vld [vmem:[#allocation49_spill] sm:$0xff] }
 0x650   : > { %vm2865_vm4 = vcmp.eq.f32.partialorder %v2864_v58, 8.507059e+37  ;;  %v8214_v58 = vld [vmem:[#allocation102_spill] sm:$0xff] }
 0x653   : > { %v5671_v21 = vpop.eup %5670  ;;  %3008 = vmatpush.bf16.msrb.mxu2 %v8128_v42  ;;  %3034 = vmatpush.bf16.msrb.mxu0 %v8129_v62 }
 0x654   : > { %v2856_v56 = vmul.f32 %v5671_v21, %v2854_v40  ;;  %vm2861_vm1 = vweird.f32 %v5671_v21  ;;  %v5673_v35 = vpop.eup %5672 }
 0x655   : > { %vm2862_vm3 = vmor %vm2860_vm2, %vm2861_vm1 }
 0x656   : > { %v2857_v47 = vsub.f32 1.0, %v2856_v56  ;;  %v8209_v56 = vld [vmem:[#allocation88_spill] sm:$0xff] }
 0x657   : > { %3009 = vmatpush.bf16.msrb.mxu2 %v8130_v45  ;;  %3035 = vmatpush.bf16.msrb.mxu0 %v8131_v2 }
 0x658   : > { %v2858_v30 = vmul.f32 %v5671_v21, %v2857_v47  ;;  %v8211_v47 = vld [vmem:[#allocation26_spill] sm:$0xff] }
 0x65a   : > { %v2859_v18 = vadd.f32 %v5671_v21, %v2858_v30  ;;  %v8213_v30 = vld [vmem:[#allocation91_spill] sm:$0xff] }
 0x65b   : > { %3010 = vmatpush.bf16.msrb.mxu2 %v8132_v38  ;;  %3036 = vmatpush.bf16.msrb.mxu0 %v8133_v51 }
 0x65c   : > { %v2863_v0 = vsel %vm2862_vm3, %v5671_v21, %v2859_v18  ;;  %v8208_v21 = vld [vmem:[#allocation44_spill] sm:$0xff] }
 0x65d   : > { %v2868_v50 = vsel %vm2865_vm4, %v2867_v52, %v2863_v0  ;;  %v8215_v18 = vld [vmem:[#allocation28_spill] sm:$0xff]  ;;  %v8216_v52 = vld [vmem:[#allocation53_spill] sm:$0xff]  ;;  %v8217_v0 = vld [vmem:[#allocation94_spill] sm:$0xff] }
 0x65e   : > { %v2876_v31 = vsub.f32 1.0, %v2868_v50  ;;  %v2880_v17 = vmul.f32 %v2878_v29, %v2868_v50  ;;  %2963 = vmatmul.bf16.vlgmr.msra.gmra.mxu2 %v2899_v9  ;;  %2989 = vmatmul.bf16.vlgmr.msra.gmra.mxu0 %v2899_v9  ;;  %v8218_v50 = vld [vmem:[#allocation103_spill] sm:$0xff]  ;;  %v8219_v29 = vld [vmem:[#allocation30_spill] sm:$0xff] }
 0x65f   : > { %3011 = vmatpush.bf16.msrb.mxu2 %v8134_v24  ;;  %3037 = vmatpush.bf16.msrb.mxu0 %v8135_v8 }
 0x660   : > { %v2877_v33 = vmul.f32 %v5673_v35, %v2876_v31  ;;  %v8220_v31 = vld [vmem:[#allocation57_spill] sm:$0xff]  ;;  %v8221_v35 = vld [vmem:[#allocation20_spill] sm:$0xff] }
 0x662   : > { %v2881_v5 = vadd.f32 %v2880_v17, %v2877_v33  ;;  %v8222_v17 = vld [vmem:[#allocation34_spill] sm:$0xff]  ;;  %v8223_v33 = vld [vmem:[#allocation32_spill] sm:$0xff] }
 0x663   : > { %3012 = vmatpush.bf16.msrb.mxu2 %v8067_v36  ;;  %3038 = vmatpush.bf16.msrb.mxu0 %v6647_v10 }
 0x664   : > { %v2887_v26 = vmul.f32 %v2881_v5, %v6928_v16  ;;  %v7089_v40 = vrot.slane %v2881_v5, 3  ;;  %v8224_v5 = vld [vmem:[#allocation61_spill] sm:$0xff] }
 0x666   : > { %v2889_v63 = vrot.slane %v2887_v26, 6  ;;  %v2896_v53 = vpack.c.bf16 %v7089_v40, %v7089_v40  ;;  %v8225_v26 = vld [vmem:[#allocation21_spill] sm:$0xff] }
 0x667   : > { %3013 = vmatpush.bf16.msrb.mxu2 %v6585_v60  ;;  %3039 = vmatpush.bf16.msrb.mxu0 %v6655_v23 }
 0x668   : > { %v2900_v46 = vrot.slane %v2896_v53, 1  ;;  %v7096_v28 = vadd.f32 %v2889_v63, %v6959_v43  ;;  %v8202_v43 = vld [vmem:[#allocation40_spill] sm:$0xff]  ;;  %v8226_v63 = vld [vmem:[#allocation37_spill] sm:$0xff]  ;;  %v8227_v53 = vld [vmem:[#allocation35_spill] sm:$0xff] }
 0x66a   : > { %2924 = vmatmul.bf16.vlgmr.msra.gmra.mxu3 %v2900_v46  ;;  %2950 = vmatmul.bf16.vlgmr.msra.gmra.mxu1 %v2900_v46 }
 0x66b   : > { %3020 = vmatpush.bf16.msra.mxu3 %v8068_v12  ;;  %3046 = vmatpush.bf16.msra.mxu1 %v6603_v41 }
 0x66c   : > { %3014 = vmatpush.bf16.msrb.mxu2 %v6597_v39  ;;  %3040 = vmatpush.bf16.msrb.mxu0 %v6663_v37 }
 0x66f   : > { %3021 = vmatpush.bf16.msra.mxu3 %v8069_v22  ;;  %3047 = vmatpush.bf16.msra.mxu1 %v6613_v13 }
 0x670   : > { %3201 = vmatpush.bf16.msra.mxu2 %v6339_v48  ;;  %3227 = vmatpush.bf16.msra.mxu0 %v6390_v27 }
 0x671   : > { %3015 = vmatmul.bf16.vlgmr.msrb.gmra.mxu2 %v2899_v9  ;;  %3041 = vmatmul.bf16.vlgmr.msrb.gmra.mxu0 %v2899_v9  ;;  %v8206_v9 = vld [vmem:[#allocation100_spill] sm:$0xff] }
 0x673   : > { %3022 = vmatpush.bf16.msra.mxu3 %v8070_v1  ;;  %3048 = vmatpush.bf16.msra.mxu1 %v6625_v3 }
 0x674   : > { %3202 = vmatpush.bf16.msra.mxu2 %v6344_v57  ;;  %3228 = vmatpush.bf16.msra.mxu0 %v6404_v32 }
 0x677   : > { %3023 = vmatpush.bf16.msra.mxu3 %v8203_v20  ;;  %3049 = vmatpush.bf16.msra.mxu1 %v8204_v44 }
 0x678   : > { %3203 = vmatpush.bf16.msra.mxu2 %v6350_v6  ;;  %3229 = vmatpush.bf16.msra.mxu0 %v8202_v43 }
 0x67a   : > { %2976 = vmatmul.bf16.vlgmr.msrb.gmra.mxu3 %v2900_v46  ;;  %3002 = vmatmul.bf16.vlgmr.msrb.gmra.mxu1 %v2900_v46 }
 0x67b   : > { %3024 = vmatpush.bf16.msra.mxu3 %v8205_v59  ;;  %3050 = vmatpush.bf16.msra.mxu1 %v8206_v9 }
 0x67c   : > { %3204 = vmatpush.bf16.msra.mxu2 %v8207_v25  ;;  %3230 = vmatpush.bf16.msra.mxu0 %v8208_v21  ;;  %v8274_v25 = vld [vmem:[#allocation105_spill] sm:$0xff] }
 0x67f   : > { %3025 = vmatpush.bf16.msra.mxu3 %v8209_v56  ;;  %3051 = vmatpush.bf16.msra.mxu1 %v8210_v15 }
 0x680   : > { %3205 = vmatpush.bf16.msra.mxu2 %v8211_v47  ;;  %3231 = vmatpush.bf16.msra.mxu0 %v8212_v14 }
 0x683   : > { %3026 = vmatpush.bf16.msra.mxu3 %v8213_v30  ;;  %3052 = vmatpush.bf16.msra.mxu1 %v8214_v58 }
 0x684   : > { %3206 = vmatpush.bf16.msra.mxu2 %v8215_v18  ;;  %3232 = vmatpush.bf16.msra.mxu0 %v8216_v52 }
 0x687   : > { %3027 = vmatpush.bf16.msra.mxu3 %v8217_v0  ;;  %3053 = vmatpush.bf16.msra.mxu1 %v8218_v50  ;;  %v8228_v50 = vld [vmem:[#allocation65_spill] sm:$0xff] }
 0x688   : > { %3207 = vmatpush.bf16.msra.mxu2 %v8219_v29  ;;  %3233 = vmatpush.bf16.msra.mxu0 %v8220_v31  ;;  %v8229_v29 = vld [vmem:[#allocation23_spill] sm:$0xff]  ;;  %v8230_v31 = vld [vmem:[#allocation41_spill] sm:$0xff] }
 0x68a   : > { %3028 = vmatmul.bf16.vlgmr.msra.gmra.mxu3 %v2900_v46  ;;  %3054 = vmatmul.bf16.vlgmr.msra.gmra.mxu1 %v2900_v46  ;;  %v8233_v46 = vld [vmem:[#allocation25_spill] sm:$0xff] }
 0x68b   : > { %3214 = vmatpush.bf16.msrb.mxu3 %v8221_v35  ;;  %3240 = vmatpush.bf16.msrb.mxu1 %v8222_v17  ;;  %v8231_v35 = vld [vmem:[#allocation38_spill] sm:$0xff]  ;;  %v8232_v17 = vld [vmem:[#allocation69_spill] sm:$0xff] }
 0x68c   : > { %3208 = vmatpush.bf16.msra.mxu2 %v8223_v33  ;;  %3234 = vmatpush.bf16.msra.mxu0 %v8224_v5  ;;  %v8234_v33 = vld [vmem:[#allocation45_spill] sm:$0xff]  ;;  %v8235_v5 = vld [vmem:[#allocation42_spill] sm:$0xff] }
 0x68f   : > { %3215 = vmatpush.bf16.msrb.mxu3 %v8225_v26  ;;  %3241 = vmatpush.bf16.msrb.mxu1 %v8226_v63  ;;  %v8236_v26 = vld [vmem:[#allocation73_spill] sm:$0xff]  ;;  %v8237_v63 = vld [vmem:[#allocation27_spill] sm:$0xff] }
 0x690   : > { %3253 = vmatpush.bf16.msrb.mxu2 %v8227_v53  ;;  %3279 = vmatpush.bf16.msrb.mxu0 %v8228_v50  ;;  %v8238_v53 = vld [vmem:[#allocation50_spill] sm:$0xff]  ;;  %v8239_v50 = vld [vmem:[#allocation47_spill] sm:$0xff] }
 0x693   : > { %3216 = vmatpush.bf16.msrb.mxu3 %v8229_v29  ;;  %3242 = vmatpush.bf16.msrb.mxu1 %v8230_v31  ;;  %v8240_v29 = vld [vmem:[#allocation77_spill] sm:$0xff] }
 0x694   : > { %3254 = vmatpush.bf16.msrb.mxu2 %v8231_v35  ;;  %3280 = vmatpush.bf16.msrb.mxu0 %v8232_v17  ;;  %v8241_v31 = vld [vmem:[#allocation29_spill] sm:$0xff]  ;;  %v8242_v35 = vld [vmem:[#allocation54_spill] sm:$0xff]  ;;  %v8243_v17 = vld [vmem:[#allocation51_spill] sm:$0xff] }
 0x697   : > { %3217 = vmatpush.bf16.msrb.mxu3 %v8233_v46  ;;  %3243 = vmatpush.bf16.msrb.mxu1 %v8234_v33  ;;  %v8244_v46 = vld [vmem:[#allocation81_spill] sm:$0xff]  ;;  %v8245_v33 = vld [vmem:[#allocation31_spill] sm:$0xff] }
 0x698   : > { %3255 = vmatpush.bf16.msrb.mxu2 %v8235_v5  ;;  %3281 = vmatpush.bf16.msrb.mxu0 %v8236_v26  ;;  %v8246_v5 = vld [vmem:[#allocation58_spill] sm:$0xff]  ;;  %v8247_v26 = vld [vmem:[#allocation55_spill] sm:$0xff] }
 0x69b   : > { %3218 = vmatpush.bf16.msrb.mxu3 %v8237_v63  ;;  %3244 = vmatpush.bf16.msrb.mxu1 %v8238_v53  ;;  %v8248_v63 = vld [vmem:[#allocation85_spill] sm:$0xff] }
 0x69c   : > { %3256 = vmatpush.bf16.msrb.mxu2 %v8239_v50  ;;  %3282 = vmatpush.bf16.msrb.mxu0 %v8240_v29  ;;  %v8249_v53 = vld [vmem:[#allocation33_spill] sm:$0xff]  ;;  %v8250_v50 = vld [vmem:[#allocation62_spill] sm:$0xff]  ;;  %v8251_v29 = vld [vmem:[#allocation59_spill] sm:$0xff] }
 0x69f   : > { %3219 = vmatpush.bf16.msrb.mxu3 %v8241_v31  ;;  %3245 = vmatpush.bf16.msrb.mxu1 %v8242_v35  ;;  %v8252_v31 = vld [vmem:[#allocation89_spill] sm:$0xff]  ;;  %v8253_v35 = vld [vmem:[#allocation36_spill] sm:$0xff] }
 0x6a0   : > { %3257 = vmatpush.bf16.msrb.mxu2 %v8243_v17  ;;  %3283 = vmatpush.bf16.msrb.mxu0 %v8244_v46  ;;  %v8254_v17 = vld [vmem:[#allocation66_spill] sm:$0xff]  ;;  %v8255_v46 = vld [vmem:[#allocation63_spill] sm:$0xff] }
 0x6a3   : > { %3220 = vmatpush.bf16.msrb.mxu3 %v8245_v33  ;;  %3246 = vmatpush.bf16.msrb.mxu1 %v8246_v5  ;;  %v8256_v33 = vld [vmem:[#allocation92_spill] sm:$0xff]  ;;  %v8257_v5 = vld [vmem:[#allocation39_spill] sm:$0xff] }
 0x6a4   : > { %3258 = vmatpush.bf16.msrb.mxu2 %v8247_v26  ;;  %3284 = vmatpush.bf16.msrb.mxu0 %v8248_v63  ;;  %v8258_v26 = vld [vmem:[#allocation70_spill] sm:$0xff]  ;;  %v8259_v63 = vld [vmem:[#allocation43_spill] sm:$0xff] }
 0x6a7   : > { %3221 = vmatpush.bf16.msrb.mxu3 %v8249_v53  ;;  %3247 = vmatpush.bf16.msrb.mxu1 %v8250_v50  ;;  %v8260_v53 = vld [vmem:[#allocation74_spill] sm:$0xff]  ;;  %v8261_v50 = vld [vmem:[#allocation48_spill] sm:$0xff] }
 0x6a8   : > { %3259 = vmatpush.bf16.msrb.mxu2 %v8251_v29  ;;  %3285 = vmatpush.bf16.msrb.mxu0 %v8252_v31  ;;  %v8262_v29 = vld [vmem:[#allocation78_spill] sm:$0xff]  ;;  %v8263_v31 = vld [vmem:[#allocation52_spill] sm:$0xff] }
 0x6ab   : > { %3266 = vmatpush.bf16.msra.mxu3 %v8253_v35  ;;  %3292 = vmatpush.bf16.msra.mxu1 %v8254_v17  ;;  %v8264_v35 = vld [vmem:[#allocation82_spill] sm:$0xff]  ;;  %v8265_v17 = vld [vmem:[#allocation56_spill] sm:$0xff] }
 0x6ac   : > { %3260 = vmatpush.bf16.msrb.mxu2 %v8255_v46  ;;  %3286 = vmatpush.bf16.msrb.mxu0 %v8256_v33  ;;  %v8266_v46 = vld [vmem:[#allocation86_spill] sm:$0xff]  ;;  %v8267_v33 = vld [vmem:[#allocation60_spill] sm:$0xff] }
 0x6af   : > { %3267 = vmatpush.bf16.msra.mxu3 %v8257_v5  ;;  %3293 = vmatpush.bf16.msra.mxu1 %v8258_v26  ;;  %v8268_v5 = vld [vmem:[#allocation90_spill] sm:$0xff]  ;;  %v8269_v26 = vld [vmem:[#allocation64_spill] sm:$0xff] }
 0x6b3   : > { %3268 = vmatpush.bf16.msra.mxu3 %v8259_v63  ;;  %3294 = vmatpush.bf16.msra.mxu1 %v8260_v53  ;;  %v8270_v63 = vld [vmem:[#allocation93_spill] sm:$0xff] }
 0x6b7   : > { %3269 = vmatpush.bf16.msra.mxu3 %v8261_v50  ;;  %3295 = vmatpush.bf16.msra.mxu1 %v8262_v29 }
 0x6bb   : > { %3270 = vmatpush.bf16.msra.mxu3 %v8263_v31  ;;  %3296 = vmatpush.bf16.msra.mxu1 %v8264_v35  ;;  %v8271_v35 = vld [vmem:[#allocation106_spill] sm:$0xff] }
 0x6bf   : > { %3271 = vmatpush.bf16.msra.mxu3 %v8265_v17  ;;  %3297 = vmatpush.bf16.msra.mxu1 %v8266_v46 }
 0x6c3   : > { %3272 = vmatpush.bf16.msra.mxu3 %v8267_v33  ;;  %3298 = vmatpush.bf16.msra.mxu1 %v8268_v5  ;;  %v8272_v33 = vld [vmem:[#allocation104_spill] sm:$0xff]  ;;  %v8273_v5 = vld [vmem:[#allocation107_spill] sm:$0xff] }
 0x6c7   : > { %3273 = vmatpush.bf16.msra.mxu3 %v8269_v26  ;;  %3299 = vmatpush.bf16.msra.mxu1 %v8270_v63 }
 0x6cb   : > { %v2938_v53 = vpop.f32.mrf.mxu0 }
 0x6cc   : > { %v2939_v58 = vadd.f32 %v2938_v53, %v8271_v35 }
 0x6d1   : > { %v2912_v50 = vpop.f32.mrf.mxu2 }
 0x6d2   : > { %v2913_v47 = vadd.f32 %v2912_v50, %v8272_v33 }
 0x6d3   : > { %v2940_v0 = vpop.f32.mrf.mxu0 }
 0x6d9   : > { %v2914_v29 = vpop.f32.mrf.mxu2 }
 0x6db   : > { %v2990_v52 = vpop.f32.mrf.mxu0 }
 0x6e1   : > { %v2964_v31 = vpop.f32.mrf.mxu2 }
 0x6e3   : > { %v2992_v18 = vpop.f32.mrf.mxu0 }
 0x6e7   : > { %v2951_v17 = vpop.f32.mrf.mxu1 }
 0x6e8   : > { %v2952_v30 = vadd.f32 %v2951_v17, %v2939_v58 }
 0x6e9   : > { %v2966_v14 = vpop.f32.mrf.mxu2 }
 0x6ea   : > { %v3083_v46 = vrot.slane %v2952_v30, 5  ;;  %v8275_v14 = vld [vmem:[#allocation110_spill] sm:$0xff] }
 0x6eb   : > { %v2991_v17 = vadd.f32 %v2990_v52, %v8275_v14 }
 0x6ec   : > { %v3085_v15 = vadd.f32 %v3083_v46, %v8273_v5 }
 0x6ed   : > { %v2925_v26 = vpop.f32.mrf.mxu3 }
 0x6ee   : > { %v7185_v56 = vpop.f32.mrf.mxu0  ;;  %v5288_v63 = vmul.f32 -1.442695, %v3085_v15  ;;  %v2926_v21 = vadd.f32 %v2925_v26, %v2913_v47  ;;  %v8276_v26 = vld [vmem:[#allocation111_spill] sm:$0xff] }
 0x6ef   : > { %v2953_v0 = vpop.f32.mrf.mxu1 }
 0x6f0   : > { %5674 = vpow2.f32 %v5288_v63  ;;  %v3060_v29 = vrot.slane %v2926_v21, 5 }
 0x6f2   : > { %v3062_v18 = vadd.f32 %v3060_v29, %v8274_v25 }
 0x6f4   : > { %v3016_v9 = vpop.f32.mrf.mxu2  ;;  %v5287_v53 = vmul.f32 -1.442695, %v3062_v18 }
 0x6f5   : > { %v2927_v35 = vpop.f32.mrf.mxu3 }
 0x6f6   : > { %v3044_v58 = vpop.f32.mrf.mxu0  ;;  %v5675_v30 = vpop.eup %5674  ;;  %5676 = vpow2.f32 %v5287_v53 }
 0x6f7   : > { %v3089_v50 = vadd.f32 1.0, %v5675_v30  ;;  %v3003_v46 = vpop.f32.mrf.mxu1 }
 0x6f8   : > { %v3004_v5 = vadd.f32 %v3003_v46, %v2991_v17  ;;  %v8277_v46 = vld [vmem:[#allocation108_spill] sm:$0xff] }
 0x6f9   : > { %5678 = vrcp.f32 %v3089_v50  ;;  %vm3095_vm10 = vweird.f32 %v3089_v50 }
 0x6fa   : > { %v3119_v33 = vrot.slane %v3004_v5, 4 }
 0x6fc   : > { %v3018_v15 = vpop.f32.mrf.mxu2  ;;  %v5677_v47 = vpop.eup %5676  ;;  %v3121_v63 = vadd.f32 %v3119_v33, %v8276_v26  ;;  %v3017_v26 = vadd.f32 %v3016_v9, %v6770_v49  ;;  %v3099_v9 = vand.u32 2147483647, %v3089_v50 }
 0x6fd   : > { %v3066_v21 = vadd.f32 1.0, %v5677_v47  ;;  %v2977_v0 = vpop.f32.mrf.mxu3  ;;  %v2965_v15 = vadd.f32 %v2964_v31, %v8277_v46 }
 0x6fe   : > { %v5289_v29 = vmul.f32 -1.442695, %v3121_v63  ;;  %vm3100_vm12 = vcmp.eq.f32.partialorder %v3099_v9, 8.507059e+37 }
 0x6ff   : > { %5680 = vrcp.f32 %v3066_v21  ;;  %v3005_v18 = vpop.f32.mrf.mxu1  ;;  %v5679_v35 = vpop.eup %5678  ;;  %v3078_v33 = vand.u32 2147483648, %v3066_v21  ;;  %v2978_v47 = vadd.f32 %v2977_v0, %v2965_v15  ;;  %vm3072_vm6 = vweird.f32 %v3066_v21 }
 0x700   : > { %5682 = vpow2.f32 %v5289_v29  ;;  %v3091_v58 = vmul.f32 %v5679_v35, %v3089_v50  ;;  %v3076_v18 = vand.u32 2147483647, %v3066_v21  ;;  %vm3096_vm9 = vweird.f32 %v5679_v35 }
 0x701   : > { %v3106_v6 = vrot.slane %v2978_v47, 5  ;;  %vm3097_vm11 = vmor %vm3095_vm10, %vm3096_vm9 }
 0x702   : > { %v3092_v14 = vsub.f32 1.0, %v3091_v58  ;;  %v3079_v58 = vor.u32 1.1754944e-38, %v3078_v33  ;;  %vm3077_vm8 = vcmp.eq.f32.partialorder %v3076_v18, 8.507059e+37 }
 0x704   : > { %v3093_v29 = vmul.f32 %v5679_v35, %v3092_v14 }
 0x705   : > { %v5681_v25 = vpop.eup %5680  ;;  %v2979_v52 = vpop.f32.mrf.mxu3 }
 0x706   : > { %v5683_v53 = vpop.eup %5682  ;;  %v3068_v30 = vmul.f32 %v5681_v25, %v3066_v21  ;;  %vm3073_vm5 = vweird.f32 %v5681_v25  ;;  %v3094_v44 = vadd.f32 %v5679_v35, %v3093_v29 }
 0x707   : > { %v7190_v17 = vadd.f32 1.0, %v5683_v53  ;;  %v3055_v5 = vpop.f32.mrf.mxu1  ;;  %vm3074_vm7 = vmor %vm3072_vm6, %vm3073_vm5 }
 0x708   : > { %v3069_v59 = vsub.f32 1.0, %v3068_v30  ;;  %v3098_v47 = vsel %vm3097_vm11, %v5679_v35, %v3094_v44 }
 0x709   : > { %5684 = vrcp.f32 %v7190_v17  ;;  %vm3131_vm14 = vweird.f32 %v7190_v17 }
 0x70a   : > { %v3070_v63 = vmul.f32 %v5681_v25, %v3069_v59  ;;  %v3101_v59 = vand.u32 2147483648, %v3089_v50 }
 0x70c   : > { %v3071_v52 = vadd.f32 %v5681_v25, %v3070_v63 }
 0x70d   : > { %v3029_v53 = vpop.f32.mrf.mxu3 }
 0x70e   : > { %v3075_v43 = vsel %vm3074_vm7, %v5681_v25, %v3071_v52  ;;  %v3030_v31 = vadd.f32 %v3029_v53, %v3017_v26  ;;  %v3102_v26 = vor.u32 1.1754944e-38, %v3101_v59  ;;  %v3135_v53 = vand.u32 2147483647, %v7190_v17 }
 0x70f   : > { %v5685_v30 = vpop.eup %5684  ;;  %v3080_v46 = vsel %vm3077_vm8, %v3079_v58, %v3075_v43  ;;  %v3057_v0 = vpop.f32.mrf.mxu1  ;;  %v3043_v58 = vadd.f32 %v7185_v56, %v6800_v4 }
 0x710   : > { %v3108_v15 = vmul.f32 %v3106_v6, %v3080_v46  ;;  %v3127_v14 = vmul.f32 %v5685_v30, %v7190_v17  ;;  %v3142_v20 = vrot.slane %v3030_v31, 4  ;;  %v3103_v29 = vsel %vm3100_vm12, %v3102_v26, %v3098_v47 }
 0x711   : > { %v3111_v6 = vsub.f32 1.0, %v3103_v29  ;;  %v3114_v46 = vrot.slane %v7067_v61, 7  ;;  %vm3132_vm13 = vweird.f32 %v5685_v30  ;;  %v3056_v59 = vadd.f32 %v3055_v5, %v3043_v58 }
 0x712   : > { %v3109_v21 = vadd.f32 %v3108_v15, %v8127_v54  ;;  %v3128_v33 = vsub.f32 1.0, %v3127_v14  ;;  %v3144_v25 = vadd.f32 %v3142_v20, %v6782_v11  ;;  %v3137_v20 = vand.u32 2147483648, %v7190_v17  ;;  %vm3133_vm15 = vmor %vm3131_vm14, %vm3132_vm13 }
 0x713   : > { %v3116_v35 = vmul.f32 %v3114_v46, %v3103_v29  ;;  %vm3136_vm0 = vcmp.eq.f32.partialorder %v3135_v53, 8.507059e+37 }
 0x714   : > { %5686 = vtanh.f32 %v3109_v21  ;;  %v5290_v63 = vmul.f32 -1.442695, %v3144_v25  ;;  %v3129_v43 = vmul.f32 %v5685_v30, %v3128_v33  ;;  %v3138_v14 = vor.u32 1.1754944e-38, %v3137_v20 }
 0x715   : > { %v3031_v18 = vpop.f32.mrf.mxu3  ;;  %v3165_v25 = vrot.slane %v3056_v59, 4  ;;  %v3172_v20 = vrot.slane %v7089_v40, 6 }
 0x716   : > { %5688 = vpow2.f32 %v5290_v63  ;;  %v3130_v52 = vadd.f32 %v5685_v30, %v3129_v43 }
 0x718   : > { %v3134_v61 = vsel %vm3133_vm15, %v5685_v30, %v3130_v52 }
 0x719   : > { %v3139_v56 = vsel %vm3136_vm0, %v3138_v14, %v3134_v61 }
 0x71a   : > { %v5687_v50 = vpop.eup %5686  ;;  %v3167_v47 = vmul.f32 %v3165_v25, %v3139_v56  ;;  %v8280_v25 = vld [vmem:[#allocation22_spill] sm:$0xff] }
 0x71b   : > { %v3112_v44 = vmul.f32 %v5687_v50, %v3111_v6 }
 0x71c   : > { %v5689_v31 = vpop.eup %5688  ;;  %v3168_v43 = vadd.f32 %v3167_v47, %v6731_v34  ;;  %v8282_v47 = vld [vmem:[#allocation84_spill] sm:$0xff] }
 0x71d   : > { %v7204_v0 = vadd.f32 %v3116_v35, %v3112_v44  ;;  %v3148_v15 = vadd.f32 1.0, %v5689_v31 }
 0x71f   : > { %v3176_v9 = vmul.f32 %v7204_v0, %v6928_v16  ;;  %5690 = vrcp.f32 %v3148_v15  ;;  %v3189_v21 = vpack.c.bf16 %v7204_v0, %v7204_v0  ;;  %v3160_v29 = vand.u32 2147483648, %v3148_v15 }
 0x720   : > { %v3158_v46 = vand.u32 2147483647, %v3148_v15  ;;  %5692 = vtanh.f32 %v3168_v43  ;;  %vm3154_vm2 = vweird.f32 %v3148_v15  ;;  %v8286_v43 = vld [vmem:[#allocation88_spill] sm:$0xff] }
 0x721   : > { %v3178_v33 = vrot.slane %v3176_v9, 3  ;;  %v3192_v17 = vshrl.u32 %v3189_v21, 16  ;;  %v3161_v52 = vor.u32 1.1754944e-38, %v3160_v29  ;;  %v8288_v29 = vld [vmem:[#allocation26_spill] sm:$0xff] }
 0x722   : > { %vm3159_vm4 = vcmp.eq.f32.partialorder %v3158_v46, 8.507059e+37  ;;  %v8290_v46 = vld [vmem:[#allocation91_spill] sm:$0xff] }
 0x723   : > { %v7211_v26 = vadd.f32 %v3178_v33, %v7074_v19  ;;  %v3194_v5 = vrot.slane %v3192_v17, 1  ;;  %v8279_v33 = vld [vmem:[#allocation98_spill] sm:$0xff]  ;;  %v8281_v17 = vld [vmem:[#allocation40_spill] sm:$0xff] }
 0x725   : > { %v5691_v30 = vpop.eup %5690  ;;  %3209 = vmatmul.bf16.vlgmr.msra.gmra.mxu2 %v3194_v5  ;;  %3235 = vmatmul.bf16.vlgmr.msra.gmra.mxu0 %v3194_v5 }
 0x726   : > { %v3150_v63 = vmul.f32 %v5691_v30, %v3148_v15  ;;  %3305 = vmatpush.bf16.msra.mxu2 %v8062_v7  ;;  %3331 = vmatpush.bf16.msra.mxu0 %v6601_v55  ;;  %vm3155_vm1 = vweird.f32 %v5691_v30  ;;  %v5693_v35 = vpop.eup %5692 }
 0x727   : > { %vm3156_vm3 = vmor %vm3154_vm2, %vm3155_vm1 }
 0x728   : > { %v3151_v18 = vsub.f32 1.0, %v3150_v63  ;;  %v8285_v63 = vld [vmem:[#allocation44_spill] sm:$0xff] }
 0x72a   : > { %v3152_v6 = vmul.f32 %v5691_v30, %v3151_v18  ;;  %3306 = vmatpush.bf16.msra.mxu2 %v8128_v42  ;;  %3332 = vmatpush.bf16.msra.mxu0 %v8129_v62  ;;  %v8287_v18 = vld [vmem:[#allocation101_spill] sm:$0xff] }
 0x72c   : > { %v3153_v19 = vadd.f32 %v5691_v30, %v3152_v6  ;;  %v8289_v6 = vld [vmem:[#allocation49_spill] sm:$0xff] }
 0x72e   : > { %v3157_v50 = vsel %vm3156_vm3, %v5691_v30, %v3153_v19  ;;  %3307 = vmatpush.bf16.msra.mxu2 %v8130_v45  ;;  %3333 = vmatpush.bf16.msra.mxu0 %v8131_v2  ;;  %v8284_v30 = vld [vmem:[#allocation24_spill] sm:$0xff]  ;;  %v8291_v19 = vld [vmem:[#allocation102_spill] sm:$0xff] }
 0x72f   : > { %v3162_v58 = vsel %vm3159_vm4, %v3161_v52, %v3157_v50  ;;  %v8292_v52 = vld [vmem:[#allocation28_spill] sm:$0xff]  ;;  %v8293_v50 = vld [vmem:[#allocation53_spill] sm:$0xff] }
 0x730   : > { %v3170_v44 = vsub.f32 1.0, %v3162_v58  ;;  %v3174_v31 = vmul.f32 %v3172_v20, %v3162_v58  ;;  %v8294_v58 = vld [vmem:[#allocation94_spill] sm:$0xff]  ;;  %v8295_v20 = vld [vmem:[#allocation103_spill] sm:$0xff] }
 0x732   : > { %v3171_v53 = vmul.f32 %v5693_v35, %v3170_v44  ;;  %3308 = vmatpush.bf16.msra.mxu2 %v8132_v38  ;;  %3334 = vmatpush.bf16.msra.mxu0 %v8133_v51  ;;  %v8296_v44 = vld [vmem:[#allocation30_spill] sm:$0xff]  ;;  %v8297_v35 = vld [vmem:[#allocation57_spill] sm:$0xff] }
 0x734   : > { %v3175_v59 = vadd.f32 %v3174_v31, %v3171_v53  ;;  %v8298_v53 = vld [vmem:[#allocation20_spill] sm:$0xff]  ;;  %v8299_v31 = vld [vmem:[#allocation34_spill] sm:$0xff] }
 0x735   : > { %3261 = vmatmul.bf16.vlgmr.msrb.gmra.mxu2 %v3194_v5  ;;  %3287 = vmatmul.bf16.vlgmr.msrb.gmra.mxu0 %v3194_v5 }
 0x736   : > { %v7223_v61 = vrot.slane %v3175_v59, 1  ;;  %v3181_v15 = vmul.f32 %v3175_v59, %v6928_v16  ;;  %3309 = vmatpush.bf16.msra.mxu2 %v8134_v24  ;;  %3335 = vmatpush.bf16.msra.mxu0 %v8135_v8  ;;  %v8300_v59 = vld [vmem:[#allocation32_spill] sm:$0xff] }
 0x738   : > { %v3190_v40 = vpack.c.bf16 %v7223_v61, %v7223_v61  ;;  %v3183_v14 = vrot.slane %v3181_v15, 5  ;;  %v8301_v15 = vld [vmem:[#allocation61_spill] sm:$0xff] }
 0x73a   : > { %v3196_v9 = vshrl.u32 %v3190_v40, 16  ;;  %v7231_v56 = vadd.f32 %v3183_v14, %v7096_v28  ;;  %3310 = vmatpush.bf16.msra.mxu2 %v8067_v36  ;;  %3336 = vmatpush.bf16.msra.mxu0 %v6647_v10  ;;  %v8278_v28 = vld [vmem:[#allocation80_spill] sm:$0xff]  ;;  %v8302_v40 = vld [vmem:[#allocation21_spill] sm:$0xff] }
 0x73b   : > { %v8303_v14 = vld [vmem:[#allocation37_spill] sm:$0xff] }
 0x73c   : > { %v3198_v21 = vrot.slane %v3196_v9, 1  ;;  %v8304_v9 = vld [vmem:[#allocation35_spill] sm:$0xff] }
 0x73e   : > { %3222 = vmatmul.bf16.vlgmr.msrb.gmra.mxu3 %v3198_v21  ;;  %3248 = vmatmul.bf16.vlgmr.msrb.gmra.mxu1 %v3198_v21 }
 0x73f   : > { %3311 = vmatpush.bf16.msra.mxu2 %v6585_v60  ;;  %3337 = vmatpush.bf16.msra.mxu0 %v6655_v23 }
 0x740   : > { %3318 = vmatpush.bf16.msrb.mxu3 %v8068_v12  ;;  %3344 = vmatpush.bf16.msrb.mxu1 %v6603_v41 }
 0x743   : > { %3312 = vmatpush.bf16.msra.mxu2 %v6597_v39  ;;  %3338 = vmatpush.bf16.msra.mxu0 %v6663_v37 }
 0x744   : > { %3319 = vmatpush.bf16.msrb.mxu3 %v8069_v22  ;;  %3345 = vmatpush.bf16.msrb.mxu1 %v6613_v13 }
 0x746   : > { %3313 = vmatmul.bf16.vlgmr.msra.gmra.mxu2 %v3194_v5  ;;  %3339 = vmatmul.bf16.vlgmr.msra.gmra.mxu0 %v3194_v5  ;;  %v8283_v5 = vld [vmem:[#allocation100_spill] sm:$0xff] }
 0x747   : > { %3493 = vmatpush.bf16.msrb.mxu2 %v6339_v48  ;;  %3519 = vmatpush.bf16.msrb.mxu0 %v6390_v27 }
 0x748   : > { %3320 = vmatpush.bf16.msrb.mxu3 %v8070_v1  ;;  %3346 = vmatpush.bf16.msrb.mxu1 %v6625_v3 }
 0x74b   : > { %3494 = vmatpush.bf16.msrb.mxu2 %v6344_v57  ;;  %3520 = vmatpush.bf16.msrb.mxu0 %v6404_v32 }
 0x74c   : > { %3321 = vmatpush.bf16.msrb.mxu3 %v8278_v28  ;;  %3347 = vmatpush.bf16.msrb.mxu1 %v8279_v33 }
 0x74e   : > { %3274 = vmatmul.bf16.vlgmr.msra.gmra.mxu3 %v3198_v21  ;;  %3300 = vmatmul.bf16.vlgmr.msra.gmra.mxu1 %v3198_v21 }
 0x74f   : > { %3495 = vmatpush.bf16.msrb.mxu2 %v8280_v25  ;;  %3521 = vmatpush.bf16.msrb.mxu0 %v8281_v17 }
 0x750   : > { %3322 = vmatpush.bf16.msrb.mxu3 %v8282_v47  ;;  %3348 = vmatpush.bf16.msrb.mxu1 %v8283_v5 }
 0x753   : > { %3496 = vmatpush.bf16.msrb.mxu2 %v8284_v30  ;;  %3522 = vmatpush.bf16.msrb.mxu0 %v8285_v63  ;;  %v8351_v30 = vld [vmem:[#allocation105_spill] sm:$0xff] }
 0x754   : > { %3323 = vmatpush.bf16.msrb.mxu3 %v8286_v43  ;;  %3349 = vmatpush.bf16.msrb.mxu1 %v8287_v18 }
 0x757   : > { %3497 = vmatpush.bf16.msrb.mxu2 %v8288_v29  ;;  %3523 = vmatpush.bf16.msrb.mxu0 %v8289_v6  ;;  %v8349_v6 = vld [vmem:[#allocation104_spill] sm:$0xff]  ;;  %v8350_v29 = vld [vmem:[#allocation107_spill] sm:$0xff] }
 0x758   : > { %3324 = vmatpush.bf16.msrb.mxu3 %v8290_v46  ;;  %3350 = vmatpush.bf16.msrb.mxu1 %v8291_v19 }
 0x75b   : > { %3498 = vmatpush.bf16.msrb.mxu2 %v8292_v52  ;;  %3524 = vmatpush.bf16.msrb.mxu0 %v8293_v50  ;;  %v8348_v52 = vld [vmem:[#allocation106_spill] sm:$0xff] }
 0x75c   : > { %3325 = vmatpush.bf16.msrb.mxu3 %v8294_v58  ;;  %3351 = vmatpush.bf16.msrb.mxu1 %v8295_v20  ;;  %v8305_v20 = vld [vmem:[#allocation65_spill] sm:$0xff] }
 0x75f   : > { %3499 = vmatpush.bf16.msrb.mxu2 %v8296_v44  ;;  %3525 = vmatpush.bf16.msrb.mxu0 %v8297_v35  ;;  %v8306_v44 = vld [vmem:[#allocation23_spill] sm:$0xff]  ;;  %v8307_v35 = vld [vmem:[#allocation41_spill] sm:$0xff] }
 0x760   : > { %3506 = vmatpush.bf16.msra.mxu3 %v8298_v53  ;;  %3532 = vmatpush.bf16.msra.mxu1 %v8299_v31  ;;  %v8308_v53 = vld [vmem:[#allocation38_spill] sm:$0xff]  ;;  %v8309_v31 = vld [vmem:[#allocation69_spill] sm:$0xff] }
 0x761   : > { %3326 = vmatmul.bf16.vlgmr.msrb.gmra.mxu3 %v3198_v21  ;;  %3352 = vmatmul.bf16.vlgmr.msrb.gmra.mxu1 %v3198_v21  ;;  %v8310_v21 = vld [vmem:[#allocation25_spill] sm:$0xff] }
 0x763   : > { %3500 = vmatpush.bf16.msrb.mxu2 %v8300_v59  ;;  %3526 = vmatpush.bf16.msrb.mxu0 %v8301_v15  ;;  %v8311_v59 = vld [vmem:[#allocation45_spill] sm:$0xff]  ;;  %v8312_v15 = vld [vmem:[#allocation42_spill] sm:$0xff] }
 0x764   : > { %3507 = vmatpush.bf16.msra.mxu3 %v8302_v40  ;;  %3533 = vmatpush.bf16.msra.mxu1 %v8303_v14  ;;  %v8313_v40 = vld [vmem:[#allocation73_spill] sm:$0xff]  ;;  %v8314_v14 = vld [vmem:[#allocation27_spill] sm:$0xff] }
 0x767   : > { %3545 = vmatpush.bf16.msra.mxu2 %v8304_v9  ;;  %3571 = vmatpush.bf16.msra.mxu0 %v8305_v20  ;;  %v8315_v9 = vld [vmem:[#allocation50_spill] sm:$0xff]  ;;  %v8316_v20 = vld [vmem:[#allocation47_spill] sm:$0xff] }
 0x768   : > { %3508 = vmatpush.bf16.msra.mxu3 %v8306_v44  ;;  %3534 = vmatpush.bf16.msra.mxu1 %v8307_v35  ;;  %v8317_v44 = vld [vmem:[#allocation77_spill] sm:$0xff] }
 0x769   : > { %v8318_v35 = vld [vmem:[#allocation29_spill] sm:$0xff] }
 0x76b   : > { %3546 = vmatpush.bf16.msra.mxu2 %v8308_v53  ;;  %3572 = vmatpush.bf16.msra.mxu0 %v8309_v31  ;;  %v8319_v53 = vld [vmem:[#allocation54_spill] sm:$0xff]  ;;  %v8320_v31 = vld [vmem:[#allocation51_spill] sm:$0xff] }
 0x76c   : > { %3509 = vmatpush.bf16.msra.mxu3 %v8310_v21  ;;  %3535 = vmatpush.bf16.msra.mxu1 %v8311_v59  ;;  %v8321_v21 = vld [vmem:[#allocation81_spill] sm:$0xff]  ;;  %v8322_v59 = vld [vmem:[#allocation31_spill] sm:$0xff] }
 0x76f   : > { %3547 = vmatpush.bf16.msra.mxu2 %v8312_v15  ;;  %3573 = vmatpush.bf16.msra.mxu0 %v8313_v40  ;;  %v8323_v15 = vld [vmem:[#allocation58_spill] sm:$0xff]  ;;  %v8324_v40 = vld [vmem:[#allocation55_spill] sm:$0xff] }
 0x770   : > { %3510 = vmatpush.bf16.msra.mxu3 %v8314_v14  ;;  %3536 = vmatpush.bf16.msra.mxu1 %v8315_v9  ;;  %v8325_v14 = vld [vmem:[#allocation85_spill] sm:$0xff] }
 0x771   : > { %v8326_v9 = vld [vmem:[#allocation33_spill] sm:$0xff] }
 0x773   : > { %3548 = vmatpush.bf16.msra.mxu2 %v8316_v20  ;;  %3574 = vmatpush.bf16.msra.mxu0 %v8317_v44  ;;  %v8327_v20 = vld [vmem:[#allocation62_spill] sm:$0xff]  ;;  %v8328_v44 = vld [vmem:[#allocation59_spill] sm:$0xff] }
 0x774   : > { %3511 = vmatpush.bf16.msra.mxu3 %v8318_v35  ;;  %3537 = vmatpush.bf16.msra.mxu1 %v8319_v53  ;;  %v8329_v35 = vld [vmem:[#allocation89_spill] sm:$0xff]  ;;  %v8330_v53 = vld [vmem:[#allocation36_spill] sm:$0xff] }
 0x777   : > { %3549 = vmatpush.bf16.msra.mxu2 %v8320_v31  ;;  %3575 = vmatpush.bf16.msra.mxu0 %v8321_v21  ;;  %v8331_v31 = vld [vmem:[#allocation66_spill] sm:$0xff]  ;;  %v8332_v21 = vld [vmem:[#allocation63_spill] sm:$0xff] }
 0x778   : > { %3512 = vmatpush.bf16.msra.mxu3 %v8322_v59  ;;  %3538 = vmatpush.bf16.msra.mxu1 %v8323_v15  ;;  %v8333_v59 = vld [vmem:[#allocation92_spill] sm:$0xff]  ;;  %v8334_v15 = vld [vmem:[#allocation39_spill] sm:$0xff] }
 0x77b   : > { %3550 = vmatpush.bf16.msra.mxu2 %v8324_v40  ;;  %3576 = vmatpush.bf16.msra.mxu0 %v8325_v14  ;;  %v8335_v40 = vld [vmem:[#allocation70_spill] sm:$0xff]  ;;  %v8336_v14 = vld [vmem:[#allocation43_spill] sm:$0xff] }
 0x77c   : > { %3513 = vmatpush.bf16.msra.mxu3 %v8326_v9  ;;  %3539 = vmatpush.bf16.msra.mxu1 %v8327_v20  ;;  %v8337_v9 = vld [vmem:[#allocation74_spill] sm:$0xff]  ;;  %v8338_v20 = vld [vmem:[#allocation48_spill] sm:$0xff] }
 0x77f   : > { %3551 = vmatpush.bf16.msra.mxu2 %v8328_v44  ;;  %3577 = vmatpush.bf16.msra.mxu0 %v8329_v35  ;;  %v8339_v44 = vld [vmem:[#allocation78_spill] sm:$0xff]  ;;  %v8340_v35 = vld [vmem:[#allocation52_spill] sm:$0xff] }
 0x780   : > { %3558 = vmatpush.bf16.msrb.mxu3 %v8330_v53  ;;  %3584 = vmatpush.bf16.msrb.mxu1 %v8331_v31  ;;  %v8341_v53 = vld [vmem:[#allocation82_spill] sm:$0xff]  ;;  %v8342_v31 = vld [vmem:[#allocation56_spill] sm:$0xff] }
 0x783   : > { %3552 = vmatpush.bf16.msra.mxu2 %v8332_v21  ;;  %3578 = vmatpush.bf16.msra.mxu0 %v8333_v59  ;;  %v8343_v21 = vld [vmem:[#allocation86_spill] sm:$0xff]  ;;  %v8344_v59 = vld [vmem:[#allocation60_spill] sm:$0xff] }
 0x784   : > { %3559 = vmatpush.bf16.msrb.mxu3 %v8334_v15  ;;  %3585 = vmatpush.bf16.msrb.mxu1 %v8335_v40  ;;  %v8345_v15 = vld [vmem:[#allocation90_spill] sm:$0xff]  ;;  %v8346_v40 = vld [vmem:[#allocation64_spill] sm:$0xff] }
 0x788   : > { %3560 = vmatpush.bf16.msrb.mxu3 %v8336_v14  ;;  %3586 = vmatpush.bf16.msrb.mxu1 %v8337_v9  ;;  %v8347_v14 = vld [vmem:[#allocation93_spill] sm:$0xff] }
 0x78c   : > { %3561 = vmatpush.bf16.msrb.mxu3 %v8338_v20  ;;  %3587 = vmatpush.bf16.msrb.mxu1 %v8339_v44 }
 0x790   : > { %3562 = vmatpush.bf16.msrb.mxu3 %v8340_v35  ;;  %3588 = vmatpush.bf16.msrb.mxu1 %v8341_v53 }
 0x794   : > { %3563 = vmatpush.bf16.msrb.mxu3 %v8342_v31  ;;  %3589 = vmatpush.bf16.msrb.mxu1 %v8343_v21 }
 0x798   : > { %3564 = vmatpush.bf16.msrb.mxu3 %v8344_v59  ;;  %3590 = vmatpush.bf16.msrb.mxu1 %v8345_v15 }
 0x79c   : > { %3565 = vmatpush.bf16.msrb.mxu3 %v8346_v40  ;;  %3591 = vmatpush.bf16.msrb.mxu1 %v8347_v14 }
 0x7a2   : > { %v3236_v9 = vpop.f32.mrf.mxu0 }
 0x7a3   : > { %v3237_v53 = vadd.f32 %v3236_v9, %v8348_v52 }
 0x7a8   : > { %v3210_v20 = vpop.f32.mrf.mxu2 }
 0x7a9   : > { %v3211_v59 = vadd.f32 %v3210_v20, %v8349_v6 }
 0x7aa   : > { %v3238_v58 = vpop.f32.mrf.mxu0 }
 0x7b0   : > { %v3212_v44 = vpop.f32.mrf.mxu2 }
 0x7b2   : > { %v3288_v50 = vpop.f32.mrf.mxu0 }
 0x7b8   : > { %v3262_v35 = vpop.f32.mrf.mxu2 }
 0x7ba   : > { %v3290_v19 = vpop.f32.mrf.mxu0 }
 0x7bb   : > { %v3249_v31 = vpop.f32.mrf.mxu1 }
 0x7bc   : > { %v3250_v46 = vadd.f32 %v3249_v31, %v3237_v53 }
 0x7be   : > { %v3381_v21 = vrot.slane %v3250_v46, 4  ;;  %v8352_v46 = vld [vmem:[#allocation110_spill] sm:$0xff] }
 0x7bf   : > { %v3289_v31 = vadd.f32 %v3288_v50, %v8352_v46 }
 0x7c0   : > { %v3383_v15 = vadd.f32 %v3381_v21, %v8350_v29  ;;  %v3264_v18 = vpop.f32.mrf.mxu2 }
 0x7c1   : > { %v3223_v40 = vpop.f32.mrf.mxu3 }
 0x7c2   : > { %v5292_v43 = vmul.f32 -1.442695, %v3383_v15  ;;  %v3224_v14 = vadd.f32 %v3223_v40, %v3211_v59  ;;  %v8353_v40 = vld [vmem:[#allocation111_spill] sm:$0xff] }
 0x7c3   : > { %v7322_v63 = vpop.f32.mrf.mxu0  ;;  %v3251_v58 = vpop.f32.mrf.mxu1 }
 0x7c4   : > { %5694 = vpow2.f32 %v5292_v43  ;;  %v3358_v44 = vrot.slane %v3224_v14, 4 }
 0x7c6   : > { %v3360_v5 = vadd.f32 %v3358_v44, %v8351_v30 }
 0x7c8   : > { %v5291_v9 = vmul.f32 -1.442695, %v3360_v5 }
 0x7c9   : > { %v3314_v19 = vpop.f32.mrf.mxu2  ;;  %v3225_v52 = vpop.f32.mrf.mxu3 }
 0x7ca   : > { %v5695_v53 = vpop.eup %5694  ;;  %5696 = vpow2.f32 %v5291_v9 }
 0x7cb   : > { %v3387_v20 = vadd.f32 1.0, %v5695_v53  ;;  %v3342_v21 = vpop.f32.mrf.mxu0  ;;  %v3301_v18 = vpop.f32.mrf.mxu1 }
 0x7cc   : > { %v3302_v29 = vadd.f32 %v3301_v18, %v3289_v31 }
 0x7cd   : > { %5698 = vrcp.f32 %v3387_v20  ;;  %vm3393_vm10 = vweird.f32 %v3387_v20 }
 0x7ce   : > { %v3417_v59 = vrot.slane %v3302_v29, 5  ;;  %v8354_v29 = vld [vmem:[#allocation108_spill] sm:$0xff] }
 0x7cf   : > { %v3263_v18 = vadd.f32 %v3262_v35, %v8354_v29 }
 0x7d0   : > { %v5697_v15 = vpop.eup %5696  ;;  %v3419_v58 = vadd.f32 %v3417_v59, %v8353_v40 }
 0x7d1   : > { %v3364_v43 = vadd.f32 1.0, %v5697_v15  ;;  %v3316_v14 = vpop.f32.mrf.mxu2  ;;  %v3275_v6 = vpop.f32.mrf.mxu3 }
 0x7d2   : > { %v5293_v44 = vmul.f32 -1.442695, %v3419_v58  ;;  %v3276_v58 = vadd.f32 %v3275_v6, %v3263_v18  ;;  %v3399_v6 = vand.u32 2147483648, %v3387_v20 }
 0x7d3   : > { %5700 = vrcp.f32 %v3364_v43  ;;  %v3303_v5 = vpop.f32.mrf.mxu1  ;;  %v5699_v52 = vpop.eup %5698  ;;  %v3376_v15 = vand.u32 2147483648, %v3364_v43  ;;  %vm3370_vm6 = vweird.f32 %v3364_v43 }
 0x7d4   : > { %5702 = vpow2.f32 %v5293_v44  ;;  %v3389_v30 = vmul.f32 %v5699_v52, %v3387_v20  ;;  %v3374_v5 = vand.u32 2147483647, %v3364_v43  ;;  %v3404_v33 = vrot.slane %v3276_v58, 4 }
 0x7d5   : > { %vm3394_vm9 = vweird.f32 %v5699_v52  ;;  %v3400_v58 = vor.u32 1.1754944e-38, %v3399_v6 }
 0x7d6   : > { %v3390_v46 = vsub.f32 1.0, %v3389_v30  ;;  %v3377_v30 = vor.u32 1.1754944e-38, %v3376_v15  ;;  %vm3375_vm8 = vcmp.eq.f32.partialorder %v3374_v5, 8.507059e+37  ;;  %vm3395_vm11 = vmor %vm3393_vm10, %vm3394_vm9 }
 0x7d8   : > { %v3391_v44 = vmul.f32 %v5699_v52, %v3390_v46 }
 0x7d9   : > { %v5701_v50 = vpop.eup %5700  ;;  %v3277_v9 = vpop.f32.mrf.mxu3 }
 0x7da   : > { %v5703_v53 = vpop.eup %5702  ;;  %v3366_v21 = vmul.f32 %v5701_v50, %v3364_v43  ;;  %vm3371_vm5 = vweird.f32 %v5701_v50  ;;  %v3315_v9 = vadd.f32 %v3314_v19, %v6770_v49  ;;  %v3392_v28 = vadd.f32 %v5699_v52, %v3391_v44 }
 0x7db   : > { %v7327_v31 = vadd.f32 1.0, %v5703_v53  ;;  %vm3372_vm7 = vmor %vm3370_vm6, %vm3371_vm5  ;;  %v3397_v43 = vand.u32 2147483647, %v3387_v20 }
 0x7dc   : > { %v3367_v47 = vsub.f32 1.0, %v3366_v21 }
 0x7dd   : > { %5704 = vrcp.f32 %v7327_v31  ;;  %vm3398_vm12 = vcmp.eq.f32.partialorder %v3397_v43, 8.507059e+37  ;;  %vm3429_vm14 = vweird.f32 %v7327_v31  ;;  %v3433_v6 = vand.u32 2147483647, %v7327_v31 }
 0x7de   : > { %v3353_v59 = vpop.f32.mrf.mxu1  ;;  %v3368_v14 = vmul.f32 %v5701_v50, %v3367_v47 }
 0x7df   : > { %vm3434_vm0 = vcmp.eq.f32.partialorder %v3433_v6, 8.507059e+37 }
 0x7e0   : > { %v3369_v40 = vadd.f32 %v5701_v50, %v3368_v14 }
 0x7e2   : > { %v3373_v53 = vsel %vm3372_vm7, %v5701_v50, %v3369_v40  ;;  %v3396_v50 = vsel %vm3395_vm11, %v5699_v52, %v3392_v28  ;;  %v3435_v28 = vand.u32 2147483648, %v7327_v31  ;;  %v3341_v52 = vadd.f32 %v7322_v63, %v6800_v4 }
 0x7e3   : > { %v5705_v21 = vpop.eup %5704  ;;  %v3378_v29 = vsel %vm3375_vm8, %v3377_v30, %v3373_v53  ;;  %v3401_v44 = vsel %vm3398_vm12, %v3400_v58, %v3396_v50  ;;  %v3412_v30 = vrot.slane %v7204_v0, 7 }
 0x7e4   : > { %v3327_v35 = vpop.f32.mrf.mxu3  ;;  %v3406_v47 = vmul.f32 %v3404_v33, %v3378_v29  ;;  %v3425_v18 = vmul.f32 %v5705_v21, %v7327_v31  ;;  %v3409_v29 = vsub.f32 1.0, %v3401_v44  ;;  %vm3430_vm13 = vweird.f32 %v5705_v21 }
 0x7e5   : > { %v3328_v17 = vadd.f32 %v3327_v35, %v3315_v9  ;;  %v3414_v35 = vmul.f32 %v3412_v30, %v3401_v44  ;;  %vm3431_vm15 = vmor %vm3429_vm14, %vm3430_vm13 }
 0x7e6   : > { %v3355_v46 = vpop.f32.mrf.mxu1  ;;  %v3407_v19 = vadd.f32 %v3406_v47, %v8127_v54  ;;  %v3426_v40 = vsub.f32 1.0, %v3425_v18 }
 0x7e7   : > { %v3440_v14 = vrot.slane %v3328_v17, 5  ;;  %v3354_v46 = vadd.f32 %v3353_v59, %v3341_v52 }
 0x7e8   : > { %5706 = vtanh.f32 %v3407_v19  ;;  %v3427_v9 = vmul.f32 %v5705_v21, %v3426_v40  ;;  %v3436_v19 = vor.u32 1.1754944e-38, %v3435_v28 }
 0x7e9   : > { %v3442_v15 = vadd.f32 %v3440_v14, %v6782_v11  ;;  %v3463_v31 = vrot.slane %v3354_v46, 5 }
 0x7ea   : > { %v3428_v17 = vadd.f32 %v5705_v21, %v3427_v9 }
 0x7eb   : > { %v5294_v5 = vmul.f32 -1.442695, %v3442_v15 }
 0x7ec   : > { %v3329_v33 = vpop.f32.mrf.mxu3  ;;  %v3432_v0 = vsel %vm3431_vm15, %v5705_v21, %v3428_v17 }
 0x7ed   : > { %5708 = vpow2.f32 %v5294_v5  ;;  %v3437_v50 = vsel %vm3434_vm0, %v3436_v19, %v3432_v0 }
 0x7ee   : > { %v5707_v20 = vpop.eup %5706  ;;  %v3465_v59 = vmul.f32 %v3463_v31, %v3437_v50  ;;  %v8358_v50 = vld [vmem:[#allocation84_spill] sm:$0xff] }
 0x7ef   : > { %v3410_v53 = vmul.f32 %v5707_v20, %v3409_v29  ;;  %v8360_v31 = vld [vmem:[#allocation24_spill] sm:$0xff] }
 0x7f0   : > { %v3466_v44 = vadd.f32 %v3465_v59, %v6731_v34  ;;  %v8361_v59 = vld [vmem:[#allocation44_spill] sm:$0xff] }
 0x7f1   : > { %v7341_v18 = vadd.f32 %v3414_v35, %v3410_v53 }
 0x7f3   : > { %v5709_v47 = vpop.eup %5708  ;;  %v3472_v14 = vmul.f32 %v7341_v18, %v6928_v16  ;;  %v3485_v40 = vpack.c.bf16 %v7341_v18, %v7341_v18 }
 0x7f4   : > { %v3446_v43 = vadd.f32 1.0, %v5709_v47 }
 0x7f5   : > { %v3474_v63 = vrot.slane %v3472_v14, 4  ;;  %v3489_v15 = vrot.slane %v3485_v40, 2  ;;  %v8356_v40 = vld [vmem:[#allocation80_spill] sm:$0xff] }
 0x7f6   : > { %5710 = vrcp.f32 %v3446_v43  ;;  %v3458_v33 = vand.u32 2147483648, %v3446_v43  ;;  %v3456_v30 = vand.u32 2147483647, %v3446_v43  ;;  %vm3452_vm2 = vweird.f32 %v3446_v43 }
 0x7f7   : > { %3501 = vmatmul.bf16.vlgmr.msrb.gmra.mxu2 %v3489_v15  ;;  %3527 = vmatmul.bf16.vlgmr.msrb.gmra.mxu0 %v3489_v15  ;;  %v7348_v58 = vadd.f32 %v3474_v63, %v7211_v26  ;;  %5712 = vtanh.f32 %v3466_v44  ;;  %v8357_v63 = vld [vmem:[#allocation98_spill] sm:$0xff] }
 0x7f8   : > { %3597 = vmatpush.bf16.msrb.mxu2 %v8062_v7  ;;  %3623 = vmatpush.bf16.msrb.mxu0 %v6601_v55  ;;  %v3459_v20 = vor.u32 1.1754944e-38, %v3458_v33  ;;  %vm3457_vm4 = vcmp.eq.f32.partialorder %v3456_v30, 8.507059e+37  ;;  %v8364_v44 = vld [vmem:[#allocation26_spill] sm:$0xff]  ;;  %v8366_v33 = vld [vmem:[#allocation91_spill] sm:$0xff]  ;;  %v8368_v30 = vld [vmem:[#allocation28_spill] sm:$0xff] }
 0x7fc   : > { %v5711_v21 = vpop.eup %5710  ;;  %3598 = vmatpush.bf16.msrb.mxu2 %v8128_v42  ;;  %3624 = vmatpush.bf16.msrb.mxu0 %v8129_v62 }
 0x7fd   : > { %v3448_v5 = vmul.f32 %v5711_v21, %v3446_v43  ;;  %vm3453_vm1 = vweird.f32 %v5711_v21  ;;  %v5713_v28 = vpop.eup %5712 }
 0x7fe   : > { %vm3454_vm3 = vmor %vm3452_vm2, %vm3453_vm1 }
 0x7ff   : > { %v3449_v9 = vsub.f32 1.0, %v3448_v5  ;;  %v8363_v5 = vld [vmem:[#allocation101_spill] sm:$0xff] }
 0x800   : > { %3599 = vmatpush.bf16.msrb.mxu2 %v8130_v45  ;;  %3625 = vmatpush.bf16.msrb.mxu0 %v8131_v2 }
 0x801   : > { %v3450_v29 = vmul.f32 %v5711_v21, %v3449_v9  ;;  %v8365_v9 = vld [vmem:[#allocation49_spill] sm:$0xff] }
 0x803   : > { %v3451_v26 = vadd.f32 %v5711_v21, %v3450_v29  ;;  %v8367_v29 = vld [vmem:[#allocation102_spill] sm:$0xff] }
 0x804   : > { %3600 = vmatpush.bf16.msrb.mxu2 %v8132_v38  ;;  %3626 = vmatpush.bf16.msrb.mxu0 %v8133_v51 }
 0x805   : > { %v3455_v17 = vsel %vm3454_vm3, %v5711_v21, %v3451_v26  ;;  %v8362_v21 = vld [vmem:[#allocation88_spill] sm:$0xff]  ;;  %v8369_v26 = vld [vmem:[#allocation53_spill] sm:$0xff] }
 0x806   : > { %v3460_v53 = vsel %vm3457_vm4, %v3459_v20, %v3455_v17  ;;  %v8370_v20 = vld [vmem:[#allocation94_spill] sm:$0xff]  ;;  %v8371_v17 = vld [vmem:[#allocation103_spill] sm:$0xff] }
 0x807   : > { %v3468_v35 = vsub.f32 1.0, %v3460_v53  ;;  %v3470_v52 = vmul.f32 %v3460_v53, %v7223_v61  ;;  %3553 = vmatmul.bf16.vlgmr.msra.gmra.mxu2 %v3489_v15  ;;  %3579 = vmatmul.bf16.vlgmr.msra.gmra.mxu0 %v3489_v15  ;;  %v8372_v53 = vld [vmem:[#allocation30_spill] sm:$0xff] }
 0x808   : > { %3601 = vmatpush.bf16.msrb.mxu2 %v8134_v24  ;;  %3627 = vmatpush.bf16.msrb.mxu0 %v8135_v8 }
 0x809   : > { %v3469_v6 = vmul.f32 %v5713_v28, %v3468_v35  ;;  %v8373_v35 = vld [vmem:[#allocation57_spill] sm:$0xff]  ;;  %v8374_v28 = vld [vmem:[#allocation20_spill] sm:$0xff] }
 0x80b   : > { %v3471_v47 = vadd.f32 %v3470_v52, %v3469_v6  ;;  %v8375_v52 = vld [vmem:[#allocation34_spill] sm:$0xff]  ;;  %v8376_v6 = vld [vmem:[#allocation32_spill] sm:$0xff] }
 0x80c   : > { %3602 = vmatpush.bf16.msrb.mxu2 %v8067_v36  ;;  %3628 = vmatpush.bf16.msrb.mxu0 %v6647_v10 }
 0x80d   : > { %v7362_v46 = vrot.slane %v3471_v47, 7  ;;  %v3477_v0 = vmul.f32 %v3471_v47, %v6928_v16  ;;  %v8377_v47 = vld [vmem:[#allocation61_spill] sm:$0xff] }
 0x80f   : > { %v3486_v43 = vpack.c.bf16 %v7362_v46, %v7362_v46  ;;  %v3479_v61 = vrot.slane %v3477_v0, 4  ;;  %v8378_v0 = vld [vmem:[#allocation21_spill] sm:$0xff] }
 0x810   : > { %3603 = vmatpush.bf16.msrb.mxu2 %v6585_v60  ;;  %3629 = vmatpush.bf16.msrb.mxu0 %v6655_v23 }
 0x811   : > { %v3490_v14 = vrot.slane %v3486_v43, 2  ;;  %v7370_v19 = vadd.f32 %v3479_v61, %v7231_v56  ;;  %v8355_v56 = vld [vmem:[#allocation40_spill] sm:$0xff]  ;;  %v8379_v43 = vld [vmem:[#allocation37_spill] sm:$0xff]  ;;  %v8380_v61 = vld [vmem:[#allocation35_spill] sm:$0xff] }
 0x813   : > { %3514 = vmatmul.bf16.vlgmr.msra.gmra.mxu3 %v3490_v14  ;;  %3540 = vmatmul.bf16.vlgmr.msra.gmra.mxu1 %v3490_v14 }
 0x814   : > { %3610 = vmatpush.bf16.msra.mxu3 %v8068_v12  ;;  %3636 = vmatpush.bf16.msra.mxu1 %v6603_v41 }
 0x815   : > { %3604 = vmatpush.bf16.msrb.mxu2 %v6597_v39  ;;  %3630 = vmatpush.bf16.msrb.mxu0 %v6663_v37 }
 0x818   : > { %3611 = vmatpush.bf16.msra.mxu3 %v8069_v22  ;;  %3637 = vmatpush.bf16.msra.mxu1 %v6613_v13 }
 0x819   : > { %3791 = vmatpush.bf16.msra.mxu2 %v6339_v48  ;;  %3817 = vmatpush.bf16.msra.mxu0 %v6390_v27 }
 0x81a   : > { %3605 = vmatmul.bf16.vlgmr.msrb.gmra.mxu2 %v3489_v15  ;;  %3631 = vmatmul.bf16.vlgmr.msrb.gmra.mxu0 %v3489_v15  ;;  %v8359_v15 = vld [vmem:[#allocation100_spill] sm:$0xff] }
 0x81c   : > { %3612 = vmatpush.bf16.msra.mxu3 %v8070_v1  ;;  %3638 = vmatpush.bf16.msra.mxu1 %v6625_v3 }
 0x81d   : > { %3792 = vmatpush.bf16.msra.mxu2 %v6344_v57  ;;  %3818 = vmatpush.bf16.msra.mxu0 %v6404_v32 }
 0x820   : > { %3613 = vmatpush.bf16.msra.mxu3 %v8356_v40  ;;  %3639 = vmatpush.bf16.msra.mxu1 %v8357_v63 }
 0x821   : > { %3793 = vmatpush.bf16.msra.mxu2 %v8280_v25  ;;  %3819 = vmatpush.bf16.msra.mxu0 %v8355_v56 }
 0x823   : > { %3566 = vmatmul.bf16.vlgmr.msrb.gmra.mxu3 %v3490_v14  ;;  %3592 = vmatmul.bf16.vlgmr.msrb.gmra.mxu1 %v3490_v14 }
 0x824   : > { %3614 = vmatpush.bf16.msra.mxu3 %v8358_v50  ;;  %3640 = vmatpush.bf16.msra.mxu1 %v8359_v15 }
 0x825   : > { %3794 = vmatpush.bf16.msra.mxu2 %v8360_v31  ;;  %3820 = vmatpush.bf16.msra.mxu0 %v8361_v59  ;;  %v8427_v31 = vld [vmem:[#allocation105_spill] sm:$0xff] }
 0x828   : > { %3615 = vmatpush.bf16.msra.mxu3 %v8362_v21  ;;  %3641 = vmatpush.bf16.msra.mxu1 %v8363_v5 }
 0x829   : > { %3795 = vmatpush.bf16.msra.mxu2 %v8364_v44  ;;  %3821 = vmatpush.bf16.msra.mxu0 %v8365_v9 }
 0x82c   : > { %3616 = vmatpush.bf16.msra.mxu3 %v8366_v33  ;;  %3642 = vmatpush.bf16.msra.mxu1 %v8367_v29 }
 0x82d   : > { %3796 = vmatpush.bf16.msra.mxu2 %v8368_v30  ;;  %3822 = vmatpush.bf16.msra.mxu0 %v8369_v26 }
 0x830   : > { %3617 = vmatpush.bf16.msra.mxu3 %v8370_v20  ;;  %3643 = vmatpush.bf16.msra.mxu1 %v8371_v17  ;;  %v8381_v17 = vld [vmem:[#allocation65_spill] sm:$0xff] }
 0x831   : > { %3797 = vmatpush.bf16.msra.mxu2 %v8372_v53  ;;  %3823 = vmatpush.bf16.msra.mxu0 %v8373_v35  ;;  %v8382_v53 = vld [vmem:[#allocation23_spill] sm:$0xff]  ;;  %v8383_v35 = vld [vmem:[#allocation41_spill] sm:$0xff] }
 0x833   : > { %3618 = vmatmul.bf16.vlgmr.msra.gmra.mxu3 %v3490_v14  ;;  %3644 = vmatmul.bf16.vlgmr.msra.gmra.mxu1 %v3490_v14  ;;  %v8386_v14 = vld [vmem:[#allocation25_spill] sm:$0xff] }
 0x834   : > { %3804 = vmatpush.bf16.msrb.mxu3 %v8374_v28  ;;  %3830 = vmatpush.bf16.msrb.mxu1 %v8375_v52  ;;  %v8384_v28 = vld [vmem:[#allocation38_spill] sm:$0xff]  ;;  %v8385_v52 = vld [vmem:[#allocation69_spill] sm:$0xff] }
 0x835   : > { %3798 = vmatpush.bf16.msra.mxu2 %v8376_v6  ;;  %3824 = vmatpush.bf16.msra.mxu0 %v8377_v47  ;;  %v8387_v6 = vld [vmem:[#allocation45_spill] sm:$0xff]  ;;  %v8388_v47 = vld [vmem:[#allocation42_spill] sm:$0xff] }
 0x838   : > { %3805 = vmatpush.bf16.msrb.mxu3 %v8378_v0  ;;  %3831 = vmatpush.bf16.msrb.mxu1 %v8379_v43  ;;  %v8389_v0 = vld [vmem:[#allocation73_spill] sm:$0xff]  ;;  %v8390_v43 = vld [vmem:[#allocation27_spill] sm:$0xff] }
 0x839   : > { %3843 = vmatpush.bf16.msrb.mxu2 %v8380_v61  ;;  %3869 = vmatpush.bf16.msrb.mxu0 %v8381_v17  ;;  %v8391_v61 = vld [vmem:[#allocation50_spill] sm:$0xff]  ;;  %v8392_v17 = vld [vmem:[#allocation47_spill] sm:$0xff] }
 0x83c   : > { %3806 = vmatpush.bf16.msrb.mxu3 %v8382_v53  ;;  %3832 = vmatpush.bf16.msrb.mxu1 %v8383_v35  ;;  %v8393_v53 = vld [vmem:[#allocation77_spill] sm:$0xff] }
 0x83d   : > { %3844 = vmatpush.bf16.msrb.mxu2 %v8384_v28  ;;  %3870 = vmatpush.bf16.msrb.mxu0 %v8385_v52  ;;  %v8394_v35 = vld [vmem:[#allocation29_spill] sm:$0xff]  ;;  %v8395_v28 = vld [vmem:[#allocation54_spill] sm:$0xff]  ;;  %v8396_v52 = vld [vmem:[#allocation51_spill] sm:$0xff] }
 0x840   : > { %3807 = vmatpush.bf16.msrb.mxu3 %v8386_v14  ;;  %3833 = vmatpush.bf16.msrb.mxu1 %v8387_v6  ;;  %v8397_v14 = vld [vmem:[#allocation81_spill] sm:$0xff]  ;;  %v8398_v6 = vld [vmem:[#allocation31_spill] sm:$0xff] }
 0x841   : > { %3845 = vmatpush.bf16.msrb.mxu2 %v8388_v47  ;;  %3871 = vmatpush.bf16.msrb.mxu0 %v8389_v0  ;;  %v8399_v47 = vld [vmem:[#allocation58_spill] sm:$0xff]  ;;  %v8400_v0 = vld [vmem:[#allocation55_spill] sm:$0xff] }
 0x844   : > { %3808 = vmatpush.bf16.msrb.mxu3 %v8390_v43  ;;  %3834 = vmatpush.bf16.msrb.mxu1 %v8391_v61  ;;  %v8401_v43 = vld [vmem:[#allocation85_spill] sm:$0xff] }
 0x845   : > { %3846 = vmatpush.bf16.msrb.mxu2 %v8392_v17  ;;  %3872 = vmatpush.bf16.msrb.mxu0 %v8393_v53  ;;  %v8402_v61 = vld [vmem:[#allocation33_spill] sm:$0xff]  ;;  %v8403_v17 = vld [vmem:[#allocation62_spill] sm:$0xff]  ;;  %v8404_v53 = vld [vmem:[#allocation59_spill] sm:$0xff] }
 0x848   : > { %3809 = vmatpush.bf16.msrb.mxu3 %v8394_v35  ;;  %3835 = vmatpush.bf16.msrb.mxu1 %v8395_v28  ;;  %v8405_v35 = vld [vmem:[#allocation89_spill] sm:$0xff]  ;;  %v8406_v28 = vld [vmem:[#allocation36_spill] sm:$0xff] }
 0x849   : > { %3847 = vmatpush.bf16.msrb.mxu2 %v8396_v52  ;;  %3873 = vmatpush.bf16.msrb.mxu0 %v8397_v14  ;;  %v8407_v52 = vld [vmem:[#allocation66_spill] sm:$0xff]  ;;  %v8408_v14 = vld [vmem:[#allocation63_spill] sm:$0xff] }
 0x84c   : > { %3810 = vmatpush.bf16.msrb.mxu3 %v8398_v6  ;;  %3836 = vmatpush.bf16.msrb.mxu1 %v8399_v47  ;;  %v8409_v6 = vld [vmem:[#allocation92_spill] sm:$0xff]  ;;  %v8410_v47 = vld [vmem:[#allocation39_spill] sm:$0xff] }
 0x84d   : > { %3848 = vmatpush.bf16.msrb.mxu2 %v8400_v0  ;;  %3874 = vmatpush.bf16.msrb.mxu0 %v8401_v43  ;;  %v8411_v0 = vld [vmem:[#allocation70_spill] sm:$0xff]  ;;  %v8412_v43 = vld [vmem:[#allocation43_spill] sm:$0xff] }
 0x850   : > { %3811 = vmatpush.bf16.msrb.mxu3 %v8402_v61  ;;  %3837 = vmatpush.bf16.msrb.mxu1 %v8403_v17  ;;  %v8413_v61 = vld [vmem:[#allocation74_spill] sm:$0xff]  ;;  %v8414_v17 = vld [vmem:[#allocation48_spill] sm:$0xff] }
 0x851   : > { %3849 = vmatpush.bf16.msrb.mxu2 %v8404_v53  ;;  %3875 = vmatpush.bf16.msrb.mxu0 %v8405_v35  ;;  %v8415_v53 = vld [vmem:[#allocation78_spill] sm:$0xff]  ;;  %v8416_v35 = vld [vmem:[#allocation52_spill] sm:$0xff] }
 0x854   : > { %3856 = vmatpush.bf16.msra.mxu3 %v8406_v28  ;;  %3882 = vmatpush.bf16.msra.mxu1 %v8407_v52  ;;  %v8417_v28 = vld [vmem:[#allocation82_spill] sm:$0xff]  ;;  %v8418_v52 = vld [vmem:[#allocation56_spill] sm:$0xff] }
 0x855   : > { %3850 = vmatpush.bf16.msrb.mxu2 %v8408_v14  ;;  %3876 = vmatpush.bf16.msrb.mxu0 %v8409_v6  ;;  %v8419_v14 = vld [vmem:[#allocation86_spill] sm:$0xff]  ;;  %v8420_v6 = vld [vmem:[#allocation60_spill] sm:$0xff] }
 0x858   : > { %3857 = vmatpush.bf16.msra.mxu3 %v8410_v47  ;;  %3883 = vmatpush.bf16.msra.mxu1 %v8411_v0  ;;  %v8421_v47 = vld [vmem:[#allocation90_spill] sm:$0xff]  ;;  %v8422_v0 = vld [vmem:[#allocation64_spill] sm:$0xff] }
 0x85c   : > { %3858 = vmatpush.bf16.msra.mxu3 %v8412_v43  ;;  %3884 = vmatpush.bf16.msra.mxu1 %v8413_v61  ;;  %v8423_v43 = vld [vmem:[#allocation93_spill] sm:$0xff] }
 0x860   : > { %3859 = vmatpush.bf16.msra.mxu3 %v8414_v17  ;;  %3885 = vmatpush.bf16.msra.mxu1 %v8415_v53 }
 0x864   : > { %3860 = vmatpush.bf16.msra.mxu3 %v8416_v35  ;;  %3886 = vmatpush.bf16.msra.mxu1 %v8417_v28  ;;  %v8424_v28 = vld [vmem:[#allocation106_spill] sm:$0xff] }
 0x868   : > { %3861 = vmatpush.bf16.msra.mxu3 %v8418_v52  ;;  %3887 = vmatpush.bf16.msra.mxu1 %v8419_v14 }
 0x86c   : > { %3862 = vmatpush.bf16.msra.mxu3 %v8420_v6  ;;  %3888 = vmatpush.bf16.msra.mxu1 %v8421_v47  ;;  %v8425_v6 = vld [vmem:[#allocation104_spill] sm:$0xff]  ;;  %v8426_v47 = vld [vmem:[#allocation107_spill] sm:$0xff] }
 0x870   : > { %3863 = vmatpush.bf16.msra.mxu3 %v8422_v0  ;;  %3889 = vmatpush.bf16.msra.mxu1 %v8423_v43 }
 0x874   : > { %v3528_v61 = vpop.f32.mrf.mxu0 }
 0x875   : > { %v3529_v29 = vadd.f32 %v3528_v61, %v8424_v28 }
 0x87a   : > { %v3502_v17 = vpop.f32.mrf.mxu2 }
 0x87b   : > { %v3503_v44 = vadd.f32 %v3502_v17, %v8425_v6 }
 0x87c   : > { %v3530_v20 = vpop.f32.mrf.mxu0 }
 0x882   : > { %v3504_v53 = vpop.f32.mrf.mxu2 }
 0x884   : > { %v3580_v26 = vpop.f32.mrf.mxu0 }
 0x88a   : > { %v3554_v35 = vpop.f32.mrf.mxu2 }
 0x88c   : > { %v3582_v30 = vpop.f32.mrf.mxu0 }
 0x890   : > { %v3541_v52 = vpop.f32.mrf.mxu1 }
 0x891   : > { %v3542_v33 = vadd.f32 %v3541_v52, %v3529_v29 }
 0x892   : > { %v3556_v9 = vpop.f32.mrf.mxu2 }
 0x893   : > { %v3673_v14 = vrot.slane %v3542_v33, 3  ;;  %v8428_v9 = vld [vmem:[#allocation110_spill] sm:$0xff] }
 0x894   : > { %v3581_v52 = vadd.f32 %v3580_v26, %v8428_v9 }
 0x895   : > { %v3675_v5 = vadd.f32 %v3673_v14, %v8426_v47 }
 0x896   : > { %v3515_v0 = vpop.f32.mrf.mxu3 }
 0x897   : > { %v7459_v21 = vpop.f32.mrf.mxu0  ;;  %v5296_v43 = vmul.f32 -1.442695, %v3675_v5  ;;  %v3516_v59 = vadd.f32 %v3515_v0, %v3503_v44  ;;  %v8429_v0 = vld [vmem:[#allocation111_spill] sm:$0xff] }
 0x898   : > { %v3543_v20 = vpop.f32.mrf.mxu1 }
 0x899   : > { %5714 = vpow2.f32 %v5296_v43  ;;  %v3650_v53 = vrot.slane %v3516_v59, 3 }
 0x89b   : > { %v3652_v30 = vadd.f32 %v3650_v53, %v8427_v31 }
 0x89d   : > { %v3606_v15 = vpop.f32.mrf.mxu2  ;;  %v5295_v61 = vmul.f32 -1.442695, %v3652_v30 }
 0x89e   : > { %v3517_v28 = vpop.f32.mrf.mxu3 }
 0x89f   : > { %v3634_v29 = vpop.f32.mrf.mxu0  ;;  %v5715_v33 = vpop.eup %5714  ;;  %5716 = vpow2.f32 %v5295_v61 }
 0x8a0   : > { %v3679_v17 = vadd.f32 1.0, %v5715_v33  ;;  %v3593_v14 = vpop.f32.mrf.mxu1 }
 0x8a1   : > { %v3594_v47 = vadd.f32 %v3593_v14, %v3581_v52  ;;  %v8430_v14 = vld [vmem:[#allocation108_spill] sm:$0xff] }
 0x8a2   : > { %5718 = vrcp.f32 %v3679_v17  ;;  %vm3685_vm10 = vweird.f32 %v3679_v17 }
 0x8a3   : > { %v3709_v6 = vrot.slane %v3594_v47, 6 }
 0x8a5   : > { %v3608_v5 = vpop.f32.mrf.mxu2  ;;  %v5717_v44 = vpop.eup %5716  ;;  %v3711_v43 = vadd.f32 %v3709_v6, %v8429_v0  ;;  %v3607_v0 = vadd.f32 %v3606_v15, %v6770_v49  ;;  %v3689_v15 = vand.u32 2147483647, %v3679_v17 }
 0x8a6   : > { %v3656_v59 = vadd.f32 1.0, %v5717_v44  ;;  %v3567_v20 = vpop.f32.mrf.mxu3  ;;  %v3555_v5 = vadd.f32 %v3554_v35, %v8430_v14 }
 0x8a7   : > { %v5297_v53 = vmul.f32 -1.442695, %v3711_v43  ;;  %vm3690_vm12 = vcmp.eq.f32.partialorder %v3689_v15, 8.507059e+37 }
 0x8a8   : > { %5720 = vrcp.f32 %v3656_v59  ;;  %v3595_v30 = vpop.f32.mrf.mxu1  ;;  %v5719_v28 = vpop.eup %5718  ;;  %v3668_v6 = vand.u32 2147483648, %v3656_v59  ;;  %v3568_v44 = vadd.f32 %v3567_v20, %v3555_v5  ;;  %vm3662_vm6 = vweird.f32 %v3656_v59 }
 0x8a9   : > { %5722 = vpow2.f32 %v5297_v53  ;;  %v3681_v29 = vmul.f32 %v5719_v28, %v3679_v17  ;;  %v3666_v30 = vand.u32 2147483647, %v3656_v59  ;;  %vm3686_vm9 = vweird.f32 %v5719_v28 }
 0x8aa   : > { %v3696_v25 = vrot.slane %v3568_v44, 3  ;;  %vm3687_vm11 = vmor %vm3685_vm10, %vm3686_vm9 }
 0x8ab   : > { %v3682_v9 = vsub.f32 1.0, %v3681_v29  ;;  %v3669_v29 = vor.u32 1.1754944e-38, %v3668_v6  ;;  %vm3667_vm8 = vcmp.eq.f32.partialorder %v3666_v30, 8.507059e+37 }
 0x8ad   : > { %v3683_v53 = vmul.f32 %v5719_v28, %v3682_v9 }
 0x8ae   : > { %v5721_v31 = vpop.eup %5720  ;;  %v3569_v26 = vpop.f32.mrf.mxu3 }
 0x8af   : > { %v5723_v61 = vpop.eup %5722  ;;  %v3658_v33 = vmul.f32 %v5721_v31, %v3656_v59  ;;  %vm3663_vm5 = vweird.f32 %v5721_v31  ;;  %v3684_v63 = vadd.f32 %v5719_v28, %v3683_v53 }
 0x8b0   : > { %v7464_v52 = vadd.f32 1.0, %v5723_v61  ;;  %v3645_v47 = vpop.f32.mrf.mxu1  ;;  %vm3664_vm7 = vmor %vm3662_vm6, %vm3663_vm5 }
 0x8b1   : > { %v3659_v50 = vsub.f32 1.0, %v3658_v33  ;;  %v3688_v44 = vsel %vm3687_vm11, %v5719_v28, %v3684_v63 }
 0x8b2   : > { %5724 = vrcp.f32 %v7464_v52  ;;  %vm3721_vm14 = vweird.f32 %v7464_v52 }
 0x8b3   : > { %v3660_v43 = vmul.f32 %v5721_v31, %v3659_v50  ;;  %v3691_v50 = vand.u32 2147483648, %v3679_v17 }
 0x8b5   : > { %v3661_v26 = vadd.f32 %v5721_v31, %v3660_v43 }
 0x8b6   : > { %v3619_v61 = vpop.f32.mrf.mxu3 }
 0x8b7   : > { %v3665_v56 = vsel %vm3664_vm7, %v5721_v31, %v3661_v26  ;;  %v3620_v35 = vadd.f32 %v3619_v61, %v3607_v0  ;;  %v3692_v0 = vor.u32 1.1754944e-38, %v3691_v50  ;;  %v3725_v61 = vand.u32 2147483647, %v7464_v52 }
 0x8b8   : > { %v5725_v33 = vpop.eup %5724  ;;  %v3670_v14 = vsel %vm3667_vm8, %v3669_v29, %v3665_v56  ;;  %v3647_v20 = vpop.f32.mrf.mxu1  ;;  %v3633_v29 = vadd.f32 %v7459_v21, %v6800_v4 }
 0x8b9   : > { %v3698_v5 = vmul.f32 %v3696_v25, %v3670_v14  ;;  %v3717_v9 = vmul.f32 %v5725_v33, %v7464_v52  ;;  %v3732_v40 = vrot.slane %v3620_v35, 6  ;;  %v3693_v53 = vsel %vm3690_vm12, %v3692_v0, %v3688_v44 }
 0x8ba   : > { %v3701_v25 = vsub.f32 1.0, %v3693_v53  ;;  %v3704_v14 = vrot.slane %v7341_v18, 7  ;;  %vm3722_vm13 = vweird.f32 %v5725_v33  ;;  %v3646_v50 = vadd.f32 %v3645_v47, %v3633_v29 }
 0x8bb   : > { %v3699_v59 = vadd.f32 %v3698_v5, %v8127_v54  ;;  %v3718_v6 = vsub.f32 1.0, %v3717_v9  ;;  %v3734_v31 = vadd.f32 %v3732_v40, %v6782_v11  ;;  %v3727_v40 = vand.u32 2147483648, %v7464_v52  ;;  %vm3723_vm15 = vmor %vm3721_vm14, %vm3722_vm13 }
 0x8bc   : > { %v3706_v28 = vmul.f32 %v3704_v14, %v3693_v53  ;;  %vm3726_vm0 = vcmp.eq.f32.partialorder %v3725_v61, 8.507059e+37 }
 0x8bd   : > { %5726 = vtanh.f32 %v3699_v59  ;;  %v5298_v43 = vmul.f32 -1.442695, %v3734_v31  ;;  %v3719_v56 = vmul.f32 %v5725_v33, %v3718_v6  ;;  %v3728_v9 = vor.u32 1.1754944e-38, %v3727_v40 }
 0x8be   : > { %v3621_v30 = vpop.f32.mrf.mxu3  ;;  %v3755_v6 = vrot.slane %v3646_v50, 6  ;;  %v3762_v40 = vrot.slane %v7362_v46, 2 }
 0x8bf   : > { %5728 = vpow2.f32 %v5298_v43  ;;  %v3720_v26 = vadd.f32 %v5725_v33, %v3719_v56 }
 0x8c1   : > { %v3724_v18 = vsel %vm3723_vm15, %v5725_v33, %v3720_v26 }
 0x8c2   : > { %v3729_v15 = vsel %vm3726_vm0, %v3728_v9, %v3724_v18 }
 0x8c3   : > { %v5727_v17 = vpop.eup %5726  ;;  %v3757_v44 = vmul.f32 %v3755_v6, %v3729_v15  ;;  %v8432_v6 = vld [vmem:[#allocation98_spill] sm:$0xff] }
 0x8c4   : > { %v3702_v63 = vmul.f32 %v5727_v17, %v3701_v25 }
 0x8c5   : > { %v5729_v35 = vpop.eup %5728  ;;  %v3758_v56 = vadd.f32 %v3757_v44, %v6731_v34  ;;  %v8437_v44 = vld [vmem:[#allocation24_spill] sm:$0xff] }
 0x8c6   : > { %v7478_v20 = vadd.f32 %v3706_v28, %v3702_v63  ;;  %v3738_v5 = vadd.f32 1.0, %v5729_v35 }
 0x8c8   : > { %5730 = vrcp.f32 %v3738_v5  ;;  %v3779_v21 = vpack.c.bf16 %v7478_v20, %v7478_v20  ;;  %v3766_v59 = vmul.f32 %v7478_v20, %v6928_v16  ;;  %v3750_v53 = vand.u32 2147483648, %v3738_v5 }
 0x8c9   : > { %v3748_v14 = vand.u32 2147483647, %v3738_v5  ;;  %5732 = vtanh.f32 %v3758_v56  ;;  %vm3744_vm2 = vweird.f32 %v3738_v5  ;;  %v8443_v56 = vld [vmem:[#allocation91_spill] sm:$0xff] }
 0x8ca   : > { %v3782_v31 = vshrl.u32 %v3779_v21, 16  ;;  %v3768_v52 = vrot.slane %v3766_v59, 5  ;;  %v3751_v26 = vor.u32 1.1754944e-38, %v3750_v53  ;;  %v8445_v53 = vld [vmem:[#allocation28_spill] sm:$0xff] }
 0x8cb   : > { %vm3749_vm4 = vcmp.eq.f32.partialorder %v3748_v14, 8.507059e+37  ;;  %v8447_v14 = vld [vmem:[#allocation94_spill] sm:$0xff] }
 0x8cc   : > { %v3784_v0 = vrot.slane %v3782_v31, 2  ;;  %v7485_v43 = vadd.f32 %v3768_v52, %v7348_v58  ;;  %v8433_v31 = vld [vmem:[#allocation22_spill] sm:$0xff]  ;;  %v8434_v52 = vld [vmem:[#allocation40_spill] sm:$0xff] }
 0x8ce   : > { %v5731_v47 = vpop.eup %5730  ;;  %3799 = vmatmul.bf16.vlgmr.msra.gmra.mxu2 %v3784_v0  ;;  %3825 = vmatmul.bf16.vlgmr.msra.gmra.mxu0 %v3784_v0 }
 0x8cf   : > { %v3740_v33 = vmul.f32 %v5731_v47, %v3738_v5  ;;  %3895 = vmatpush.bf16.msra.mxu2 %v8062_v7  ;;  %3921 = vmatpush.bf16.msra.mxu0 %v6601_v55  ;;  %vm3745_vm1 = vweird.f32 %v5731_v47  ;;  %v5733_v28 = vpop.eup %5732 }
 0x8d0   : > { %vm3746_vm3 = vmor %vm3744_vm2, %vm3745_vm1 }
 0x8d1   : > { %v3741_v30 = vsub.f32 1.0, %v3740_v33  ;;  %v8442_v33 = vld [vmem:[#allocation49_spill] sm:$0xff] }
 0x8d3   : > { %v3742_v25 = vmul.f32 %v5731_v47, %v3741_v30  ;;  %3896 = vmatpush.bf16.msra.mxu2 %v8128_v42  ;;  %3922 = vmatpush.bf16.msra.mxu0 %v8129_v62  ;;  %v8444_v30 = vld [vmem:[#allocation102_spill] sm:$0xff] }
 0x8d5   : > { %v3743_v58 = vadd.f32 %v5731_v47, %v3742_v25  ;;  %v8446_v25 = vld [vmem:[#allocation53_spill] sm:$0xff] }
 0x8d7   : > { %v3747_v17 = vsel %vm3746_vm3, %v5731_v47, %v3743_v58  ;;  %3897 = vmatpush.bf16.msra.mxu2 %v8130_v45  ;;  %3923 = vmatpush.bf16.msra.mxu0 %v8131_v2  ;;  %v8441_v47 = vld [vmem:[#allocation26_spill] sm:$0xff]  ;;  %v8448_v58 = vld [vmem:[#allocation103_spill] sm:$0xff] }
 0x8d8   : > { %v3752_v29 = vsel %vm3749_vm4, %v3751_v26, %v3747_v17  ;;  %v8449_v26 = vld [vmem:[#allocation30_spill] sm:$0xff]  ;;  %v8450_v17 = vld [vmem:[#allocation57_spill] sm:$0xff] }
 0x8d9   : > { %v3760_v63 = vsub.f32 1.0, %v3752_v29  ;;  %v3764_v35 = vmul.f32 %v3762_v40, %v3752_v29  ;;  %v8451_v29 = vld [vmem:[#allocation20_spill] sm:$0xff]  ;;  %v8452_v40 = vld [vmem:[#allocation34_spill] sm:$0xff] }
 0x8db   : > { %v3761_v61 = vmul.f32 %v5733_v28, %v3760_v63  ;;  %3898 = vmatpush.bf16.msra.mxu2 %v8132_v38  ;;  %3924 = vmatpush.bf16.msra.mxu0 %v8133_v51  ;;  %v8453_v63 = vld [vmem:[#allocation32_spill] sm:$0xff]  ;;  %v8454_v28 = vld [vmem:[#allocation61_spill] sm:$0xff] }
 0x8dd   : > { %v3765_v50 = vadd.f32 %v3764_v35, %v3761_v61  ;;  %v8455_v61 = vld [vmem:[#allocation21_spill] sm:$0xff] }
 0x8de   : > { %3851 = vmatmul.bf16.vlgmr.msrb.gmra.mxu2 %v3784_v0  ;;  %3877 = vmatmul.bf16.vlgmr.msrb.gmra.mxu0 %v3784_v0  ;;  %v8456_v35 = vld [vmem:[#allocation37_spill] sm:$0xff] }
 0x8df   : > { %v7497_v18 = vrot.slane %v3765_v50, 5  ;;  %v3771_v5 = vmul.f32 %v3765_v50, %v6928_v16  ;;  %3899 = vmatpush.bf16.msra.mxu2 %v8134_v24  ;;  %3925 = vmatpush.bf16.msra.mxu0 %v8135_v8  ;;  %v8457_v50 = vld [vmem:[#allocation35_spill] sm:$0xff] }
 0x8e1   : > { %v3780_v46 = vpack.c.bf16 %v7497_v18, %v7497_v18  ;;  %v3773_v9 = vrot.slane %v3771_v5, 3  ;;  %v8458_v5 = vld [vmem:[#allocation65_spill] sm:$0xff] }
 0x8e3   : > { %v3786_v15 = vshrl.u32 %v3780_v46, 16  ;;  %v7505_v21 = vadd.f32 %v3773_v9, %v7370_v19  ;;  %3900 = vmatpush.bf16.msra.mxu2 %v8067_v36  ;;  %3926 = vmatpush.bf16.msra.mxu0 %v6647_v10  ;;  %v8431_v19 = vld [vmem:[#allocation80_spill] sm:$0xff]  ;;  %v8459_v46 = vld [vmem:[#allocation23_spill] sm:$0xff]  ;;  %v8460_v9 = vld [vmem:[#allocation41_spill] sm:$0xff] }
 0x8e5   : > { %v3788_v59 = vrot.slane %v3786_v15, 2  ;;  %v8461_v15 = vld [vmem:[#allocation38_spill] sm:$0xff] }
 0x8e7   : > { %3812 = vmatmul.bf16.vlgmr.msrb.gmra.mxu3 %v3788_v59  ;;  %3838 = vmatmul.bf16.vlgmr.msrb.gmra.mxu1 %v3788_v59 }
 0x8e8   : > { %3901 = vmatpush.bf16.msra.mxu2 %v6585_v60  ;;  %3927 = vmatpush.bf16.msra.mxu0 %v6655_v23 }
 0x8e9   : > { %3908 = vmatpush.bf16.msrb.mxu3 %v8068_v12  ;;  %3934 = vmatpush.bf16.msrb.mxu1 %v6603_v41 }
 0x8ec   : > { %3902 = vmatpush.bf16.msra.mxu2 %v6597_v39  ;;  %3928 = vmatpush.bf16.msra.mxu0 %v6663_v37 }
 0x8ed   : > { %3909 = vmatpush.bf16.msrb.mxu3 %v8069_v22  ;;  %3935 = vmatpush.bf16.msrb.mxu1 %v6613_v13 }
 0x8ef   : > { %3903 = vmatmul.bf16.vlgmr.msra.gmra.mxu2 %v3784_v0  ;;  %3929 = vmatmul.bf16.vlgmr.msra.gmra.mxu0 %v3784_v0  ;;  %v8438_v0 = vld [vmem:[#allocation44_spill] sm:$0xff] }
 0x8f0   : > { %4085 = vmatpush.bf16.msrb.mxu2 %v6339_v48  ;;  %4111 = vmatpush.bf16.msrb.mxu0 %v6390_v27  ;;  %v8435_v48 = vld [vmem:[#allocation84_spill] sm:$0xff] }
 0x8f1   : > { %3910 = vmatpush.bf16.msrb.mxu3 %v8070_v1  ;;  %3936 = vmatpush.bf16.msrb.mxu1 %v6625_v3  ;;  %v8436_v27 = vld [vmem:[#allocation100_spill] sm:$0xff] }
 0x8f4   : > { %4086 = vmatpush.bf16.msrb.mxu2 %v6344_v57  ;;  %4112 = vmatpush.bf16.msrb.mxu0 %v6404_v32  ;;  %v8439_v57 = vld [vmem:[#allocation88_spill] sm:$0xff]  ;;  %v8440_v32 = vld [vmem:[#allocation101_spill] sm:$0xff] }
 0x8f5   : > { %3911 = vmatpush.bf16.msrb.mxu3 %v8431_v19  ;;  %3937 = vmatpush.bf16.msrb.mxu1 %v8432_v6 }
 0x8f7   : > { %3864 = vmatmul.bf16.vlgmr.msra.gmra.mxu3 %v3788_v59  ;;  %3890 = vmatmul.bf16.vlgmr.msra.gmra.mxu1 %v3788_v59 }
 0x8f8   : > { %4087 = vmatpush.bf16.msrb.mxu2 %v8433_v31  ;;  %4113 = vmatpush.bf16.msrb.mxu0 %v8434_v52  ;;  %v8462_v31 = vld [vmem:[#allocation69_spill] sm:$0xff] }
 0x8f9   : > { %3912 = vmatpush.bf16.msrb.mxu3 %v8435_v48  ;;  %3938 = vmatpush.bf16.msrb.mxu1 %v8436_v27  ;;  %v8464_v52 = vld [vmem:[#allocation45_spill] sm:$0xff] }
 0x8fc   : > { %4088 = vmatpush.bf16.msrb.mxu2 %v8437_v44  ;;  %4114 = vmatpush.bf16.msrb.mxu0 %v8438_v0  ;;  %v8465_v44 = vld [vmem:[#allocation42_spill] sm:$0xff]  ;;  %v8466_v0 = vld [vmem:[#allocation73_spill] sm:$0xff] }
 0x8fd   : > { %3913 = vmatpush.bf16.msrb.mxu3 %v8439_v57  ;;  %3939 = vmatpush.bf16.msrb.mxu1 %v8440_v32 }
 0x900   : > { %4089 = vmatpush.bf16.msrb.mxu2 %v8441_v47  ;;  %4115 = vmatpush.bf16.msrb.mxu0 %v8442_v33  ;;  %v8467_v47 = vld [vmem:[#allocation27_spill] sm:$0xff]  ;;  %v8468_v33 = vld [vmem:[#allocation50_spill] sm:$0xff] }
 0x901   : > { %3914 = vmatpush.bf16.msrb.mxu3 %v8443_v56  ;;  %3940 = vmatpush.bf16.msrb.mxu1 %v8444_v30 }
 0x904   : > { %4090 = vmatpush.bf16.msrb.mxu2 %v8445_v53  ;;  %4116 = vmatpush.bf16.msrb.mxu0 %v8446_v25  ;;  %v8469_v53 = vld [vmem:[#allocation47_spill] sm:$0xff]  ;;  %v8470_v25 = vld [vmem:[#allocation77_spill] sm:$0xff] }
 0x905   : > { %3915 = vmatpush.bf16.msrb.mxu3 %v8447_v14  ;;  %3941 = vmatpush.bf16.msrb.mxu1 %v8448_v58 }
 0x908   : > { %4091 = vmatpush.bf16.msrb.mxu2 %v8449_v26  ;;  %4117 = vmatpush.bf16.msrb.mxu0 %v8450_v17  ;;  %v8471_v26 = vld [vmem:[#allocation29_spill] sm:$0xff]  ;;  %v8472_v17 = vld [vmem:[#allocation54_spill] sm:$0xff] }
 0x909   : > { %4098 = vmatpush.bf16.msra.mxu3 %v8451_v29  ;;  %4124 = vmatpush.bf16.msra.mxu1 %v8452_v40  ;;  %v8473_v29 = vld [vmem:[#allocation51_spill] sm:$0xff]  ;;  %v8474_v40 = vld [vmem:[#allocation81_spill] sm:$0xff] }
 0x90a   : > { %3916 = vmatmul.bf16.vlgmr.msrb.gmra.mxu3 %v3788_v59  ;;  %3942 = vmatmul.bf16.vlgmr.msrb.gmra.mxu1 %v3788_v59  ;;  %v8463_v59 = vld [vmem:[#allocation25_spill] sm:$0xff] }
 0x90c   : > { %4092 = vmatpush.bf16.msrb.mxu2 %v8453_v63  ;;  %4118 = vmatpush.bf16.msrb.mxu0 %v8454_v28  ;;  %v8475_v63 = vld [vmem:[#allocation31_spill] sm:$0xff]  ;;  %v8476_v28 = vld [vmem:[#allocation58_spill] sm:$0xff] }
 0x90d   : > { %4099 = vmatpush.bf16.msra.mxu3 %v8455_v61  ;;  %4125 = vmatpush.bf16.msra.mxu1 %v8456_v35  ;;  %v8477_v61 = vld [vmem:[#allocation55_spill] sm:$0xff]  ;;  %v8478_v35 = vld [vmem:[#allocation85_spill] sm:$0xff] }
 0x910   : > { %4137 = vmatpush.bf16.msra.mxu2 %v8457_v50  ;;  %4163 = vmatpush.bf16.msra.mxu0 %v8458_v5  ;;  %v8479_v50 = vld [vmem:[#allocation33_spill] sm:$0xff]  ;;  %v8480_v5 = vld [vmem:[#allocation62_spill] sm:$0xff] }
 0x911   : > { %4100 = vmatpush.bf16.msra.mxu3 %v8459_v46  ;;  %4126 = vmatpush.bf16.msra.mxu1 %v8460_v9  ;;  %v8481_v46 = vld [vmem:[#allocation59_spill] sm:$0xff]  ;;  %v8482_v9 = vld [vmem:[#allocation89_spill] sm:$0xff] }
 0x914   : > { %4138 = vmatpush.bf16.msra.mxu2 %v8461_v15  ;;  %4164 = vmatpush.bf16.msra.mxu0 %v8462_v31  ;;  %v8483_v15 = vld [vmem:[#allocation36_spill] sm:$0xff]  ;;  %v8484_v31 = vld [vmem:[#allocation66_spill] sm:$0xff] }
 0x915   : > { %4101 = vmatpush.bf16.msra.mxu3 %v8463_v59  ;;  %4127 = vmatpush.bf16.msra.mxu1 %v8464_v52  ;;  %v8485_v59 = vld [vmem:[#allocation63_spill] sm:$0xff]  ;;  %v8486_v52 = vld [vmem:[#allocation92_spill] sm:$0xff] }
 0x918   : > { %4139 = vmatpush.bf16.msra.mxu2 %v8465_v44  ;;  %4165 = vmatpush.bf16.msra.mxu0 %v8466_v0  ;;  %v8487_v44 = vld [vmem:[#allocation39_spill] sm:$0xff]  ;;  %v8488_v0 = vld [vmem:[#allocation70_spill] sm:$0xff] }
 0x919   : > { %4102 = vmatpush.bf16.msra.mxu3 %v8467_v47  ;;  %4128 = vmatpush.bf16.msra.mxu1 %v8468_v33  ;;  %v8489_v47 = vld [vmem:[#allocation43_spill] sm:$0xff]  ;;  %v8490_v33 = vld [vmem:[#allocation74_spill] sm:$0xff] }
 0x91c   : > { %4140 = vmatpush.bf16.msra.mxu2 %v8469_v53  ;;  %4166 = vmatpush.bf16.msra.mxu0 %v8470_v25  ;;  %v8491_v53 = vld [vmem:[#allocation48_spill] sm:$0xff]  ;;  %v8492_v25 = vld [vmem:[#allocation78_spill] sm:$0xff] }
 0x91d   : > { %4103 = vmatpush.bf16.msra.mxu3 %v8471_v26  ;;  %4129 = vmatpush.bf16.msra.mxu1 %v8472_v17  ;;  %v8493_v26 = vld [vmem:[#allocation52_spill] sm:$0xff]  ;;  %v8494_v17 = vld [vmem:[#allocation82_spill] sm:$0xff] }
 0x920   : > { %4141 = vmatpush.bf16.msra.mxu2 %v8473_v29  ;;  %4167 = vmatpush.bf16.msra.mxu0 %v8474_v40  ;;  %v8495_v29 = vld [vmem:[#allocation56_spill] sm:$0xff]  ;;  %v8496_v40 = vld [vmem:[#allocation86_spill] sm:$0xff] }
 0x921   : > { %4104 = vmatpush.bf16.msra.mxu3 %v8475_v63  ;;  %4130 = vmatpush.bf16.msra.mxu1 %v8476_v28  ;;  %v8497_v63 = vld [vmem:[#allocation60_spill] sm:$0xff]  ;;  %v8498_v28 = vld [vmem:[#allocation90_spill] sm:$0xff] }
 0x924   : > { %4142 = vmatpush.bf16.msra.mxu2 %v8477_v61  ;;  %4168 = vmatpush.bf16.msra.mxu0 %v8478_v35  ;;  %v8499_v61 = vld [vmem:[#allocation64_spill] sm:$0xff]  ;;  %v8500_v35 = vld [vmem:[#allocation93_spill] sm:$0xff] }
 0x925   : > { %4105 = vmatpush.bf16.msra.mxu3 %v8479_v50  ;;  %4131 = vmatpush.bf16.msra.mxu1 %v8480_v5 }
 0x928   : > { %4143 = vmatpush.bf16.msra.mxu2 %v8481_v46  ;;  %4169 = vmatpush.bf16.msra.mxu0 %v8482_v9 }
 0x929   : > { %4150 = vmatpush.bf16.msrb.mxu3 %v8483_v15  ;;  %4176 = vmatpush.bf16.msrb.mxu1 %v8484_v31 }
 0x92c   : > { %4144 = vmatpush.bf16.msra.mxu2 %v8485_v59  ;;  %4170 = vmatpush.bf16.msra.mxu0 %v8486_v52  ;;  %v8501_v59 = vld [vmem:[#allocation106_spill] sm:$0xff] }
 0x92d   : > { %4151 = vmatpush.bf16.msrb.mxu3 %v8487_v44  ;;  %4177 = vmatpush.bf16.msrb.mxu1 %v8488_v0 }
 0x931   : > { %4152 = vmatpush.bf16.msrb.mxu3 %v8489_v47  ;;  %4178 = vmatpush.bf16.msrb.mxu1 %v8490_v33 }
 0x935   : > { %4153 = vmatpush.bf16.msrb.mxu3 %v8491_v53  ;;  %4179 = vmatpush.bf16.msrb.mxu1 %v8492_v25  ;;  %v8502_v53 = vld [vmem:[#allocation104_spill] sm:$0xff] }
 0x939   : > { %4154 = vmatpush.bf16.msrb.mxu3 %v8493_v26  ;;  %4180 = vmatpush.bf16.msrb.mxu1 %v8494_v17  ;;  %v8503_v26 = vld [vmem:[#allocation107_spill] sm:$0xff] }
 0x93d   : > { %4155 = vmatpush.bf16.msrb.mxu3 %v8495_v29  ;;  %4181 = vmatpush.bf16.msrb.mxu1 %v8496_v40 }
 0x941   : > { %4156 = vmatpush.bf16.msrb.mxu3 %v8497_v63  ;;  %4182 = vmatpush.bf16.msrb.mxu1 %v8498_v28 }
 0x945   : > { %4157 = vmatpush.bf16.msrb.mxu3 %v8499_v61  ;;  %4183 = vmatpush.bf16.msrb.mxu1 %v8500_v35 }
 0x94b   : > { %v3826_v50 = vpop.f32.mrf.mxu0 }
 0x94c   : > { %v3827_v52 = vadd.f32 %v3826_v50, %v8501_v59 }
 0x951   : > { %v3800_v5 = vpop.f32.mrf.mxu2 }
 0x952   : > { %v3801_v25 = vadd.f32 %v3800_v5, %v8502_v53 }
 0x953   : > { %v3828_v46 = vpop.f32.mrf.mxu0 }
 0x959   : > { %v3802_v9 = vpop.f32.mrf.mxu2 }
 0x95a   : > { %v8504_v9 = vld [vmem:[#allocation105_spill] sm:$0xff] }
 0x95b   : > { %v3878_v15 = vpop.f32.mrf.mxu0 }
 0x961   : > { %v3852_v31 = vpop.f32.mrf.mxu2 }
 0x963   : > { %v3880_v44 = vpop.f32.mrf.mxu0 }
 0x964   : > { %v3839_v0 = vpop.f32.mrf.mxu1 }
 0x965   : > { %v3840_v47 = vadd.f32 %v3839_v0, %v3827_v52  ;;  %v8505_v0 = vld [vmem:[#allocation110_spill] sm:$0xff] }
 0x967   : > { %v3971_v33 = vrot.slane %v3840_v47, 2  ;;  %v3879_v47 = vadd.f32 %v3878_v15, %v8505_v0 }
 0x969   : > { %v3973_v17 = vadd.f32 %v3971_v33, %v8503_v26  ;;  %v3854_v29 = vpop.f32.mrf.mxu2 }
 0x96a   : > { %v3813_v40 = vpop.f32.mrf.mxu3 }
 0x96b   : > { %v5300_v63 = vmul.f32 -1.442695, %v3973_v17  ;;  %v3814_v28 = vadd.f32 %v3813_v40, %v3801_v25  ;;  %v8506_v40 = vld [vmem:[#allocation111_spill] sm:$0xff] }
 0x96c   : > { %v7596_v61 = vpop.f32.mrf.mxu0  ;;  %v3841_v35 = vpop.f32.mrf.mxu1 }
 0x96d   : > { %5734 = vpow2.f32 %v5300_v63  ;;  %v3948_v46 = vrot.slane %v3814_v28, 2 }
 0x96f   : > { %v3950_v58 = vadd.f32 %v3948_v46, %v8504_v9 }
 0x971   : > { %v5299_v50 = vmul.f32 -1.442695, %v3950_v58 }
 0x972   : > { %v3904_v44 = vpop.f32.mrf.mxu2  ;;  %v3815_v59 = vpop.f32.mrf.mxu3 }
 0x973   : > { %v5735_v52 = vpop.eup %5734  ;;  %5736 = vpow2.f32 %v5299_v50 }
 0x974   : > { %v3977_v5 = vadd.f32 1.0, %v5735_v52  ;;  %v3932_v33 = vpop.f32.mrf.mxu0  ;;  %v3891_v29 = vpop.f32.mrf.mxu1 }
 0x975   : > { %v3892_v26 = vadd.f32 %v3891_v29, %v3879_v47 }
 0x976   : > { %5738 = vrcp.f32 %v3977_v5  ;;  %vm3983_vm10 = vweird.f32 %v3977_v5 }
 0x977   : > { %v4007_v25 = vrot.slane %v3892_v26, 7  ;;  %v8507_v26 = vld [vmem:[#allocation108_spill] sm:$0xff] }
 0x978   : > { %v3853_v29 = vadd.f32 %v3852_v31, %v8507_v26 }
 0x979   : > { %v5737_v17 = vpop.eup %5736  ;;  %v4009_v35 = vadd.f32 %v4007_v25, %v8506_v40 }
 0x97a   : > { %v3954_v63 = vadd.f32 1.0, %v5737_v17  ;;  %v3906_v28 = vpop.f32.mrf.mxu2  ;;  %v3865_v53 = vpop.f32.mrf.mxu3 }
 0x97b   : > { %v5301_v46 = vmul.f32 -1.442695, %v4009_v35  ;;  %v3866_v35 = vadd.f32 %v3865_v53, %v3853_v29  ;;  %v3989_v53 = vand.u32 2147483648, %v3977_v5 }
 0x97c   : > { %5740 = vrcp.f32 %v3954_v63  ;;  %v3893_v58 = vpop.f32.mrf.mxu1  ;;  %v5739_v59 = vpop.eup %5738  ;;  %v3966_v17 = vand.u32 2147483648, %v3954_v63  ;;  %vm3960_vm6 = vweird.f32 %v3954_v63 }
 0x97d   : > { %5742 = vpow2.f32 %v5301_v46  ;;  %v3979_v9 = vmul.f32 %v5739_v59, %v3977_v5  ;;  %v3964_v58 = vand.u32 2147483647, %v3954_v63  ;;  %v3994_v30 = vrot.slane %v3866_v35, 2 }
 0x97e   : > { %vm3984_vm9 = vweird.f32 %v5739_v59  ;;  %v3990_v35 = vor.u32 1.1754944e-38, %v3989_v53 }
 0x97f   : > { %v3980_v0 = vsub.f32 1.0, %v3979_v9  ;;  %v3967_v9 = vor.u32 1.1754944e-38, %v3966_v17  ;;  %vm3965_vm8 = vcmp.eq.f32.partialorder %v3964_v58, 8.507059e+37  ;;  %vm3985_vm11 = vmor %vm3983_vm10, %vm3984_vm9 }
 0x981   : > { %v3981_v46 = vmul.f32 %v5739_v59, %v3980_v0 }
 0x982   : > { %v5741_v15 = vpop.eup %5740  ;;  %v3867_v50 = vpop.f32.mrf.mxu3 }
 0x983   : > { %v5743_v52 = vpop.eup %5742  ;;  %v3956_v33 = vmul.f32 %v5741_v15, %v3954_v63  ;;  %vm3961_vm5 = vweird.f32 %v5741_v15  ;;  %v3905_v50 = vadd.f32 %v3904_v44, %v6770_v49  ;;  %v3982_v56 = vadd.f32 %v5739_v59, %v3981_v46 }
 0x984   : > { %v7601_v47 = vadd.f32 1.0, %v5743_v52  ;;  %vm3962_vm7 = vmor %vm3960_vm6, %vm3961_vm5  ;;  %v3987_v63 = vand.u32 2147483647, %v3977_v5 }
 0x985   : > { %v3957_v14 = vsub.f32 1.0, %v3956_v33 }
 0x986   : > { %5744 = vrcp.f32 %v7601_v47  ;;  %vm3988_vm12 = vcmp.eq.f32.partialorder %v3987_v63, 8.507059e+37  ;;  %vm4019_vm14 = vweird.f32 %v7601_v47  ;;  %v4023_v53 = vand.u32 2147483647, %v7601_v47 }
 0x987   : > { %v3943_v25 = vpop.f32.mrf.mxu1  ;;  %v3958_v28 = vmul.f32 %v5741_v15, %v3957_v14 }
 0x988   : > { %vm4024_vm0 = vcmp.eq.f32.partialorder %v4023_v53, 8.507059e+37  ;;  %v8515_v53 = vld [vmem:[#allocation107_spill] sm:$0xff] }
 0x989   : > { %v3959_v40 = vadd.f32 %v5741_v15, %v3958_v28 }
 0x98b   : > { %v3963_v52 = vsel %vm3962_vm7, %v5741_v15, %v3959_v40  ;;  %v3986_v15 = vsel %vm3985_vm11, %v5739_v59, %v3982_v56  ;;  %v4025_v56 = vand.u32 2147483648, %v7601_v47  ;;  %v3931_v59 = vadd.f32 %v7596_v61, %v6800_v4 }
 0x98c   : > { %v5745_v33 = vpop.eup %5744  ;;  %v3968_v26 = vsel %vm3965_vm8, %v3967_v9, %v3963_v52  ;;  %v3991_v46 = vsel %vm3988_vm12, %v3990_v35, %v3986_v15  ;;  %v4002_v9 = vrot.slane %v7478_v20, 7 }
 0x98d   : > { %v3917_v31 = vpop.f32.mrf.mxu3  ;;  %v3996_v14 = vmul.f32 %v3994_v30, %v3968_v26  ;;  %v4015_v29 = vmul.f32 %v5745_v33, %v7601_v47  ;;  %v3999_v26 = vsub.f32 1.0, %v3991_v46  ;;  %vm4020_vm13 = vweird.f32 %v5745_v33 }
 0x98e   : > { %v3918_v32 = vadd.f32 %v3917_v31, %v3905_v50  ;;  %v4004_v31 = vmul.f32 %v4002_v9, %v3991_v46  ;;  %vm4021_vm15 = vmor %vm4019_vm14, %vm4020_vm13 }
 0x98f   : > { %v3945_v0 = vpop.f32.mrf.mxu1  ;;  %v3997_v44 = vadd.f32 %v3996_v14, %v8127_v54  ;;  %v4016_v40 = vsub.f32 1.0, %v4015_v29 }
 0x990   : > { %v4030_v28 = vrot.slane %v3918_v32, 7  ;;  %v3944_v0 = vadd.f32 %v3943_v25, %v3931_v59 }
 0x991   : > { %5746 = vtanh.f32 %v3997_v44  ;;  %v4017_v50 = vmul.f32 %v5745_v33, %v4016_v40 }
 0x992   : > { %v4032_v17 = vadd.f32 %v4030_v28, %v6782_v11  ;;  %v4026_v28 = vor.u32 1.1754944e-38, %v4025_v56  ;;  %v4053_v47 = vrot.slane %v3944_v0, 7 }
 0x993   : > { %v4018_v32 = vadd.f32 %v5745_v33, %v4017_v50 }
 0x994   : > { %v5302_v58 = vmul.f32 -1.442695, %v4032_v17 }
 0x995   : > { %v3919_v30 = vpop.f32.mrf.mxu3  ;;  %v4022_v20 = vsel %vm4021_vm15, %v5745_v33, %v4018_v32 }
 0x996   : > { %5748 = vpow2.f32 %v5302_v58  ;;  %v4027_v61 = vsel %vm4024_vm0, %v4026_v28, %v4022_v20 }
 0x997   : > { %v5747_v5 = vpop.eup %5746  ;;  %v4055_v25 = vmul.f32 %v4053_v47, %v4027_v61  ;;  %v8516_v61 = vld [vmem:[#allocation105_spill] sm:$0xff] }
 0x998   : > { %v4000_v52 = vmul.f32 %v5747_v5, %v3999_v26 }
 0x999   : > { %v4056_v46 = vadd.f32 %v4055_v25, %v6731_v34 }
 0x99a   : > { %v7615_v29 = vadd.f32 %v4004_v31, %v4000_v52 }
 0x99c   : > { %v5749_v14 = vpop.eup %5748  ;;  %v4077_v44 = vpack.c.bf16 %v7615_v29, %v7615_v29  ;;  %v4064_v40 = vmul.f32 %v7615_v29, %v6928_v16 }
 0x99d   : > { %v4036_v63 = vadd.f32 1.0, %v5749_v14 }
 0x99e   : > { %v4081_v15 = vrot.slane %v4077_v44, 3  ;;  %v4066_v17 = vrot.slane %v4064_v40, 6 }
 0x99f   : > { %5750 = vrcp.f32 %v4036_v63  ;;  %v4048_v30 = vand.u32 2147483648, %v4036_v63  ;;  %v4046_v9 = vand.u32 2147483647, %v4036_v63  ;;  %vm4042_vm2 = vweird.f32 %v4036_v63 }
 0x9a0   : > { %4093 = vmatmul.bf16.vlgmr.msrb.gmra.mxu2 %v4081_v15  ;;  %4119 = vmatmul.bf16.vlgmr.msrb.gmra.mxu0 %v4081_v15  ;;  %v7622_v35 = vadd.f32 %v4066_v17, %v7485_v43  ;;  %5752 = vtanh.f32 %v4056_v46  ;;  %v8517_v46 = vld [vmem:[#allocation110_spill] sm:$0xff] }
 0x9a1   : > { %4189 = vmatpush.bf16.msrb.mxu2 %v8062_v7  ;;  %4215 = vmatpush.bf16.msrb.mxu0 %v6601_v55  ;;  %v4049_v55 = vor.u32 1.1754944e-38, %v4048_v30  ;;  %vm4047_vm4 = vcmp.eq.f32.partialorder %v4046_v9, 8.507059e+37 }
 0x9a5   : > { %v5751_v33 = vpop.eup %5750  ;;  %4190 = vmatpush.bf16.msrb.mxu2 %v8128_v42  ;;  %4216 = vmatpush.bf16.msrb.mxu0 %v8129_v62  ;;  %v4060_v42 = vrot.slane %v7497_v18, 4 }
 0x9a6   : > { %v4038_v58 = vmul.f32 %v5751_v33, %v4036_v63  ;;  %vm4043_vm1 = vweird.f32 %v5751_v33  ;;  %v5753_v32 = vpop.eup %5752 }
 0x9a7   : > { %vm4044_vm3 = vmor %vm4042_vm2, %vm4043_vm1 }
 0x9a8   : > { %v4039_v50 = vsub.f32 1.0, %v4038_v58 }
 0x9a9   : > { %4191 = vmatpush.bf16.msrb.mxu2 %v8130_v45  ;;  %4217 = vmatpush.bf16.msrb.mxu0 %v8131_v2 }
 0x9aa   : > { %v4040_v26 = vmul.f32 %v5751_v33, %v4039_v50 }
 0x9ac   : > { %v4041_v7 = vadd.f32 %v5751_v33, %v4040_v26 }
 0x9ad   : > { %4192 = vmatpush.bf16.msrb.mxu2 %v8132_v38  ;;  %4218 = vmatpush.bf16.msrb.mxu0 %v8133_v51 }
 0x9ae   : > { %v4045_v43 = vsel %vm4044_vm3, %v5751_v33, %v4041_v7  ;;  %v8518_v7 = vld [vmem:[#allocation111_spill] sm:$0xff] }
 0x9af   : > { %v4050_v5 = vsel %vm4047_vm4, %v4049_v55, %v4045_v43 }
 0x9b0   : > { %v4058_v62 = vsub.f32 1.0, %v4050_v5  ;;  %v4062_v52 = vmul.f32 %v4060_v42, %v4050_v5  ;;  %4145 = vmatmul.bf16.vlgmr.msra.gmra.mxu2 %v4081_v15  ;;  %4171 = vmatmul.bf16.vlgmr.msra.gmra.mxu0 %v4081_v15 }
 0x9b1   : > { %4193 = vmatpush.bf16.msrb.mxu2 %v8134_v24  ;;  %4219 = vmatpush.bf16.msrb.mxu0 %v8135_v8  ;;  %v8513_v24 = vld [vmem:[#allocation106_spill] sm:$0xff] }
 0x9b2   : > { %v4059_v45 = vmul.f32 %v5753_v32, %v4058_v62 }
 0x9b4   : > { %v4063_v2 = vadd.f32 %v4062_v52, %v4059_v45 }
 0x9b5   : > { %4194 = vmatpush.bf16.msrb.mxu2 %v8067_v36  ;;  %4220 = vmatpush.bf16.msrb.mxu0 %v6647_v10  ;;  %v8508_v10 = vld [vmem:[#allocation101_spill] sm:$0xff] }
 0x9b6   : > { %v7636_v31 = vrot.slane %v4063_v2, 3  ;;  %v4069_v56 = vmul.f32 %v4063_v2, %v6928_v16 }
 0x9b8   : > { %v4078_v38 = vpack.c.bf16 %v7636_v31, %v7636_v31  ;;  %v4071_v51 = vrot.slane %v4069_v56, 2 }
 0x9b9   : > { %4195 = vmatpush.bf16.msrb.mxu2 %v6585_v60  ;;  %4221 = vmatpush.bf16.msrb.mxu0 %v6655_v23  ;;  %v8509_v23 = vld [vmem:[#allocation91_spill] sm:$0xff] }
 0x9ba   : > { %v4082_v18 = vrot.slane %v4078_v38, 3  ;;  %v7644_v59 = vadd.f32 %v4071_v51, %v7505_v21  ;;  %v8512_v60 = vld [vmem:[#allocation103_spill] sm:$0xff] }
 0x9bc   : > { %4106 = vmatmul.bf16.vlgmr.msra.gmra.mxu3 %v4082_v18  ;;  %4132 = vmatmul.bf16.vlgmr.msra.gmra.mxu1 %v4082_v18 }
 0x9bd   : > { %4202 = vmatpush.bf16.msra.mxu3 %v8068_v12  ;;  %4228 = vmatpush.bf16.msra.mxu1 %v6603_v41  ;;  %v8511_v41 = vld [vmem:[#allocation94_spill] sm:$0xff] }
 0x9be   : > { %4196 = vmatpush.bf16.msrb.mxu2 %v6597_v39  ;;  %4222 = vmatpush.bf16.msrb.mxu0 %v6663_v37  ;;  %v8510_v37 = vld [vmem:[#allocation102_spill] sm:$0xff] }
 0x9c1   : > { %4203 = vmatpush.bf16.msra.mxu3 %v8069_v22  ;;  %4229 = vmatpush.bf16.msra.mxu1 %v6613_v13 }
 0x9c2   : > { %4197 = vmatmul.bf16.vlgmr.msrb.gmra.mxu2 %v4081_v15  ;;  %4223 = vmatmul.bf16.vlgmr.msrb.gmra.mxu0 %v4081_v15 }
 0x9c5   : > { %4204 = vmatpush.bf16.msra.mxu3 %v8070_v1  ;;  %4230 = vmatpush.bf16.msra.mxu1 %v6625_v3 }
 0x9c9   : > { %4205 = vmatpush.bf16.msra.mxu3 %v8431_v19  ;;  %4231 = vmatpush.bf16.msra.mxu1 %v8432_v6 }
 0x9cc   : > { %4158 = vmatmul.bf16.vlgmr.msrb.gmra.mxu3 %v4082_v18  ;;  %4184 = vmatmul.bf16.vlgmr.msrb.gmra.mxu1 %v4082_v18 }
 0x9cd   : > { %4206 = vmatpush.bf16.msra.mxu3 %v8435_v48  ;;  %4232 = vmatpush.bf16.msra.mxu1 %v8436_v27  ;;  %v8514_v27 = vld [vmem:[#allocation104_spill] sm:$0xff] }
 0x9d1   : > { %4207 = vmatpush.bf16.msra.mxu3 %v8439_v57  ;;  %4233 = vmatpush.bf16.msra.mxu1 %v8508_v10 }
 0x9d5   : > { %4208 = vmatpush.bf16.msra.mxu3 %v8509_v23  ;;  %4234 = vmatpush.bf16.msra.mxu1 %v8510_v37  ;;  %v8519_v23 = vld [vmem:[#allocation108_spill] sm:$0xff] }
 0x9d9   : > { %4209 = vmatpush.bf16.msra.mxu3 %v8511_v41  ;;  %4235 = vmatpush.bf16.msra.mxu1 %v8512_v60 }
 0x9dc   : > { %4210 = vmatmul.bf16.vlgmr.msra.gmra.mxu3 %v4082_v18  ;;  %4236 = vmatmul.bf16.vlgmr.msra.gmra.mxu1 %v4082_v18 }
 0xa1d   : > { %v4120_v39 = vpop.f32.mrf.mxu0 }
 0xa1e   : > { %v4121_v8 = vadd.f32 %v4120_v39, %v8513_v24 }
 0xa23   : > { %v4094_v13 = vpop.f32.mrf.mxu2 }
 0xa24   : > { %v4095_v57 = vadd.f32 %v4094_v13, %v8514_v27 }
 0xa25   : > { %v4122_v3 = vpop.f32.mrf.mxu0 }
 0xa2b   : > { %v4096_v36 = vpop.f32.mrf.mxu2 }
 0xa2d   : > { %v4172_v12 = vpop.f32.mrf.mxu0 }
 0xa2e   : > { %v4173_v50 = vadd.f32 %v4172_v12, %v8517_v46 }
 0xa33   : > { %v4146_v22 = vpop.f32.mrf.mxu2 }
 0xa34   : > { %v4147_v37 = vadd.f32 %v4146_v22, %v8519_v23 }
 0xa35   : > { %v4174_v1 = vpop.f32.mrf.mxu0 }
 0xa39   : > { %v4133_v21 = vpop.f32.mrf.mxu1 }
 0xa3a   : > { %v4134_v19 = vadd.f32 %v4133_v21, %v4121_v8 }
 0xa3b   : > { %v4148_v48 = vpop.f32.mrf.mxu2 }
 0xa3c   : > { %v4265_v6 = vrot.slane %v4134_v19, 1 }
 0xa3e   : > { %v4267_v14 = vadd.f32 %v4265_v6, %v8515_v53 }
 0xa3f   : > { %v4107_v0 = vpop.f32.mrf.mxu3  ;;  %v7669_v20 = vpop.f32.mrf.mxu0 }
 0xa40   : > { %v5304_v63 = vmul.f32 -1.442695, %v4267_v14  ;;  %v4108_v28 = vadd.f32 %v4107_v0, %v4095_v57 }
 0xa41   : > { %v4135_v44 = vpop.f32.mrf.mxu1 }
 0xa42   : > { %5754 = vpow2.f32 %v5304_v63  ;;  %v4242_v40 = vrot.slane %v4108_v28, 1 }
 0xa44   : > { %v4244_v15 = vadd.f32 %v4242_v40, %v8516_v61 }
 0xa45   : > { %v4198_v17 = vpop.f32.mrf.mxu2 }
 0xa46   : > { %v5303_v47 = vmul.f32 -1.442695, %v4244_v15  ;;  %v4199_v24 = vadd.f32 %v4198_v17, %v6770_v49 }
 0xa47   : > { %v4109_v25 = vpop.f32.mrf.mxu3  ;;  %v4226_v33 = vpop.f32.mrf.mxu0 }
 0xa48   : > { %v5755_v58 = vpop.eup %5754  ;;  %5756 = vpow2.f32 %v5303_v47 }
 0xa49   : > { %v4271_v30 = vadd.f32 1.0, %v5755_v58  ;;  %v4185_v26 = vpop.f32.mrf.mxu1 }
 0xa4a   : > { %v4186_v9 = vadd.f32 %v4185_v26, %v4173_v50  ;;  %v4296_v26 = vrot.slane %v7615_v29, 7 }
 0xa4b   : > { %5758 = vrcp.f32 %v4271_v30  ;;  %v4283_v63 = vand.u32 2147483648, %v4271_v30  ;;  %vm4277_vm10 = vweird.f32 %v4271_v30  ;;  %v4281_v40 = vand.u32 2147483647, %v4271_v30 }
 0xa4c   : > { %v4300_v55 = vadd.f32 %v4186_v9, %v8518_v7 }
 0xa4d   : > { %v4200_v43 = vpop.f32.mrf.mxu2  ;;  %v4284_v47 = vor.u32 1.1754944e-38, %v4283_v63  ;;  %vm4282_vm12 = vcmp.eq.f32.partialorder %v4281_v40, 8.507059e+37 }
 0xa4e   : > { %v5757_v5 = vpop.eup %5756  ;;  %v5305_v42 = vmul.f32 -1.442695, %v4300_v55 }
 0xa4f   : > { %v4248_v62 = vadd.f32 1.0, %v5757_v5  ;;  %v4159_v32 = vpop.f32.mrf.mxu3 }
 0xa50   : > { %5760 = vpow2.f32 %v5305_v42  ;;  %v4160_v13 = vadd.f32 %v4159_v32, %v4147_v37  ;;  %v4225_v32 = vadd.f32 %v7669_v20, %v6800_v4 }
 0xa51   : > { %5762 = vrcp.f32 %v4248_v62  ;;  %v4187_v52 = vpop.f32.mrf.mxu1  ;;  %v5759_v45 = vpop.eup %5758  ;;  %v4260_v3 = vand.u32 2147483648, %v4248_v62  ;;  %v4258_v12 = vand.u32 2147483647, %v4248_v62  ;;  %vm4254_vm6 = vweird.f32 %v4248_v62 }
 0xa52   : > { %v4273_v2 = vmul.f32 %v5759_v45, %v4271_v30  ;;  %v4288_v6 = vrot.slane %v4160_v13, 1  ;;  %vm4278_vm9 = vweird.f32 %v5759_v45 }
 0xa53   : > { %v4261_v19 = vor.u32 1.1754944e-38, %v4260_v3  ;;  %vm4259_vm8 = vcmp.eq.f32.partialorder %v4258_v12, 8.507059e+37  ;;  %vm4279_vm11 = vmor %vm4277_vm10, %vm4278_vm9  ;;  %v4345_v3 = vrot.slane %v7636_v31, 6 }
 0xa54   : > { %v4274_v41 = vsub.f32 1.0, %v4273_v2 }
 0xa56   : > { %v5761_v56 = vpop.eup %5760  ;;  %v4275_v1 = vmul.f32 %v5759_v45, %v4274_v41 }
 0xa57   : > { %v5763_v38 = vpop.eup %5762  ;;  %v7674_v51 = vadd.f32 1.0, %v5761_v56  ;;  %v4161_v18 = vpop.f32.mrf.mxu3 }
 0xa58   : > { %v4250_v10 = vmul.f32 %v5763_v38, %v4248_v62  ;;  %vm4255_vm5 = vweird.f32 %v5763_v38  ;;  %v4276_v14 = vadd.f32 %v5759_v45, %v4275_v1 }
 0xa59   : > { %5764 = vrcp.f32 %v7674_v51  ;;  %v4237_v60 = vpop.f32.mrf.mxu1  ;;  %vm4256_vm7 = vmor %vm4254_vm6, %vm4255_vm5  ;;  %vm4310_vm14 = vweird.f32 %v7674_v51  ;;  %vm4362_vm5 = vcmask 1040384  }
 0xa5a   : > { %v4251_v39 = vsub.f32 1.0, %v4250_v10  ;;  %v4280_v17 = vsel %vm4279_vm11, %v5759_v45, %v4276_v14  ;;  %v4238_v45 = vadd.f32 %v4237_v60, %v4225_v32 }
 0xa5b   : > { %v4285_v58 = vsel %vm4282_vm12, %v4284_v47, %v4280_v17 }
 0xa5c   : > { %v4252_v36 = vmul.f32 %v5763_v38, %v4251_v39  ;;  %v4293_v50 = vsub.f32 1.0, %v4285_v58  ;;  %v4298_v55 = vmul.f32 %v4296_v26, %v4285_v58 }
 0xa5e   : > { %v4253_v8 = vadd.f32 %v5763_v38, %v4252_v36 }
 0xa5f   : > { %v5765_v21 = vpop.eup %5764  ;;  %v4211_v22 = vpop.f32.mrf.mxu3 }
 0xa60   : > { %v4257_v48 = vsel %vm4256_vm7, %v5763_v38, %v4253_v8  ;;  %v4306_v27 = vmul.f32 %v5765_v21, %v7674_v51  ;;  %v4212_v57 = vadd.f32 %v4211_v22, %v4199_v24  ;;  %vm4311_vm13 = vweird.f32 %v5765_v21 }
 0xa61   : > { %v4262_v53 = vsel %vm4259_vm8, %v4261_v19, %v4257_v48  ;;  %v4239_v0 = vpop.f32.mrf.mxu1  ;;  %vm4312_vm15 = vmor %vm4310_vm14, %vm4311_vm13 }
 0xa62   : > { %v4290_v28 = vmul.f32 %v4288_v6, %v4262_v53  ;;  %v4307_v44 = vsub.f32 1.0, %v4306_v27  ;;  %v4320_v49 = vadd.f32 %v4212_v57, %v6782_v11  ;;  %v4316_v11 = vand.u32 2147483648, %v7674_v51 }
 0xa64   : > { %v4291_v61 = vadd.f32 %v4290_v28, %v8127_v54  ;;  %v5306_v15 = vmul.f32 -1.442695, %v4320_v49  ;;  %v4308_v25 = vmul.f32 %v5765_v21, %v4307_v44  ;;  %v4314_v54 = vand.u32 2147483647, %v7674_v51 }
 0xa65   : > { %v4317_v62 = vor.u32 1.1754944e-38, %v4316_v11 }
 0xa66   : > { %5766 = vtanh.f32 %v4291_v61  ;;  %v4309_v46 = vadd.f32 %v5765_v21, %v4308_v25  ;;  %vm4315_vm0 = vcmp.eq.f32.partialorder %v4314_v54, 8.507059e+37 }
 0xa67   : > { %5768 = vpow2.f32 %v5306_v15  ;;  %v4213_v33 = vpop.f32.mrf.mxu3 }
 0xa68   : > { %v4313_v43 = vsel %vm4312_vm15, %v5765_v21, %v4309_v46 }
 0xa69   : > { %v4318_v29 = vsel %vm4315_vm0, %v4317_v62, %v4313_v43 }
 0xa6a   : > { %v4340_v56 = vmul.f32 %v4318_v29, %v4238_v45 }
 0xa6c   : > { %v5767_v30 = vpop.eup %5766  ;;  %v4341_v10 = vadd.f32 %v4340_v56, %v6731_v34 }
 0xa6d   : > { %v5769_v9 = vpop.eup %5768  ;;  %v4294_v7 = vmul.f32 %v5767_v30, %v4293_v50 }
 0xa6e   : > { %v4324_v5 = vadd.f32 1.0, %v5769_v9 }
 0xa6f   : > { %v4299_v42 = vadd.f32 %v4298_v55, %v4294_v7 }
 0xa70   : > { %5770 = vrcp.f32 %v4324_v5  ;;  %v4336_v37 = vand.u32 2147483648, %v4324_v5  ;;  %v4334_v4 = vand.u32 2147483647, %v4324_v5  ;;  %vm4330_vm2 = vweird.f32 %v4324_v5 }
 0xa71   : > { %v4349_v52 = vmul.f32 %v4299_v42, %v6928_v16  ;;  %5772 = vtanh.f32 %v4341_v10 }
 0xa72   : > { %v4337_v60 = vor.u32 1.1754944e-38, %v4336_v37  ;;  %vm4335_vm4 = vcmp.eq.f32.partialorder %v4334_v4, 8.507059e+37 }
 0xa73   : > { %v4351_v2 = vrot.slane %v4349_v52, 7 }
 0xa75   : > { %v4353_v38 = vadd.f32 %v4351_v2, %v7622_v35 }
 0xa76   : > { %v5771_v51 = vpop.eup %5770 }
 0xa77   : > { %v4326_v18 = vmul.f32 %v5771_v51, %v4324_v5  ;;  %vm4331_vm1 = vweird.f32 %v5771_v51  ;;  %v5773_v36 = vpop.eup %5772 }
 0xa78   : > { %vm4332_vm3 = vmor %vm4330_vm2, %vm4331_vm1 }
 0xa79   : > { %v4327_v23 = vsub.f32 1.0, %v4326_v18 }
 0xa7b   : > { %v4328_v41 = vmul.f32 %v5771_v51, %v4327_v23 }
 0xa7d   : > { %v4329_v20 = vadd.f32 %v5771_v51, %v4328_v41 }
 0xa7f   : > { %v4333_v39 = vsel %vm4332_vm3, %v5771_v51, %v4329_v20 }
 0xa80   : > { %v4338_v13 = vsel %vm4335_vm4, %v4337_v60, %v4333_v39 }
 0xa81   : > { %v4343_v35 = vsub.f32 1.0, %v4338_v13  ;;  %v4347_v12 = vmul.f32 %v4345_v3, %v4338_v13 }
 0xa83   : > { %v4344_v34 = vmul.f32 %v5773_v36, %v4343_v35 }
 0xa85   : > { %v4348_v1 = vadd.f32 %v4347_v12, %v4344_v34 }
 0xa87   : > { %v4354_v24 = vmul.f32 %v4348_v1, %v6928_v16 }
 0xa89   : > { %v4356_v8 = vrot.slane %v4354_v24, 1 }
 0xa8b   : > { %v4358_v21 = vadd.f32 %v4356_v8, %v7644_v59 }
 0xa8d   : > { %v4360_v31 = vrot.slane %v4358_v21, 6 }
 0xa8f   : > { %v4363_v19 = vsel %vm4362_vm5, %v4353_v38, %v4360_v31 }
 0xa90   : > { %4364 = vst [vmem:[%s499_s7] sm:$0x3] %v4363_v19 }
 0xa91   : > { %6011 = shalt.err (!%p6008_p10)
}
 0xa92   : > { %5513 = dma.vmem_to_hbm [thread:$0]  (%p6233_p4), %s4379_s21, 32, %s4381_s27, %s4366_s20  }
 0xa93 PF: > { %s4392_s18 = sand.u32 1, %s6050_s13   ;;  %p8521_p13 = scmp.ge.s32.totalorder %s6062_s16, 2 }
 0xa94   : > { %s4393_s11 = scalar_lea.sflag [#allocation4], %s4392_s18 }
 0xa95   : > { %p5539_p11 = pnand %p8521_p13, %p6237_p6 }
 0xa97   : > { %p5540_p0 = pneg %p5539_p11 }
 0xa99   : > { %6045 = dma.done.wait (%p5540_p0), %s4393_s11, 32  }
 0xa9a   : > { %6047 = vsyncadd (%p5540_p0), %s4393_s11, 4294967264  ;;  %p26_p2 = scmp.ge.s32.totalorder %s6207_s29, 4   ;;  %s8522_s13 = smov %s6054_s14 }
 0xa9b   : > { %s8523_s14 = smov %s6058_s15  ;;  %s8524_s15 = smov %s6218_s17 }
 0xa9c   : > { %s8525_s16 = smov %s6207_s29  ;;  %28 = sbr.rel (!%p26_p2) target bundleno = 14 (0xe), region = 141 }
 0xaa1   :  { %4399 = vsyncpa [#allocation3], 1 }
 0xaa2   :  { %4401 = vsyncpa [#allocation3 + $0x1], 1 }
 0xaa3   :  { %4402 = vsyncpa [#allocation6], 1 }
 0xaa4   :  { %4403 = vsyncpa [#allocation9], 1 }
 0xaa5   :  { %4404 = vsyncpa [#allocation12], 1 }
 0xaa6   :  { %4405 = vsyncpa [#allocation4], 1 }
 0xaa7   :  { %4407 = vsyncpa [#allocation4 + $0x1], 1 }

</bundles_post_ra>
